<compile_context>
chip_gen: v7x
topology: tpu7x:2x2x1
jax: 0.10.0
libtpu: 0.0.40
codegen_flags: <defaults>
</compile_context>

<pallas_src>
import math

import jax
import jax.numpy as jnp
from jax.experimental import pallas as pl
from jax.experimental.pallas import tpu as pltpu


def _pick_groups_per_block(n_groups, group_size, target_rows, min_grid):
    """Largest divisor of n_groups with rows <= target_rows while keeping at
    least `min_grid` grid steps (v7x megacore + DMA pipelining); falls back to
    the plain row-count rule if that is impossible."""
    divisors = [d for d in range(1, n_groups + 1) if n_groups % d == 0]
    cap = max(1, target_rows // group_size)
    good = [d for d in divisors if d <= cap and n_groups // d >= min_grid]
    if good:
        return max(good)
    good = [d for d in divisors if d <= cap]
    return max(good) if good else 1


def _make_mha_kernel(groups_per_block, group_size, heads, head_dim, embed_dim):
    rows = groups_per_block * group_size
    C = embed_dim

    def kernel(x_ref, wqkv_ref, wo_ref, bo_ref, o_ref, ctx_ref):
        x = x_ref[...]                                                # (rows, C)

        # Single lane-dense qkv projection (scale already folded into the q
        # columns of wqkv on the host).
        qkv = jnp.dot(x, wqkv_ref[...],
                      preferred_element_type=jnp.float32)             # (rows, 3C)
        qkv_b = qkv.reshape(groups_per_block, group_size, 3 * C)      # leading split

        for h in range(heads):                                        # static unroll
            lo = h * head_dim
            q = qkv_b[:, :, lo:lo + head_dim]                          # (gb, g, Dh)
            k = qkv_b[:, :, C + lo:C + lo + head_dim]
            v = qkv_b[:, :, 2 * C + lo:2 * C + lo + head_dim]

            # Block-diagonal attention, batched over the groups of this block.
            e = jnp.einsum('bqd,bkd->bqk', q, k,
                           preferred_element_type=jnp.float32)         # (gb, g, g)
            e = e - jnp.max(e, axis=-1, keepdims=True)
            p = jnp.exp(e)
            p = p * pl.reciprocal(jnp.sum(p, axis=-1, keepdims=True),
                                  approx=True)                         # EUP slot
            ob = jnp.einsum('bqk,bkd->bqd', p, v,
                            preferred_element_type=jnp.float32)        # (gb, g, Dh)

            # Stash this head's context at its static lane offset; the head
            # concat then happens implicitly inside the single fc_out matmul.
            ctx_ref[:, lo:lo + head_dim] = ob.reshape(rows, head_dim)

        # fc_out: one (rows, C) @ (C, C) matmul + bias; single output store.
        o_ref[...] = (jnp.dot(ctx_ref[...], wo_ref[...],
                              preferred_element_type=jnp.float32)
                      + bo_ref[...])

    return kernel


def multi_head_attention(x, wqkv, wout, bout, *, group_size, heads,
                         target_rows_per_block=512, min_grid=4):
    """Pallas forward of MultiHeadAttention.

    x     : (N, C) float32, N = n_groups * group_size
    wqkv  : (C, 3C)  qkv weight (no bias), output columns ordered [q | k | v]
    wout  : (C, C)   fc_out weight (input channels head-major: h*head_dim + d)
    bout  : (C,)     fc_out bias
    """
    N, C = x.shape
    assert C % heads == 0, "embed_size must be divisible by heads"
    assert N % group_size == 0, "N must be a multiple of group_size"
    head_dim = C // heads
    n_groups = N // group_size

    gb = _pick_groups_per_block(n_groups, group_size, target_rows_per_block,
                                min_grid)
    rows = gb * group_size
    grid_len = n_groups // gb
    assert rows % 8 == 0 or rows == N, "row block must be sublane aligned"

    # Host-side weight prep (free glue): fold the softmax scale into the q
    # projection columns so the kernel never multiplies the scores.
    scale = 1.0 / math.sqrt(C)        # reference: softmax(e / sqrt(embed_size))
    wqkv_scaled = jnp.concatenate([wqkv[:, :C] * scale, wqkv[:, C:]], axis=1)

    kernel = _make_mha_kernel(gb, group_size, heads, head_dim, C)
    const2 = lambda g: (0, 0)
    return pl.pallas_call(
        kernel,
        out_shape=jax.ShapeDtypeStruct((N, C), jnp.float32),
        grid=(grid_len,),
        in_specs=[
            pl.BlockSpec((rows, C), lambda g: (g, 0)),     # x: row-tiled
            pl.BlockSpec((C, 3 * C), const2),              # resident qkv weight
            pl.BlockSpec((C, C), const2),                  # resident fc_out weight
            pl.BlockSpec((1, C), const2),                  # fc_out bias
        ],
        out_specs=pl.BlockSpec((rows, C), lambda g: (g, 0)),
        scratch_shapes=[pltpu.VMEM((rows, C), jnp.float32)],   # per-head context
        compiler_params=pltpu.CompilerParams(
            dimension_semantics=("parallel",),   # shard row blocks across TCs
            vmem_limit_bytes=32 * 1024 * 1024,   # safe on v5e/v6e (128 MiB) and
                                                 # v7x (64 MiB); working set ≪ this
        ),
    )(x, wqkv_scaled, wout, bout.reshape(1, -1))


# ------------------------- pure-JAX reference (check) ------------------------ #

def mha_reference(x, wqkv, wout, bout, *, group_size, heads):
    N, C = x.shape
    head_dim = C // heads
    qkv = x @ wqkv
    q, k, v = qkv[:, :C], qkv[:, C:2 * C], qkv[:, 2 * C:]

    def split(t):   # rearrange '(n g) (h c) -> n h g c'
        t = t.reshape(N // group_size, group_size, heads, head_dim)
        return t.transpose(0, 2, 1, 3)

    q, k, v = split(q), split(k), split(v)
    e = jnp.einsum('nhqd,nhkd->nhqk', q, k) / jnp.sqrt(jnp.float32(C))
    p = jax.nn.softmax(e, axis=-1)
    o = jnp.einsum('nhqk,nhkd->nhqd', p, v)
    o = o.transpose(0, 2, 1, 3).reshape(N, C)   # '(n h) g c -> (n g) (h c)'
    return o @ wout + bout


# ----------------------------------- main ------------------------------------ #

if __name__ == "__main__":
    embed_dim = 32
    heads = 4
    group_size = 16
    n_groups = 64
    N = n_groups * group_size        # 1024 rows

    key = jax.random.PRNGKey(0)
    kx, kqkv, kw, kb = jax.random.split(key, 4)
    x = jax.random.normal(kx, (N, embed_dim), jnp.float32)
    wqkv = jax.random.normal(kqkv, (embed_dim, 3 * embed_dim), jnp.float32) * 0.1
    wout = jax.random.normal(kw, (embed_dim, embed_dim), jnp.float32) * 0.1
    bout = jax.random.normal(kb, (embed_dim,), jnp.float32) * 0.1

    out = multi_head_attention(x, wqkv, wout, bout, group_size=group_size,
                               heads=heads, target_rows_per_block=512)
    out = jax.block_until_ready(out)

    ref = jax.block_until_ready(
        mha_reference(x, wqkv, wout, bout, group_size=group_size, heads=heads))

    assert out.shape == (N, embed_dim)
    assert bool(jnp.all(jnp.isfinite(out)))
    max_err = float(jnp.max(jnp.abs(out - ref)))
    assert max_err < 1e-2, f"mismatch vs reference: max abs err {max_err}"
    print("KERNEL_OK")
</pallas_src>

<mosaic_0001>
module attributes {stable_mosaic.version = 11 : i64} {
  func.func @kernel(%arg0: i32, %arg1: memref<256x32xf32, #tpu.memory_space<vmem>>, %arg2: memref<32x96xf32, #tpu.memory_space<vmem>>, %arg3: memref<32x32xf32, #tpu.memory_space<vmem>>, %arg4: memref<1x32xf32, #tpu.memory_space<vmem>>, %arg5: memref<256x32xf32, #tpu.memory_space<vmem>>, %arg6: memref<256x32xf32, #tpu.memory_space<vmem>>) attributes {dimension_semantics = [#tpu.dimension_semantics<parallel>], iteration_bounds = array<i64: 4>, scalar_prefetch = 0 : i64, scratch_operands = 1 : i64, tpu.core_type = #tpu.core_type<tc>, window_params = [{transform_indices = @transform_0, window_bounds = array<i64: 256, 32>}, {pipeline_mode = #tpu.pipeline_mode<synchronous>, transform_indices = @transform_1, window_bounds = array<i64: 32, 96>}, {pipeline_mode = #tpu.pipeline_mode<synchronous>, transform_indices = @transform_2, window_bounds = array<i64: 32, 32>}, {pipeline_mode = #tpu.pipeline_mode<synchronous>, transform_indices = @transform_3, window_bounds = array<i64: 1, 32>}, {transform_indices = @transform_4, window_bounds = array<i64: 256, 32>}]} {
    %c0 = arith.constant 0 : index
    %c0_0 = arith.constant 0 : index
    %0 = vector.load %arg1[%c0, %c0_0] : memref<256x32xf32, #tpu.memory_space<vmem>>, vector<256x32xf32>
    %c0_1 = arith.constant 0 : index
    %c0_2 = arith.constant 0 : index
    %1 = vector.load %arg2[%c0_1, %c0_2] : memref<32x96xf32, #tpu.memory_space<vmem>>, vector<32x96xf32>
    %cst = arith.constant dense<0.000000e+00> : vector<256x96xf32>
    %2 = tpu.matmul %0, %1, %cst {dimension_numbers = #tpu.dot_dimension_numbers<[1], [0], [0], [1], [0, 0, 1, 1], [], []>} : vector<256x32xf32>, vector<32x96xf32>, vector<256x96xf32> -> vector<256x96xf32>
    %3 = vector.shape_cast %2 : vector<256x96xf32> to vector<16x16x96xf32>
    %4 = vector.extract_strided_slice %3 {offsets = [0, 0, 0], sizes = [16, 16, 8], strides = [1, 1, 1]} : vector<16x16x96xf32> to vector<16x16x8xf32>
    %5 = vector.extract_strided_slice %3 {offsets = [0, 0, 32], sizes = [16, 16, 8], strides = [1, 1, 1]} : vector<16x16x96xf32> to vector<16x16x8xf32>
    %6 = vector.extract_strided_slice %3 {offsets = [0, 0, 64], sizes = [16, 16, 8], strides = [1, 1, 1]} : vector<16x16x96xf32> to vector<16x16x8xf32>
    "tpu.trace_start"() <{level = 10 : i32, message = "bqd,bkd->bqk"}> : () -> ()
    %cst_3 = arith.constant dense<0.000000e+00> : vector<16x16x16xf32>
    %7 = tpu.matmul %4, %5, %cst_3 {dimension_numbers = #tpu.dot_dimension_numbers<[2], [2], [1], [1], [0, 0, 0, 1, 1, 1], [0], [0]>} : vector<16x16x8xf32>, vector<16x16x8xf32>, vector<16x16x16xf32> -> vector<16x16x16xf32>
    "tpu.trace_stop"() : () -> ()
    %cst_4 = arith.constant dense<0xFF800000> : vector<16x16xf32>
    %8 = vector.multi_reduction <maximumf>, %7, %cst_4 [2] : vector<16x16x16xf32> to vector<16x16xf32>
    %9 = vector.shape_cast %8 : vector<16x16xf32> to vector<16x16x1xf32>
    %10 = vector.broadcast %9 : vector<16x16x1xf32> to vector<16x16x16xf32>
    %11 = arith.subf %7, %10 : vector<16x16x16xf32>
    %12 = math.exp %11 : vector<16x16x16xf32>
    %cst_5 = arith.constant dense<0.000000e+00> : vector<16x16xf32>
    %13 = vector.multi_reduction <add>, %12, %cst_5 [2] : vector<16x16x16xf32> to vector<16x16xf32>
    %14 = vector.shape_cast %13 : vector<16x16xf32> to vector<16x16x1xf32>
    %15 = tpu.reciprocal %14 {approx = true} : vector<16x16x1xf32> -> vector<16x16x1xf32>
    %16 = vector.broadcast %15 : vector<16x16x1xf32> to vector<16x16x16xf32>
    %17 = arith.mulf %12, %16 : vector<16x16x16xf32>
    "tpu.trace_start"() <{level = 10 : i32, message = "bqk,bkd->bqd"}> : () -> ()
    %cst_6 = arith.constant dense<0.000000e+00> : vector<16x16x8xf32>
    %18 = tpu.matmul %17, %6, %cst_6 {dimension_numbers = #tpu.dot_dimension_numbers<[2], [1], [1], [2], [0, 0, 0, 1, 1, 2], [0], [0]>} : vector<16x16x16xf32>, vector<16x16x8xf32>, vector<16x16x8xf32> -> vector<16x16x8xf32>
    "tpu.trace_stop"() : () -> ()
    %19 = vector.shape_cast %18 : vector<16x16x8xf32> to vector<256x8xf32>
    %c0_7 = arith.constant 0 : index
    %c0_8 = arith.constant 0 : index
    %20 = vector.load %arg6[%c0_7, %c0_8] : memref<256x32xf32, #tpu.memory_space<vmem>>, vector<256x8xf32>
    tpu.vector_store %arg6[%c0_7, %c0_8], %19 {strides = array<i32>} : memref<256x32xf32, #tpu.memory_space<vmem>>, vector<256x8xf32>,
    %21 = vector.extract_strided_slice %3 {offsets = [0, 0, 8], sizes = [16, 16, 8], strides = [1, 1, 1]} : vector<16x16x96xf32> to vector<16x16x8xf32>
    %22 = vector.extract_strided_slice %3 {offsets = [0, 0, 40], sizes = [16, 16, 8], strides = [1, 1, 1]} : vector<16x16x96xf32> to vector<16x16x8xf32>
    %23 = vector.extract_strided_slice %3 {offsets = [0, 0, 72], sizes = [16, 16, 8], strides = [1, 1, 1]} : vector<16x16x96xf32> to vector<16x16x8xf32>
    "tpu.trace_start"() <{level = 10 : i32, message = "bqd,bkd->bqk"}> : () -> ()
    %cst_9 = arith.constant dense<0.000000e+00> : vector<16x16x16xf32>
    %24 = tpu.matmul %21, %22, %cst_9 {dimension_numbers = #tpu.dot_dimension_numbers<[2], [2], [1], [1], [0, 0, 0, 1, 1, 1], [0], [0]>} : vector<16x16x8xf32>, vector<16x16x8xf32>, vector<16x16x16xf32> -> vector<16x16x16xf32>
    "tpu.trace_stop"() : () -> ()
    %cst_10 = arith.constant dense<0xFF800000> : vector<16x16xf32>
    %25 = vector.multi_reduction <maximumf>, %24, %cst_10 [2] : vector<16x16x16xf32> to vector<16x16xf32>
    %26 = vector.shape_cast %25 : vector<16x16xf32> to vector<16x16x1xf32>
    %27 = vector.broadcast %26 : vector<16x16x1xf32> to vector<16x16x16xf32>
    %28 = arith.subf %24, %27 : vector<16x16x16xf32>
    %29 = math.exp %28 : vector<16x16x16xf32>
    %cst_11 = arith.constant dense<0.000000e+00> : vector<16x16xf32>
    %30 = vector.multi_reduction <add>, %29, %cst_11 [2] : vector<16x16x16xf32> to vector<16x16xf32>
    %31 = vector.shape_cast %30 : vector<16x16xf32> to vector<16x16x1xf32>
    %32 = tpu.reciprocal %31 {approx = true} : vector<16x16x1xf32> -> vector<16x16x1xf32>
    %33 = vector.broadcast %32 : vector<16x16x1xf32> to vector<16x16x16xf32>
    %34 = arith.mulf %29, %33 : vector<16x16x16xf32>
    "tpu.trace_start"() <{level = 10 : i32, message = "bqk,bkd->bqd"}> : () -> ()
    %cst_12 = arith.constant dense<0.000000e+00> : vector<16x16x8xf32>
    %35 = tpu.matmul %34, %23, %cst_12 {dimension_numbers = #tpu.dot_dimension_numbers<[2], [1], [1], [2], [0, 0, 0, 1, 1, 2], [0], [0]>} : vector<16x16x16xf32>, vector<16x16x8xf32>, vector<16x16x8xf32> -> vector<16x16x8xf32>
    "tpu.trace_stop"() : () -> ()
    %36 = vector.shape_cast %35 : vector<16x16x8xf32> to vector<256x8xf32>
    %c0_13 = arith.constant 0 : index
    %c8 = arith.constant 8 : index
    %37 = vector.load %arg6[%c0_13, %c8] : memref<256x32xf32, #tpu.memory_space<vmem>>, vector<256x8xf32>
    tpu.vector_store %arg6[%c0_13, %c8], %36 {strides = array<i32>} : memref<256x32xf32, #tpu.memory_space<vmem>>, vector<256x8xf32>,
    %38 = vector.extract_strided_slice %3 {offsets = [0, 0, 16], sizes = [16, 16, 8], strides = [1, 1, 1]} : vector<16x16x96xf32> to vector<16x16x8xf32>
    %39 = vector.extract_strided_slice %3 {offsets = [0, 0, 48], sizes = [16, 16, 8], strides = [1, 1, 1]} : vector<16x16x96xf32> to vector<16x16x8xf32>
    %40 = vector.extract_strided_slice %3 {offsets = [0, 0, 80], sizes = [16, 16, 8], strides = [1, 1, 1]} : vector<16x16x96xf32> to vector<16x16x8xf32>
    "tpu.trace_start"() <{level = 10 : i32, message = "bqd,bkd->bqk"}> : () -> ()
    %cst_14 = arith.constant dense<0.000000e+00> : vector<16x16x16xf32>
    %41 = tpu.matmul %38, %39, %cst_14 {dimension_numbers = #tpu.dot_dimension_numbers<[2], [2], [1], [1], [0, 0, 0, 1, 1, 1], [0], [0]>} : vector<16x16x8xf32>, vector<16x16x8xf32>, vector<16x16x16xf32> -> vector<16x16x16xf32>
    "tpu.trace_stop"() : () -> ()
    %cst_15 = arith.constant dense<0xFF800000> : vector<16x16xf32>
    %42 = vector.multi_reduction <maximumf>, %41, %cst_15 [2] : vector<16x16x16xf32> to vector<16x16xf32>
    %43 = vector.shape_cast %42 : vector<16x16xf32> to vector<16x16x1xf32>
    %44 = vector.broadcast %43 : vector<16x16x1xf32> to vector<16x16x16xf32>
    %45 = arith.subf %41, %44 : vector<16x16x16xf32>
    %46 = math.exp %45 : vector<16x16x16xf32>
    %cst_16 = arith.constant dense<0.000000e+00> : vector<16x16xf32>
    %47 = vector.multi_reduction <add>, %46, %cst_16 [2] : vector<16x16x16xf32> to vector<16x16xf32>
    %48 = vector.shape_cast %47 : vector<16x16xf32> to vector<16x16x1xf32>
    %49 = tpu.reciprocal %48 {approx = true} : vector<16x16x1xf32> -> vector<16x16x1xf32>
    %50 = vector.broadcast %49 : vector<16x16x1xf32> to vector<16x16x16xf32>
    %51 = arith.mulf %46, %50 : vector<16x16x16xf32>
    "tpu.trace_start"() <{level = 10 : i32, message = "bqk,bkd->bqd"}> : () -> ()
    %cst_17 = arith.constant dense<0.000000e+00> : vector<16x16x8xf32>
    %52 = tpu.matmul %51, %40, %cst_17 {dimension_numbers = #tpu.dot_dimension_numbers<[2], [1], [1], [2], [0, 0, 0, 1, 1, 2], [0], [0]>} : vector<16x16x16xf32>, vector<16x16x8xf32>, vector<16x16x8xf32> -> vector<16x16x8xf32>
    "tpu.trace_stop"() : () -> ()
    %53 = vector.shape_cast %52 : vector<16x16x8xf32> to vector<256x8xf32>
    %c0_18 = arith.constant 0 : index
    %c16 = arith.constant 16 : index
    %54 = vector.load %arg6[%c0_18, %c16] : memref<256x32xf32, #tpu.memory_space<vmem>>, vector<256x8xf32>
    tpu.vector_store %arg6[%c0_18, %c16], %53 {strides = array<i32>} : memref<256x32xf32, #tpu.memory_space<vmem>>, vector<256x8xf32>,
    %55 = vector.extract_strided_slice %3 {offsets = [0, 0, 24], sizes = [16, 16, 8], strides = [1, 1, 1]} : vector<16x16x96xf32> to vector<16x16x8xf32>
    %56 = vector.extract_strided_slice %3 {offsets = [0, 0, 56], sizes = [16, 16, 8], strides = [1, 1, 1]} : vector<16x16x96xf32> to vector<16x16x8xf32>
    %57 = vector.extract_strided_slice %3 {offsets = [0, 0, 88], sizes = [16, 16, 8], strides = [1, 1, 1]} : vector<16x16x96xf32> to vector<16x16x8xf32>
    "tpu.trace_start"() <{level = 10 : i32, message = "bqd,bkd->bqk"}> : () -> ()
    %cst_19 = arith.constant dense<0.000000e+00> : vector<16x16x16xf32>
    %58 = tpu.matmul %55, %56, %cst_19 {dimension_numbers = #tpu.dot_dimension_numbers<[2], [2], [1], [1], [0, 0, 0, 1, 1, 1], [0], [0]>} : vector<16x16x8xf32>, vector<16x16x8xf32>, vector<16x16x16xf32> -> vector<16x16x16xf32>
    "tpu.trace_stop"() : () -> ()
    %cst_20 = arith.constant dense<0xFF800000> : vector<16x16xf32>
    %59 = vector.multi_reduction <maximumf>, %58, %cst_20 [2] : vector<16x16x16xf32> to vector<16x16xf32>
    %60 = vector.shape_cast %59 : vector<16x16xf32> to vector<16x16x1xf32>
    %61 = vector.broadcast %60 : vector<16x16x1xf32> to vector<16x16x16xf32>
    %62 = arith.subf %58, %61 : vector<16x16x16xf32>
    %63 = math.exp %62 : vector<16x16x16xf32>
    %cst_21 = arith.constant dense<0.000000e+00> : vector<16x16xf32>
    %64 = vector.multi_reduction <add>, %63, %cst_21 [2] : vector<16x16x16xf32> to vector<16x16xf32>
    %65 = vector.shape_cast %64 : vector<16x16xf32> to vector<16x16x1xf32>
    %66 = tpu.reciprocal %65 {approx = true} : vector<16x16x1xf32> -> vector<16x16x1xf32>
    %67 = vector.broadcast %66 : vector<16x16x1xf32> to vector<16x16x16xf32>
    %68 = arith.mulf %63, %67 : vector<16x16x16xf32>
    "tpu.trace_start"() <{level = 10 : i32, message = "bqk,bkd->bqd"}> : () -> ()
    %cst_22 = arith.constant dense<0.000000e+00> : vector<16x16x8xf32>
    %69 = tpu.matmul %68, %57, %cst_22 {dimension_numbers = #tpu.dot_dimension_numbers<[2], [1], [1], [2], [0, 0, 0, 1, 1, 2], [0], [0]>} : vector<16x16x16xf32>, vector<16x16x8xf32>, vector<16x16x8xf32> -> vector<16x16x8xf32>
    "tpu.trace_stop"() : () -> ()
    %70 = vector.shape_cast %69 : vector<16x16x8xf32> to vector<256x8xf32>
    %c0_23 = arith.constant 0 : index
    %c24 = arith.constant 24 : index
    %71 = vector.load %arg6[%c0_23, %c24] : memref<256x32xf32, #tpu.memory_space<vmem>>, vector<256x8xf32>
    tpu.vector_store %arg6[%c0_23, %c24], %70 {strides = array<i32>} : memref<256x32xf32, #tpu.memory_space<vmem>>, vector<256x8xf32>,
    %c0_24 = arith.constant 0 : index
    %c0_25 = arith.constant 0 : index
    %72 = vector.load %arg6[%c0_24, %c0_25] : memref<256x32xf32, #tpu.memory_space<vmem>>, vector<256x32xf32>
    %c0_26 = arith.constant 0 : index
    %c0_27 = arith.constant 0 : index
    %73 = vector.load %arg3[%c0_26, %c0_27] : memref<32x32xf32, #tpu.memory_space<vmem>>, vector<32x32xf32>
    %cst_28 = arith.constant dense<0.000000e+00> : vector<256x32xf32>
    %74 = tpu.matmul %72, %73, %cst_28 {dimension_numbers = #tpu.dot_dimension_numbers<[1], [0], [0], [1], [0, 0, 1, 1], [], []>} : vector<256x32xf32>, vector<32x32xf32>, vector<256x32xf32> -> vector<256x32xf32>
    %c0_29 = arith.constant 0 : index
    %c0_30 = arith.constant 0 : index
    %75 = vector.load %arg4[%c0_29, %c0_30] : memref<1x32xf32, #tpu.memory_space<vmem>>, vector<1x32xf32>
    %76 = vector.broadcast %75 : vector<1x32xf32> to vector<256x32xf32>
    %77 = arith.addf %74, %76 : vector<256x32xf32>
    %c0_31 = arith.constant 0 : index
    %c0_32 = arith.constant 0 : index
    %78 = vector.load %arg5[%c0_31, %c0_32] : memref<256x32xf32, #tpu.memory_space<vmem>>, vector<256x32xf32>
    tpu.vector_store %arg5[%c0_31, %c0_32], %77 {strides = array<i32>} : memref<256x32xf32, #tpu.memory_space<vmem>>, vector<256x32xf32>,
    return
  }
  func.func @transform_0(%arg0: i32) -> (i32, i32) {
    %c0_i32 = arith.constant 0 : i32
    %c0_i32_0 = arith.constant 0 : i32
    return %arg0, %c0_i32 : i32, i32
  }
  func.func @transform_1(%arg0: i32) -> (i32, i32) {
    %c0_i32 = arith.constant 0 : i32
    %c0_i32_0 = arith.constant 0 : i32
    %c0_i32_1 = arith.constant 0 : i32
    return %c0_i32, %c0_i32_0 : i32, i32
  }
  func.func @transform_2(%arg0: i32) -> (i32, i32) {
    %c0_i32 = arith.constant 0 : i32
    %c0_i32_0 = arith.constant 0 : i32
    %c0_i32_1 = arith.constant 0 : i32
    return %c0_i32, %c0_i32_0 : i32, i32
  }
  func.func @transform_3(%arg0: i32) -> (i32, i32) {
    %c0_i32 = arith.constant 0 : i32
    %c0_i32_0 = arith.constant 0 : i32
    %c0_i32_1 = arith.constant 0 : i32
    return %c0_i32, %c0_i32_0 : i32, i32
  }
  func.func @transform_4(%arg0: i32) -> (i32, i32) {
    %c0_i32 = arith.constant 0 : i32
    %c0_i32_0 = arith.constant 0 : i32
    return %arg0, %c0_i32 : i32, i32
  }
}

</mosaic_0001>

<bundles_post_ra>
// kernel: tpu_custom_call.1
= control target key start
LH: loop header
LB: loop body
LE: loop exit
PB: predicated region body
PF: predicated region fallthrough
CT: control target
= control target key end

     0   :  { %s18229_s15 = smov 0   ;;  %s21828_s0 = inlined_call_operand.vmem [shape: f32[1024,32], index: 0, kind: input, shape index: {}]   ;;  %s21829_s1 = inlined_call_operand.vmem [shape: f32[32,96], index: 1, kind: input, shape index: {}]   ;;  %s21830_s2 = inlined_call_operand.vmem [shape: f32[32,32], index: 2, kind: input, shape index: {}]   ;;  %s21831_s3 = inlined_call_operand.vmem [shape: f32[1,32], index: 3, kind: input, shape index: {}]   ;;  %s21832_s4 = inlined_call_operand.vmem [shape: f32[1024,32], index: 4, kind: output, shape index: {}]  }
   0x1 LB: > { %s14296_s16 = sadd.s32 4294967295, %s18188_s15   ;;  %p14300_p0 = scmp.ge.s32.totalorder %s18188_s15, 1  ;;  %s18188_s15 = sphi %s18229_s15, %s14_s15  }
   0x2   : > { %p163_p1 = scmp.lt.s32.totalorder %s18188_s15, 5 }
   0x4   : > { %p164_p2 = pnand %p14300_p0, %p163_p1 }
   0x6   : > { %167 = sbr.rel (%p164_p2) target bundleno = 3665 (0xe51), region = 36 }
   0xd   : > { %v233_v0 = vld [vmem:[%s21829_s1] sm:$0xff]  ;;  %v234_v1 = vld [vmem:[%s21829_s1 + $0x8] sm:$0xff]  ;;  %v235_v2 = vld [vmem:[%s21829_s1 + $0x10] sm:$0xff]  ;;  %s14301_s23 = sshll.u32 %s14296_s16, 5  ;;  %vm237_vm0 = vcmask 261120   ;;  %vm565_vm1 = vcmask 64512  }
   0xe   : > { %v16348_v3 = vpack.c.bf16 %v234_v1, %v233_v0  ;;  %v236_v4 = vld [vmem:[%s21829_s1 + $0x18] sm:$0xff]  ;;  %p190_p3 = scmp.lt.s32.totalorder %s14301_s23, 127  ;;  %s18190_s30 = smov 96   ;;  %vm18547_vm2 = vmpackc.low %vm565_vm1, %vm565_vm1  ;;  %vm1984_vm3 = vcmask 130048   ;;  %vm7089_vm4 = vcmask 130112   ;;  %vm10450_vm5 = vcmask 195712  }
   0xf   : > { %v16352_v5 = vpack.c.bf16 %v236_v4, %v235_v2  ;;  %s18191_s5 = smov 64   ;;  %s18192_s6 = smov 88   ;;  %vm13811_vm6 = vcmask 261312  }
  0x10   : > { %16349 = vmatprep.subr.bf16.mxu0 %v16348_v3  ;;  %s22404_s23 = smov (!%p190_p3, %s14301_s23), 127  ;;  %17004 = vmatprep.subr.bf16.mxu1 %v16348_v3  ;;  %s18193_s7 = smov 120  }
  0x11   : > { %16351 = vmatpush3.bf16.msra.mxu0 %v16348_v3  ;;  %17006 = vmatpush3.bf16.msra.mxu1 %v16348_v3  ;;  %s14302_s26 = sshll.u32 %s22404_s23, 3  ;;  %s18194_s8 = smov 56  }
  0x12   : > { %16353 = vmatprep.subr.bf16.mxu0 %v16352_v5  ;;  %17005 = vmatprep.subr.bf16.mxu1 %v16352_v5  ;;  %s18257_s29 = scalar_lea.vmem %s21828_s0, %s14302_s26  ;;  %s18195_s9 = smov 80  }
  0x13   : > { %v201_v6 = vld [vmem:[%s18257_s29] sm:$0xff]  ;;  %v202_v7 = vld [vmem:[%s18257_s29 + $0x8] sm:$0xff]  ;;  %v203_v8 = vld [vmem:[%s18257_s29 + $0x10] sm:$0xff]  ;;  %s18196_s10 = smov 112   ;;  %s18197_s11 = smov 48  }
  0x14   : > { %15348 = vmatprep.mubr.msk.f32.mxu0 %vm237_vm0, %v201_v6  ;;  %v217_v9 = vld [vmem:[%s18257_s29 + $0x80] sm:$0xff]  ;;  %v218_v10 = vld [vmem:[%s18257_s29 + $0x88] sm:$0xff]  ;;  %v219_v11 = vld [vmem:[%s18257_s29 + $0x90] sm:$0xff]  ;;  %s18198_s12 = smov 72   ;;  %s18199_s13 = smov 104  }
  0x15   : > { %16355 = vmatpush3.bf16.msra.mxu0 %v16352_v5  ;;  %17007 = vmatpush3.bf16.msra.mxu1 %v16352_v5  ;;  %v204_v12 = vld [vmem:[%s18257_s29 + $0x18] sm:$0xff]  ;;  %v205_v13 = vld [vmem:[%s18257_s29 + $0x20] sm:$0xff]  ;;  %v206_v16 = vld [vmem:[%s18257_s29 + $0x28] sm:$0xff]  ;;  %s18200_s14 = smov 40   ;;  %s18201_s16 = smov 8  }
  0x16   : > { %15372 = vmatprep.mubr.msk.f32.mxu1 %vm237_vm0, %v217_v9  ;;  %v220_v14 = vld [vmem:[%s18257_s29 + $0x98] sm:$0xff]  ;;  %v221_v15 = vld [vmem:[%s18257_s29 + $0xa0] sm:$0xff]  ;;  %v207_v17 = vld [vmem:[%s18257_s29 + $0x30] sm:$0xff]  ;;  %s18202_s17 = smov 16   ;;  %s18203_s28 = smov 24  }
  0x17   : > { %v222_v18 = vld [vmem:[%s18257_s29 + $0xa8] sm:$0xff]  ;;  %v223_v19 = vld [vmem:[%s18257_s29 + $0xb0] sm:$0xff]  ;;  %v208_v20 = vld [vmem:[%s18257_s29 + $0x38] sm:$0xff] }
  0x18   : > { %15349 = vmatmul.mubr.msk.f32.vlgmr.msra.gmra.mrb[0].mxu0 %vm237_vm0, %v202_v7  ;;  %15373 = vmatmul.mubr.msk.f32.vlgmr.msra.gmra.mrb[0].mxu1 %vm237_vm0, %v218_v10  ;;  %v209_v21 = vld [vmem:[%s18257_s29 + $0x40] sm:$0xff]  ;;  %v224_v22 = vld [vmem:[%s18257_s29 + $0xb8] sm:$0xff]  ;;  %v210_v24 = vld [vmem:[%s18257_s29 + $0x48] sm:$0xff] }
  0x19   : > { %15351 = vmatprep.mubr.msk.f32.mxu0 %vm237_vm0, %v203_v8  ;;  %15375 = vmatprep.mubr.msk.f32.mxu1 %vm237_vm0, %v219_v11  ;;  %v225_v23 = vld [vmem:[%s18257_s29 + $0xc0] sm:$0xff]  ;;  %v211_v25 = vld [vmem:[%s18257_s29 + $0x50] sm:$0xff]  ;;  %v226_v26 = vld [vmem:[%s18257_s29 + $0xc8] sm:$0xff] }
  0x1a   : > { %v227_v27 = vld [vmem:[%s18257_s29 + $0xd0] sm:$0xff]  ;;  %v212_v28 = vld [vmem:[%s18257_s29 + $0x58] sm:$0xff]  ;;  %v213_v29 = vld [vmem:[%s18257_s29 + $0x60] sm:$0xff] }
  0x1b   : > { %v228_v30 = vld [vmem:[%s18257_s29 + $0xd8] sm:$0xff]  ;;  %v229_v31 = vld [vmem:[%s18257_s29 + $0xe0] sm:$0xff]  ;;  %v214_v32 = vld [vmem:[%s18257_s29 + $0x68] sm:$0xff] }
  0x1c   : > { %15352 = vmatmul.mubr.msk.f32.gmra.mrb[2].mxu0 %vm237_vm0, %v204_v12  ;;  %15376 = vmatmul.mubr.msk.f32.gmra.mrb[2].mxu1 %vm237_vm0, %v220_v14  ;;  %v215_v33 = vld [vmem:[%s18257_s29 + $0x70] sm:$0xff]  ;;  %v230_v34 = vld [vmem:[%s18257_s29 + $0xe8] sm:$0xff]  ;;  %v216_v36 = vld [vmem:[%s18257_s29 + $0x78] sm:$0xff] }
  0x1d   : > { %15354 = vmatprep.mubr.msk.f32.mxu0 %vm237_vm0, %v205_v13  ;;  %15378 = vmatprep.mubr.msk.f32.mxu1 %vm237_vm0, %v221_v15  ;;  %v231_v35 = vld [vmem:[%s18257_s29 + $0xf0] sm:$0xff]  ;;  %v232_v37 = vld [vmem:[%s18257_s29 + $0xf8] sm:$0xff] }
  0x20   : > { %15355 = vmatmul.mubr.msk.f32.gmra.mrb[4].mxu0 %vm237_vm0, %v206_v16  ;;  %15379 = vmatmul.mubr.msk.f32.gmra.mrb[4].mxu1 %vm237_vm0, %v222_v18 }
  0x21   : > { %15357 = vmatprep.mubr.msk.f32.mxu0 %vm237_vm0, %v207_v17  ;;  %15381 = vmatprep.mubr.msk.f32.mxu1 %vm237_vm0, %v223_v19 }
  0x24   : > { %15358 = vmatmul.mubr.msk.f32.gmra.mrb[6].mxu0 %vm237_vm0, %v208_v20  ;;  %15382 = vmatmul.mubr.msk.f32.gmra.mrb[6].mxu1 %vm237_vm0, %v224_v22 }
  0x25   : > { %15360 = vmatprep.mubr.msk.f32.mxu0 %vm237_vm0, %v209_v21  ;;  %15384 = vmatprep.mubr.msk.f32.mxu1 %vm237_vm0, %v225_v23 }
  0x28   : > { %15361 = vmatmul.mubr.msk.f32.gmra.mrb[8].mxu0 %vm237_vm0, %v210_v24  ;;  %15385 = vmatmul.mubr.msk.f32.gmra.mrb[8].mxu1 %vm237_vm0, %v226_v26 }
  0x29   : > { %15363 = vmatprep.mubr.msk.f32.mxu0 %vm237_vm0, %v211_v25  ;;  %15387 = vmatprep.mubr.msk.f32.mxu1 %vm237_vm0, %v227_v27  ;;  %v22018_v25 = vmov 0 }
  0x2a   : > { %v22019_v25 = vsel %vm18547_vm2, 4294967295, %v22018_v25 }
  0x2b   : > { %22020 = vst [vmem:[#allocation39_spill] sm:$0xff] %v22019_v25 }
  0x2c   : > { %15364 = vmatmul.mubr.msk.f32.gmra.mrb[10].mxu0 %vm237_vm0, %v212_v28  ;;  %15388 = vmatmul.mubr.msk.f32.gmra.mrb[10].mxu1 %vm237_vm0, %v228_v30 }
  0x2d   : > { %15366 = vmatprep.mubr.msk.f32.mxu0 %vm237_vm0, %v213_v29  ;;  %15390 = vmatprep.mubr.msk.f32.mxu1 %vm237_vm0, %v229_v31 }
  0x30   : > { %15367 = vmatmul.mubr.msk.f32.gmra.mrb[12].mxu0 %vm237_vm0, %v214_v32  ;;  %15391 = vmatmul.mubr.msk.f32.gmra.mrb[12].mxu1 %vm237_vm0, %v230_v34 }
  0x31   : > { %15369 = vmatprep.mubr.msk.f32.mxu0 %vm237_vm0, %v215_v33  ;;  %15393 = vmatprep.mubr.msk.f32.mxu1 %vm237_vm0, %v231_v35 }
  0x34   : > { %15370 = vmatmul.mubr.msk.f32.gmra.mrb[14].mxu0 %vm237_vm0, %v216_v36  ;;  %15394 = vmatmul.mubr.msk.f32.gmra.mrb[14].mxu1 %vm237_vm0, %v232_v37 }
  0xeb   : > { %v18323_v38 = vpop.f32.mrb[0].mxu0  ;;  %v18327_v40 = vpop.f32.mrb[0].mxu1 }
  0xec   : > { %21982 = vst [vmem:[#allocation3_spill] sm:$0xff] %v18323_v38  ;;  %v18325_v39 = vpop.f32.mrb[1].mxu0  ;;  %v18335_v42 = vpop.f32.mrb[1].mxu1 }
  0xed   : > { %21983 = vst [vmem:[#allocation4_spill] sm:$0xff] %v18325_v39  ;;  %15400 = vmatprep.mubr.msk.f32.mxu1 %vm565_vm1, %v18325_v39  ;;  %v18333_v41 = vpack.i.bf16 %v18323_v38, %v18325_v39  ;;  %21985 = vst [vmem:[#allocation6_spill] sm:$0xff] %v18335_v42  ;;  %15456 = vmatprep.mubr.msk.f32.mxu0 %vm565_vm1, %v18335_v42  ;;  %v18341_v43 = vpack.i.bf16 %v18327_v40, %v18335_v42 }
  0xef   : > { %21984 = vst [vmem:[#allocation5_spill] sm:$0xff] %v18333_v41  ;;  %17031 = vrot.lane.b32.xlu0 %v18333_v41, %s18190_s30  ;;  %v18345_v44 = vpop.f32.mrb[2].mxu0  ;;  %v18349_v46 = vpop.f32.mrb[2].mxu1 }
  0xf0   : > { %21986 = vst [vmem:[#allocation7_spill] sm:$0xff] %v18345_v44  ;;  %v18347_v45 = vpop.f32.mrb[3].mxu0  ;;  %21988 = vst [vmem:[#allocation9_spill] sm:$0xff] %v18349_v46  ;;  %v18355_v48 = vpop.f32.mrb[3].mxu1 }
  0xf1   : > { %21987 = vst [vmem:[#allocation8_spill] sm:$0xff] %v18347_v45  ;;  %v18353_v47 = vpack.i.bf16 %v18345_v44, %v18347_v45  ;;  %v18359_v49 = vpack.i.bf16 %v18349_v46, %v18355_v48 }
  0xf3   : > { %21989 = vst [vmem:[#allocation10_spill] sm:$0xff] %v18353_v47  ;;  %21990 = vst [vmem:[#allocation11_spill] sm:$0xff] %v18359_v49  ;;  %17036 = vrot.lane.b32.xlu0 %v18353_v47, %s18190_s30  ;;  %v18363_v50 = vpop.f32.mrb[4].mxu0  ;;  %v18367_v52 = vpop.f32.mrb[4].mxu1 }
  0xf4   : > { %21991 = vst [vmem:[#allocation12_spill] sm:$0xff] %v18363_v50  ;;  %v18365_v51 = vpop.f32.mrb[5].mxu0  ;;  %21993 = vst [vmem:[#allocation14_spill] sm:$0xff] %v18367_v52  ;;  %v18373_v54 = vpop.f32.mrb[5].mxu1 }
  0xf5   : > { %21992 = vst [vmem:[#allocation13_spill] sm:$0xff] %v18365_v51  ;;  %v18371_v53 = vpack.i.bf16 %v18363_v50, %v18365_v51  ;;  %21995 = vst [vmem:[#allocation16_spill] sm:$0xff] %v18373_v54  ;;  %v18377_v55 = vpack.i.bf16 %v18367_v52, %v18373_v54 }
  0xf7   : > { %21994 = vst [vmem:[#allocation15_spill] sm:$0xff] %v18371_v53  ;;  %17041 = vrot.lane.b32.xlu1 %v18371_v53, %s18190_s30  ;;  %v18381_v56 = vpop.f32.mrb[6].mxu0  ;;  %v18385_v58 = vpop.f32.mrb[6].mxu1 }
  0xf8   : > { %21996 = vst [vmem:[#allocation17_spill] sm:$0xff] %v18381_v56  ;;  %v18383_v57 = vpop.f32.mrb[7].mxu0  ;;  %21998 = vst [vmem:[#allocation19_spill] sm:$0xff] %v18385_v58  ;;  %v18391_v60 = vpop.f32.mrb[7].mxu1 }
  0xf9   : > { %21997 = vst [vmem:[#allocation18_spill] sm:$0xff] %v18383_v57  ;;  %v18389_v59 = vpack.i.bf16 %v18381_v56, %v18383_v57  ;;  %22000 = vst [vmem:[#allocation21_spill] sm:$0xff] %v18391_v60  ;;  %v18395_v61 = vpack.i.bf16 %v18385_v58, %v18391_v60 }
  0xfb   : > { %21999 = vst [vmem:[#allocation20_spill] sm:$0xff] %v18389_v59  ;;  %22001 = vst [vmem:[#allocation22_spill] sm:$0xff] %v18395_v61  ;;  %17046 = vrot.lane.b32.xlu1 %v18389_v59, %s18190_s30  ;;  %v18399_v62 = vpop.f32.mrb[8].mxu0  ;;  %v18403_v0 = vpop.f32.mrb[8].mxu1 }
  0xfc   : > { %v18401_v63 = vpop.f32.mrb[9].mxu0  ;;  %22002 = vst [vmem:[#allocation23_spill] sm:$0xff] %v18403_v0  ;;  %v18409_v2 = vpop.f32.mrb[9].mxu1 }
  0xfd   : > { %v18407_v1 = vpack.i.bf16 %v18399_v62, %v18401_v63  ;;  %22004 = vst [vmem:[#allocation25_spill] sm:$0xff] %v18409_v2  ;;  %v18413_v3 = vpack.i.bf16 %v18403_v0, %v18409_v2 }
  0xff   : > { %22003 = vst [vmem:[#allocation24_spill] sm:$0xff] %v18407_v1  ;;  %17051 = vrot.lane.b32.xlu0 %v18407_v1, %s18190_s30  ;;  %v18417_v4 = vpop.f32.mrb[10].mxu0  ;;  %v18421_v6 = vpop.f32.mrb[10].mxu1 }
 0x100   : > { %22005 = vst [vmem:[#allocation26_spill] sm:$0xff] %v18417_v4  ;;  %v18419_v5 = vpop.f32.mrb[11].mxu0  ;;  %22006 = vst [vmem:[#allocation27_spill] sm:$0xff] %v18421_v6  ;;  %v18427_v8 = vpop.f32.mrb[11].mxu1 }
 0x101   : > { %v18425_v7 = vpack.i.bf16 %v18417_v4, %v18419_v5  ;;  %22008 = vst [vmem:[#allocation29_spill] sm:$0xff] %v18427_v8  ;;  %v18431_v9 = vpack.i.bf16 %v18421_v6, %v18427_v8 }
 0x103   : > { %22007 = vst [vmem:[#allocation28_spill] sm:$0xff] %v18425_v7  ;;  %22009 = vst [vmem:[#allocation30_spill] sm:$0xff] %v18431_v9  ;;  %17056 = vrot.lane.b32.xlu1 %v18425_v7, %s18190_s30  ;;  %v18435_v10 = vpop.f32.mrb[12].mxu0  ;;  %v18439_v12 = vpop.f32.mrb[12].mxu1 }
 0x104   : > { %v18437_v11 = vpop.f32.mrb[13].mxu0  ;;  %22011 = vst [vmem:[#allocation32_spill] sm:$0xff] %v18439_v12  ;;  %v18445_v14 = vpop.f32.mrb[13].mxu1 }
 0x105   : > { %22010 = vst [vmem:[#allocation31_spill] sm:$0xff] %v18437_v11  ;;  %v18443_v13 = vpack.i.bf16 %v18435_v10, %v18437_v11  ;;  %22012 = vst [vmem:[#allocation33_spill] sm:$0xff] %v18445_v14  ;;  %v18449_v15 = vpack.i.bf16 %v18439_v12, %v18445_v14 }
 0x107   : > { %22013 = vst [vmem:[#allocation34_spill] sm:$0xff] %v18449_v15  ;;  %17061 = vrot.lane.b32.xlu0 %v18443_v13, %s18190_s30  ;;  %v18453_v16 = vpop.f32.mrb[14].mxu0  ;;  %v18457_v18 = vpop.f32.mrb[14].mxu1 }
 0x108   : > { %22014 = vst [vmem:[#allocation35_spill] sm:$0xff] %v18453_v16  ;;  %v18455_v17 = vpop.f32.mrb[15].mxu0  ;;  %22015 = vst [vmem:[#allocation36_spill] sm:$0xff] %v18457_v18  ;;  %v18463_v20 = vpop.f32.mrb[15].mxu1 }
 0x109   : > { %v18461_v19 = vpack.i.bf16 %v18453_v16, %v18455_v17  ;;  %22016 = vst [vmem:[#allocation37_spill] sm:$0xff] %v18463_v20  ;;  %v18467_v21 = vpack.i.bf16 %v18457_v18, %v18463_v20 }
 0x10b   : > { %22017 = vst [vmem:[#allocation38_spill] sm:$0xff] %v18467_v21  ;;  %17071 = vrot.lane.b32.xlu0 %v18341_v43, %s18190_s30  ;;  %17066 = vrot.lane.b32.xlu1 %v18461_v19, %s18190_s30 }
 0x10f   : > { %17081 = vrot.lane.b32.xlu0 %v18377_v55, %s18190_s30  ;;  %17076 = vrot.lane.b32.xlu1 %v18359_v49, %s18190_s30 }
 0x113   : > { %17091 = vrot.lane.b32.xlu0 %v18413_v3, %s18190_s30  ;;  %17086 = vrot.lane.b32.xlu1 %v18395_v61, %s18190_s30 }
 0x117   : > { %17101 = vrot.lane.b32.xlu0 %v18449_v15, %s18190_s30  ;;  %17096 = vrot.lane.b32.xlu1 %v18431_v9, %s18190_s30 }
 0x11b   : > { %17121 = vrot.lane.b32.xlu0 %v18371_v53, %s18191_s5  ;;  %17106 = vrot.lane.b32.xlu1 %v18467_v21, %s18190_s30 }
 0x11f   : > { %17131 = vrot.lane.b32.xlu0 %v18407_v1, %s18191_s5  ;;  %17111 = vrot.lane.b32.xlu1 %v18333_v41, %s18191_s5 }
 0x123   : > { %17136 = vrot.lane.b32.xlu0 %v18425_v7, %s18191_s5  ;;  %17116 = vrot.lane.b32.xlu1 %v18353_v47, %s18191_s5 }
 0x127   : > { %17141 = vrot.lane.b32.xlu0 %v18443_v13, %s18191_s5  ;;  %17126 = vrot.lane.b32.xlu1 %v18389_v59, %s18191_s5 }
 0x12b   : > { %17156 = vrot.lane.b32.xlu0 %v18377_v55, %s18191_s5  ;;  %17146 = vrot.lane.b32.xlu1 %v18341_v43, %s18191_s5 }
 0x12f   : > { %17181 = vrot.lane.b32.xlu0 %v18333_v41, %s18192_s6  ;;  %17151 = vrot.lane.b32.xlu1 %v18359_v49, %s18191_s5 }
 0x133   : > { %17191 = vrot.lane.b32.xlu0 %v18371_v53, %s18192_s6  ;;  %17161 = vrot.lane.b32.xlu1 %v18395_v61, %s18191_s5 }
 0x137   : > { %3763 = vrot.lane.b32.xlu0 %v18323_v38, %s18193_s7  ;;  %17166 = vrot.lane.b32.xlu1 %v18413_v3, %s18191_s5 }
 0x13b   : > { %3852 = vrot.lane.b32.xlu0 %v18347_v45, %s18193_s7  ;;  %17171 = vrot.lane.b32.xlu1 %v18431_v9, %s18191_s5 }
 0x13f   : > { %17201 = vrot.lane.b32.xlu0 %v18407_v1, %s18192_s6  ;;  %17176 = vrot.lane.b32.xlu1 %v18449_v15, %s18191_s5 }
 0x143   : > { %3945 = vrot.lane.b32.xlu0 %v18363_v50, %s18193_s7  ;;  %17186 = vrot.lane.b32.xlu1 %v18353_v47, %s18192_s6 }
 0x147   : > { %4034 = vrot.lane.b32.xlu0 %v18383_v57, %s18193_s7  ;;  %3761 = vrot.lane.b32.xlu1 %v18325_v39, %s18193_s7 }
 0x14b   : > { %17196 = vrot.lane.b32.xlu1 %v18389_v59, %s18192_s6 }
 0x14f   : > { %3854 = vrot.lane.b32.xlu1 %v18345_v44, %s18193_s7 }
 0x153   : > { %3943 = vrot.lane.b32.xlu1 %v18365_v51, %s18193_s7 }
 0x157   : > { %17206 = vrot.lane.b32.xlu1 %v18425_v7, %s18192_s6 }
 0x15b   : > { %4036 = vrot.lane.b32.xlu1 %v18381_v56, %s18193_s7 }
 0x15f   : > { %17211 = vrot.lane.b32.xlu1 %v18461_v19, %s18191_s5 }
 0x161   : > { %v17032_v22 = vpop.permute.xlu0 %17031 }
 0x162   : > { %v17034_v23 = vunpack.i.h.bf16 %v17032_v22  ;;  %v17033_v24 = vunpack.i.l.bf16 %v17032_v22 }
 0x163   : > { %17216 = vrot.lane.b32.xlu1 %v18467_v21, %s18191_s5 }
 0x164   : > { %v16356_v26 = vpack.c.bf16 %v17034_v23, %v17033_v24 }
 0x165   : > { %v17037_v27 = vpop.permute.xlu0 %17036 }
 0x166   : > { %v17039_v28 = vunpack.i.h.bf16 %v17037_v27  ;;  %v17038_v29 = vunpack.i.l.bf16 %v17037_v27  ;;  %16358 = vmatprep.subr.msk.bf16.mxu1 %vm18547_vm2, %v16356_v26 }
 0x167   : > { %16361 = vmatpush3.bf16.xpose.msk.msra.mxu1 %vm18547_vm2, %v16356_v26 }
 0x168   : > { %v16362_v30 = vpack.c.bf16 %v17039_v28, %v17038_v29 }
 0x169   : > { %v17042_v31 = vpop.permute.xlu1 %17041 }
 0x16a   : > { %v17044_v32 = vunpack.i.h.bf16 %v17042_v31  ;;  %v17043_v33 = vunpack.i.l.bf16 %v17042_v31  ;;  %16364 = vmatprep.subr.msk.bf16.mxu1 %vm18547_vm2, %v16362_v30 }
 0x16c   : > { %v16368_v34 = vpack.c.bf16 %v17044_v32, %v17043_v33 }
 0x16d   : > { %v17047_v35 = vpop.permute.xlu1 %17046 }
 0x16e   : > { %15401 = vmatmul.mubr.msk.f32.vlgmr.msra.gmra.mrb[16].mxu1 %vm565_vm1, %v18323_v38  ;;  %v17049_v36 = vunpack.i.h.bf16 %v17047_v35  ;;  %v17048_v37 = vunpack.i.l.bf16 %v17047_v35 }
 0x16f   : > { %16367 = vmatpush3.bf16.xpose.msk.msra.mxu1 %vm18547_vm2, %v16362_v30  ;;  %15407 = vmatprep.mubr.msk.f32.mxu1 %vm565_vm1, %v18347_v45 }
 0x170   : > { %16370 = vmatprep.subr.msk.bf16.mxu1 %vm18547_vm2, %v16368_v34  ;;  %v16374_v23 = vpack.c.bf16 %v17049_v36, %v17048_v37 }
 0x171   : > { %v17052_v22 = vpop.permute.xlu0 %17051 }
 0x172   : > { %v17054_v27 = vunpack.i.h.bf16 %v17052_v22  ;;  %v17053_v28 = vunpack.i.l.bf16 %v17052_v22 }
 0x174   : > { %v16380_v31 = vpack.c.bf16 %v17054_v27, %v17053_v28 }
 0x175   : > { %v17057_v24 = vpop.permute.xlu1 %17056 }
 0x176   : > { %15408 = vmatmul.mubr.msk.f32.vlgmr.msra.gmra.mrb[18].mxu1 %vm565_vm1, %v18345_v44  ;;  %v17059_v37 = vunpack.i.h.bf16 %v17057_v24  ;;  %v17058_v22 = vunpack.i.l.bf16 %v17057_v24 }
 0x177   : > { %16373 = vmatpush3.bf16.xpose.msk.msra.mxu1 %vm18547_vm2, %v16368_v34  ;;  %15414 = vmatprep.mubr.msk.f32.mxu1 %vm565_vm1, %v18365_v51 }
 0x178   : > { %16376 = vmatprep.subr.msk.bf16.mxu1 %vm18547_vm2, %v16374_v23 }
 0x179   : > { %v17062_v26 = vpop.permute.xlu0 %17061 }
 0x17d   : > { %v17072_v29 = vpop.permute.xlu0 %17071  ;;  %v17067_v30 = vpop.permute.xlu1 %17066 }
 0x17e   : > { %v17074_v32 = vunpack.i.h.bf16 %v17072_v29  ;;  %v17073_v33 = vunpack.i.l.bf16 %v17072_v29  ;;  %15415 = vmatmul.mubr.msk.f32.vlgmr.msra.gmra.mrb[20].mxu1 %vm565_vm1, %v18363_v50 }
 0x17f   : > { %16379 = vmatpush3.bf16.xpose.msk.msra.mxu1 %vm18547_vm2, %v16374_v23  ;;  %15421 = vmatprep.mubr.msk.f32.mxu1 %vm565_vm1, %v18383_v57 }
 0x180   : > { %v16404_v34 = vpack.c.bf16 %v17074_v32, %v17073_v33  ;;  %16382 = vmatprep.subr.msk.bf16.mxu1 %vm18547_vm2, %v16380_v31  ;;  %v16386_v32 = vpack.c.bf16 %v17059_v37, %v17058_v22  ;;  %v17063_v37 = vunpack.i.l.bf16 %v17062_v26 }
 0x181   : > { %v17082_v35 = vpop.permute.xlu0 %17081  ;;  %v17077_v36 = vpop.permute.xlu1 %17076 }
 0x182   : > { %v17084_v27 = vunpack.i.h.bf16 %v17082_v35  ;;  %v17083_v28 = vunpack.i.l.bf16 %v17082_v35  ;;  %16406 = vmatprep.subr.msk.bf16.mxu0 %vm18547_vm2, %v16404_v34  ;;  %v17064_v35 = vunpack.i.h.bf16 %v17062_v26  ;;  %v17069_v26 = vunpack.i.h.bf16 %v17067_v30 }
 0x183   : > { %16409 = vmatpush3.bf16.xpose.msk.msra.mxu0 %vm18547_vm2, %v16404_v34 }
 0x184   : > { %v16416_v23 = vpack.c.bf16 %v17084_v27, %v17083_v28  ;;  %v16392_v28 = vpack.c.bf16 %v17064_v35, %v17063_v37  ;;  %v17078_v37 = vunpack.i.l.bf16 %v17077_v36 }
 0x185   : > { %v17092_v29 = vpop.permute.xlu0 %17091  ;;  %v18587_v51 = vpop.permute.xlu1 %17086 }
 0x186   : > { %v17094_v33 = vunpack.i.h.bf16 %v17092_v29  ;;  %v17093_v44 = vunpack.i.l.bf16 %v17092_v29  ;;  %15422 = vmatmul.mubr.msk.f32.vlgmr.msra.gmra.mrb[22].mxu1 %vm565_vm1, %v18381_v56  ;;  %16418 = vmatprep.subr.msk.bf16.mxu0 %vm18547_vm2, %v16416_v23 }
 0x187   : > { %16385 = vmatpush3.bf16.xpose.msk.msra.mxu1 %vm18547_vm2, %v16380_v31  ;;  %15428 = vmatprep.mubr.msk.f32.mxu1 %vm565_vm1, %v18401_v63 }
 0x188   : > { %v16428_v24 = vpack.c.bf16 %v17094_v33, %v17093_v44  ;;  %16388 = vmatprep.subr.msk.bf16.mxu1 %vm18547_vm2, %v16386_v32 }
 0x189   : > { %v17097_v34 = vpop.permute.xlu1 %17096  ;;  %v17102_v22 = vpop.permute.xlu0 %17101 }
 0x18a   : > { %15457 = vmatmul.mubr.msk.f32.vlgmr.msra.gmra.mrb[16].mxu0 %vm565_vm1, %v18327_v40  ;;  %v17104_v31 = vunpack.i.h.bf16 %v17102_v22  ;;  %v17103_v27 = vunpack.i.l.bf16 %v17102_v22 }
 0x18b   : > { %16421 = vmatpush3.bf16.xpose.msk.msra.mxu0 %vm18547_vm2, %v16416_v23  ;;  %15470 = vmatprep.mubr.msk.f32.mxu0 %vm565_vm1, %v18373_v54  ;;  %v17068_v23 = vunpack.i.l.bf16 %v17067_v30 }
 0x18c   : > { %16430 = vmatprep.subr.msk.bf16.mxu0 %vm18547_vm2, %v16428_v24  ;;  %v16440_v29 = vpack.c.bf16 %v17104_v31, %v17103_v27 }
 0x18d   : > { %v17107_v44 = vpop.permute.xlu1 %17106  ;;  %v17122_v31 = vpop.permute.xlu0 %17121 }
 0x18e   : > { %15429 = vmatmul.mubr.msk.f32.vlgmr.msra.gmra.mrb[24].mxu1 %vm565_vm1, %v18399_v62 }
 0x18f   : > { %16391 = vmatpush3.bf16.xpose.msk.msra.mxu1 %vm18547_vm2, %v16386_v32  ;;  %15435 = vmatprep.mubr.msk.f32.mxu1 %vm565_vm1, %v18419_v5  ;;  %v16398_v32 = vpack.c.bf16 %v17069_v26, %v17068_v23  ;;  %v17123_v26 = vunpack.i.l.bf16 %v17122_v31  ;;  %v17088_v23 = vunpack.i.l.bf16 %v18587_v51 }
 0x190   : > { %16394 = vmatprep.subr.msk.bf16.mxu1 %vm18547_vm2, %v16392_v28 }
 0x191   : > { %v17112_v33 = vpop.permute.xlu1 %17111  ;;  %v18833_v21 = vpop.permute.xlu0 %17131 }
 0x192   : > { %15471 = vmatmul.mubr.msk.f32.vlgmr.msra.gmra.mrb[18].mxu0 %vm565_vm1, %v18367_v52  ;;  %v17114_v35 = vunpack.i.h.bf16 %v17112_v33  ;;  %v17113_v30 = vunpack.i.l.bf16 %v17112_v33 }
 0x193   : > { %16433 = vmatpush3.bf16.xpose.msk.msra.mxu0 %vm18547_vm2, %v16428_v24  ;;  %15484 = vmatprep.mubr.msk.f32.mxu0 %vm565_vm1, %v18409_v2  ;;  %v17079_v24 = vunpack.i.h.bf16 %v17077_v36  ;;  %v17089_v36 = vunpack.i.h.bf16 %v18587_v51  ;;  %v17099_v51 = vunpack.i.h.bf16 %v17097_v34 }
 0x194   : > { %16442 = vmatprep.subr.msk.bf16.mxu0 %vm18547_vm2, %v16440_v29  ;;  %v16452_v22 = vpack.c.bf16 %v17114_v35, %v17113_v30  ;;  %v17109_v30 = vunpack.i.h.bf16 %v17107_v44 }
 0x195   : > { %v16410_v27 = vpack.c.bf16 %v17079_v24, %v17078_v37  ;;  %v16422_v33 = vpack.c.bf16 %v17089_v36, %v17088_v23  ;;  %v17108_v24 = vunpack.i.l.bf16 %v17107_v44  ;;  %v18837_v42 = vpop.permute.xlu0 %17136 }
 0x196   : > { %15436 = vmatmul.mubr.msk.f32.vlgmr.msra.gmra.mrb[26].mxu1 %vm565_vm1, %v18417_v4 }
 0x197   : > { %16397 = vmatpush3.bf16.xpose.msk.msra.mxu1 %vm18547_vm2, %v16392_v28  ;;  %15442 = vmatprep.mubr.msk.f32.mxu1 %vm565_vm1, %v18437_v11  ;;  %v17124_v28 = vunpack.i.h.bf16 %v17122_v31  ;;  %v16446_v37 = vpack.c.bf16 %v17109_v30, %v17108_v24 }
 0x198   : > { %16400 = vmatprep.subr.msk.bf16.mxu1 %vm18547_vm2, %v16398_v32 }
 0x19a   : > { %15485 = vmatmul.mubr.msk.f32.vlgmr.msra.gmra.mrb[20].mxu0 %vm565_vm1, %v18403_v0 }
 0x19b   : > { %16445 = vmatpush3.bf16.xpose.msk.msra.mxu0 %vm18547_vm2, %v16440_v29  ;;  %15498 = vmatprep.mubr.msk.f32.mxu0 %vm565_vm1, %v18445_v14  ;;  %v18649_v29 = vpack.c.bf16 %v17124_v28, %v17123_v26 }
 0x19c   : > { %16453 = vmatprep.subr.bf16.mxu0 %v16452_v22 }
 0x19e   : > { %15443 = vmatmul.mubr.msk.f32.vlgmr.msra.gmra.mrb[28].mxu1 %vm565_vm1, %v18435_v10 }
 0x19f   : > { %16403 = vmatpush3.bf16.xpose.msk.msra.mxu1 %vm18547_vm2, %v16398_v32  ;;  %15449 = vmatprep.mubr.msk.f32.mxu1 %vm565_vm1, %v18455_v17  ;;  %v17098_v32 = vunpack.i.l.bf16 %v17097_v34  ;;  %v17117_v34 = vpop.permute.xlu1 %17116 }
 0x1a0   : > { %16412 = vmatprep.subr.msk.bf16.mxu1 %vm18547_vm2, %v16410_v27  ;;  %v17118_v31 = vunpack.i.l.bf16 %v17117_v34 }
 0x1a1   : > { %v16434_v35 = vpack.c.bf16 %v17099_v51, %v17098_v32 }
 0x1a2   : > { %15499 = vmatmul.mubr.msk.f32.vlgmr.msra.gmra.mrb[22].mxu0 %vm565_vm1, %v18439_v12 }
 0x1a3   : > { %16455 = vmatpush3.bf16.msra.mxu0 %v16452_v22  ;;  %v17119_v22 = vunpack.i.h.bf16 %v17117_v34 }
 0x1a4   : > { %16461 = vmatprep.subr.bf16.mxu0 %v18649_v29 }
 0x1a5   : > { %v16456_v44 = vpack.c.bf16 %v17119_v22, %v17118_v31 }
 0x1a6   : > { %15450 = vmatmul.mubr.msk.f32.vlgmr.msra.gmra.mrb[30].mxu1 %vm565_vm1, %v18453_v16 }
 0x1a7   : > { %16415 = vmatpush3.bf16.xpose.msk.msra.mxu1 %vm18547_vm2, %v16410_v27  ;;  %15463 = vmatprep.mubr.msk.f32.mxu1 %vm565_vm1, %v18355_v48  ;;  %v17127_v27 = vpop.permute.xlu1 %17126 }
 0x1a8   : > { %16424 = vmatprep.subr.msk.bf16.mxu1 %vm18547_vm2, %v16422_v33  ;;  %v17129_v28 = vunpack.i.h.bf16 %v17127_v27  ;;  %v17128_v26 = vunpack.i.l.bf16 %v17127_v27 }
 0x1aa   : > { %v18684_v36 = vpack.c.bf16 %v17129_v28, %v17128_v26 }
 0x1ab   : > { %v18757_v25 = vpop.permute.xlu1 %17146 }
 0x1ac   : > { %22021 = vst [vmem:[#allocation40_spill] sm:$0xff] %v18757_v25 }
 0x1ae   : > { %15464 = vmatmul.mubr.msk.f32.vlgmr.msra.gmra.mrb[32].mxu1 %vm565_vm1, %v18349_v46 }
 0x1af   : > { %16427 = vmatpush3.bf16.xpose.msk.msra.mxu1 %vm18547_vm2, %v16422_v33  ;;  %15477 = vmatprep.mubr.msk.f32.mxu1 %vm565_vm1, %v18391_v60  ;;  %v18769_v15 = vpop.permute.xlu1 %17151 }
 0x1b0   : > { %16436 = vmatprep.subr.msk.bf16.mxu1 %vm18547_vm2, %v16434_v35  ;;  %22022 = vst [vmem:[#allocation41_spill] sm:$0xff] %v18769_v15 }
 0x1b3   : > { %v18779_v1 = vpop.permute.xlu1 %17161 }
 0x1b4   : > { %22023 = vst [vmem:[#allocation42_spill] sm:$0xff] %v18779_v1 }
 0x1b6   : > { %15478 = vmatmul.mubr.msk.f32.vlgmr.msra.gmra.mrb[34].mxu1 %vm565_vm1, %v18385_v58 }
 0x1b7   : > { %16439 = vmatpush3.bf16.xpose.msk.msra.mxu1 %vm18547_vm2, %v16434_v35  ;;  %15491 = vmatprep.mubr.msk.f32.mxu1 %vm565_vm1, %v18427_v8  ;;  %v18793_v54 = vpop.permute.xlu1 %17166 }
 0x1b8   : > { %16448 = vmatprep.subr.msk.bf16.mxu1 %vm18547_vm2, %v16446_v37  ;;  %22024 = vst [vmem:[#allocation43_spill] sm:$0xff] %v18793_v54 }
 0x1bb   : > { %v18801_v25 = vpop.permute.xlu1 %17171 }
 0x1bc   : > { %22025 = vst [vmem:[#allocation44_spill] sm:$0xff] %v18801_v25 }
 0x1be   : > { %15492 = vmatmul.mubr.msk.f32.vlgmr.msra.gmra.mrb[36].mxu1 %vm565_vm1, %v18421_v6 }
 0x1bf   : > { %16451 = vmatpush3.bf16.xpose.msk.msra.mxu1 %vm18547_vm2, %v16446_v37  ;;  %15505 = vmatprep.mubr.msk.f32.mxu1 %vm565_vm1, %v18463_v20  ;;  %v18813_v54 = vpop.permute.xlu1 %17176 }
 0x1c0   : > { %16457 = vmatprep.subr.bf16.mxu1 %v16456_v44  ;;  %22026 = vst [vmem:[#allocation45_spill] sm:$0xff] %v18813_v54 }
 0x1c3   : > { %v18823_v1 = vpop.permute.xlu1 %17186 }
 0x1c4   : > { %22027 = vst [vmem:[#allocation46_spill] sm:$0xff] %v18823_v1  ;;  %v18841_v1 = vpop.permute.xlu0 %17141 }
 0x1c5   : > { %22032 = vst [vmem:[#allocation51_spill] sm:$0xff] %v18841_v1 }
 0x1c6   : > { %15506 = vmatmul.mubr.msk.f32.vlgmr.msra.gmra.mrb[38].mxu1 %vm565_vm1, %v18457_v18 }
 0x1c7   : > { %16459 = vmatpush3.bf16.msra.mxu1 %v16456_v44  ;;  %v18829_v54 = vpop.permute.xlu1 %3761 }
 0x1c8   : > { %16465 = vmatprep.subr.bf16.mxu1 %v18684_v36  ;;  %22028 = vst [vmem:[#allocation47_spill] sm:$0xff] %v18829_v54 }
 0x1cb   : > { %v18831_v61 = vpop.permute.xlu1 %17196 }
 0x1cc   : > { %22029 = vst [vmem:[#allocation48_spill] sm:$0xff] %v18831_v61 }
 0x241   : > { %v18687_v23 = vpop.f32.mrb[16].mxu1 }
 0x242   : > { %v18689_v33 = vpop.f32.mrb[17].mxu1  ;;  %v1988_v51 = vsel %vm1984_vm3, %v18687_v23, -inf }
 0x243   : > { %1989 = vmax.xlane.f32.xlu1 %v1988_v51  ;;  %v1985_v56 = vsel %vm1984_vm3, %v18689_v33, -inf }
 0x249   : > { %v18693_v32 = vpop.f32.mrb[18].mxu1 }
 0x24a   : > { %v18695_v35 = vpop.f32.mrb[19].mxu1  ;;  %v1994_v30 = vsel %vm1984_vm3, %v18693_v32, -inf }
 0x24b   : > { %1995 = vmax.xlane.f32.xlu1 %v1994_v30 }
 0x251   : > { %v18699_v24 = vpop.f32.mrb[20].mxu1 }
 0x252   : > { %v18701_v37 = vpop.f32.mrb[21].mxu1 }
 0x259   : > { %v18703_v34 = vpop.f32.mrb[22].mxu1 }
 0x25a   : > { %v18705_v22 = vpop.f32.mrb[23].mxu1  ;;  %v2006_v31 = vsel %vm1984_vm3, %v18703_v34, -inf }
 0x25b   : > { %2007 = vmax.xlane.f32.xlu1 %v2006_v31  ;;  %v2003_v28 = vsel %vm1984_vm3, %v18705_v22, -inf }
 0x25d   : > { %v18709_v44 = vpop.f32.mrb[16].mxu0 }
 0x25e   : > { %v18711_v27 = vpop.f32.mrb[17].mxu0  ;;  %v2036_v26 = vsel %vm1984_vm3, %v18709_v44, -inf }
 0x25f   : > { %2004 = vmax.xlane.f32.xlu1 %v2003_v28  ;;  %2037 = vmax.xlane.f32.xlu0 %v2036_v26  ;;  %v2033_v57 = vsel %vm1984_vm3, %v18711_v27, -inf }
 0x261   : > { %v18717_v51 = vpop.f32.mrb[24].mxu1 }
 0x262   : > { %v18719_v30 = vpop.f32.mrb[25].mxu1 }
 0x263   : > { %1986 = vmax.xlane.f32.xlu0 %v1985_v56  ;;  %v1991_v56 = vsel %vm1984_vm3, %v18695_v35, -inf }
 0x265   : > { %v18723_v31 = vpop.f32.mrb[18].mxu0 }
 0x266   : > { %v18725_v39 = vpop.f32.mrb[19].mxu0  ;;  %v2048_v26 = vsel %vm1984_vm3, %v18723_v31, -inf }
 0x267   : > { %2034 = vmax.xlane.f32.xlu0 %v2033_v57  ;;  %v2045_v57 = vsel %vm1984_vm3, %v18725_v39, -inf }
 0x269   : > { %v18729_v50 = vpop.f32.mrb[26].mxu1 }
 0x26a   : > { %v18731_v28 = vpop.f32.mrb[27].mxu1  ;;  %v2018_v8 = vsel %vm1984_vm3, %v18729_v50, -inf }
 0x26b   : > { %2049 = vmax.xlane.f32.xlu0 %v2048_v26  ;;  %v2000_v26 = vsel %vm1984_vm3, %v18699_v24, -inf }
 0x26d   : > { %v18735_v59 = vpop.f32.mrb[20].mxu0 }
 0x26e   : > { %v18737_v47 = vpop.f32.mrb[21].mxu0 }
 0x26f   : > { %1992 = vmax.xlane.f32.xlu0 %v1991_v56 }
 0x271   : > { %v18741_v45 = vpop.f32.mrb[28].mxu1 }
 0x272   : > { %v18743_v38 = vpop.f32.mrb[29].mxu1 }
 0x273   : > { %2046 = vmax.xlane.f32.xlu0 %v2045_v57  ;;  %v2060_v57 = vsel %vm1984_vm3, %v18735_v59, -inf }
 0x275   : > { %v18747_v18 = vpop.f32.mrb[22].mxu0 }
 0x276   : > { %v18749_v12 = vpop.f32.mrb[23].mxu0 }
 0x277   : > { %2001 = vmax.xlane.f32.xlu0 %v2000_v26  ;;  %v2069_v41 = vsel %vm1984_vm3, %v18749_v12, -inf  ;;  %v1997_v26 = vsel %vm1984_vm3, %v18701_v37, -inf }
 0x278   : > { %2070 = vmax.xlane.f32.xlu1 %v2069_v41  ;;  %v2015_v41 = vsel %vm1984_vm3, %v18731_v28, -inf }
 0x279   : > { %v18755_v56 = vpop.f32.mrb[30].mxu1 }
 0x27a   : > { %v18759_v6 = vpop.f32.mrb[31].mxu1 }
 0x27b   : > { %2061 = vmax.xlane.f32.xlu0 %v2060_v57  ;;  %v2057_v57 = vsel %vm1984_vm3, %v18737_v47, -inf }
 0x27c   : > { %2019 = vmax.xlane.f32.xlu1 %v2018_v8  ;;  %v2030_v8 = vsel %vm1984_vm3, %v18755_v56, -inf }
 0x27f   : > { %1998 = vmax.xlane.f32.xlu0 %v1997_v26  ;;  %v2072_v26 = vsel %vm1984_vm3, %v18747_v18, -inf }
 0x280   : > { %2016 = vmax.xlane.f32.xlu1 %v2015_v41  ;;  %v2027_v41 = vsel %vm1984_vm3, %v18759_v6, -inf }
 0x281   : > { %v18771_v7 = vpop.f32.mrb[32].mxu1 }
 0x282   : > { %v18773_v58 = vpop.f32.mrb[33].mxu1 }
 0x283   : > { %2058 = vmax.xlane.f32.xlu0 %v2057_v57  ;;  %v2012_v57 = vsel %vm1984_vm3, %v18717_v51, -inf }
 0x284   : > { %2031 = vmax.xlane.f32.xlu1 %v2030_v8  ;;  %v2042_v8 = vsel %vm1984_vm3, %v18771_v7, -inf }
 0x287   : > { %2073 = vmax.xlane.f32.xlu0 %v2072_v26  ;;  %v2009_v26 = vsel %vm1984_vm3, %v18719_v30, -inf }
 0x288   : > { %2028 = vmax.xlane.f32.xlu1 %v2027_v41  ;;  %v2039_v41 = vsel %vm1984_vm3, %v18773_v58, -inf }
 0x289   : > { %v18785_v9 = vpop.f32.mrb[34].mxu1 }
 0x28a   : > { %v18787_v53 = vpop.f32.mrb[35].mxu1 }
 0x28b   : > { %2013 = vmax.xlane.f32.xlu0 %v2012_v57  ;;  %v2024_v57 = vsel %vm1984_vm3, %v18741_v45, -inf }
 0x28c   : > { %2043 = vmax.xlane.f32.xlu1 %v2042_v8  ;;  %v2054_v8 = vsel %vm1984_vm3, %v18785_v9, -inf }
 0x28f   : > { %2010 = vmax.xlane.f32.xlu0 %v2009_v26  ;;  %v2021_v26 = vsel %vm1984_vm3, %v18743_v38, -inf }
 0x290   : > { %2040 = vmax.xlane.f32.xlu1 %v2039_v41  ;;  %v2051_v41 = vsel %vm1984_vm3, %v18787_v53, -inf }
 0x291   : > { %v18799_v20 = vpop.f32.mrb[36].mxu1 }
 0x292   : > { %v18803_v46 = vpop.f32.mrb[37].mxu1 }
 0x293   : > { %2025 = vmax.xlane.f32.xlu0 %v2024_v57  ;;  %v2066_v57 = vsel %vm1984_vm3, %v18799_v20, -inf }
 0x294   : > { %2055 = vmax.xlane.f32.xlu1 %v2054_v8  ;;  %v2063_v8 = vsel %vm1984_vm3, %v18803_v46, -inf }
 0x297   : > { %2022 = vmax.xlane.f32.xlu0 %v2021_v26 }
 0x298   : > { %2052 = vmax.xlane.f32.xlu1 %v2051_v41 }
 0x299   : > { %v18815_v25 = vpop.f32.mrb[38].mxu1 }
 0x29a   : > { %v18817_v14 = vpop.f32.mrb[39].mxu1  ;;  %v2078_v26 = vsel %vm1984_vm3, %v18815_v25, -inf }
 0x29b   : > { %2067 = vmax.xlane.f32.xlu0 %v2066_v57  ;;  %v2075_v41 = vsel %vm1984_vm3, %v18817_v14, -inf  ;;  %v18835_v57 = vpop.permute.xlu1 %3854 }
 0x29c   : > { %2064 = vmax.xlane.f32.xlu1 %v2063_v8  ;;  %22030 = vst [vmem:[#allocation49_spill] sm:$0xff] %v18835_v57 }
 0x29f   : > { %2079 = vmax.xlane.f32.xlu0 %v2078_v26  ;;  %v18839_v8 = vpop.permute.xlu1 %3943  ;;  %v18845_v26 = vpop.permute.xlu0 %17156 }
 0x2a0   : > { %2076 = vmax.xlane.f32.xlu1 %v2075_v41  ;;  %22031 = vst [vmem:[#allocation50_spill] sm:$0xff] %v18839_v8  ;;  %22034 = vst [vmem:[#allocation53_spill] sm:$0xff] %v18845_v26 }
 0x2a3   : > { %v18843_v0 = vpop.permute.xlu1 %17206  ;;  %v18849_v41 = vpop.permute.xlu0 %17181 }
 0x2a4   : > { %22033 = vst [vmem:[#allocation52_spill] sm:$0xff] %v18843_v0  ;;  %22036 = vst [vmem:[#allocation55_spill] sm:$0xff] %v18849_v41 }
 0x2a7   : > { %v18847_v15 = vpop.permute.xlu1 %4036  ;;  %v18853_v61 = vpop.permute.xlu0 %17191 }
 0x2a8   : > { %22035 = vst [vmem:[#allocation54_spill] sm:$0xff] %v18847_v15  ;;  %22037 = vst [vmem:[#allocation56_spill] sm:$0xff] %v18853_v61 }
 0x2ab   : > { %v18851_v54 = vpop.permute.xlu1 %17211  ;;  %v18857_v57 = vpop.permute.xlu0 %3763 }
 0x2ac   : > { %22039 = vst [vmem:[#allocation58_spill] sm:$0xff] %v18857_v57 }
 0x2af   : > { %v18855_v16 = vpop.permute.xlu1 %17216  ;;  %v18860_v0 = vpop.permute.xlu0 %3852 }
 0x2b0   : > { %22038 = vst [vmem:[#allocation57_spill] sm:$0xff] %v18855_v16  ;;  %22040 = vst [vmem:[#allocation59_spill] sm:$0xff] %v18860_v0 }
 0x2b3   : > { %v18862_v26 = vpop.permute.xlu0 %17201 }
 0x2b4   : > { %22041 = vst [vmem:[#allocation60_spill] sm:$0xff] %v18862_v26 }
 0x2b7   : > { %v18868_v61 = vpop.permute.xlu0 %3945 }
 0x2b8   : > { %22042 = vst [vmem:[#allocation61_spill] sm:$0xff] %v18868_v61 }
 0x2bb   : > { %v18870_v16 = vpop.permute.xlu0 %4034 }
 0x2bc   : > { %22043 = vst [vmem:[#allocation62_spill] sm:$0xff] %v18870_v16 }
 0x2d0   : > { %v1990_v2 = vpop.xlane.xlu1 %1989 }
 0x2d1   : > { %v2082_v8 = vsub.f32 %v18687_v23, %v1990_v2 }
 0x2d3   : > { %v2115_v49 = vmul.f32 1.442695, %v2082_v8 }
 0x2d5   : > { %17670 = vpow2.f32 %v2115_v49 }
 0x2d8   : > { %v1996_v57 = vpop.xlane.xlu1 %1995 }
 0x2d9   : > { %v2084_v49 = vsub.f32 %v18693_v32, %v1996_v57 }
 0x2db   : > { %v2119_v26 = vmul.f32 1.442695, %v2084_v49 }
 0x2df   : > { %v18864_v15 = vpop.eup %17670 }
 0x2e0   : > { %v2180_v41 = vsel %vm1984_vm3, %v18864_v15, 0.0 }
 0x2e1   : > { %2181 = vadd.xlane.f32.xlu0 %v2180_v41 }
 0x2e8   : > { %v2008_v61 = vpop.xlane.xlu1 %2007 }
 0x2e9   : > { %v2088_v32 = vsub.f32 %v18703_v34, %v2008_v61 }
 0x2ec   : > { %v2038_v1 = vpop.xlane.xlu0 %2037 }
 0x2ed   : > { %v2098_v2 = vsub.f32 %v18709_v44, %v2038_v1 }
 0x2ef   : > { %v2147_v23 = vmul.f32 1.442695, %v2098_v2 }
 0x2f0   : > { %v1987_v8 = vpop.xlane.xlu0 %1986 }
 0x2f1   : > { %v2081_v0 = vsub.f32 %v18689_v33, %v1987_v8  ;;  %17672 = vpow2.f32 %v2147_v23  ;;  %v2005_v33 = vpop.xlane.xlu1 %2004 }
 0x2f3   : > { %v2113_v60 = vmul.f32 1.442695, %v2081_v0 }
 0x2f4   : > { %v2035_v11 = vpop.xlane.xlu0 %2034 }
 0x2f5   : > { %17674 = vpow2.f32 %v2113_v60  ;;  %v2097_v41 = vsub.f32 %v18711_v27, %v2035_v11  ;;  %v2127_v27 = vmul.f32 1.442695, %v2088_v32 }
 0x2f6   : > { %17676 = vpow2.f32 %v2119_v26 }
 0x2f7   : > { %v2145_v16 = vmul.f32 1.442695, %v2097_v41 }
 0x2f8   : > { %v2050_v52 = vpop.xlane.xlu0 %2049 }
 0x2f9   : > { %17678 = vpow2.f32 %v2145_v16  ;;  %v2102_v1 = vsub.f32 %v18723_v31, %v2050_v52  ;;  %v2087_v16 = vsub.f32 %v18705_v22, %v2005_v33 }
 0x2fb   : > { %v2155_v44 = vmul.f32 1.442695, %v2102_v1  ;;  %v18878_v57 = vpop.eup %17672  ;;  %v2125_v49 = vmul.f32 1.442695, %v2087_v16 }
 0x2fc   : > { %v1993_v2 = vpop.xlane.xlu0 %1992  ;;  %v2228_v60 = vsel %vm1984_vm3, %v18878_v57, 0.0 }
 0x2fd   : > { %17680 = vpow2.f32 %v2155_v44  ;;  %v2083_v0 = vsub.f32 %v18695_v35, %v1993_v2  ;;  %2229 = vadd.xlane.f32.xlu0 %v2228_v60 }
 0x2ff   : > { %v18883_v11 = vpop.eup %17674  ;;  %v2117_v52 = vmul.f32 1.442695, %v2083_v0 }
 0x300   : > { %v2047_v31 = vpop.xlane.xlu0 %2046  ;;  %v2177_v61 = vsel %vm1984_vm3, %v18883_v11, 0.0  ;;  %v18888_v34 = vpop.eup %17676 }
 0x301   : > { %17682 = vpow2.f32 %v2117_v52  ;;  %v2101_v26 = vsub.f32 %v18725_v39, %v2047_v31  ;;  %2178 = vadd.xlane.f32.xlu1 %v2177_v61  ;;  %v2186_v41 = vsel %vm1984_vm3, %v18888_v34, 0.0 }
 0x302   : > { %17684 = vpow2.f32 %v2127_v27 }
 0x303   : > { %v18891_v35 = vpop.eup %17678  ;;  %v2153_v23 = vmul.f32 1.442695, %v2101_v26 }
 0x304   : > { %v2002_v8 = vpop.xlane.xlu0 %2001  ;;  %v2225_v22 = vsel %vm1984_vm3, %v18891_v35, 0.0 }
 0x305   : > { %17686 = vpow2.f32 %v2153_v23  ;;  %v2086_v1 = vsub.f32 %v18699_v24, %v2002_v8  ;;  %v2071_v32 = vpop.xlane.xlu1 %2070  ;;  %2226 = vadd.xlane.f32.xlu0 %v2225_v22  ;;  %2187 = vadd.xlane.f32.xlu1 %v2186_v41 }
 0x306   : > { %v2109_v39 = vsub.f32 %v18749_v12, %v2071_v32  ;;  %17688 = vpow2.f32 %v2125_v49 }
 0x307   : > { %v18899_v44 = vpop.eup %17680  ;;  %v2123_v33 = vmul.f32 1.442695, %v2086_v1 }
 0x308   : > { %v2169_v2 = vmul.f32 1.442695, %v2109_v39  ;;  %v2062_v0 = vpop.xlane.xlu0 %2061  ;;  %v2240_v60 = vsel %vm1984_vm3, %v18899_v44, 0.0 }
 0x309   : > { %17690 = vpow2.f32 %v2123_v33  ;;  %v2106_v27 = vsub.f32 %v18735_v59, %v2062_v0  ;;  %v2020_v16 = vpop.xlane.xlu1 %2019  ;;  %2241 = vadd.xlane.f32.xlu0 %v2240_v60 }
 0x30a   : > { %v2092_v24 = vsub.f32 %v18729_v50, %v2020_v16  ;;  %17692 = vpow2.f32 %v2169_v2 }
 0x30b   : > { %v18905_v52 = vpop.eup %17682  ;;  %v2163_v12 = vmul.f32 1.442695, %v2106_v27 }
 0x30c   : > { %v2135_v31 = vmul.f32 1.442695, %v2092_v24  ;;  %v1999_v61 = vpop.xlane.xlu0 %1998  ;;  %v2183_v26 = vsel %vm1984_vm3, %v18905_v52, 0.0  ;;  %v18909_v49 = vpop.eup %17684 }
 0x30d   : > { %17694 = vpow2.f32 %v2163_v12  ;;  %v2085_v23 = vsub.f32 %v18701_v37, %v1999_v61  ;;  %v2017_v8 = vpop.xlane.xlu1 %2016  ;;  %2184 = vadd.xlane.f32.xlu1 %v2183_v26  ;;  %v2198_v39 = vsel %vm1984_vm3, %v18909_v49, 0.0 }
 0x30e   : > { %v2091_v59 = vsub.f32 %v18731_v28, %v2017_v8  ;;  %17696 = vpow2.f32 %v2135_v31 }
 0x30f   : > { %v18913_v22 = vpop.eup %17686  ;;  %v2121_v50 = vmul.f32 1.442695, %v2085_v23 }
 0x310   : > { %v2133_v41 = vmul.f32 1.442695, %v2091_v59  ;;  %v2059_v1 = vpop.xlane.xlu0 %2058  ;;  %v2237_v32 = vsel %vm1984_vm3, %v18913_v22, 0.0  ;;  %v18919_v33 = vpop.eup %17688 }
 0x311   : > { %17698 = vpow2.f32 %v2121_v50  ;;  %v2105_v37 = vsub.f32 %v18737_v47, %v2059_v1  ;;  %v2032_v2 = vpop.xlane.xlu1 %2031  ;;  %2238 = vadd.xlane.f32.xlu0 %v2237_v32  ;;  %2199 = vadd.xlane.f32.xlu1 %v2198_v39  ;;  %v2195_v12 = vsel %vm1984_vm3, %v18919_v33, 0.0 }
 0x312   : > { %v2096_v28 = vsub.f32 %v18755_v56, %v2032_v2  ;;  %17700 = vpow2.f32 %v2133_v41 }
 0x313   : > { %v18923_v0 = vpop.eup %17690  ;;  %v2161_v60 = vmul.f32 1.442695, %v2105_v37 }
 0x314   : > { %v2143_v27 = vmul.f32 1.442695, %v2096_v28  ;;  %v2074_v16 = vpop.xlane.xlu0 %2073  ;;  %v2192_v24 = vsel %vm1984_vm3, %v18923_v0, 0.0  ;;  %v18929_v31 = vpop.eup %17692 }
 0x315   : > { %17702 = vpow2.f32 %v2161_v60  ;;  %v2110_v47 = vsub.f32 %v18747_v18, %v2074_v16  ;;  %v2029_v61 = vpop.xlane.xlu1 %2028  ;;  %2193 = vadd.xlane.f32.xlu0 %v2192_v24  ;;  %2196 = vadd.xlane.f32.xlu1 %v2195_v12  ;;  %v2261_v41 = vsel %vm1984_vm3, %v18929_v31, 0.0 }
 0x316   : > { %v2095_v56 = vsub.f32 %v18759_v6, %v2029_v61  ;;  %17704 = vpow2.f32 %v2143_v27 }
 0x317   : > { %v18933_v26 = vpop.eup %17694  ;;  %v2171_v23 = vmul.f32 1.442695, %v2110_v47 }
 0x318   : > { %v2141_v8 = vmul.f32 1.442695, %v2095_v56  ;;  %v2014_v59 = vpop.xlane.xlu0 %2013  ;;  %v2252_v50 = vsel %vm1984_vm3, %v18933_v26, 0.0  ;;  %v18939_v1 = vpop.eup %17696 }
 0x319   : > { %17706 = vpow2.f32 %v2171_v23  ;;  %v2090_v18 = vsub.f32 %v18717_v51, %v2014_v59  ;;  %v2044_v32 = vpop.xlane.xlu1 %2043  ;;  %2253 = vadd.xlane.f32.xlu0 %v2252_v50  ;;  %2262 = vadd.xlane.f32.xlu1 %v2261_v41  ;;  %v2210_v27 = vsel %vm1984_vm3, %v18939_v1, 0.0 }
 0x31a   : > { %v2100_v6 = vsub.f32 %v18771_v7, %v2044_v32  ;;  %17708 = vpow2.f32 %v2141_v8 }
 0x31b   : > { %v18943_v39 = vpop.eup %17698  ;;  %v2131_v37 = vmul.f32 1.442695, %v2090_v18 }
 0x31c   : > { %v2151_v2 = vmul.f32 1.442695, %v2100_v6  ;;  %v2011_v28 = vpop.xlane.xlu0 %2010  ;;  %v2189_v60 = vsel %vm1984_vm3, %v18943_v39, 0.0  ;;  %v18949_v16 = vpop.eup %17700 }
 0x31d   : > { %17710 = vpow2.f32 %v2131_v37  ;;  %v2089_v51 = vsub.f32 %v18719_v30, %v2011_v28  ;;  %v2041_v24 = vpop.xlane.xlu1 %2040  ;;  %2190 = vadd.xlane.f32.xlu0 %v2189_v60  ;;  %2211 = vadd.xlane.f32.xlu1 %v2210_v27  ;;  %v2207_v8 = vsel %vm1984_vm3, %v18949_v16, 0.0 }
 0x31e   : > { %v2099_v7 = vsub.f32 %v18773_v58, %v2041_v24  ;;  %17712 = vpow2.f32 %v2151_v2 }
 0x31f   : > { %v18953_v12 = vpop.eup %17702  ;;  %v2129_v47 = vmul.f32 1.442695, %v2089_v51 }
 0x320   : > { %v2149_v61 = vmul.f32 1.442695, %v2099_v7  ;;  %v2026_v56 = vpop.xlane.xlu0 %2025  ;;  %v2249_v23 = vsel %vm1984_vm3, %v18953_v12, 0.0  ;;  %v18959_v59 = vpop.eup %17704 }
 0x321   : > { %17714 = vpow2.f32 %v2129_v47  ;;  %v2094_v30 = vsub.f32 %v18741_v45, %v2026_v56  ;;  %v2056_v50 = vpop.xlane.xlu1 %2055  ;;  %2250 = vadd.xlane.f32.xlu0 %v2249_v23  ;;  %2208 = vadd.xlane.f32.xlu1 %v2207_v8  ;;  %v2222_v37 = vsel %vm1984_vm3, %v18959_v59, 0.0 }
 0x322   : > { %17716 = vpow2.f32 %v2149_v61  ;;  %v2104_v18 = vsub.f32 %v18785_v9, %v2056_v50 }
 0x323   : > { %v18962_v58 = vpop.eup %17706  ;;  %v2139_v41 = vmul.f32 1.442695, %v2094_v30 }
 0x324   : > { %v2023_v32 = vpop.xlane.xlu0 %2022  ;;  %v2264_v6 = vsel %vm1984_vm3, %v18962_v58, 0.0  ;;  %v18969_v2 = vpop.eup %17708  ;;  %v2159_v27 = vmul.f32 1.442695, %v2104_v18 }
 0x325   : > { %17718 = vpow2.f32 %v2139_v41  ;;  %v2093_v45 = vsub.f32 %v18743_v38, %v2023_v32  ;;  %v2053_v28 = vpop.xlane.xlu1 %2052  ;;  %2265 = vadd.xlane.f32.xlu0 %v2264_v6  ;;  %2223 = vadd.xlane.f32.xlu1 %v2222_v37  ;;  %v2219_v47 = vsel %vm1984_vm3, %v18969_v2, 0.0 }
 0x326   : > { %v2103_v9 = vsub.f32 %v18787_v53, %v2053_v28 }
 0x327   : > { %v18972_v60 = vpop.eup %17710  ;;  %v2137_v51 = vmul.f32 1.442695, %v2093_v45 }
 0x328   : > { %v2068_v24 = vpop.xlane.xlu0 %2067  ;;  %v2204_v7 = vsel %vm1984_vm3, %v18972_v60, 0.0  ;;  %v18979_v61 = vpop.eup %17712  ;;  %v2157_v56 = vmul.f32 1.442695, %v2103_v9 }
 0x329   : > { %17720 = vpow2.f32 %v2137_v51  ;;  %2205 = vadd.xlane.f32.xlu0 %v2204_v7  ;;  %2220 = vadd.xlane.f32.xlu1 %v2219_v47  ;;  %v2108_v23 = vsub.f32 %v18799_v20, %v2068_v24  ;;  %v2234_v8 = vsel %vm1984_vm3, %v18979_v61, 0.0  ;;  %v2065_v24 = vpop.xlane.xlu1 %2064 }
 0x32a   : > { %17722 = vpow2.f32 %v2159_v27  ;;  %v2107_v7 = vsub.f32 %v18803_v46, %v2065_v24 }
 0x32b   : > { %v18981_v38 = vpop.eup %17714  ;;  %17724 = vpow2.f32 %v2157_v56  ;;  %v2167_v41 = vmul.f32 1.442695, %v2108_v23 }
 0x32c   : > { %v2201_v53 = vsel %vm1984_vm3, %v18981_v38, 0.0  ;;  %v18988_v30 = vpop.eup %17716  ;;  %v2165_v47 = vmul.f32 1.442695, %v2107_v7  ;;  %v2080_v56 = vpop.xlane.xlu0 %2079 }
 0x32d   : > { %2202 = vadd.xlane.f32.xlu0 %v2201_v53  ;;  %2235 = vadd.xlane.f32.xlu1 %v2234_v8  ;;  %v2231_v20 = vsel %vm1984_vm3, %v18988_v30, 0.0  ;;  %17726 = vpow2.f32 %v2167_v41  ;;  %v2112_v23 = vsub.f32 %v18815_v25, %v2080_v56 }
 0x32e   : > { %17728 = vpow2.f32 %v2165_v47 }
 0x32f   : > { %v18990_v50 = vpop.eup %17718  ;;  %v2175_v8 = vmul.f32 1.442695, %v2112_v23  ;;  %v17134_v23 = vunpack.i.h.bf16 %v18833_v21 }
 0x330   : > { %v2216_v18 = vsel %vm1984_vm3, %v18990_v50, 0.0 }
 0x331   : > { %2217 = vadd.xlane.f32.xlu0 %v2216_v18  ;;  %2232 = vadd.xlane.f32.xlu1 %v2231_v20  ;;  %17730 = vpow2.f32 %v2175_v8  ;;  %v2077_v20 = vpop.xlane.xlu1 %2076  ;;  %v17133_v8 = vunpack.i.l.bf16 %v18833_v21 }
 0x332   : > { %v2111_v25 = vsub.f32 %v18817_v14, %v2077_v20 }
 0x333   : > { %v18996_v32 = vpop.eup %17720  ;;  %v19055_v21 = vpack.c.bf16 %v17134_v23, %v17133_v8 }
 0x334   : > { %v2213_v6 = vsel %vm1984_vm3, %v18996_v32, 0.0  ;;  %v19000_v37 = vpop.eup %17722 }
 0x335   : > { %2214 = vadd.xlane.f32.xlu0 %v2213_v6  ;;  %v2246_v45 = vsel %vm1984_vm3, %v19000_v37, 0.0  ;;  %v19004_v28 = vpop.eup %17724  ;;  %v2173_v6 = vmul.f32 1.442695, %v2111_v25 }
 0x336   : > { %v2243_v27 = vsel %vm1984_vm3, %v19004_v28, 0.0 }
 0x337   : > { %v19008_v51 = vpop.eup %17726  ;;  %17732 = vpow2.f32 %v2173_v6 }
 0x338   : > { %v2258_v9 = vsel %vm1984_vm3, %v19008_v51, 0.0  ;;  %v19018_v53 = vpop.eup %17728 }
 0x339   : > { %2247 = vadd.xlane.f32.xlu0 %v2246_v45  ;;  %v2255_v41 = vsel %vm1984_vm3, %v19018_v53, 0.0 }
 0x33b   : > { %v19022_v18 = vpop.eup %17730 }
 0x33c   : > { %v2270_v46 = vsel %vm1984_vm3, %v19022_v18, 0.0 }
 0x33d   : > { %2244 = vadd.xlane.f32.xlu0 %v2243_v27 }
 0x341   : > { %2259 = vadd.xlane.f32.xlu0 %v2258_v9  ;;  %v19039_v7 = vpop.eup %17732 }
 0x342   : > { %4125 = vrot.lane.b32.xlu1 %v18401_v63, %s18193_s7  ;;  %v2267_v20 = vsel %vm1984_vm3, %v19039_v7, 0.0 }
 0x357   : > { %17221 = vrot.lane.b32.xlu0 %v18443_v13, %s18192_s6 }
 0x366   : > { %2256 = vadd.xlane.f32.xlu1 %v2255_v41 }
 0x36e   : > { %v2182_v45 = vpop.xlane.xlu0 %2181 }
 0x36f   : > { %17734 = vrcp.f32 %v2182_v45 }
 0x376   : > { %2271 = vadd.xlane.f32.xlu0 %v2270_v46 }
 0x377   : > { %17226 = vrot.lane.b32.xlu1 %v18461_v19, %s18192_s6 }
 0x379   : > { %v17735_v47 = vpop.eup %17734 }
 0x37a   : > { %v2306_v6 = vmul.f32 %v17735_v47, %v18864_v15 }
 0x38a   : > { %v19031_v9 = vpop.xlane.xlu0 %2229 }
 0x38c   : > { %4127 = vrot.lane.b32.xlu0 %v18399_v62, %s18193_s7 }
 0x38e   : > { %v2179_v27 = vpop.xlane.xlu1 %2178 }
 0x38f   : > { %17736 = vrcp.f32 %v2179_v27 }
 0x390   : > { %4216 = vrot.lane.b32.xlu0 %v18419_v5, %s18193_s7 }
 0x392   : > { %v19035_v24 = vpop.xlane.xlu0 %2226  ;;  %v2188_v14 = vpop.xlane.xlu1 %2187 }
 0x393   : > { %17738 = vrcp.f32 %v2188_v14 }
 0x394   : > { %17231 = vrot.lane.b32.xlu0 %v18341_v43, %s18192_s6 }
 0x396   : > { %v19045_v41 = vpop.xlane.xlu0 %2241 }
 0x398   : > { %4309 = vrot.lane.b32.xlu0 %v18435_v10, %s18193_s7 }
 0x399   : > { %v17737_v56 = vpop.eup %17736 }
 0x39a   : > { %v2185_v46 = vpop.xlane.xlu1 %2184  ;;  %v2305_v25 = vmul.f32 %v17737_v56, %v18883_v11  ;;  %v17139_v56 = vunpack.i.h.bf16 %v18837_v42 }
 0x39b   : > { %17740 = vrcp.f32 %v2185_v46  ;;  %2268 = vadd.xlane.f32.xlu1 %v2267_v20 }
 0x39c   : > { %4398 = vrot.lane.b32.xlu0 %v18455_v17, %s18193_s7  ;;  %15512 = vmatprep.mubr.msk.f32.mxu0 %vm1984_vm3, %v2305_v25 }
 0x39d   : > { %15513 = vmatmul.mubr.msk.f32.vlgmr.msra.gmra.mrb[24].mxu0 %vm1984_vm3, %v2306_v6  ;;  %v17739_v14 = vpop.eup %17738 }
 0x39e   : > { %16463 = vmatpush3.bf16.msra.mxu0 %v18649_v29  ;;  %v19058_v45 = vpop.xlane.xlu0 %2238  ;;  %v2200_v27 = vpop.xlane.xlu1 %2199  ;;  %v17138_v29 = vunpack.i.l.bf16 %v18837_v42  ;;  %v2308_v20 = vmul.f32 %v17739_v14, %v18888_v34 }
 0x39f   : > { %16469 = vmatprep.subr.bf16.mxu0 %v19055_v21  ;;  %17742 = vrcp.f32 %v2200_v27  ;;  %v17214_v27 = vunpack.i.h.bf16 %v18851_v54 }
 0x3a0   : > { %17241 = vrot.lane.b32.xlu0 %v18377_v55, %s18192_s6  ;;  %v16472_v25 = vpack.c.bf16 %v17139_v56, %v17138_v29  ;;  %v22045_v56 = vld [vmem:[#allocation31_spill] sm:$0xff] }
 0x3a2   : > { %v2194_v15 = vpop.xlane.xlu0 %2193  ;;  %v2197_v11 = vpop.xlane.xlu1 %2196 }
 0x3a3   : > { %17744 = vrcp.f32 %v2197_v11  ;;  %v17213_v11 = vunpack.i.l.bf16 %v18851_v54 }
 0x3a4   : > { %4491 = vrot.lane.b32.xlu0 %v18327_v40, %s18193_s7  ;;  %17746 = vrcp.f32 %v2194_v15 }
 0x3a5   : > { %v17741_v47 = vpop.eup %17740 }
 0x3a6   : > { %v19067_v23 = vpop.xlane.xlu0 %2253  ;;  %v19069_v8 = vpop.xlane.xlu1 %2262  ;;  %v2307_v46 = vmul.f32 %v17741_v47, %v18905_v52  ;;  %v22044_v47 = vld [vmem:[#allocation14_spill] sm:$0xff] }
 0x3a8   : > { %4580 = vrot.lane.b32.xlu0 %v18355_v48, %s18193_s7  ;;  %15519 = vmatprep.mubr.msk.f32.mxu1 %vm1984_vm3, %v2307_v46  ;;  %v16480_v46 = vpack.c.bf16 %v17214_v27, %v17213_v11  ;;  %v22049_v27 = vld [vmem:[#allocation25_spill] sm:$0xff] }
 0x3a9   : > { %15520 = vmatmul.mubr.msk.f32.vlgmr.msra.gmra.mrb[40].mxu1 %vm1984_vm3, %v2308_v20  ;;  %v17743_v34 = vpop.eup %17742 }
 0x3aa   : > { %16467 = vmatpush3.bf16.msra.mxu1 %v18684_v36  ;;  %v2191_v42 = vpop.xlane.xlu0 %2190  ;;  %v2212_v6 = vpop.xlane.xlu1 %2211  ;;  %v2312_v29 = vmul.f32 %v17743_v34, %v18909_v49  ;;  %v22048_v49 = vld [vmem:[#allocation11_spill] sm:$0xff] }
 0x3ab   : > { %17748 = vrcp.f32 %v2191_v42  ;;  %16473 = vmatprep.subr.bf16.mxu1 %v16472_v25 }
 0x3ac   : > { %17251 = vrot.lane.b32.xlu0 %v18413_v3, %s18192_s6  ;;  %4218 = vrot.lane.b32.xlu1 %v18417_v4, %s18193_s7  ;;  %17750 = vrcp.f32 %v2212_v6 }
 0x3ad   : > { %v17745_v52 = vpop.eup %17744 }
 0x3ae   : > { %v19084_v14 = vpop.xlane.xlu0 %2250  ;;  %v2209_v15 = vpop.xlane.xlu1 %2208  ;;  %v2311_v36 = vmul.f32 %v17745_v52, %v18919_v33  ;;  %v22046_v33 = vld [vmem:[#allocation21_spill] sm:$0xff]  ;;  %v22047_v52 = vld [vmem:[#allocation51_spill] sm:$0xff] }
 0x3af   : > { %17752 = vrcp.f32 %v2209_v15  ;;  %v17747_v42 = vpop.eup %17746  ;;  %v17144_v15 = vunpack.i.h.bf16 %v22047_v52 }
 0x3b0   : > { %4673 = vrot.lane.b32.xlu0 %v22044_v47, %s18193_s7  ;;  %4307 = vrot.lane.b32.xlu1 %v22045_v56, %s18193_s7  ;;  %v17143_v56 = vunpack.i.l.bf16 %v22047_v52  ;;  %v22051_v47 = vld [vmem:[#allocation41_spill] sm:$0xff] }
 0x3b1   : > { %15533 = vmatprep.mubr.msk.f32.mxu1 %vm1984_vm3, %v2311_v36 }
 0x3b2   : > { %15534 = vmatmul.mubr.msk.f32.vlgmr.msra.gmra.mrb[42].mxu1 %vm1984_vm3, %v2312_v29  ;;  %v19094_v54 = vpop.xlane.xlu0 %2265  ;;  %v2224_v20 = vpop.xlane.xlu1 %2223  ;;  %v19110_v52 = vpack.c.bf16 %v17144_v15, %v17143_v56  ;;  %v22053_v15 = vld [vmem:[#allocation6_spill] sm:$0xff] }
 0x3b3   : > { %16475 = vmatpush3.bf16.msra.mxu1 %v16472_v25  ;;  %17754 = vrcp.f32 %v2224_v20  ;;  %v2310_v25 = vmul.f32 %v17747_v42, %v18923_v0  ;;  %v17153_v20 = vunpack.i.l.bf16 %v22051_v47 }
 0x3b4   : > { %16481 = vmatprep.subr.bf16.mxu1 %v16480_v46  ;;  %4762 = vrot.lane.b32.xlu0 %v22046_v33, %s18193_s7  ;;  %v22050_v33 = vld [vmem:[#allocation35_spill] sm:$0xff] }
 0x3b5   : > { %v17749_v6 = vpop.eup %17748  ;;  %17236 = vrot.lane.b32.xlu1 %v22048_v49, %s18192_s6 }
 0x3b6   : > { %v2206_v34 = vpop.xlane.xlu0 %2205  ;;  %v2221_v36 = vpop.xlane.xlu1 %2220  ;;  %v2309_v29 = vmul.f32 %v17749_v6, %v18943_v39  ;;  %v17154_v39 = vunpack.i.h.bf16 %v22051_v47 }
 0x3b7   : > { %17756 = vrcp.f32 %v2221_v36  ;;  %v17751_v11 = vpop.eup %17750  ;;  %v22052_v36 = vld [vmem:[#allocation23_spill] sm:$0xff] }
 0x3b8   : > { %4853 = vrot.lane.b32.xlu0 %v22049_v27, %s18193_s7  ;;  %15526 = vmatprep.mubr.msk.f32.mxu0 %vm1984_vm3, %v2309_v29  ;;  %17758 = vrcp.f32 %v2206_v34  ;;  %v2316_v56 = vmul.f32 %v17751_v11, %v18939_v1  ;;  %v16488_v47 = vpack.c.bf16 %v17154_v39, %v17153_v20  ;;  %v22055_v1 = vld [vmem:[#allocation22_spill] sm:$0xff]  ;;  %v22057_v20 = vld [vmem:[#allocation33_spill] sm:$0xff] }
 0x3b9   : > { %4400 = vrot.lane.b32.xlu1 %v22050_v33, %s18193_s7  ;;  %15527 = vmatmul.mubr.msk.f32.vlgmr.msra.gmra.mrb[26].mxu0 %vm1984_vm3, %v2310_v25  ;;  %v17753_v4 = vpop.eup %17752  ;;  %v22056_v25 = vld [vmem:[#allocation42_spill] sm:$0xff] }
 0x3ba   : > { %16471 = vmatpush3.bf16.msra.mxu0 %v19055_v21  ;;  %v2203_v0 = vpop.xlane.xlu0 %2202  ;;  %v2236_v42 = vpop.xlane.xlu1 %2235  ;;  %v2315_v6 = vmul.f32 %v17753_v4, %v18949_v16  ;;  %v22054_v4 = vld [vmem:[#allocation38_spill] sm:$0xff]  ;;  %v17164_v11 = vunpack.i.h.bf16 %v22056_v25 }
 0x3bb   : > { %17760 = vrcp.f32 %v2203_v0  ;;  %16477 = vmatprep.subr.bf16.mxu0 %v19110_v52  ;;  %v17163_v0 = vunpack.i.l.bf16 %v22056_v25  ;;  %v22059_v25 = vld [vmem:[#allocation40_spill] sm:$0xff] }
 0x3bc   : > { %4855 = vrot.lane.b32.xlu0 %v22052_v36, %s18193_s7  ;;  %15547 = vmatprep.mubr.msk.f32.mxu1 %vm1984_vm3, %v2315_v6  ;;  %17762 = vrcp.f32 %v2236_v42 }
 0x3bd   : > { %4489 = vrot.lane.b32.xlu1 %v22053_v15, %s18193_s7  ;;  %15548 = vmatmul.mubr.msk.f32.vlgmr.msra.gmra.mrb[44].mxu1 %vm1984_vm3, %v2316_v56  ;;  %v17755_v16 = vpop.eup %17754 }
 0x3be   : > { %v2218_v21 = vpop.xlane.xlu0 %2217  ;;  %v2233_v34 = vpop.xlane.xlu1 %2232  ;;  %16483 = vmatpush3.bf16.msra.mxu1 %v16480_v46  ;;  %v2320_v42 = vmul.f32 %v17755_v16, %v18959_v59  ;;  %v22060_v59 = vld [vmem:[#allocation37_spill] sm:$0xff] }
 0x3bf   : > { %16489 = vmatprep.subr.bf16.mxu1 %v16488_v47  ;;  %17764 = vrcp.f32 %v2233_v34  ;;  %v22058_v34 = vld [vmem:[#allocation9_spill] sm:$0xff] }
 0x3c0   : > { %17266 = vrot.lane.b32.xlu0 %v22054_v4, %s18192_s6  ;;  %17766 = vrcp.f32 %v2218_v21  ;;  %v17149_v21 = vunpack.i.h.bf16 %v22059_v25 }
 0x3c1   : > { %17246 = vrot.lane.b32.xlu1 %v22055_v1, %s18192_s6  ;;  %v17757_v29 = vpop.eup %17756 }
 0x3c2   : > { %v2215_v6 = vpop.xlane.xlu0 %2214  ;;  %v2319_v39 = vmul.f32 %v17757_v29, %v18969_v2  ;;  %v17759_v46 = vpop.eup %17758  ;;  %v16496_v29 = vpack.c.bf16 %v17164_v11, %v17163_v0  ;;  %v22062_v11 = vld [vmem:[#allocation44_spill] sm:$0xff] }
 0x3c3   : > { %17768 = vrcp.f32 %v2215_v6  ;;  %v17148_v6 = vunpack.i.l.bf16 %v22059_v25  ;;  %v2314_v16 = vmul.f32 %v17759_v46, %v18972_v60  ;;  %v22063_v46 = vld [vmem:[#allocation15_spill] sm:$0xff] }
 0x3c4   : > { %17770 = vrcp.f32 %v19035_v24  ;;  %5035 = vrot.lane.b32.xlu0 %v22057_v20, %s18193_s7  ;;  %15561 = vmatprep.mubr.msk.f32.mxu1 %vm1984_vm3, %v2319_v39 }
 0x3c5   : > { %v17761_v56 = vpop.eup %17760  ;;  %4582 = vrot.lane.b32.xlu1 %v22058_v34, %s18193_s7  ;;  %15562 = vmatmul.mubr.msk.f32.vlgmr.msra.gmra.mrb[46].mxu1 %vm1984_vm3, %v2320_v42  ;;  %17772 = vrcp.f32 %v19031_v9  ;;  %v22061_v42 = vld [vmem:[#allocation16_spill] sm:$0xff]  ;;  %v17174_v9 = vunpack.i.h.bf16 %v22062_v11  ;;  %v16484_v0 = vpack.c.bf16 %v17149_v21, %v17148_v6  ;;  %v22065_v21 = vld [vmem:[#allocation53_spill] sm:$0xff] }
 0x3c6   : > { %v2248_v2 = vpop.xlane.xlu0 %2247  ;;  %v2313_v24 = vmul.f32 %v17761_v56, %v18981_v38  ;;  %16491 = vmatpush3.bf16.msra.mxu1 %v16488_v47  ;;  %17774 = vrcp.f32 %v19058_v45  ;;  %v17763_v39 = vpop.eup %17762  ;;  %v17173_v47 = vunpack.i.l.bf16 %v22062_v11  ;;  %v17159_v6 = vunpack.i.h.bf16 %v22065_v21 }
 0x3c7   : > { %16497 = vmatprep.subr.bf16.mxu1 %v16496_v29  ;;  %17776 = vrcp.f32 %v19045_v41  ;;  %v2324_v56 = vmul.f32 %v17763_v39, %v18979_v61  ;;  %v22066_v61 = vld [vmem:[#allocation24_spill] sm:$0xff] }
 0x3c8   : > { %5126 = vrot.lane.b32.xlu0 %v22060_v59, %s18193_s7  ;;  %15540 = vmatprep.mubr.msk.f32.mxu0 %vm1984_vm3, %v2313_v24  ;;  %17778 = vrcp.f32 %v2248_v2  ;;  %v22064_v2 = vld [vmem:[#allocation30_spill] sm:$0xff]  ;;  %v16504_v24 = vpack.c.bf16 %v17174_v9, %v17173_v47  ;;  %v22068_v9 = vld [vmem:[#allocation43_spill] sm:$0xff] }
 0x3c9   : > { %4671 = vrot.lane.b32.xlu1 %v22061_v42, %s18193_s7  ;;  %v17765_v38 = vpop.eup %17764  ;;  %15541 = vmatmul.mubr.msk.f32.vlgmr.msra.gmra.mrb[28].mxu0 %vm1984_vm3, %v2314_v16 }
 0x3ca   : > { %v2245_v45 = vpop.xlane.xlu0 %2244  ;;  %16479 = vmatpush3.bf16.msra.mxu0 %v19110_v52  ;;  %v2323_v60 = vmul.f32 %v17765_v38, %v18988_v30  ;;  %v17767_v41 = vpop.eup %17766  ;;  %v17158_v30 = vunpack.i.l.bf16 %v22065_v21  ;;  %v22067_v38 = vld [vmem:[#allocation19_spill] sm:$0xff] }
 0x3cb   : > { %17780 = vrcp.f32 %v2245_v45  ;;  %16485 = vmatprep.subr.bf16.mxu0 %v16484_v0  ;;  %v22069_v45 = vld [vmem:[#allocation28_spill] sm:$0xff] }
 0x3cc   : > { %17281 = vrot.lane.b32.xlu0 %v22063_v46, %s18194_s8  ;;  %17782 = vrcp.f32 %v19084_v14  ;;  %15575 = vmatprep.mubr.msk.f32.mxu1 %vm1984_vm3, %v2323_v60  ;;  %v2318_v14 = vmul.f32 %v17767_v41, %v18990_v50  ;;  %v22070_v41 = vld [vmem:[#allocation34_spill] sm:$0xff] }
 0x3cd   : > { %v17769_v25 = vpop.eup %17768  ;;  %17256 = vrot.lane.b32.xlu1 %v22064_v2, %s18192_s6  ;;  %15576 = vmatmul.mubr.msk.f32.vlgmr.msra.gmra.mrb[48].mxu1 %vm1984_vm3, %v2324_v56  ;;  %17784 = vrcp.f32 %v19067_v23  ;;  %v17169_v23 = vunpack.i.h.bf16 %v22068_v9 }
 0x3ce   : > { %v17771_v52 = vpop.eup %17770  ;;  %v2317_v16 = vmul.f32 %v17769_v25, %v18996_v32  ;;  %16499 = vmatpush3.bf16.msra.mxu1 %v16496_v29  ;;  %17786 = vrcp.f32 %v19069_v8  ;;  %v17168_v29 = vunpack.i.l.bf16 %v22068_v9  ;;  %v16492_v8 = vpack.c.bf16 %v17159_v6, %v17158_v30  ;;  %v22071_v25 = vld [vmem:[#allocation45_spill] sm:$0xff] }
 0x3cf   : > { %16505 = vmatprep.subr.bf16.mxu1 %v16504_v24  ;;  %v17773_v39 = vpop.eup %17772  ;;  %v2321_v11 = vmul.f32 %v17771_v52, %v18891_v35  ;;  %17788 = vrcp.f32 %v19094_v54  ;;  %v17179_v52 = vunpack.i.h.bf16 %v22071_v25  ;;  %v17178_v54 = vunpack.i.l.bf16 %v22071_v25  ;;  %v22072_v30 = vld [vmem:[#allocation57_spill] sm:$0xff] }
 0x3d0   : > { %17291 = vrot.lane.b32.xlu0 %v22066_v61, %s18194_s8  ;;  %15554 = vmatprep.mubr.msk.f32.mxu0 %vm1984_vm3, %v2317_v16  ;;  %v17775_v32 = vpop.eup %17774  ;;  %v2322_v35 = vmul.f32 %v17773_v39, %v18878_v57  ;;  %v17219_v16 = vunpack.i.h.bf16 %v22072_v30  ;;  %v17218_v57 = vunpack.i.l.bf16 %v22072_v30  ;;  %v22083_v30 = vld [vmem:[#allocation60_spill] sm:$0xff] }
 0x3d1   : > { %4764 = vrot.lane.b32.xlu1 %v22067_v38, %s18193_s7  ;;  %15555 = vmatmul.mubr.msk.f32.vlgmr.msra.gmra.mrb[30].mxu0 %vm1984_vm3, %v2318_v14  ;;  %v17777_v47 = vpop.eup %17776  ;;  %v2325_v56 = vmul.f32 %v17775_v32, %v18913_v22  ;;  %v22074_v32 = vld [vmem:[#allocation55_spill] sm:$0xff] }
 0x3d2   : > { %16487 = vmatpush3.bf16.msra.mxu0 %v16484_v0  ;;  %15568 = vmatprep.mubr.msk.f32.mxu0 %vm1984_vm3, %v2321_v11  ;;  %v17779_v50 = vpop.eup %17778  ;;  %v16500_v0 = vpack.c.bf16 %v17169_v23, %v17168_v29  ;;  %v2326_v22 = vmul.f32 %v17777_v47, %v18899_v44  ;;  %v22073_v11 = vld [vmem:[#allocation29_spill] sm:$0xff]  ;;  %v17184_v9 = vunpack.i.h.bf16 %v22074_v32  ;;  %v17183_v23 = vunpack.i.l.bf16 %v22074_v32  ;;  %v22086_v32 = vld [vmem:[#allocation58_spill] sm:$0xff] }
 0x3d3   : > { %16493 = vmatprep.subr.bf16.mxu0 %v16492_v8  ;;  %v2328_v14 = vmul.f32 %v17779_v50, %v19000_v37  ;;  %v16508_v44 = vpack.c.bf16 %v17179_v52, %v17178_v54  ;;  %v19206_v37 = vpack.c.bf16 %v17219_v16, %v17218_v57  ;;  %v22080_v54 = vld [vmem:[#allocation47_spill] sm:$0xff]  ;;  %v17204_v16 = vunpack.i.h.bf16 %v22083_v30 }
 0x3d4   : > { %17296 = vrot.lane.b32.xlu0 %v22069_v45, %s18194_s8  ;;  %v17203_v57 = vunpack.i.l.bf16 %v22083_v30 }
 0x3d5   : > { %v17781_v60 = vpop.eup %17780  ;;  %17261 = vrot.lane.b32.xlu1 %v22070_v41, %s18192_s6  ;;  %15569 = vmatmul.mubr.msk.f32.vlgmr.msra.gmra.mrb[32].mxu0 %vm1984_vm3, %v2322_v35  ;;  %v16516_v35 = vpack.c.bf16 %v17184_v9, %v17183_v23  ;;  %v22087_v23 = vld [vmem:[#allocation50_spill] sm:$0xff] }
 0x3d6   : > { %v2327_v21 = vmul.f32 %v17781_v60, %v19004_v28  ;;  %v17783_v6 = vpop.eup %17782  ;;  %16495 = vmatpush3.bf16.msra.mxu0 %v16492_v8  ;;  %15582 = vmatprep.mubr.msk.f32.mxu0 %vm1984_vm3, %v2325_v56  ;;  %v22077_v60 = vld [vmem:[#allocation5_spill] sm:$0xff]  ;;  %v22079_v56 = vld [vmem:[#allocation56_spill] sm:$0xff] }
 0x3d7   : > { %16501 = vmatprep.subr.bf16.mxu0 %v16500_v0  ;;  %v17785_v39 = vpop.eup %17784  ;;  %v2329_v29 = vmul.f32 %v17783_v6, %v18953_v12  ;;  %v22075_v12 = vld [vmem:[#allocation27_spill] sm:$0xff]  ;;  %v17194_v25 = vunpack.i.h.bf16 %v22079_v56  ;;  %v17193_v52 = vunpack.i.l.bf16 %v22079_v56  ;;  %v2260_v6 = vpop.xlane.xlu0 %2259  ;;  %v22091_v56 = vld [vmem:[#allocation18_spill] sm:$0xff] }
 0x3d8   : > { %17301 = vrot.lane.b32.xlu0 %v18443_v13, %s18194_s8  ;;  %15589 = vmatprep.mubr.msk.f32.mxu1 %vm1984_vm3, %v2327_v21  ;;  %v17787_v28 = vpop.eup %17786  ;;  %v2330_v8 = vmul.f32 %v17785_v39, %v18933_v26  ;;  %v22082_v21 = vld [vmem:[#allocation3_spill] sm:$0xff]  ;;  %v16540_v39 = vpack.c.bf16 %v17204_v16, %v17203_v57  ;;  %17790 = vrcp.f32 %v2260_v6 }
 0x3d9   : > { %4944 = vrot.lane.b32.xlu1 %v22073_v11, %s18193_s7  ;;  %15583 = vmatmul.mubr.msk.f32.vlgmr.msra.gmra.mrb[34].mxu0 %vm1984_vm3, %v2326_v22  ;;  %v17789_v47 = vpop.eup %17788  ;;  %v2333_v50 = vmul.f32 %v17787_v28, %v18929_v31  ;;  %v22078_v31 = vld [vmem:[#allocation32_spill] sm:$0xff]  ;;  %v4126_v28 = vpop.permute.xlu1 %4125 }
 0x3da   : > { %15590 = vmatmul.mubr.msk.f32.vlgmr.msra.gmra.mrb[50].mxu1 %vm1984_vm3, %v2328_v14  ;;  %16503 = vmatpush3.bf16.msra.mxu0 %v16500_v0  ;;  %v2334_v26 = vmul.f32 %v17789_v47, %v18962_v58  ;;  %v22081_v58 = vld [vmem:[#allocation36_spill] sm:$0xff]  ;;  %v16528_v0 = vpack.c.bf16 %v17194_v25, %v17193_v52  ;;  %v22085_v14 = vld [vmem:[#allocation10_spill] sm:$0xff] }
 0x3db   : > { %16507 = vmatpush3.bf16.msra.mxu1 %v16504_v24  ;;  %15596 = vmatprep.mubr.msk.f32.mxu0 %vm1984_vm3, %v2329_v29  ;;  %v22084_v22 = vld [vmem:[#allocation8_spill] sm:$0xff]  ;;  %v17222_v9 = vpop.permute.xlu0 %17221 }
 0x3dc   : > { %16509 = vmatprep.subr.bf16.mxu0 %v16508_v44  ;;  %16513 = vmatprep.subr.bf16.mxu1 %v19206_v37  ;;  %v22088_v29 = vld [vmem:[#allocation20_spill] sm:$0xff] }
 0x3dd   : > { %17321 = vrot.lane.b32.xlu0 %v18377_v55, %s18194_s8  ;;  %4946 = vrot.lane.b32.xlu1 %v22075_v12, %s18193_s7 }
 0x3de   : > { %15597 = vmatmul.mubr.msk.f32.vlgmr.msra.gmra.mrb[36].mxu0 %vm1984_vm3, %v2330_v8  ;;  %v17223_v8 = vunpack.i.l.bf16 %v17222_v9 }
 0x3df   : > { %16511 = vmatpush3.bf16.msra.mxu0 %v16508_v44  ;;  %15610 = vmatprep.mubr.msk.f32.mxu0 %vm1984_vm3, %v2333_v50  ;;  %v17224_v44 = vunpack.i.h.bf16 %v17222_v9  ;;  %v22089_v50 = vld [vmem:[#allocation12_spill] sm:$0xff] }
 0x3e0   : > { %16518 = vmatprep.subr.msk.bf16.mxu0 %vm18547_vm2, %v16516_v35 }
 0x3e1   : > { %17351 = vrot.lane.b32.xlu0 %v22077_v60, %s18195_s9  ;;  %5037 = vrot.lane.b32.xlu1 %v22078_v31, %s18193_s7 }
 0x3e2   : > { %15611 = vmatmul.mubr.msk.f32.vlgmr.msra.gmra.mrb[38].mxu0 %vm1984_vm3, %v2334_v26  ;;  %v22090_v26 = vld [vmem:[#allocation61_spill] sm:$0xff]  ;;  %v17791_v25 = vpop.eup %17790 }
 0x3e3   : > { %15624 = vmatprep.mubr.msk.f32.mxu0 %vm565_vm1, %v22080_v54  ;;  %v22092_v54 = vld [vmem:[#allocation46_spill] sm:$0xff]  ;;  %v2332_v16 = vmul.f32 %v17791_v25, %v19008_v51 }
 0x3e4   : > { %v17188_v6 = vunpack.i.l.bf16 %v22092_v54 }
 0x3e5   : > { %17361 = vrot.lane.b32.xlu0 %v22063_v46, %s18195_s9  ;;  %5128 = vrot.lane.b32.xlu1 %v22081_v58, %s18193_s7  ;;  %s21715_s7 = scalar_lea.vmem %s21832_s4, %s14302_s26 }
 0x3e8   : > { %16521 = vmatpush3.bf16.xpose.msk.msra.mxu0 %vm18547_vm2, %v16516_v35  ;;  %v16552_v35 = vpack.c.bf16 %v17224_v44, %v17223_v8  ;;  %v22093_v8 = vld [vmem:[#allocation4_spill] sm:$0xff] }
 0x3e9   : > { %16530 = vmatprep.subr.msk.bf16.mxu0 %vm18547_vm2, %v16528_v0  ;;  %7124 = vrot.lane.b32.xlu0 %v22082_v21, %s18196_s10 }
 0x3ea   : > { %17271 = vrot.lane.b32.xlu1 %v22077_v60, %s18194_s8 }
 0x3ed   : > { %7213 = vrot.lane.b32.xlu0 %v22084_v22, %s18196_s10 }
 0x3ee   : > { %17276 = vrot.lane.b32.xlu1 %v22085_v14, %s18194_s8 }
 0x3ef   : > { %15625 = vmatmul.mubr.msk.f32.vlgmr.msra.gmra.mrb[40].mxu0 %vm565_vm1, %v22086_v32 }
 0x3f0   : > { %16533 = vmatpush3.bf16.xpose.msk.msra.mxu0 %vm18547_vm2, %v16528_v0  ;;  %15638 = vmatprep.mubr.msk.f32.mxu0 %vm565_vm1, %v22087_v23  ;;  %v17189_v0 = vunpack.i.h.bf16 %v22092_v54 }
 0x3f1   : > { %16542 = vmatprep.subr.msk.bf16.mxu0 %vm18547_vm2, %v16540_v39  ;;  %17371 = vrot.lane.b32.xlu0 %v22066_v61, %s18195_s9 }
 0x3f2   : > { %17286 = vrot.lane.b32.xlu1 %v22088_v29, %s18194_s8  ;;  %v16522_v57 = vpack.c.bf16 %v17189_v0, %v17188_v6 }
 0x3f3   : > { %v2257_v47 = vpop.xlane.xlu1 %2256 }
 0x3f4   : > { %17792 = vrcp.f32 %v2257_v47 }
 0x3f5   : > { %7306 = vrot.lane.b32.xlu0 %v22089_v50, %s18196_s10 }
 0x3f6   : > { %17306 = vrot.lane.b32.xlu1 %v18461_v19, %s18194_s8 }
 0x3f7   : > { %15639 = vmatmul.mubr.msk.f32.vlgmr.msra.gmra.mrb[42].mxu0 %vm565_vm1, %v22090_v26  ;;  %v22094_v26 = vld [vmem:[#allocation7_spill] sm:$0xff]  ;;  %v17227_v25 = vpop.permute.xlu1 %17226 }
 0x3f8   : > { %16545 = vmatpush3.bf16.xpose.msk.msra.mxu0 %vm18547_vm2, %v16540_v39  ;;  %15652 = vmatprep.mubr.msk.f32.mxu0 %vm565_vm1, %v4126_v28 }
 0x3f9   : > { %16554 = vmatprep.subr.msk.bf16.mxu0 %vm18547_vm2, %v16552_v35  ;;  %7395 = vrot.lane.b32.xlu0 %v22091_v56, %s18196_s10 }
 0x3fa   : > { %17311 = vrot.lane.b32.xlu1 %v18341_v43, %s18194_s8 }
 0x3fe   : > { %v17793_v52 = vpop.eup %17792  ;;  %17316 = vrot.lane.b32.xlu1 %v22048_v49, %s18194_s8 }
 0x3ff   : > { %v2331_v30 = vmul.f32 %v17793_v52, %v19018_v53  ;;  %v22095_v52 = vld [vmem:[#allocation13_spill] sm:$0xff] }
 0x401   : > { %15603 = vmatprep.mubr.msk.f32.mxu1 %vm1984_vm3, %v2331_v30 }
 0x402   : > { %17326 = vrot.lane.b32.xlu1 %v22055_v1, %s18194_s8  ;;  %15604 = vmatmul.mubr.msk.f32.vlgmr.msra.gmra.mrb[52].mxu1 %vm1984_vm3, %v2332_v16 }
 0x403   : > { %16515 = vmatpush3.bf16.msra.mxu1 %v19206_v37  ;;  %v2272_v39 = vpop.xlane.xlu0 %2271 }
 0x404   : > { %16524 = vmatprep.subr.msk.bf16.mxu1 %vm18547_vm2, %v16522_v57  ;;  %17794 = vrcp.f32 %v2272_v39 }
 0x406   : > { %17331 = vrot.lane.b32.xlu1 %v18413_v3, %s18194_s8 }
 0x407   : > { %v4128_v53 = vpop.permute.xlu0 %4127 }
 0x408   : > { %15653 = vmatmul.mubr.msk.f32.vlgmr.msra.gmra.mrb[44].mxu0 %vm565_vm1, %v4128_v53 }
 0x409   : > { %16557 = vmatpush3.bf16.xpose.msk.msra.mxu0 %vm18547_vm2, %v16552_v35 }
 0x40a   : > { %17336 = vrot.lane.b32.xlu1 %v22064_v2, %s18194_s8 }
 0x40b   : > { %v19295_v51 = vpop.permute.xlu0 %4216 }
 0x40e   : > { %17341 = vrot.lane.b32.xlu1 %v22070_v41, %s18194_s8 }
 0x40f   : > { %v17232_v37 = vpop.permute.xlu0 %17231 }
 0x410   : > { %v17234_v28 = vunpack.i.h.bf16 %v17232_v37  ;;  %v17233_v32 = vunpack.i.l.bf16 %v17232_v37  ;;  %v22096_v37 = vld [vmem:[#allocation17_spill] sm:$0xff] }
 0x412   : > { %v16564_v9 = vpack.c.bf16 %v17234_v28, %v17233_v32  ;;  %17346 = vrot.lane.b32.xlu1 %v22054_v4, %s18194_s8  ;;  %v17795_v32 = vpop.eup %17794 }
 0x413   : > { %v4310_v23 = vpop.permute.xlu0 %4309 }
 0x414   : > { %16566 = vmatprep.subr.msk.bf16.mxu0 %vm18547_vm2, %v16564_v9 }
 0x416   : > { %17356 = vrot.lane.b32.xlu1 %v22085_v14, %s18195_s9 }
 0x417   : > { %v19305_v44 = vpop.permute.xlu0 %4398 }
 0x41a   : > { %7122 = vrot.lane.b32.xlu1 %v22093_v8, %s18196_s10 }
 0x41b   : > { %v17242_v47 = vpop.permute.xlu0 %17241 }
 0x41c   : > { %v17244_v30 = vunpack.i.h.bf16 %v17242_v47  ;;  %v17243_v16 = vunpack.i.l.bf16 %v17242_v47 }
 0x41e   : > { %17366 = vrot.lane.b32.xlu1 %v22088_v29, %s18195_s9  ;;  %v16576_v39 = vpack.c.bf16 %v17244_v30, %v17243_v16  ;;  %v22098_v30 = vld [vmem:[#allocation59_spill] sm:$0xff] }
 0x41f   : > { %v4492_v35 = vpop.permute.xlu0 %4491 }
 0x422   : > { %7215 = vrot.lane.b32.xlu1 %v22094_v26, %s18196_s10 }
 0x423   : > { %v19315_v54 = vpop.permute.xlu0 %4580 }
 0x426   : > { %7304 = vrot.lane.b32.xlu1 %v22095_v52, %s18196_s10 }
 0x427   : > { %v17252_v53 = vpop.permute.xlu0 %17251 }
 0x428   : > { %v2269_v0 = vpop.xlane.xlu1 %2268 }
 0x429   : > { %17796 = vrcp.f32 %v2269_v0  ;;  %v22097_v0 = vld [vmem:[#allocation48_spill] sm:$0xff] }
 0x42a   : > { %17376 = vrot.lane.b32.xlu1 %v22069_v45, %s18195_s9  ;;  %v17199_v26 = vunpack.i.h.bf16 %v22097_v0  ;;  %v17198_v8 = vunpack.i.l.bf16 %v22097_v0  ;;  %v22100_v0 = vld [vmem:[#allocation49_spill] sm:$0xff] }
 0x42b   : > { %v4674_v47 = vpop.permute.xlu0 %4673 }
 0x42c   : > { %v19319_v6 = vpop.permute.xlu1 %4218 }
 0x42e   : > { %7397 = vrot.lane.b32.xlu1 %v22096_v37, %s18196_s10 }
 0x42f   : > { %v19341_v16 = vpop.permute.xlu0 %4762 }
 0x430   : > { %v4308_v28 = vpop.permute.xlu1 %4307 }
 0x431   : > { %15666 = vmatprep.mubr.msk.f32.mxu0 %vm565_vm1, %v4308_v28  ;;  %v2336_v28 = vmul.f32 %v17795_v32, %v19022_v18 }
 0x432   : > { %15667 = vmatmul.mubr.msk.f32.vlgmr.msra.gmra.mrb[46].mxu0 %vm565_vm1, %v4310_v23  ;;  %v16534_v23 = vpack.c.bf16 %v17199_v26, %v17198_v8  ;;  %v17253_v8 = vunpack.i.l.bf16 %v17252_v53 }
 0x433   : > { %v17797_v52 = vpop.eup %17796  ;;  %16569 = vmatpush3.bf16.xpose.msk.msra.mxu0 %vm18547_vm2, %v16564_v9 }
 0x434   : > { %16578 = vmatprep.subr.msk.bf16.mxu0 %vm18547_vm2, %v16576_v39  ;;  %v17237_v37 = vpop.permute.xlu1 %17236  ;;  %v2335_v56 = vmul.f32 %v17797_v52, %v19039_v7  ;;  %v22099_v7 = vld [vmem:[#allocation52_spill] sm:$0xff] }
 0x435   : > { %v17209_v52 = vunpack.i.h.bf16 %v22099_v7  ;;  %v17208_v18 = vunpack.i.l.bf16 %v22099_v7  ;;  %v17228_v7 = vunpack.i.l.bf16 %v17227_v25 }
 0x436   : > { %15617 = vmatprep.mubr.msk.f32.mxu1 %vm1984_vm3, %v2335_v56  ;;  %v17254_v56 = vunpack.i.h.bf16 %v17252_v53 }
 0x437   : > { %15618 = vmatmul.mubr.msk.f32.vlgmr.msra.gmra.mrb[54].mxu1 %vm1984_vm3, %v2336_v28  ;;  %v4854_v28 = vpop.permute.xlu0 %4853 }
 0x438   : > { %16527 = vmatpush3.bf16.xpose.msk.msra.mxu1 %vm18547_vm2, %v16522_v57  ;;  %15631 = vmatprep.mubr.msk.f32.mxu1 %vm565_vm1, %v22098_v30  ;;  %v4401_v9 = vpop.permute.xlu1 %4400  ;;  %v16546_v57 = vpack.c.bf16 %v17209_v52, %v17208_v18  ;;  %v16588_v32 = vpack.c.bf16 %v17254_v56, %v17253_v8  ;;  %v22101_v30 = vld [vmem:[#allocation62_spill] sm:$0xff]  ;;  %v17238_v8 = vunpack.i.l.bf16 %v17237_v37 }
 0x439   : > { %16536 = vmatprep.subr.msk.bf16.mxu1 %vm18547_vm2, %v16534_v23 }
 0x43b   : > { %v4856_v18 = vpop.permute.xlu0 %4855 }
 0x43c   : > { %v4490_v26 = vpop.permute.xlu1 %4489 }
 0x43d   : > { %15680 = vmatprep.mubr.msk.f32.mxu0 %vm565_vm1, %v4490_v26 }
 0x43e   : > { %15681 = vmatmul.mubr.msk.f32.vlgmr.msra.gmra.mrb[48].mxu0 %vm565_vm1, %v4492_v35  ;;  %v17229_v35 = vunpack.i.h.bf16 %v17227_v25  ;;  %v17239_v25 = vunpack.i.h.bf16 %v17237_v37 }
 0x43f   : > { %15632 = vmatmul.mubr.msk.f32.vlgmr.msra.gmra.mrb[56].mxu1 %vm565_vm1, %v22100_v0  ;;  %16581 = vmatpush3.bf16.xpose.msk.msra.mxu0 %vm18547_vm2, %v16576_v39  ;;  %v22102_v39 = vld [vmem:[#allocation54_spill] sm:$0xff]  ;;  %v17267_v26 = vpop.permute.xlu0 %17266 }
 0x440   : > { %16539 = vmatpush3.bf16.xpose.msk.msra.mxu1 %vm18547_vm2, %v16534_v23  ;;  %15645 = vmatprep.mubr.msk.f32.mxu1 %vm565_vm1, %v22101_v30  ;;  %v17247_v53 = vpop.permute.xlu1 %17246  ;;  %v16558_v56 = vpack.c.bf16 %v17229_v35, %v17228_v7  ;;  %v16570_v0 = vpack.c.bf16 %v17239_v25, %v17238_v8  ;;  %v17268_v25 = vunpack.i.l.bf16 %v17267_v26 }
 0x441   : > { %16590 = vmatprep.subr.msk.bf16.mxu0 %vm18547_vm2, %v16588_v32  ;;  %16548 = vmatprep.subr.msk.bf16.mxu1 %vm18547_vm2, %v16546_v57 }
 0x443   : > { %v5036_v37 = vpop.permute.xlu0 %5035 }
 0x444   : > { %v4583_v52 = vpop.permute.xlu1 %4582 }
 0x447   : > { %15646 = vmatmul.mubr.msk.f32.vlgmr.msra.gmra.mrb[58].mxu1 %vm565_vm1, %v22102_v39  ;;  %v5127_v39 = vpop.permute.xlu0 %5126 }
 0x448   : > { %16551 = vmatpush3.bf16.xpose.msk.msra.mxu1 %vm18547_vm2, %v16546_v57  ;;  %15659 = vmatprep.mubr.msk.f32.mxu1 %vm565_vm1, %v19295_v51  ;;  %v4672_v23 = vpop.permute.xlu1 %4671 }
 0x449   : > { %16560 = vmatprep.subr.msk.bf16.mxu1 %vm18547_vm2, %v16558_v56  ;;  %15694 = vmatprep.mubr.msk.f32.mxu0 %vm565_vm1, %v4672_v23  ;;  %v17269_v23 = vunpack.i.h.bf16 %v17267_v26 }
 0x44a   : > { %15695 = vmatmul.mubr.msk.f32.vlgmr.msra.gmra.mrb[50].mxu0 %vm565_vm1, %v4674_v47  ;;  %v17249_v47 = vunpack.i.h.bf16 %v17247_v53 }
 0x44b   : > { %16593 = vmatpush3.bf16.xpose.msk.msra.mxu0 %vm18547_vm2, %v16588_v32  ;;  %15708 = vmatprep.mubr.msk.f32.mxu0 %vm565_vm1, %v4854_v28  ;;  %v17248_v32 = vunpack.i.l.bf16 %v17247_v53 }
 0x44c   : > { %v17257_v57 = vpop.permute.xlu1 %17256 }
 0x44d   : > { %v16582_v35 = vpack.c.bf16 %v17249_v47, %v17248_v32  ;;  %v17259_v53 = vunpack.i.h.bf16 %v17257_v57 }
 0x44f   : > { %15660 = vmatmul.mubr.msk.f32.vlgmr.msra.gmra.mrb[60].mxu1 %vm565_vm1, %v19319_v6 }
 0x450   : > { %16563 = vmatpush3.bf16.xpose.msk.msra.mxu1 %vm18547_vm2, %v16558_v56  ;;  %15673 = vmatprep.mubr.msk.f32.mxu1 %vm565_vm1, %v19305_v44  ;;  %v4765_v51 = vpop.permute.xlu1 %4764 }
 0x451   : > { %16572 = vmatprep.subr.msk.bf16.mxu1 %vm18547_vm2, %v16570_v0 }
 0x452   : > { %15709 = vmatmul.mubr.msk.f32.vlgmr.msra.gmra.mrb[52].mxu0 %vm565_vm1, %v4856_v18  ;;  %v17258_v18 = vunpack.i.l.bf16 %v17257_v57  ;;  %v17282_v57 = vpop.permute.xlu0 %17281 }
 0x453   : > { %15722 = vmatprep.mubr.msk.f32.mxu0 %vm565_vm1, %v5036_v37  ;;  %v17283_v37 = vunpack.i.l.bf16 %v17282_v57 }
 0x454   : > { %v17262_v28 = vpop.permute.xlu1 %17261 }
 0x455   : > { %v17264_v30 = vunpack.i.h.bf16 %v17262_v28  ;;  %v17263_v6 = vunpack.i.l.bf16 %v17262_v28 }
 0x457   : > { %v16600_v7 = vpack.c.bf16 %v17264_v30, %v17263_v6  ;;  %15674 = vmatmul.mubr.msk.f32.vlgmr.msra.gmra.mrb[62].mxu1 %vm565_vm1, %v4401_v9  ;;  %v16594_v9 = vpack.c.bf16 %v17259_v53, %v17258_v18 }
 0x458   : > { %16575 = vmatpush3.bf16.xpose.msk.msra.mxu1 %vm18547_vm2, %v16570_v0  ;;  %15687 = vmatprep.mubr.msk.f32.mxu1 %vm565_vm1, %v19315_v54  ;;  %v4945_v44 = vpop.permute.xlu1 %4944  ;;  %v16606_v0 = vpack.c.bf16 %v17269_v23, %v17268_v25 }
 0x459   : > { %16584 = vmatprep.subr.msk.bf16.mxu1 %vm18547_vm2, %v16582_v35  ;;  %16602 = vmatprep.subr.msk.bf16.mxu0 %vm18547_vm2, %v16600_v7 }
 0x45a   : > { %16605 = vmatpush3.bf16.xpose.msk.msra.mxu0 %vm18547_vm2, %v16600_v7 }
 0x45c   : > { %v4947_v56 = vpop.permute.xlu1 %4946 }
 0x45f   : > { %15688 = vmatmul.mubr.msk.f32.vlgmr.msra.gmra.mrb[64].mxu1 %vm565_vm1, %v4583_v52 }
 0x460   : > { %16587 = vmatpush3.bf16.xpose.msk.msra.mxu1 %vm18547_vm2, %v16582_v35  ;;  %15701 = vmatprep.mubr.msk.f32.mxu1 %vm565_vm1, %v19341_v16  ;;  %v5038_v54 = vpop.permute.xlu1 %5037  ;;  %v17284_v16 = vunpack.i.h.bf16 %v17282_v57 }
 0x461   : > { %16596 = vmatprep.subr.msk.bf16.mxu1 %vm18547_vm2, %v16594_v9  ;;  %15723 = vmatmul.mubr.msk.f32.vlgmr.msra.gmra.mrb[54].mxu0 %vm565_vm1, %v5038_v54 }
 0x462   : > { %v19407_v35 = vpack.c.bf16 %v17284_v16, %v17283_v37 }
 0x464   : > { %v5129_v8 = vpop.permute.xlu1 %5128 }
 0x467   : > { %15702 = vmatmul.mubr.msk.f32.vlgmr.msra.gmra.mrb[66].mxu1 %vm565_vm1, %v4765_v51 }
 0x468   : > { %16599 = vmatpush3.bf16.xpose.msk.msra.mxu1 %vm18547_vm2, %v16594_v9  ;;  %15715 = vmatprep.mubr.msk.f32.mxu1 %vm565_vm1, %v4945_v44  ;;  %v17272_v52 = vpop.permute.xlu1 %17271 }
 0x469   : > { %v17274_v47 = vunpack.i.h.bf16 %v17272_v52  ;;  %v17273_v32 = vunpack.i.l.bf16 %v17272_v52  ;;  %16608 = vmatprep.subr.msk.bf16.mxu1 %vm18547_vm2, %v16606_v0 }
 0x46b   : > { %v16612_v28 = vpack.c.bf16 %v17274_v47, %v17273_v32 }
 0x46c   : > { %v17277_v26 = vpop.permute.xlu1 %17276 }
 0x46d   : > { %v17279_v30 = vunpack.i.h.bf16 %v17277_v26  ;;  %v17278_v6 = vunpack.i.l.bf16 %v17277_v26  ;;  %16613 = vmatprep.subr.bf16.mxu0 %v16612_v28 }
 0x46e   : > { %16615 = vmatpush3.bf16.msra.mxu0 %v16612_v28 }
 0x46f   : > { %15716 = vmatmul.mubr.msk.f32.vlgmr.msra.gmra.mrb[68].mxu1 %vm565_vm1, %v4947_v56  ;;  %16621 = vmatprep.subr.bf16.mxu0 %v19407_v35  ;;  %v16616_v51 = vpack.c.bf16 %v17279_v30, %v17278_v6 }
 0x470   : > { %16611 = vmatpush3.bf16.xpose.msk.msra.mxu1 %vm18547_vm2, %v16606_v0  ;;  %15729 = vmatprep.mubr.msk.f32.mxu1 %vm565_vm1, %v5127_v39  ;;  %v15514_v7 = vpop.f32.mrb[24].mxu0  ;;  %v17287_v44 = vpop.permute.xlu1 %17286 }
 0x471   : > { %3730 = vst.msk [vmem:[#allocation2 + $0x8] sm:$0xff] %vm565_vm1, %v15514_v7  ;;  %v2415_v53 = vpop.f32.mrb[25].mxu0  ;;  %16617 = vmatprep.subr.bf16.mxu1 %v16616_v51  ;;  %v17289_v18 = vunpack.i.h.bf16 %v17287_v44  ;;  %v17288_v9 = vunpack.i.l.bf16 %v17287_v44 }
 0x472   : > { %3729 = vst.msk [vmem:[#allocation2] sm:$0xff] %vm565_vm1, %v2415_v53 }
 0x473   : > { %v19417_v56 = vpack.c.bf16 %v17289_v18, %v17288_v9 }
 0x475   : > { %22103 = vst [vmem:[#allocation51_spill] sm:$0xff] %v19417_v56 }
 0x477   : > { %15730 = vmatmul.mubr.msk.f32.vlgmr.msra.gmra.mrb[70].mxu1 %vm565_vm1, %v5129_v8 }
 0x478   : > { %16619 = vmatpush3.bf16.msra.mxu1 %v16616_v51 }
 0x479   : > { %16625 = vmatprep.subr.bf16.mxu1 %v19417_v56 }
 0x47c   : > { %v15521_v54 = vpop.f32.mrb[40].mxu1 }
 0x47d   : > { %3732 = vst.msk [vmem:[#allocation2 + $0x18] sm:$0xff] %vm565_vm1, %v15521_v54  ;;  %v2502_v39 = vpop.f32.mrb[41].mxu1 }
 0x47e   : > { %3731 = vst.msk [vmem:[#allocation2 + $0x10] sm:$0xff] %vm565_vm1, %v2502_v39 }
 0x485   : > { %v15535_v23 = vpop.f32.mrb[42].mxu1 }
 0x486   : > { %3736 = vst.msk [vmem:[#allocation2 + $0x38] sm:$0xff] %vm565_vm1, %v15535_v23  ;;  %v2676_v25 = vpop.f32.mrb[43].mxu1 }
 0x487   : > { %3735 = vst.msk [vmem:[#allocation2 + $0x30] sm:$0xff] %vm565_vm1, %v2676_v25 }
 0x48c   : > { %v15528_v57 = vpop.f32.mrb[26].mxu0 }
 0x48d   : > { %3734 = vst.msk [vmem:[#allocation2 + $0x28] sm:$0xff] %vm565_vm1, %v15528_v57  ;;  %v2589_v8 = vpop.f32.mrb[27].mxu0 }
 0x48e   : > { %3733 = vst.msk [vmem:[#allocation2 + $0x20] sm:$0xff] %vm565_vm1, %v2589_v8 }
 0x490   : > { %v15549_v0 = vpop.f32.mrb[44].mxu1 }
 0x491   : > { %3740 = vst.msk [vmem:[#allocation2 + $0x58] sm:$0xff] %vm565_vm1, %v15549_v0  ;;  %v2850_v52 = vpop.f32.mrb[45].mxu1 }
 0x492   : > { %3739 = vst.msk [vmem:[#allocation2 + $0x50] sm:$0xff] %vm565_vm1, %v2850_v52 }
 0x498   : > { %v15563_v16 = vpop.f32.mrb[46].mxu1 }
 0x499   : > { %3744 = vst.msk [vmem:[#allocation2 + $0x78] sm:$0xff] %vm565_vm1, %v15563_v16  ;;  %v3024_v37 = vpop.f32.mrb[47].mxu1 }
 0x49a   : > { %3743 = vst.msk [vmem:[#allocation2 + $0x70] sm:$0xff] %vm565_vm1, %v3024_v37 }
 0x49c   : > { %v15542_v47 = vpop.f32.mrb[28].mxu0 }
 0x49d   : > { %3738 = vst.msk [vmem:[#allocation2 + $0x48] sm:$0xff] %vm565_vm1, %v15542_v47  ;;  %v2763_v32 = vpop.f32.mrb[29].mxu0 }
 0x49e   : > { %3737 = vst.msk [vmem:[#allocation2 + $0x40] sm:$0xff] %vm565_vm1, %v2763_v32 }
 0x4a0   : > { %v15577_v28 = vpop.f32.mrb[48].mxu1 }
 0x4a1   : > { %3748 = vst.msk [vmem:[#allocation2 + $0x98] sm:$0xff] %vm565_vm1, %v15577_v28  ;;  %v3198_v26 = vpop.f32.mrb[49].mxu1 }
 0x4a2   : > { %3747 = vst.msk [vmem:[#allocation2 + $0x90] sm:$0xff] %vm565_vm1, %v3198_v26 }
 0x4a4   : > { %v15556_v30 = vpop.f32.mrb[30].mxu0 }
 0x4a5   : > { %3742 = vst.msk [vmem:[#allocation2 + $0x68] sm:$0xff] %vm565_vm1, %v15556_v30  ;;  %v2937_v6 = vpop.f32.mrb[31].mxu0 }
 0x4a6   : > { %3741 = vst.msk [vmem:[#allocation2 + $0x60] sm:$0xff] %vm565_vm1, %v2937_v6 }
 0x4a8   : > { %v15570_v51 = vpop.f32.mrb[32].mxu0 }
 0x4a9   : > { %3746 = vst.msk [vmem:[#allocation2 + $0x88] sm:$0xff] %vm565_vm1, %v15570_v51  ;;  %v3111_v7 = vpop.f32.mrb[33].mxu0 }
 0x4aa   : > { %3745 = vst.msk [vmem:[#allocation2 + $0x80] sm:$0xff] %vm565_vm1, %v3111_v7 }
 0x4ac   : > { %v15584_v44 = vpop.f32.mrb[34].mxu0 }
 0x4ad   : > { %v15591_v53 = vpop.f32.mrb[50].mxu1  ;;  %3750 = vst.msk [vmem:[#allocation2 + $0xa8] sm:$0xff] %vm565_vm1, %v15584_v44  ;;  %v3285_v18 = vpop.f32.mrb[35].mxu0 }
 0x4ae   : > { %3752 = vst.msk [vmem:[#allocation2 + $0xb8] sm:$0xff] %vm565_vm1, %v15591_v53  ;;  %v3372_v9 = vpop.f32.mrb[51].mxu1  ;;  %3749 = vst.msk [vmem:[#allocation2 + $0xa0] sm:$0xff] %vm565_vm1, %v3285_v18  ;;  %v19472_v44 = vpop.permute.xlu1 %17306 }
 0x4af   : > { %3751 = vst.msk [vmem:[#allocation2 + $0xb0] sm:$0xff] %vm565_vm1, %v3372_v9  ;;  %22104 = vst [vmem:[#allocation41_spill] sm:$0xff] %v19472_v44 }
 0x4b1   : > { %v15598_v54 = vpop.f32.mrb[36].mxu0 }
 0x4b2   : > { %3754 = vst.msk [vmem:[#allocation2 + $0xc8] sm:$0xff] %vm565_vm1, %v15598_v54  ;;  %v3459_v39 = vpop.f32.mrb[37].mxu0  ;;  %v19474_v53 = vpop.permute.xlu1 %17311 }
 0x4b3   : > { %3753 = vst.msk [vmem:[#allocation2 + $0xc0] sm:$0xff] %vm565_vm1, %v3459_v39 }
 0x4b5   : > { %v15612_v23 = vpop.f32.mrb[38].mxu0 }
 0x4b6   : > { %3758 = vst.msk [vmem:[#allocation2 + $0xe8] sm:$0xff] %vm565_vm1, %v15612_v23  ;;  %v3633_v25 = vpop.f32.mrb[39].mxu0  ;;  %v19476_v18 = vpop.permute.xlu1 %17316 }
 0x4b7   : > { %3757 = vst.msk [vmem:[#allocation2 + $0xe0] sm:$0xff] %vm565_vm1, %v3633_v25  ;;  %22105 = vst [vmem:[#allocation42_spill] sm:$0xff] %v19476_v18 }
 0x4ba   : > { %v19482_v23 = vpop.permute.xlu1 %17326 }
 0x4bb   : > { %22106 = vst [vmem:[#allocation40_spill] sm:$0xff] %v19482_v23 }
 0x4c2   : > { %v19446_v57 = vpop.f32.mrb[40].mxu0 }
 0x4c3   : > { %v19448_v8 = vpop.f32.mrb[41].mxu0  ;;  %v5220_v0 = vsel %vm1984_vm3, %v19446_v57, -inf }
 0x4c4   : > { %5221 = vmax.xlane.f32.xlu1 %v5220_v0  ;;  %v5217_v52 = vsel %vm1984_vm3, %v19448_v8, -inf  ;;  %v19486_v0 = vpop.permute.xlu0 %17291 }
 0x4c5   : > { %5218 = vmax.xlane.f32.xlu0 %v5217_v52  ;;  %v19488_v52 = vpop.permute.xlu1 %17331 }
 0x4c6   : > { %22107 = vst [vmem:[#allocation44_spill] sm:$0xff] %v19488_v52 }
 0x4ca   : > { %v19454_v16 = vpop.f32.mrb[42].mxu0 }
 0x4cb   : > { %v19456_v37 = vpop.f32.mrb[43].mxu0  ;;  %v5232_v47 = vsel %vm1984_vm3, %v19454_v16, -inf }
 0x4cc   : > { %5233 = vmax.xlane.f32.xlu0 %v5232_v47  ;;  %v5229_v32 = vsel %vm1984_vm3, %v19456_v37, -inf }
 0x4d0   : > { %5230 = vmax.xlane.f32.xlu0 %v5229_v32 }
 0x4d5   : > { %v15605_v28 = vpop.f32.mrb[52].mxu1 }
 0x4d6   : > { %3756 = vst.msk [vmem:[#allocation2 + $0xd8] sm:$0xff] %vm565_vm1, %v15605_v28  ;;  %v3546_v26 = vpop.f32.mrb[53].mxu1 }
 0x4d7   : > { %3755 = vst.msk [vmem:[#allocation2 + $0xd0] sm:$0xff] %vm565_vm1, %v3546_v26 }
 0x4db   : > { %v19464_v30 = vpop.f32.mrb[44].mxu0 }
 0x4dc   : > { %v19466_v6 = vpop.f32.mrb[45].mxu0  ;;  %v5244_v51 = vsel %vm1984_vm3, %v19464_v30, -inf }
 0x4dd   : > { %5245 = vmax.xlane.f32.xlu0 %v5244_v51  ;;  %v5241_v7 = vsel %vm1984_vm3, %v19466_v6, -inf }
 0x4e1   : > { %5242 = vmax.xlane.f32.xlu0 %v5241_v7 }
 0x505   : > { %v19478_v9 = vpop.f32.mrb[46].mxu0 }
 0x506   : > { %v19480_v54 = vpop.f32.mrb[47].mxu0  ;;  %v5256_v29 = vsel %vm1984_vm3, %v19478_v9, -inf }
 0x50a   : > { %v15619_v39 = vpop.f32.mrb[54].mxu1 }
 0x50b   : > { %3760 = vst.msk [vmem:[#allocation2 + $0xf8] sm:$0xff] %vm565_vm1, %v15619_v39  ;;  %v3720_v25 = vpop.f32.mrb[55].mxu1  ;;  %v19502_v39 = vpop.permute.xlu1 %17336 }
 0x50c   : > { %3759 = vst.msk [vmem:[#allocation2 + $0xf0] sm:$0xff] %vm565_vm1, %v3720_v25  ;;  %22108 = vst [vmem:[#allocation53_spill] sm:$0xff] %v19502_v39  ;;  %v19504_v25 = vpop.permute.xlu0 %17296 }
 0x510   : > { %v19520_v21 = vpop.permute.xlu0 %17301 }
 0x511   : > { %v19490_v47 = vpop.f32.mrb[48].mxu0 }
 0x512   : > { %v19492_v32 = vpop.f32.mrb[56].mxu1  ;;  %v19494_v28 = vpop.f32.mrb[49].mxu0  ;;  %v5268_v12 = vsel %vm1984_vm3, %v19490_v47, -inf }
 0x513   : > { %v19496_v26 = vpop.f32.mrb[57].mxu1  ;;  %v5226_v51 = vsel %vm1984_vm3, %v19492_v32, -inf  ;;  %v5265_v38 = vsel %vm1984_vm3, %v19494_v28, -inf }
 0x514   : > { %5227 = vmax.xlane.f32.xlu1 %v5226_v51  ;;  %v5223_v7 = vsel %vm1984_vm3, %v19496_v26, -inf  ;;  %v5253_v51 = vsel %vm1984_vm3, %v19480_v54, -inf  ;;  %v19536_v41 = vpop.permute.xlu0 %17321 }
 0x515   : > { %5224 = vmax.xlane.f32.xlu0 %v5223_v7  ;;  %v19516_v7 = vpop.permute.xlu1 %17341 }
 0x516   : > { %22109 = vst [vmem:[#allocation43_spill] sm:$0xff] %v19516_v7 }
 0x518   : > { %v19550_v61 = vpop.permute.xlu0 %17351 }
 0x519   : > { %5257 = vmax.xlane.f32.xlu0 %v5256_v29  ;;  %v19530_v60 = vpop.permute.xlu1 %17346  ;;  %22112 = vst [vmem:[#allocation55_spill] sm:$0xff] %v19550_v61 }
 0x51a   : > { %v19508_v50 = vpop.f32.mrb[58].mxu1  ;;  %22110 = vst [vmem:[#allocation45_spill] sm:$0xff] %v19530_v60 }
 0x51b   : > { %v19510_v14 = vpop.f32.mrb[59].mxu1  ;;  %v5238_v22 = vsel %vm1984_vm3, %v19508_v50, -inf }
 0x51c   : > { %5239 = vmax.xlane.f32.xlu1 %v5238_v22  ;;  %v5235_v29 = vsel %vm1984_vm3, %v19510_v14, -inf }
 0x51d   : > { %5254 = vmax.xlane.f32.xlu0 %v5253_v51  ;;  %v19518_v58 = vpop.f32.mrb[50].mxu0  ;;  %v19548_v2 = vpop.permute.xlu1 %17356 }
 0x51e   : > { %v19522_v31 = vpop.f32.mrb[51].mxu0  ;;  %v5280_v60 = vsel %vm1984_vm3, %v19518_v58, -inf  ;;  %22111 = vst [vmem:[#allocation57_spill] sm:$0xff] %v19548_v2 }
 0x51f   : > { %v5277_v46 = vsel %vm1984_vm3, %v19522_v31, -inf }
 0x520   : > { %5236 = vmax.xlane.f32.xlu1 %v5235_v29 }
 0x521   : > { %5269 = vmax.xlane.f32.xlu0 %v5268_v12 }
 0x522   : > { %v19528_v22 = vpop.f32.mrb[60].mxu1 }
 0x523   : > { %v19532_v11 = vpop.f32.mrb[61].mxu1  ;;  %v5250_v51 = vsel %vm1984_vm3, %v19528_v22, -inf }
 0x524   : > { %5251 = vmax.xlane.f32.xlu1 %v5250_v51  ;;  %v5247_v12 = vsel %vm1984_vm3, %v19532_v11, -inf }
 0x525   : > { %5266 = vmax.xlane.f32.xlu0 %v5265_v38  ;;  %v19540_v29 = vpop.f32.mrb[52].mxu0 }
 0x526   : > { %v19542_v45 = vpop.f32.mrb[53].mxu0  ;;  %v5292_v24 = vsel %vm1984_vm3, %v19540_v29, -inf }
 0x528   : > { %5248 = vmax.xlane.f32.xlu1 %v5247_v12  ;;  %v19560_v12 = vpop.permute.xlu1 %7122 }
 0x529   : > { %5281 = vmax.xlane.f32.xlu0 %v5280_v60  ;;  %22113 = vst [vmem:[#allocation56_spill] sm:$0xff] %v19560_v12  ;;  %v19564_v60 = vpop.permute.xlu0 %17361 }
 0x52a   : > { %v19552_v51 = vpop.f32.mrb[62].mxu1  ;;  %22114 = vst [vmem:[#allocation47_spill] sm:$0xff] %v19564_v60 }
 0x52b   : > { %v19554_v42 = vpop.f32.mrb[63].mxu1  ;;  %v5262_v38 = vsel %vm1984_vm3, %v19552_v51, -inf }
 0x52c   : > { %5263 = vmax.xlane.f32.xlu1 %v5262_v38  ;;  %v5259_v2 = vsel %vm1984_vm3, %v19554_v42, -inf  ;;  %v19578_v59 = vpop.permute.xlu1 %17366 }
 0x52d   : > { %5278 = vmax.xlane.f32.xlu0 %v5277_v46  ;;  %v5289_v46 = vsel %vm1984_vm3, %v19542_v45, -inf  ;;  %22115 = vst [vmem:[#allocation60_spill] sm:$0xff] %v19578_v59  ;;  %v19582_v60 = vpop.permute.xlu0 %7124 }
 0x52e   : > { %22116 = vst [vmem:[#allocation58_spill] sm:$0xff] %v19582_v60 }
 0x530   : > { %5260 = vmax.xlane.f32.xlu1 %v5259_v2  ;;  %v19590_v61 = vpop.permute.xlu1 %7215 }
 0x531   : > { %5293 = vmax.xlane.f32.xlu0 %v5292_v24  ;;  %22117 = vst [vmem:[#allocation50_spill] sm:$0xff] %v19590_v61  ;;  %v19596_v59 = vpop.permute.xlu0 %7213 }
 0x532   : > { %v19568_v39 = vpop.f32.mrb[64].mxu1  ;;  %22118 = vst [vmem:[#allocation61_spill] sm:$0xff] %v19596_v59 }
 0x533   : > { %v19570_v34 = vpop.f32.mrb[65].mxu1  ;;  %v5274_v38 = vsel %vm1984_vm3, %v19568_v39, -inf }
 0x534   : > { %5275 = vmax.xlane.f32.xlu1 %v5274_v38  ;;  %v19576_v12 = vpop.f32.mrb[54].mxu0  ;;  %v5271_v24 = vsel %vm1984_vm3, %v19570_v34, -inf }
 0x535   : > { %5290 = vmax.xlane.f32.xlu0 %v5289_v46  ;;  %v19580_v2 = vpop.f32.mrb[55].mxu0  ;;  %v5304_v1 = vsel %vm1984_vm3, %v19576_v12, -inf  ;;  %v19602_v15 = vpop.permute.xlu0 %17371 }
 0x536   : > { %v5301_v46 = vsel %vm1984_vm3, %v19580_v2, -inf  ;;  %22120 = vst [vmem:[#allocation48_spill] sm:$0xff] %v19602_v15 }
 0x538   : > { %5272 = vmax.xlane.f32.xlu1 %v5271_v24  ;;  %v19600_v24 = vpop.permute.xlu1 %7304 }
 0x539   : > { %5305 = vmax.xlane.f32.xlu0 %v5304_v1  ;;  %22119 = vst [vmem:[#allocation46_spill] sm:$0xff] %v19600_v24  ;;  %v19616_v59 = vpop.permute.xlu0 %7306 }
 0x53a   : > { %v19588_v38 = vpop.f32.mrb[66].mxu1  ;;  %22122 = vst [vmem:[#allocation52_spill] sm:$0xff] %v19616_v59 }
 0x53b   : > { %v19592_v20 = vpop.f32.mrb[67].mxu1  ;;  %v5286_v60 = vsel %vm1984_vm3, %v19588_v38, -inf }
 0x53c   : > { %5302 = vmax.xlane.f32.xlu1 %v5301_v46  ;;  %v5283_v61 = vsel %vm1984_vm3, %v19592_v20, -inf  ;;  %v19612_v46 = vpop.permute.xlu1 %17376 }
 0x53d   : > { %22121 = vst [vmem:[#allocation59_spill] sm:$0xff] %v19612_v46  ;;  %v19628_v46 = vpop.permute.xlu0 %7395 }
 0x53e   : > { %22124 = vst [vmem:[#allocation62_spill] sm:$0xff] %v19628_v46 }
 0x540   : > { %5287 = vmax.xlane.f32.xlu1 %v5286_v60 }
 0x542   : > { %v19604_v1 = vpop.f32.mrb[68].mxu1 }
 0x543   : > { %v19606_v23 = vpop.f32.mrb[69].mxu1  ;;  %v5298_v4 = vsel %vm1984_vm3, %v19604_v1, -inf }
 0x544   : > { %5284 = vmax.xlane.f32.xlu1 %v5283_v61  ;;  %5299 = vmax.xlane.f32.xlu0 %v5298_v4  ;;  %v5295_v60 = vsel %vm1984_vm3, %v19606_v23, -inf  ;;  %v19626_v4 = vpop.permute.xlu1 %7397 }
 0x545   : > { %22123 = vst [vmem:[#allocation49_spill] sm:$0xff] %v19626_v4 }
 0x548   : > { %5296 = vmax.xlane.f32.xlu1 %v5295_v60 }
 0x54a   : > { %v19618_v24 = vpop.f32.mrb[70].mxu1 }
 0x54b   : > { %v19620_v15 = vpop.f32.mrb[71].mxu1  ;;  %v5310_v7 = vsel %vm1984_vm3, %v19618_v24, -inf }
 0x54c   : > { %5311 = vmax.xlane.f32.xlu0 %v5310_v7  ;;  %v5307_v61 = vsel %vm1984_vm3, %v19620_v15, -inf }
 0x54d   : > { %5308 = vmax.xlane.f32.xlu1 %v5307_v61 }
 0x551   : > { %v5222_v33 = vpop.xlane.xlu1 %5221 }
 0x552   : > { %v5314_v59 = vsub.f32 %v19446_v57, %v5222_v33  ;;  %v5219_v60 = vpop.xlane.xlu0 %5218 }
 0x553   : > { %v5313_v36 = vsub.f32 %v19448_v8, %v5219_v60 }
 0x554   : > { %v5347_v18 = vmul.f32 1.442695, %v5314_v59 }
 0x555   : > { %v5345_v49 = vmul.f32 1.442695, %v5313_v36 }
 0x556   : > { %17798 = vpow2.f32 %v5347_v18 }
 0x557   : > { %17800 = vpow2.f32 %v5345_v49 }
 0x559   : > { %v5234_v27 = vpop.xlane.xlu0 %5233 }
 0x55a   : > { %v5318_v7 = vsub.f32 %v19454_v16, %v5234_v27 }
 0x55c   : > { %v5355_v52 = vmul.f32 1.442695, %v5318_v7 }
 0x55d   : > { %v5231_v44 = vpop.xlane.xlu0 %5230 }
 0x55e   : > { %17802 = vpow2.f32 %v5355_v52  ;;  %v5317_v61 = vsub.f32 %v19456_v37, %v5231_v44 }
 0x560   : > { %v19634_v4 = vpop.eup %17798  ;;  %v5353_v46 = vmul.f32 1.442695, %v5317_v61 }
 0x561   : > { %v19636_v56 = vpop.eup %17800  ;;  %v5412_v33 = vsel %vm1984_vm3, %v19634_v4, 0.0 }
 0x562   : > { %17804 = vpow2.f32 %v5353_v46  ;;  %5413 = vadd.xlane.f32.xlu0 %v5412_v33  ;;  %v5409_v49 = vsel %vm1984_vm3, %v19636_v56, 0.0 }
 0x563   : > { %5410 = vadd.xlane.f32.xlu1 %v5409_v49 }
 0x568   : > { %v19642_v27 = vpop.eup %17802 }
 0x569   : > { %v5424_v36 = vsel %vm1984_vm3, %v19642_v27, 0.0 }
 0x56a   : > { %5425 = vadd.xlane.f32.xlu0 %v5424_v36  ;;  %v5246_v59 = vpop.xlane.xlu0 %5245 }
 0x56b   : > { %v5322_v57 = vsub.f32 %v19464_v30, %v5246_v59 }
 0x56c   : > { %v19647_v8 = vpop.eup %17804 }
 0x56d   : > { %v5363_v16 = vmul.f32 1.442695, %v5322_v57  ;;  %v5421_v37 = vsel %vm1984_vm3, %v19647_v8, 0.0 }
 0x56e   : > { %5422 = vadd.xlane.f32.xlu0 %v5421_v37  ;;  %v5243_v44 = vpop.xlane.xlu0 %5242 }
 0x56f   : > { %17806 = vpow2.f32 %v5363_v16  ;;  %v5321_v18 = vsub.f32 %v19466_v6, %v5243_v44 }
 0x571   : > { %v5361_v52 = vmul.f32 1.442695, %v5321_v18 }
 0x573   : > { %17808 = vpow2.f32 %v5361_v52 }
 0x579   : > { %v19652_v46 = vpop.eup %17806 }
 0x57a   : > { %v5436_v60 = vsel %vm1984_vm3, %v19652_v46, 0.0 }
 0x57b   : > { %5437 = vadd.xlane.f32.xlu0 %v5436_v60 }
 0x57d   : > { %v19656_v30 = vpop.eup %17808 }
 0x57e   : > { %v5433_v7 = vsel %vm1984_vm3, %v19656_v30, 0.0 }
 0x57f   : > { %5434 = vadd.xlane.f32.xlu0 %v5433_v7 }
 0x5a1   : > { %v5228_v61 = vpop.xlane.xlu1 %5227 }
 0x5a2   : > { %v5316_v33 = vsub.f32 %v19492_v32, %v5228_v61  ;;  %v5225_v49 = vpop.xlane.xlu0 %5224 }
 0x5a3   : > { %v5315_v6 = vsub.f32 %v19496_v26, %v5225_v49 }
 0x5a4   : > { %v5351_v36 = vmul.f32 1.442695, %v5316_v33 }
 0x5a5   : > { %v5349_v59 = vmul.f32 1.442695, %v5315_v6 }
 0x5a6   : > { %17810 = vpow2.f32 %v5351_v36  ;;  %v5258_v57 = vpop.xlane.xlu0 %5257 }
 0x5a7   : > { %v5326_v16 = vsub.f32 %v19478_v9, %v5258_v57  ;;  %17812 = vpow2.f32 %v5349_v59 }
 0x5a9   : > { %v5371_v37 = vmul.f32 1.442695, %v5326_v16  ;;  %v5240_v44 = vpop.xlane.xlu1 %5239 }
 0x5aa   : > { %v5320_v18 = vsub.f32 %v19508_v50, %v5240_v44  ;;  %v5255_v52 = vpop.xlane.xlu0 %5254 }
 0x5ab   : > { %17814 = vpow2.f32 %v5371_v37  ;;  %v5325_v60 = vsub.f32 %v19480_v54, %v5255_v52 }
 0x5ac   : > { %v5359_v7 = vmul.f32 1.442695, %v5320_v18 }
 0x5ad   : > { %v5369_v32 = vmul.f32 1.442695, %v5325_v60  ;;  %v5237_v61 = vpop.xlane.xlu1 %5236 }
 0x5ae   : > { %17816 = vpow2.f32 %v5359_v7  ;;  %v5319_v26 = vsub.f32 %v19510_v14, %v5237_v61  ;;  %v5270_v33 = vpop.xlane.xlu0 %5269 }
 0x5af   : > { %17818 = vpow2.f32 %v5369_v32  ;;  %v5330_v49 = vsub.f32 %v19490_v47, %v5270_v33 }
 0x5b0   : > { %v19667_v9 = vpop.eup %17810  ;;  %v5357_v6 = vmul.f32 1.442695, %v5319_v26 }
 0x5b1   : > { %v5379_v36 = vmul.f32 1.442695, %v5330_v49  ;;  %v5252_v59 = vpop.xlane.xlu1 %5251  ;;  %v5418_v50 = vsel %vm1984_vm3, %v19667_v9, 0.0  ;;  %v19671_v57 = vpop.eup %17812 }
 0x5b2   : > { %17820 = vpow2.f32 %v5357_v6  ;;  %v5324_v54 = vsub.f32 %v19528_v22, %v5252_v59  ;;  %v5267_v16 = vpop.xlane.xlu0 %5266  ;;  %5419 = vadd.xlane.f32.xlu1 %v5418_v50  ;;  %v5415_v52 = vsel %vm1984_vm3, %v19671_v57, 0.0 }
 0x5b3   : > { %17822 = vpow2.f32 %v5379_v36  ;;  %v5329_v14 = vsub.f32 %v19494_v28, %v5267_v16 }
 0x5b4   : > { %v5367_v37 = vmul.f32 1.442695, %v5324_v54 }
 0x5b5   : > { %v19675_v47 = vpop.eup %17814  ;;  %v5377_v44 = vmul.f32 1.442695, %v5329_v14  ;;  %v5249_v18 = vpop.xlane.xlu1 %5248 }
 0x5b6   : > { %17824 = vpow2.f32 %v5367_v37  ;;  %v5323_v60 = vsub.f32 %v19532_v11, %v5249_v18  ;;  %v5282_v7 = vpop.xlane.xlu0 %5281  ;;  %5416 = vadd.xlane.f32.xlu1 %v5415_v52  ;;  %v5448_v22 = vsel %vm1984_vm3, %v19675_v47, 0.0 }
 0x5b7   : > { %17826 = vpow2.f32 %v5377_v44  ;;  %v5334_v32 = vsub.f32 %v19518_v58, %v5282_v7  ;;  %5449 = vadd.xlane.f32.xlu0 %v5448_v22 }
 0x5b8   : > { %v19683_v28 = vpop.eup %17816  ;;  %v5365_v61 = vmul.f32 1.442695, %v5323_v60 }
 0x5b9   : > { %v19685_v26 = vpop.eup %17818  ;;  %v5387_v33 = vmul.f32 1.442695, %v5334_v32  ;;  %v5264_v49 = vpop.xlane.xlu1 %5263  ;;  %v5430_v6 = vsel %vm1984_vm3, %v19683_v28, 0.0 }
 0x5ba   : > { %17828 = vpow2.f32 %v5365_v61  ;;  %v5328_v11 = vsub.f32 %v19552_v51, %v5264_v49  ;;  %v5279_v36 = vpop.xlane.xlu0 %5278  ;;  %5431 = vadd.xlane.f32.xlu1 %v5430_v6  ;;  %v5445_v59 = vsel %vm1984_vm3, %v19685_v26, 0.0 }
 0x5bb   : > { %17830 = vpow2.f32 %v5387_v33  ;;  %v5333_v58 = vsub.f32 %v19522_v31, %v5279_v36  ;;  %5446 = vadd.xlane.f32.xlu0 %v5445_v59 }
 0x5bc   : > { %v19693_v50 = vpop.eup %17820  ;;  %v5375_v54 = vmul.f32 1.442695, %v5328_v11 }
 0x5bd   : > { %v19695_v16 = vpop.eup %17822  ;;  %v5385_v14 = vmul.f32 1.442695, %v5333_v58  ;;  %v5261_v37 = vpop.xlane.xlu1 %5260  ;;  %v5427_v44 = vsel %vm1984_vm3, %v19693_v50, 0.0 }
 0x5be   : > { %17832 = vpow2.f32 %v5375_v54  ;;  %v5327_v51 = vsub.f32 %v19554_v42, %v5261_v37  ;;  %v5294_v18 = vpop.xlane.xlu0 %5293  ;;  %5428 = vadd.xlane.f32.xlu1 %v5427_v44  ;;  %v5460_v52 = vsel %vm1984_vm3, %v19695_v16, 0.0 }
 0x5bf   : > { %17834 = vpow2.f32 %v5385_v14  ;;  %v5338_v31 = vsub.f32 %v19540_v29, %v5294_v18  ;;  %5461 = vadd.xlane.f32.xlu0 %v5460_v52 }
 0x5c0   : > { %v19703_v60 = vpop.eup %17824  ;;  %v5373_v7 = vmul.f32 1.442695, %v5327_v51 }
 0x5c1   : > { %v19705_v22 = vpop.eup %17826  ;;  %v5395_v32 = vmul.f32 1.442695, %v5338_v31  ;;  %v5276_v61 = vpop.xlane.xlu1 %5275  ;;  %v5442_v33 = vsel %vm1984_vm3, %v19703_v60, 0.0 }
 0x5c2   : > { %17836 = vpow2.f32 %v5373_v7  ;;  %v5332_v42 = vsub.f32 %v19568_v39, %v5276_v61  ;;  %v5291_v49 = vpop.xlane.xlu0 %5290  ;;  %5443 = vadd.xlane.f32.xlu1 %v5442_v33  ;;  %v5457_v6 = vsel %vm1984_vm3, %v19705_v22, 0.0 }
 0x5c3   : > { %17838 = vpow2.f32 %v5395_v32  ;;  %v5337_v29 = vsub.f32 %v19542_v45, %v5291_v49  ;;  %5458 = vadd.xlane.f32.xlu0 %v5457_v6 }
 0x5c4   : > { %v19713_v11 = vpop.eup %17828  ;;  %v5383_v36 = vmul.f32 1.442695, %v5332_v42 }
 0x5c5   : > { %v19715_v59 = vpop.eup %17830  ;;  %v5393_v58 = vmul.f32 1.442695, %v5337_v29  ;;  %v5273_v54 = vpop.xlane.xlu1 %5272  ;;  %v5439_v14 = vsel %vm1984_vm3, %v19713_v11, 0.0 }
 0x5c6   : > { %17840 = vpow2.f32 %v5383_v36  ;;  %v5331_v39 = vsub.f32 %v19570_v34, %v5273_v54  ;;  %v5306_v37 = vpop.xlane.xlu0 %5305  ;;  %5440 = vadd.xlane.f32.xlu1 %v5439_v14  ;;  %v5472_v44 = vsel %vm1984_vm3, %v19715_v59, 0.0 }
 0x5c7   : > { %17842 = vpow2.f32 %v5393_v58  ;;  %v5342_v45 = vsub.f32 %v19576_v12, %v5306_v37  ;;  %5473 = vadd.xlane.f32.xlu0 %v5472_v44 }
 0x5c8   : > { %v19723_v51 = vpop.eup %17832  ;;  %v5381_v18 = vmul.f32 1.442695, %v5331_v39 }
 0x5c9   : > { %v19725_v52 = vpop.eup %17834  ;;  %v5403_v31 = vmul.f32 1.442695, %v5342_v45  ;;  %v5303_v7 = vpop.xlane.xlu1 %5302  ;;  %v5454_v32 = vsel %vm1984_vm3, %v19723_v51, 0.0 }
 0x5ca   : > { %17844 = vpow2.f32 %v5381_v18  ;;  %v5341_v34 = vsub.f32 %v19580_v2, %v5303_v7  ;;  %5455 = vadd.xlane.f32.xlu1 %v5454_v32  ;;  %v5469_v61 = vsel %vm1984_vm3, %v19725_v52, 0.0 }
 0x5cb   : > { %17846 = vpow2.f32 %v5403_v31  ;;  %5470 = vadd.xlane.f32.xlu0 %v5469_v61 }
 0x5cc   : > { %v19732_v12 = vpop.eup %17836  ;;  %v5401_v33 = vmul.f32 1.442695, %v5341_v34 }
 0x5cd   : > { %v19734_v42 = vpop.eup %17838  ;;  %v5288_v49 = vpop.xlane.xlu1 %5287  ;;  %v5451_v6 = vsel %vm1984_vm3, %v19732_v12, 0.0 }
 0x5ce   : > { %17848 = vpow2.f32 %v5401_v33  ;;  %v5336_v29 = vsub.f32 %v19588_v38, %v5288_v49  ;;  %5452 = vadd.xlane.f32.xlu1 %v5451_v6  ;;  %v5484_v2 = vsel %vm1984_vm3, %v19734_v42, 0.0 }
 0x5cf   : > { %5485 = vadd.xlane.f32.xlu0 %v5484_v2 }
 0x5d0   : > { %v19741_v36 = vpop.eup %17840  ;;  %v5391_v58 = vmul.f32 1.442695, %v5336_v29 }
 0x5d1   : > { %v19743_v54 = vpop.eup %17842  ;;  %v5285_v14 = vpop.xlane.xlu1 %5284  ;;  %v5466_v37 = vsel %vm1984_vm3, %v19741_v36, 0.0 }
 0x5d2   : > { %v5300_v39 = vpop.xlane.xlu0 %5299  ;;  %17850 = vpow2.f32 %v5391_v58  ;;  %v5335_v44 = vsub.f32 %v19592_v20, %v5285_v14  ;;  %5467 = vadd.xlane.f32.xlu1 %v5466_v37  ;;  %v5481_v45 = vsel %vm1984_vm3, %v19743_v54, 0.0 }
 0x5d3   : > { %v5340_v38 = vsub.f32 %v19604_v1, %v5300_v39  ;;  %5482 = vadd.xlane.f32.xlu0 %v5481_v45 }
 0x5d4   : > { %v19751_v18 = vpop.eup %17844  ;;  %v5389_v31 = vmul.f32 1.442695, %v5335_v44 }
 0x5d5   : > { %v5399_v7 = vmul.f32 1.442695, %v5340_v38  ;;  %v19753_v32 = vpop.eup %17846  ;;  %v5463_v34 = vsel %vm1984_vm3, %v19751_v18, 0.0  ;;  %v5297_v14 = vpop.xlane.xlu1 %5296 }
 0x5d6   : > { %17852 = vpow2.f32 %v5389_v31  ;;  %5464 = vadd.xlane.f32.xlu1 %v5463_v34  ;;  %v5496_v20 = vsel %vm1984_vm3, %v19753_v32, 0.0  ;;  %v5339_v31 = vsub.f32 %v19606_v23, %v5297_v14 }
 0x5d7   : > { %5497 = vadd.xlane.f32.xlu0 %v5496_v20  ;;  %17854 = vpow2.f32 %v5399_v7  ;;  %v17294_v20 = vunpack.i.h.bf16 %v19486_v0 }
 0x5d8   : > { %v19759_v1 = vpop.eup %17848 }
 0x5d9   : > { %v5493_v61 = vsel %vm1984_vm3, %v19759_v1, 0.0  ;;  %v5312_v39 = vpop.xlane.xlu0 %5311 }
 0x5da   : > { %5494 = vadd.xlane.f32.xlu1 %v5493_v61  ;;  %v5309_v37 = vpop.xlane.xlu1 %5308  ;;  %v17293_v61 = vunpack.i.l.bf16 %v19486_v0  ;;  %v5344_v0 = vsub.f32 %v19618_v24, %v5312_v39 }
 0x5dc   : > { %v19763_v33 = vpop.eup %17850  ;;  %v16628_v23 = vpack.c.bf16 %v17294_v20, %v17293_v61  ;;  %v17314_v61 = vunpack.i.h.bf16 %v19474_v53 }
 0x5dd   : > { %v5478_v49 = vsel %vm1984_vm3, %v19763_v33, 0.0 }
 0x5de   : > { %5479 = vadd.xlane.f32.xlu0 %v5478_v49 }
 0x5e0   : > { %v19767_v6 = vpop.eup %17852 }
 0x5e1   : > { %v5475_v29 = vsel %vm1984_vm3, %v19767_v6, 0.0  ;;  %v19771_v2 = vpop.eup %17854 }
 0x5e2   : > { %5476 = vadd.xlane.f32.xlu0 %v5475_v29  ;;  %v5490_v58 = vsel %vm1984_vm3, %v19771_v2, 0.0 }
 0x5e6   : > { %5491 = vadd.xlane.f32.xlu0 %v5490_v58  ;;  %v5397_v58 = vmul.f32 1.442695, %v5339_v31  ;;  %v5407_v31 = vmul.f32 1.442695, %v5344_v0 }
 0x5eb   : > { %7486 = vrot.lane.b32.xlu1 %v18401_v63, %s18196_s10 }
 0x5ef   : > { %v5414_v44 = vpop.xlane.xlu0 %5413 }
 0x5f0   : > { %17856 = vrcp.f32 %v5414_v44  ;;  %v5411_v38 = vpop.xlane.xlu1 %5410 }
 0x5f1   : > { %17858 = vrcp.f32 %v5411_v38 }
 0x5f7   : > { %v5426_v45 = vpop.xlane.xlu0 %5425 }
 0x5f8   : > { %17860 = vrcp.f32 %v5426_v45  ;;  %v17304_v45 = vunpack.i.h.bf16 %v19520_v21 }
 0x5fa   : > { %v17857_v7 = vpop.eup %17856 }
 0x5fb   : > { %v17859_v34 = vpop.eup %17858  ;;  %v5423_v49 = vpop.xlane.xlu0 %5422  ;;  %v5538_v44 = vmul.f32 %v17857_v7, %v19634_v4 }
 0x5fc   : > { %17862 = vrcp.f32 %v5423_v49  ;;  %17381 = vrot.lane.b32.xlu0 %v18443_v13, %s18195_s9  ;;  %v5537_v29 = vmul.f32 %v17859_v34, %v19636_v56  ;;  %v17303_v56 = vunpack.i.l.bf16 %v19520_v21  ;;  %v17313_v49 = vunpack.i.l.bf16 %v19474_v53 }
 0x5fd   : > { %17864 = vpow2.f32 %v5397_v58  ;;  %v5343_v53 = vsub.f32 %v19620_v15, %v5309_v37 }
 0x5fe   : > { %15736 = vmatprep.mubr.msk.f32.mxu0 %vm1984_vm3, %v5537_v29  ;;  %17866 = vpow2.f32 %v5407_v31 }
 0x5ff   : > { %15737 = vmatmul.mubr.msk.f32.vlgmr.msra.gmra.mrb[56].mxu0 %vm1984_vm3, %v5538_v44 }
 0x600   : > { %16623 = vmatpush3.bf16.msra.mxu0 %v19407_v35  ;;  %v16636_v35 = vpack.c.bf16 %v17304_v45, %v17303_v56 }
 0x601   : > { %16629 = vmatprep.subr.bf16.mxu0 %v16628_v23 }
 0x602   : > { %v17861_v14 = vpop.eup %17860 }
 0x603   : > { %v5542_v34 = vmul.f32 %v17861_v14, %v19642_v27 }
 0x606   : > { %v17863_v38 = vpop.eup %17862 }
 0x607   : > { %v5541_v4 = vmul.f32 %v17863_v38, %v19647_v8  ;;  %v19794_v20 = vpop.eup %17864 }
 0x608   : > { %v5438_v7 = vpop.xlane.xlu0 %5437  ;;  %v5487_v21 = vsel %vm1984_vm3, %v19794_v20, 0.0  ;;  %v19798_v8 = vpop.eup %17866 }
 0x609   : > { %15750 = vmatprep.mubr.msk.f32.mxu0 %vm1984_vm3, %v5541_v4  ;;  %17868 = vrcp.f32 %v5438_v7  ;;  %v5502_v44 = vsel %vm1984_vm3, %v19798_v8, 0.0 }
 0x60a   : > { %15751 = vmatmul.mubr.msk.f32.vlgmr.msra.gmra.mrb[58].mxu0 %vm1984_vm3, %v5542_v34  ;;  %v17299_v34 = vunpack.i.h.bf16 %v19504_v25 }
 0x60b   : > { %16631 = vmatpush3.bf16.msra.mxu0 %v16628_v23  ;;  %v19808_v23 = vpack.c.bf16 %v17314_v61, %v17313_v49 }
 0x60c   : > { %16637 = vmatprep.subr.bf16.mxu0 %v16636_v35  ;;  %v5435_v24 = vpop.xlane.xlu0 %5434 }
 0x60d   : > { %17870 = vrcp.f32 %v5435_v24 }
 0x60f   : > { %5488 = vadd.xlane.f32.xlu1 %v5487_v21 }
 0x613   : > { %v17869_v27 = vpop.eup %17868 }
 0x614   : > { %v5546_v58 = vmul.f32 %v17869_v27, %v19652_v46  ;;  %v5405_v46 = vmul.f32 1.442695, %v5343_v53 }
 0x616   : > { %17872 = vpow2.f32 %v5405_v46 }
 0x617   : > { %v17871_v39 = vpop.eup %17870 }
 0x618   : > { %v5545_v29 = vmul.f32 %v17871_v39, %v19656_v30 }
 0x61a   : > { %15764 = vmatprep.mubr.msk.f32.mxu0 %vm1984_vm3, %v5545_v29 }
 0x61b   : > { %5503 = vadd.xlane.f32.xlu0 %v5502_v44  ;;  %15765 = vmatmul.mubr.msk.f32.vlgmr.msra.gmra.mrb[60].mxu0 %vm1984_vm3, %v5546_v58  ;;  %v17323_v58 = vunpack.i.l.bf16 %v19536_v41 }
 0x61c   : > { %16639 = vmatpush3.bf16.msra.mxu0 %v16636_v35  ;;  %v17298_v35 = vunpack.i.l.bf16 %v19504_v25  ;;  %v17324_v25 = vunpack.i.h.bf16 %v19536_v41  ;;  %v22128_v41 = vld [vmem:[#allocation41_spill] sm:$0xff] }
 0x61d   : > { %16645 = vmatprep.subr.bf16.mxu0 %v19808_v23 }
 0x61e   : > { %v16632_v49 = vpack.c.bf16 %v17299_v34, %v17298_v35  ;;  %v22130_v35 = vld [vmem:[#allocation31_spill] sm:$0xff] }
 0x620   : > { %17386 = vrot.lane.b32.xlu1 %v18461_v19, %s18195_s9  ;;  %v19822_v0 = vpop.eup %17872 }
 0x621   : > { %v5499_v37 = vsel %vm1984_vm3, %v19822_v0, 0.0 }
 0x631   : > { %7488 = vrot.lane.b32.xlu0 %v18399_v62, %s18196_s10 }
 0x635   : > { %7577 = vrot.lane.b32.xlu0 %v18419_v5, %s18196_s10 }
 0x639   : > { %17391 = vrot.lane.b32.xlu0 %v18341_v43, %s18195_s9 }
 0x63d   : > { %7670 = vrot.lane.b32.xlu0 %v18435_v10, %s18196_s10 }
 0x63f   : > { %v5420_v30 = vpop.xlane.xlu1 %5419 }
 0x640   : > { %17874 = vrcp.f32 %v5420_v30  ;;  %v22126_v30 = vld [vmem:[#allocation14_spill] sm:$0xff] }
 0x641   : > { %7759 = vrot.lane.b32.xlu0 %v18455_v17, %s18196_s10 }
 0x643   : > { %v5417_v15 = vpop.xlane.xlu1 %5416 }
 0x644   : > { %17876 = vrcp.f32 %v5417_v15  ;;  %v5450_v14 = vpop.xlane.xlu0 %5449  ;;  %5500 = vadd.xlane.f32.xlu1 %v5499_v37  ;;  %v22127_v15 = vld [vmem:[#allocation26_spill] sm:$0xff] }
 0x645   : > { %17401 = vrot.lane.b32.xlu0 %v18377_v55, %s18195_s9  ;;  %17878 = vrcp.f32 %v5450_v14 }
 0x647   : > { %v5432_v38 = vpop.xlane.xlu1 %5431 }
 0x648   : > { %v5447_v45 = vpop.xlane.xlu0 %5446 }
 0x649   : > { %17880 = vrcp.f32 %v5447_v45  ;;  %7852 = vrot.lane.b32.xlu0 %v18327_v40, %s18196_s10  ;;  %v17308_v45 = vunpack.i.l.bf16 %v22128_v41 }
 0x64a   : > { %17882 = vrcp.f32 %v5432_v38  ;;  %v17875_v4 = vpop.eup %17874  ;;  %v17309_v38 = vunpack.i.h.bf16 %v22128_v41 }
 0x64b   : > { %v5429_v56 = vpop.xlane.xlu1 %5428  ;;  %v5540_v39 = vmul.f32 %v17875_v4, %v19667_v9 }
 0x64c   : > { %17884 = vrcp.f32 %v5429_v56  ;;  %v5462_v31 = vpop.xlane.xlu0 %5461 }
 0x64d   : > { %7941 = vrot.lane.b32.xlu0 %v18355_v48, %s18196_s10  ;;  %17886 = vrcp.f32 %v5462_v31 }
 0x64e   : > { %v17877_v7 = vpop.eup %17876 }
 0x64f   : > { %v5444_v24 = vpop.xlane.xlu1 %5443  ;;  %v5539_v21 = vmul.f32 %v17877_v7, %v19671_v57  ;;  %v17879_v61 = vpop.eup %17878  ;;  %v22125_v57 = vld [vmem:[#allocation51_spill] sm:$0xff] }
 0x650   : > { %v5459_v27 = vpop.xlane.xlu0 %5458  ;;  %v5550_v37 = vmul.f32 %v17879_v61, %v19675_v47  ;;  %v22129_v47 = vld [vmem:[#allocation21_spill] sm:$0xff] }
 0x651   : > { %17888 = vrcp.f32 %v5459_v27  ;;  %17411 = vrot.lane.b32.xlu0 %v18413_v3, %s18195_s9  ;;  %15743 = vmatprep.mubr.msk.f32.mxu1 %vm1984_vm3, %v5539_v21  ;;  %v22131_v21 = vld [vmem:[#allocation44_spill] sm:$0xff] }
 0x652   : > { %15744 = vmatmul.mubr.msk.f32.vlgmr.msra.gmra.mrb[72].mxu1 %vm1984_vm3, %v5540_v39  ;;  %17890 = vrcp.f32 %v5444_v24  ;;  %v17333_v27 = vunpack.i.l.bf16 %v22131_v21 }
 0x653   : > { %v17881_v29 = vpop.eup %17880  ;;  %16627 = vmatpush3.bf16.msra.mxu1 %v22125_v57  ;;  %v5441_v44 = vpop.xlane.xlu1 %5440 }
 0x654   : > { %16633 = vmatprep.subr.bf16.mxu1 %v16632_v49  ;;  %17892 = vrcp.f32 %v5441_v44  ;;  %v5474_v9 = vpop.xlane.xlu0 %5473  ;;  %v5549_v53 = vmul.f32 %v17881_v29, %v19685_v26  ;;  %v17883_v46 = vpop.eup %17882  ;;  %v16652_v26 = vpack.c.bf16 %v17324_v25, %v17323_v58  ;;  %v22132_v25 = vld [vmem:[#allocation25_spill] sm:$0xff]  ;;  %v22133_v44 = vld [vmem:[#allocation11_spill] sm:$0xff] }
 0x655   : > { %8034 = vrot.lane.b32.xlu0 %v22126_v30, %s18196_s10  ;;  %7579 = vrot.lane.b32.xlu1 %v22127_v15, %s18196_s10  ;;  %17894 = vrcp.f32 %v5474_v9  ;;  %v5544_v7 = vmul.f32 %v17883_v46, %v19683_v28  ;;  %v22134_v9 = vld [vmem:[#allocation42_spill] sm:$0xff] }
 0x656   : > { %v17885_v14 = vpop.eup %17884  ;;  %15778 = vmatprep.mubr.msk.f32.mxu0 %vm1984_vm3, %v5549_v53  ;;  %v17319_v53 = vunpack.i.h.bf16 %v22134_v9 }
 0x657   : > { %15779 = vmatmul.mubr.msk.f32.vlgmr.msra.gmra.mrb[62].mxu0 %vm1984_vm3, %v5550_v37  ;;  %v5456_v56 = vpop.xlane.xlu1 %5455  ;;  %v5543_v31 = vmul.f32 %v17885_v14, %v19693_v50  ;;  %v17887_v34 = vpop.eup %17886  ;;  %v17334_v50 = vunpack.i.h.bf16 %v22131_v21  ;;  %v22138_v21 = vld [vmem:[#allocation38_spill] sm:$0xff] }
 0x658   : > { %16647 = vmatpush3.bf16.msra.mxu0 %v19808_v23  ;;  %v5471_v4 = vpop.xlane.xlu0 %5470  ;;  %v16640_v23 = vpack.c.bf16 %v17309_v38, %v17308_v45  ;;  %v5554_v58 = vmul.f32 %v17887_v34, %v19695_v16  ;;  %v22135_v16 = vld [vmem:[#allocation23_spill] sm:$0xff] }
 0x659   : > { %17896 = vrcp.f32 %v5471_v4  ;;  %16653 = vmatprep.subr.bf16.mxu0 %v16652_v26  ;;  %8123 = vrot.lane.b32.xlu0 %v22129_v47, %s18196_s10  ;;  %v16660_v46 = vpack.c.bf16 %v17334_v50, %v17333_v27  ;;  %v22136_v45 = vld [vmem:[#allocation35_spill] sm:$0xff] }
 0x65a   : > { %7668 = vrot.lane.b32.xlu1 %v22130_v35, %s18196_s10  ;;  %15757 = vmatprep.mubr.msk.f32.mxu1 %vm1984_vm3, %v5543_v31  ;;  %17898 = vrcp.f32 %v5456_v56  ;;  %v22137_v31 = vld [vmem:[#allocation43_spill] sm:$0xff] }
 0x65b   : > { %v17889_v24 = vpop.eup %17888  ;;  %15758 = vmatmul.mubr.msk.f32.vlgmr.msra.gmra.mrb[74].mxu1 %vm1984_vm3, %v5544_v7  ;;  %v5453_v39 = vpop.xlane.xlu1 %5452  ;;  %v17344_v4 = vunpack.i.h.bf16 %v22137_v31 }
 0x65c   : > { %16635 = vmatpush3.bf16.msra.mxu1 %v16632_v49  ;;  %17900 = vrcp.f32 %v5453_v39  ;;  %v5486_v61 = vpop.xlane.xlu0 %5485  ;;  %v5553_v28 = vmul.f32 %v17889_v24, %v19705_v22  ;;  %v17891_v29 = vpop.eup %17890  ;;  %v17318_v49 = vunpack.i.l.bf16 %v22134_v9  ;;  %v22139_v39 = vld [vmem:[#allocation40_spill] sm:$0xff] }
 0x65d   : > { %16641 = vmatprep.subr.bf16.mxu1 %v16640_v23  ;;  %8214 = vrot.lane.b32.xlu0 %v22132_v25, %s18196_s10  ;;  %17902 = vrcp.f32 %v5486_v61  ;;  %v5548_v41 = vmul.f32 %v17891_v29, %v19703_v60  ;;  %v17329_v61 = vunpack.i.h.bf16 %v22139_v39 }
 0x65e   : > { %v17893_v57 = vpop.eup %17892  ;;  %17396 = vrot.lane.b32.xlu1 %v22133_v44, %s18195_s9  ;;  %15792 = vmatprep.mubr.msk.f32.mxu0 %vm1984_vm3, %v5553_v28  ;;  %v22140_v28 = vld [vmem:[#allocation6_spill] sm:$0xff] }
 0x65f   : > { %15793 = vmatmul.mubr.msk.f32.vlgmr.msra.gmra.mrb[64].mxu0 %vm1984_vm3, %v5554_v58  ;;  %v5468_v22 = vpop.xlane.xlu1 %5467  ;;  %v5547_v37 = vmul.f32 %v17893_v57, %v19713_v11  ;;  %v17895_v38 = vpop.eup %17894  ;;  %v17343_v11 = vunpack.i.l.bf16 %v22137_v31 }
 0x660   : > { %16655 = vmatpush3.bf16.msra.mxu0 %v16652_v26  ;;  %v5483_v14 = vpop.xlane.xlu0 %5482  ;;  %v16648_v26 = vpack.c.bf16 %v17319_v53, %v17318_v49  ;;  %v5558_v50 = vmul.f32 %v17895_v38, %v19715_v59  ;;  %v22141_v59 = vld [vmem:[#allocation33_spill] sm:$0xff]  ;;  %v22142_v53 = vld [vmem:[#allocation55_spill] sm:$0xff] }
 0x661   : > { %17904 = vrcp.f32 %v5483_v14  ;;  %16661 = vmatprep.subr.bf16.mxu0 %v16660_v46  ;;  %8216 = vrot.lane.b32.xlu0 %v22135_v16, %s18196_s10  ;;  %v16668_v29 = vpack.c.bf16 %v17344_v4, %v17343_v11  ;;  %v17354_v49 = vunpack.i.h.bf16 %v22142_v53  ;;  %v22145_v11 = vld [vmem:[#allocation9_spill] sm:$0xff] }
 0x662   : > { %7761 = vrot.lane.b32.xlu1 %v22136_v45, %s18196_s10  ;;  %15771 = vmatprep.mubr.msk.f32.mxu1 %vm1984_vm3, %v5547_v37  ;;  %17906 = vrcp.f32 %v5468_v22  ;;  %v17353_v22 = vunpack.i.l.bf16 %v22142_v53  ;;  %v22143_v37 = vld [vmem:[#allocation22_spill] sm:$0xff] }
 0x663   : > { %v17897_v56 = vpop.eup %17896  ;;  %15772 = vmatmul.mubr.msk.f32.vlgmr.msra.gmra.mrb[76].mxu1 %vm1984_vm3, %v5548_v41  ;;  %v5465_v7 = vpop.xlane.xlu1 %5464 }
 0x664   : > { %16643 = vmatpush3.bf16.msra.mxu1 %v16640_v23  ;;  %17908 = vrcp.f32 %v5465_v7  ;;  %v5498_v34 = vpop.xlane.xlu0 %5497  ;;  %v5557_v60 = vmul.f32 %v17897_v56, %v19725_v52  ;;  %v17899_v24 = vpop.eup %17898  ;;  %v17328_v23 = vunpack.i.l.bf16 %v22139_v39  ;;  %v16676_v4 = vpack.c.bf16 %v17354_v49, %v17353_v22  ;;  %v22146_v7 = vld [vmem:[#allocation53_spill] sm:$0xff]  ;;  %v22154_v22 = vld [vmem:[#allocation28_spill] sm:$0xff] }
 0x665   : > { %16649 = vmatprep.subr.bf16.mxu1 %v16648_v26  ;;  %17426 = vrot.lane.b32.xlu0 %v22138_v21, %s18195_s9  ;;  %17910 = vrcp.f32 %v5498_v34  ;;  %v5552_v57 = vmul.f32 %v17899_v24, %v19723_v51  ;;  %v22144_v51 = vld [vmem:[#allocation37_spill] sm:$0xff]  ;;  %v17339_v34 = vunpack.i.h.bf16 %v22146_v7 }
 0x666   : > { %v17901_v27 = vpop.eup %17900  ;;  %7850 = vrot.lane.b32.xlu1 %v22140_v28, %s18196_s10  ;;  %15806 = vmatprep.mubr.msk.f32.mxu0 %vm1984_vm3, %v5557_v60 }
 0x667   : > { %15807 = vmatmul.mubr.msk.f32.vlgmr.msra.gmra.mrb[66].mxu0 %vm1984_vm3, %v5558_v50  ;;  %v5495_v52 = vpop.xlane.xlu1 %5494  ;;  %v5551_v58 = vmul.f32 %v17901_v27, %v19732_v12  ;;  %v17903_v9 = vpop.eup %17902  ;;  %v22148_v50 = vld [vmem:[#allocation15_spill] sm:$0xff] }
 0x668   : > { %16663 = vmatpush3.bf16.msra.mxu0 %v16660_v46  ;;  %17912 = vrcp.f32 %v5495_v52  ;;  %v16656_v46 = vpack.c.bf16 %v17329_v61, %v17328_v23  ;;  %v5562_v56 = vmul.f32 %v17903_v9, %v19734_v42  ;;  %v22149_v61 = vld [vmem:[#allocation16_spill] sm:$0xff]  ;;  %v22150_v52 = vld [vmem:[#allocation47_spill] sm:$0xff]  ;;  %v22152_v9 = vld [vmem:[#allocation30_spill] sm:$0xff] }
 0x669   : > { %16669 = vmatprep.subr.bf16.mxu0 %v16668_v29  ;;  %8396 = vrot.lane.b32.xlu0 %v22141_v59, %s18196_s10 }
 0x66a   : > { %17406 = vrot.lane.b32.xlu1 %v22143_v37, %s18195_s9  ;;  %15785 = vmatprep.mubr.msk.f32.mxu1 %vm1984_vm3, %v5551_v58  ;;  %v17363_v58 = vunpack.i.l.bf16 %v22150_v52 }
 0x66b   : > { %v17905_v14 = vpop.eup %17904  ;;  %15786 = vmatmul.mubr.msk.f32.vlgmr.msra.gmra.mrb[78].mxu1 %vm1984_vm3, %v5552_v57  ;;  %v5480_v12 = vpop.xlane.xlu0 %5479  ;;  %v22151_v57 = vld [vmem:[#allocation24_spill] sm:$0xff] }
 0x66c   : > { %16651 = vmatpush3.bf16.msra.mxu1 %v16648_v26  ;;  %v5561_v41 = vmul.f32 %v17905_v14, %v19743_v54  ;;  %v17907_v38 = vpop.eup %17906  ;;  %v17338_v26 = vunpack.i.l.bf16 %v22146_v7  ;;  %17914 = vrcp.f32 %v5480_v12 }
 0x66d   : > { %16657 = vmatprep.subr.bf16.mxu1 %v16656_v46  ;;  %8487 = vrot.lane.b32.xlu0 %v22144_v51, %s18196_s10  ;;  %v5556_v27 = vmul.f32 %v17907_v38, %v19741_v36 }
 0x66e   : > { %v17909_v31 = vpop.eup %17908  ;;  %7943 = vrot.lane.b32.xlu1 %v22145_v11, %s18196_s10  ;;  %15820 = vmatprep.mubr.msk.f32.mxu0 %vm1984_vm3, %v5561_v41  ;;  %v22156_v41 = vld [vmem:[#allocation19_spill] sm:$0xff] }
 0x66f   : > { %v5477_v54 = vpop.xlane.xlu0 %5476  ;;  %15821 = vmatmul.mubr.msk.f32.vlgmr.msra.gmra.mrb[68].mxu0 %vm1984_vm3, %v5562_v56  ;;  %v5555_v60 = vmul.f32 %v17909_v31, %v19751_v18  ;;  %v17911_v42 = vpop.eup %17910  ;;  %v16664_v18 = vpack.c.bf16 %v17339_v34, %v17338_v26  ;;  %v22158_v26 = vld [vmem:[#allocation34_spill] sm:$0xff] }
 0x670   : > { %17916 = vrcp.f32 %v5477_v54  ;;  %16671 = vmatpush3.bf16.msra.mxu0 %v16668_v29  ;;  %v17364_v29 = vunpack.i.h.bf16 %v22150_v52  ;;  %v5566_v36 = vmul.f32 %v17911_v42, %v19753_v32  ;;  %v22155_v32 = vld [vmem:[#allocation45_spill] sm:$0xff]  ;;  %v22163_v52 = vld [vmem:[#allocation27_spill] sm:$0xff] }
 0x671   : > { %16678 = vmatprep.subr.msk.bf16.mxu0 %vm18547_vm2, %v16676_v4  ;;  %17441 = vrot.lane.b32.xlu0 %v22148_v50, %s18197_s11  ;;  %v17349_v12 = vunpack.i.h.bf16 %v22155_v32 }
 0x672   : > { %v17913_v39 = vpop.eup %17912  ;;  %8032 = vrot.lane.b32.xlu1 %v22149_v61, %s18196_s10  ;;  %15799 = vmatprep.mubr.msk.f32.mxu1 %vm1984_vm3, %v5555_v60  ;;  %v16688_v53 = vpack.c.bf16 %v17364_v29, %v17363_v58  ;;  %v22160_v60 = vld [vmem:[#allocation46_spill] sm:$0xff]  ;;  %v7487_v29 = vpop.permute.xlu1 %7486  ;;  %v22164_v58 = vld [vmem:[#allocation52_spill] sm:$0xff] }
 0x673   : > { %15800 = vmatmul.mubr.msk.f32.vlgmr.msra.gmra.mrb[80].mxu1 %vm1984_vm3, %v5556_v27  ;;  %v5565_v23 = vmul.f32 %v17913_v39, %v19759_v1  ;;  %v22153_v1 = vld [vmem:[#allocation56_spill] sm:$0xff]  ;;  %v5492_v56 = vpop.xlane.xlu0 %5491  ;;  %v22161_v27 = vld [vmem:[#allocation29_spill] sm:$0xff] }
 0x674   : > { %16659 = vmatpush3.bf16.msra.mxu1 %v16656_v46  ;;  %v17348_v46 = vunpack.i.l.bf16 %v22155_v32  ;;  %v22169_v32 = vld [vmem:[#allocation10_spill] sm:$0xff]  ;;  %17918 = vrcp.f32 %v5492_v56 }
 0x675   : > { %16665 = vmatprep.subr.bf16.mxu1 %v16664_v18  ;;  %17451 = vrot.lane.b32.xlu0 %v22151_v57, %s18197_s11 }
 0x676   : > { %17416 = vrot.lane.b32.xlu1 %v22152_v9, %s18195_s9  ;;  %15834 = vmatprep.mubr.msk.f32.mxu0 %vm1984_vm3, %v5565_v23  ;;  %v17915_v49 = vpop.eup %17914  ;;  %v16672_v54 = vpack.c.bf16 %v17349_v12, %v17348_v46  ;;  %v22162_v23 = vld [vmem:[#allocation5_spill] sm:$0xff]  ;;  %v22170_v12 = vld [vmem:[#allocation12_spill] sm:$0xff] }
 0x677   : > { %15835 = vmatmul.mubr.msk.f32.vlgmr.msra.gmra.mrb[70].mxu0 %vm1984_vm3, %v5566_v36  ;;  %v5560_v31 = vmul.f32 %v17915_v49, %v19763_v33  ;;  %v17382_v42 = vpop.permute.xlu0 %17381  ;;  %v22167_v49 = vld [vmem:[#allocation36_spill] sm:$0xff] }
 0x678   : > { %15848 = vmatprep.mubr.msk.f32.mxu0 %vm565_vm1, %v22153_v1  ;;  %v17384_v39 = vunpack.i.h.bf16 %v17382_v42  ;;  %v22166_v1 = vld [vmem:[#allocation3_spill] sm:$0xff]  ;;  %v22171_v46 = vld [vmem:[#allocation20_spill] sm:$0xff] }
 0x679   : > { %16681 = vmatpush3.bf16.xpose.msk.msra.mxu0 %vm18547_vm2, %v16676_v4  ;;  %17456 = vrot.lane.b32.xlu0 %v22154_v22, %s18197_s11  ;;  %v22157_v4 = vld [vmem:[#allocation48_spill] sm:$0xff] }
 0x67a   : > { %v17917_v14 = vpop.eup %17916  ;;  %8125 = vrot.lane.b32.xlu1 %v22156_v41, %s18196_s10  ;;  %16690 = vmatprep.subr.msk.bf16.mxu0 %vm18547_vm2, %v16688_v53  ;;  %v17374_v7 = vunpack.i.h.bf16 %v22157_v4  ;;  %v17373_v34 = vunpack.i.l.bf16 %v22157_v4 }
 0x67b   : > { %v5559_v38 = vmul.f32 %v17917_v14, %v19767_v6  ;;  %v22159_v6 = vld [vmem:[#allocation58_spill] sm:$0xff]  ;;  %v22168_v14 = vld [vmem:[#allocation8_spill] sm:$0xff] }
 0x67c   : > { %v16700_v33 = vpack.c.bf16 %v17374_v7, %v17373_v34  ;;  %v22173_v34 = vld [vmem:[#allocation57_spill] sm:$0xff] }
 0x67d   : > { %17461 = vrot.lane.b32.xlu0 %v18443_v13, %s18197_s11  ;;  %15813 = vmatprep.mubr.msk.f32.mxu1 %vm1984_vm3, %v5559_v38  ;;  %v17358_v56 = vunpack.i.l.bf16 %v22173_v34 }
 0x67e   : > { %17421 = vrot.lane.b32.xlu1 %v22158_v26, %s18195_s9  ;;  %15814 = vmatmul.mubr.msk.f32.vlgmr.msra.gmra.mrb[82].mxu1 %vm1984_vm3, %v5560_v31  ;;  %v22172_v31 = vld [vmem:[#allocation18_spill] sm:$0xff]  ;;  %v17919_v4 = vpop.eup %17918 }
 0x67f   : > { %16667 = vmatpush3.bf16.msra.mxu1 %v16664_v18  ;;  %v17383_v18 = vunpack.i.l.bf16 %v17382_v42  ;;  %v5564_v42 = vmul.f32 %v17919_v4, %v19771_v2 }
 0x680   : > { %16673 = vmatprep.subr.bf16.mxu1 %v16672_v54  ;;  %15849 = vmatmul.mubr.msk.f32.vlgmr.msra.gmra.mrb[72].mxu0 %vm565_vm1, %v22159_v6  ;;  %v17359_v6 = vunpack.i.h.bf16 %v22173_v34 }
 0x681   : > { %16693 = vmatpush3.bf16.xpose.msk.msra.mxu0 %vm18547_vm2, %v16688_v53  ;;  %15862 = vmatprep.mubr.msk.f32.mxu0 %vm565_vm1, %v22160_v60  ;;  %v16712_v36 = vpack.c.bf16 %v17384_v39, %v17383_v18  ;;  %v22165_v53 = vld [vmem:[#allocation32_spill] sm:$0xff] }
 0x682   : > { %17481 = vrot.lane.b32.xlu0 %v18377_v55, %s18197_s11  ;;  %8305 = vrot.lane.b32.xlu1 %v22161_v27, %s18196_s10  ;;  %v16682_v39 = vpack.c.bf16 %v17359_v6, %v17358_v56 }
 0x683   : > { %16702 = vmatprep.subr.msk.bf16.mxu0 %vm18547_vm2, %v16700_v33 }
 0x686   : > { %17511 = vrot.lane.b32.xlu0 %v22162_v23, %s18198_s12  ;;  %8307 = vrot.lane.b32.xlu1 %v22163_v52, %s18196_s10 }
 0x688   : > { %15863 = vmatmul.mubr.msk.f32.vlgmr.msra.gmra.mrb[74].mxu0 %vm565_vm1, %v22164_v58 }
 0x689   : > { %16705 = vmatpush3.bf16.xpose.msk.msra.mxu0 %vm18547_vm2, %v16700_v33  ;;  %15876 = vmatprep.mubr.msk.f32.mxu0 %vm565_vm1, %v7487_v29 }
 0x68a   : > { %17521 = vrot.lane.b32.xlu0 %v22148_v50, %s18198_s12  ;;  %8398 = vrot.lane.b32.xlu1 %v22165_v53, %s18196_s10 }
 0x68b   : > { %16714 = vmatprep.subr.msk.bf16.mxu0 %vm18547_vm2, %v16712_v36 }
 0x68e   : > { %10485 = vrot.lane.b32.xlu0 %v22166_v1, %s18199_s13  ;;  %8489 = vrot.lane.b32.xlu1 %v22167_v49, %s18196_s10 }
 0x692   : > { %10574 = vrot.lane.b32.xlu0 %v22168_v14, %s18199_s13  ;;  %17431 = vrot.lane.b32.xlu1 %v22162_v23, %s18197_s11  ;;  %v22174_v14 = vld [vmem:[#allocation4_spill] sm:$0xff] }
 0x696   : > { %17531 = vrot.lane.b32.xlu0 %v22151_v57, %s18198_s12  ;;  %17436 = vrot.lane.b32.xlu1 %v22169_v32, %s18197_s11 }
 0x69a   : > { %10667 = vrot.lane.b32.xlu0 %v22170_v12, %s18199_s13  ;;  %17446 = vrot.lane.b32.xlu1 %v22171_v46, %s18197_s11 }
 0x69c   : > { %v5489_v38 = vpop.xlane.xlu1 %5488 }
 0x69d   : > { %17920 = vrcp.f32 %v5489_v38 }
 0x69e   : > { %10756 = vrot.lane.b32.xlu0 %v22172_v31, %s18199_s13  ;;  %17466 = vrot.lane.b32.xlu1 %v18461_v19, %s18197_s11  ;;  %v22175_v31 = vld [vmem:[#allocation7_spill] sm:$0xff] }
 0x6a0   : > { %v17387_v4 = vpop.permute.xlu1 %17386 }
 0x6a2   : > { %17471 = vrot.lane.b32.xlu1 %v18341_v43, %s18197_s11 }
 0x6a6   : > { %17476 = vrot.lane.b32.xlu1 %v22133_v44, %s18197_s11 }
 0x6a7   : > { %v17921_v7 = vpop.eup %17920 }
 0x6a8   : > { %v5504_v33 = vpop.xlane.xlu0 %5503  ;;  %v5563_v60 = vmul.f32 %v17921_v7, %v19794_v20  ;;  %v22176_v7 = vld [vmem:[#allocation13_spill] sm:$0xff] }
 0x6a9   : > { %17922 = vrcp.f32 %v5504_v33 }
 0x6aa   : > { %17486 = vrot.lane.b32.xlu1 %v22143_v37, %s18197_s11  ;;  %15827 = vmatprep.mubr.msk.f32.mxu1 %vm1984_vm3, %v5563_v60 }
 0x6ab   : > { %15828 = vmatmul.mubr.msk.f32.vlgmr.msra.gmra.mrb[84].mxu1 %vm1984_vm3, %v5564_v42 }
 0x6ac   : > { %16675 = vmatpush3.bf16.msra.mxu1 %v16672_v54  ;;  %v7489_v18 = vpop.permute.xlu0 %7488 }
 0x6ad   : > { %16684 = vmatprep.subr.msk.bf16.mxu1 %vm18547_vm2, %v16682_v39  ;;  %15877 = vmatmul.mubr.msk.f32.vlgmr.msra.gmra.mrb[76].mxu0 %vm565_vm1, %v7489_v18 }
 0x6ae   : > { %17491 = vrot.lane.b32.xlu1 %v18413_v3, %s18197_s11  ;;  %16717 = vmatpush3.bf16.xpose.msk.msra.mxu0 %vm18547_vm2, %v16712_v36 }
 0x6b0   : > { %v20024_v2 = vpop.permute.xlu0 %7577 }
 0x6b2   : > { %17496 = vrot.lane.b32.xlu1 %v22152_v9, %s18197_s11 }
 0x6b3   : > { %v17923_v33 = vpop.eup %17922 }
 0x6b4   : > { %v17392_v20 = vpop.permute.xlu0 %17391 }
 0x6b5   : > { %v17394_v29 = vunpack.i.h.bf16 %v17392_v20  ;;  %v17393_v54 = vunpack.i.l.bf16 %v17392_v20  ;;  %v22179_v20 = vld [vmem:[#allocation17_spill] sm:$0xff] }
 0x6b6   : > { %17501 = vrot.lane.b32.xlu1 %v22158_v26, %s18197_s11 }
 0x6b7   : > { %v16724_v58 = vpack.c.bf16 %v17394_v29, %v17393_v54 }
 0x6b8   : > { %v7671_v1 = vpop.permute.xlu0 %7670 }
 0x6b9   : > { %16726 = vmatprep.subr.msk.bf16.mxu0 %vm18547_vm2, %v16724_v58 }
 0x6ba   : > { %17506 = vrot.lane.b32.xlu1 %v22138_v21, %s18197_s11 }
 0x6bc   : > { %v20034_v36 = vpop.permute.xlu0 %7759 }
 0x6be   : > { %17516 = vrot.lane.b32.xlu1 %v22169_v32, %s18198_s12 }
 0x6c0   : > { %v17402_v12 = vpop.permute.xlu0 %17401 }
 0x6c1   : > { %v17404_v29 = vunpack.i.h.bf16 %v17402_v12  ;;  %v17403_v54 = vunpack.i.l.bf16 %v17402_v12 }
 0x6c2   : > { %10483 = vrot.lane.b32.xlu1 %v22174_v14, %s18199_s13 }
 0x6c4   : > { %v7853_v38 = vpop.permute.xlu0 %7852 }
 0x6c6   : > { %17526 = vrot.lane.b32.xlu1 %v22171_v46, %s18198_s12 }
 0x6c8   : > { %v20046_v34 = vpop.permute.xlu0 %7941 }
 0x6ca   : > { %10576 = vrot.lane.b32.xlu1 %v22175_v31, %s18199_s13  ;;  %v16736_v31 = vpack.c.bf16 %v17404_v29, %v17403_v54 }
 0x6cc   : > { %v17412_v18 = vpop.permute.xlu0 %17411 }
 0x6ce   : > { %10665 = vrot.lane.b32.xlu1 %v22176_v7, %s18199_s13 }
 0x6d1   : > { %v5501_v6 = vpop.xlane.xlu1 %5500 }
 0x6d2   : > { %17536 = vrot.lane.b32.xlu1 %v22154_v22, %s18198_s12  ;;  %v20050_v56 = vpop.f32.mrb[56].mxu0  ;;  %17924 = vrcp.f32 %v5501_v6  ;;  %v8035_v22 = vpop.permute.xlu0 %8034 }
 0x6d3   : > { %22177 = vst [vmem:[#allocation54_spill] sm:$0xff] %v20050_v56  ;;  %v20052_v60 = vpop.f32.mrb[57].mxu0  ;;  %v22180_v56 = vld [vmem:[#allocation60_spill] sm:$0xff] }
 0x6d4   : > { %22178 = vst [vmem:[#allocation51_spill] sm:$0xff] %v20052_v60  ;;  %v17369_v6 = vunpack.i.h.bf16 %v22180_v56  ;;  %v17368_v60 = vunpack.i.l.bf16 %v22180_v56 }
 0x6d5   : > { %v20054_v42 = vpop.permute.xlu1 %7579 }
 0x6d6   : > { %10758 = vrot.lane.b32.xlu1 %v22179_v20, %s18199_s13  ;;  %v16694_v54 = vpack.c.bf16 %v17369_v6, %v17368_v60  ;;  %v17413_v60 = vunpack.i.l.bf16 %v17412_v18 }
 0x6d9   : > { %v7669_v14 = vpop.permute.xlu1 %7668 }
 0x6da   : > { %15890 = vmatprep.mubr.msk.f32.mxu0 %vm565_vm1, %v7669_v14  ;;  %v22184_v14 = vld [vmem:[#allocation59_spill] sm:$0xff] }
 0x6db   : > { %15891 = vmatmul.mubr.msk.f32.vlgmr.msra.gmra.mrb[78].mxu0 %vm565_vm1, %v7671_v1  ;;  %v5568_v1 = vmul.f32 %v17923_v33, %v19798_v8  ;;  %v17378_v8 = vunpack.i.l.bf16 %v22184_v14  ;;  %v17414_v33 = vunpack.i.h.bf16 %v17412_v18 }
 0x6dc   : > { %v17925_v7 = vpop.eup %17924  ;;  %16729 = vmatpush3.bf16.xpose.msk.msra.mxu0 %vm18547_vm2, %v16724_v58  ;;  %v22183_v58 = vld [vmem:[#allocation61_spill] sm:$0xff] }
 0x6dd   : > { %v20064_v46 = vpop.f32.mrb[58].mxu0  ;;  %16738 = vmatprep.subr.msk.bf16.mxu0 %vm18547_vm2, %v16736_v31  ;;  %v17397_v12 = vpop.permute.xlu1 %17396  ;;  %v5567_v20 = vmul.f32 %v17925_v7, %v19822_v0  ;;  %v17379_v7 = vunpack.i.h.bf16 %v22184_v14  ;;  %v22186_v14 = vld [vmem:[#allocation62_spill] sm:$0xff] }
 0x6de   : > { %22181 = vst [vmem:[#allocation41_spill] sm:$0xff] %v20064_v46  ;;  %v20069_v29 = vpop.f32.mrb[59].mxu0  ;;  %v20080_v0 = vpop.permute.xlu0 %8123 }
 0x6df   : > { %22182 = vst [vmem:[#allocation44_spill] sm:$0xff] %v20069_v29  ;;  %15841 = vmatprep.mubr.msk.f32.mxu1 %vm1984_vm3, %v5567_v20  ;;  %v16748_v20 = vpack.c.bf16 %v17414_v33, %v17413_v60 }
 0x6e0   : > { %15842 = vmatmul.mubr.msk.f32.vlgmr.msra.gmra.mrb[86].mxu1 %vm1984_vm3, %v5568_v1  ;;  %v22185_v1 = vld [vmem:[#allocation50_spill] sm:$0xff] }
 0x6e1   : > { %16687 = vmatpush3.bf16.xpose.msk.msra.mxu1 %vm18547_vm2, %v16682_v39  ;;  %15855 = vmatprep.mubr.msk.f32.mxu1 %vm565_vm1, %v22183_v58  ;;  %v7762_v56 = vpop.permute.xlu1 %7761  ;;  %v16706_v39 = vpack.c.bf16 %v17379_v7, %v17378_v8  ;;  %v17388_v7 = vunpack.i.l.bf16 %v17387_v4 }
 0x6e2   : > { %16696 = vmatprep.subr.msk.bf16.mxu1 %vm18547_vm2, %v16694_v54  ;;  %v8215_v58 = vpop.permute.xlu0 %8214 }
 0x6e5   : > { %v7851_v6 = vpop.permute.xlu1 %7850 }
 0x6e6   : > { %15904 = vmatprep.mubr.msk.f32.mxu0 %vm565_vm1, %v7851_v6 }
 0x6e7   : > { %15905 = vmatmul.mubr.msk.f32.vlgmr.msra.gmra.mrb[80].mxu0 %vm565_vm1, %v7853_v38  ;;  %v17389_v38 = vunpack.i.h.bf16 %v17387_v4  ;;  %v17399_v4 = vunpack.i.h.bf16 %v17397_v12 }
 0x6e8   : > { %15856 = vmatmul.mubr.msk.f32.vlgmr.msra.gmra.mrb[88].mxu1 %vm565_vm1, %v22185_v1  ;;  %16741 = vmatpush3.bf16.xpose.msk.msra.mxu0 %vm18547_vm2, %v16736_v31  ;;  %v8217_v31 = vpop.permute.xlu0 %8216 }
 0x6e9   : > { %16699 = vmatpush3.bf16.xpose.msk.msra.mxu1 %vm18547_vm2, %v16694_v54  ;;  %15869 = vmatprep.mubr.msk.f32.mxu1 %vm565_vm1, %v22186_v14  ;;  %v17407_v18 = vpop.permute.xlu1 %17406  ;;  %v16718_v6 = vpack.c.bf16 %v17389_v38, %v17388_v7  ;;  %v22189_v54 = vld [vmem:[#allocation49_spill] sm:$0xff]  ;;  %v17398_v14 = vunpack.i.l.bf16 %v17397_v12 }
 0x6ea   : > { %16750 = vmatprep.subr.msk.bf16.mxu0 %vm18547_vm2, %v16748_v20  ;;  %16708 = vmatprep.subr.msk.bf16.mxu1 %vm18547_vm2, %v16706_v39  ;;  %v17409_v12 = vunpack.i.h.bf16 %v17407_v18 }
 0x6eb   : > { %v16730_v7 = vpack.c.bf16 %v17399_v4, %v17398_v14 }
 0x6ec   : > { %v17427_v38 = vpop.permute.xlu0 %17426 }
 0x6ed   : > { %v7944_v8 = vpop.permute.xlu1 %7943 }
 0x6ee   : > { %v20098_v33 = vpop.f32.mrb[60].mxu0 }
 0x6ef   : > { %22187 = vst [vmem:[#allocation42_spill] sm:$0xff] %v20098_v33  ;;  %v20100_v60 = vpop.f32.mrb[61].mxu0 }
 0x6f0   : > { %22188 = vst [vmem:[#allocation43_spill] sm:$0xff] %v20100_v60  ;;  %15870 = vmatmul.mubr.msk.f32.vlgmr.msra.gmra.mrb[90].mxu1 %vm565_vm1, %v22189_v54 }
 0x6f1   : > { %16711 = vmatpush3.bf16.xpose.msk.msra.mxu1 %vm18547_vm2, %v16706_v39  ;;  %15883 = vmatprep.mubr.msk.f32.mxu1 %vm565_vm1, %v20024_v2  ;;  %v8033_v1 = vpop.permute.xlu1 %8032  ;;  %v8397_v2 = vpop.permute.xlu0 %8396 }
 0x6f2   : > { %16720 = vmatprep.subr.msk.bf16.mxu1 %vm18547_vm2, %v16718_v6  ;;  %15918 = vmatprep.mubr.msk.f32.mxu0 %vm565_vm1, %v8033_v1 }
 0x6f3   : > { %15919 = vmatmul.mubr.msk.f32.vlgmr.msra.gmra.mrb[82].mxu0 %vm565_vm1, %v8035_v22 }
 0x6f4   : > { %16753 = vmatpush3.bf16.xpose.msk.msra.mxu0 %vm18547_vm2, %v16748_v20  ;;  %15932 = vmatprep.mubr.msk.f32.mxu0 %vm565_vm1, %v8215_v58  ;;  %v17408_v20 = vunpack.i.l.bf16 %v17407_v18 }
 0x6f5   : > { %v17417_v39 = vpop.permute.xlu1 %17416  ;;  %v8488_v14 = vpop.permute.xlu0 %8487 }
 0x6f6   : > { %v16742_v1 = vpack.c.bf16 %v17409_v12, %v17408_v20  ;;  %v17419_v18 = vunpack.i.h.bf16 %v17417_v39 }
 0x6f8   : > { %15884 = vmatmul.mubr.msk.f32.vlgmr.msra.gmra.mrb[92].mxu1 %vm565_vm1, %v20054_v42 }
 0x6f9   : > { %16723 = vmatpush3.bf16.xpose.msk.msra.mxu1 %vm18547_vm2, %v16718_v6  ;;  %15897 = vmatprep.mubr.msk.f32.mxu1 %vm565_vm1, %v20034_v36  ;;  %v8126_v22 = vpop.permute.xlu1 %8125  ;;  %v17442_v12 = vpop.permute.xlu0 %17441 }
 0x6fa   : > { %16732 = vmatprep.subr.msk.bf16.mxu1 %vm18547_vm2, %v16730_v7 }
 0x6fb   : > { %15933 = vmatmul.mubr.msk.f32.vlgmr.msra.gmra.mrb[84].mxu0 %vm565_vm1, %v8217_v31  ;;  %v17418_v31 = vunpack.i.l.bf16 %v17417_v39 }
 0x6fc   : > { %15946 = vmatprep.mubr.msk.f32.mxu0 %vm565_vm1, %v8397_v2  ;;  %v17428_v2 = vunpack.i.l.bf16 %v17427_v38 }
 0x6fd   : > { %v17422_v58 = vpop.permute.xlu1 %17421 }
 0x6fe   : > { %v17424_v54 = vunpack.i.h.bf16 %v17422_v58  ;;  %v17423_v42 = vunpack.i.l.bf16 %v17422_v58  ;;  %v17443_v58 = vunpack.i.l.bf16 %v17442_v12 }
 0x700   : > { %v16760_v4 = vpack.c.bf16 %v17424_v54, %v17423_v42  ;;  %15898 = vmatmul.mubr.msk.f32.vlgmr.msra.gmra.mrb[94].mxu1 %vm565_vm1, %v7762_v56  ;;  %v16754_v56 = vpack.c.bf16 %v17419_v18, %v17418_v31 }
 0x701   : > { %16735 = vmatpush3.bf16.xpose.msk.msra.mxu1 %vm18547_vm2, %v16730_v7  ;;  %15911 = vmatprep.mubr.msk.f32.mxu1 %vm565_vm1, %v20046_v34  ;;  %v8306_v36 = vpop.permute.xlu1 %8305  ;;  %v17429_v7 = vunpack.i.h.bf16 %v17427_v38 }
 0x702   : > { %16744 = vmatprep.subr.msk.bf16.mxu1 %vm18547_vm2, %v16742_v1  ;;  %16762 = vmatprep.subr.msk.bf16.mxu0 %vm18547_vm2, %v16760_v4 }
 0x703   : > { %16765 = vmatpush3.bf16.xpose.msk.msra.mxu0 %vm18547_vm2, %v16760_v4  ;;  %v16766_v20 = vpack.c.bf16 %v17429_v7, %v17428_v2 }
 0x705   : > { %v8308_v6 = vpop.permute.xlu1 %8307 }
 0x708   : > { %15912 = vmatmul.mubr.msk.f32.vlgmr.msra.gmra.mrb[96].mxu1 %vm565_vm1, %v7944_v8 }
 0x709   : > { %16747 = vmatpush3.bf16.xpose.msk.msra.mxu1 %vm18547_vm2, %v16742_v1  ;;  %15925 = vmatprep.mubr.msk.f32.mxu1 %vm565_vm1, %v20080_v0  ;;  %v8399_v34 = vpop.permute.xlu1 %8398  ;;  %v17444_v0 = vunpack.i.h.bf16 %v17442_v12 }
 0x70a   : > { %16756 = vmatprep.subr.msk.bf16.mxu1 %vm18547_vm2, %v16754_v56  ;;  %15947 = vmatmul.mubr.msk.f32.vlgmr.msra.gmra.mrb[86].mxu0 %vm565_vm1, %v8399_v34 }
 0x70b   : > { %v20150_v31 = vpack.c.bf16 %v17444_v0, %v17443_v58 }
 0x70d   : > { %v8490_v39 = vpop.permute.xlu1 %8489 }
 0x710   : > { %15926 = vmatmul.mubr.msk.f32.vlgmr.msra.gmra.mrb[98].mxu1 %vm565_vm1, %v8126_v22 }
 0x711   : > { %16759 = vmatpush3.bf16.xpose.msk.msra.mxu1 %vm18547_vm2, %v16754_v56  ;;  %15939 = vmatprep.mubr.msk.f32.mxu1 %vm565_vm1, %v8306_v36  ;;  %v17432_v8 = vpop.permute.xlu1 %17431 }
 0x712   : > { %v17434_v54 = vunpack.i.h.bf16 %v17432_v8  ;;  %v17433_v42 = vunpack.i.l.bf16 %v17432_v8  ;;  %16768 = vmatprep.subr.msk.bf16.mxu1 %vm18547_vm2, %v16766_v20 }
 0x714   : > { %v16772_v1 = vpack.c.bf16 %v17434_v54, %v17433_v42 }
 0x715   : > { %v17437_v38 = vpop.permute.xlu1 %17436 }
 0x716   : > { %v17439_v4 = vunpack.i.h.bf16 %v17437_v38  ;;  %v17438_v18 = vunpack.i.l.bf16 %v17437_v38  ;;  %16773 = vmatprep.subr.bf16.mxu0 %v16772_v1 }
 0x717   : > { %16775 = vmatpush3.bf16.msra.mxu0 %v16772_v1 }
 0x718   : > { %15940 = vmatmul.mubr.msk.f32.vlgmr.msra.gmra.mrb[100].mxu1 %vm565_vm1, %v8308_v6  ;;  %16781 = vmatprep.subr.bf16.mxu0 %v20150_v31  ;;  %v16776_v22 = vpack.c.bf16 %v17439_v4, %v17438_v18 }
 0x719   : > { %16771 = vmatpush3.bf16.xpose.msk.msra.mxu1 %vm18547_vm2, %v16766_v20  ;;  %15953 = vmatprep.mubr.msk.f32.mxu1 %vm565_vm1, %v8488_v14  ;;  %v17447_v36 = vpop.permute.xlu1 %17446 }
 0x71a   : > { %16777 = vmatprep.subr.bf16.mxu1 %v16776_v22  ;;  %v17449_v56 = vunpack.i.h.bf16 %v17447_v36  ;;  %v17448_v34 = vunpack.i.l.bf16 %v17447_v36 }
 0x71c   : > { %v20158_v7 = vpack.c.bf16 %v17449_v56, %v17448_v34 }
 0x71e   : > { %22190 = vst [vmem:[#allocation40_spill] sm:$0xff] %v20158_v7 }
 0x720   : > { %15954 = vmatmul.mubr.msk.f32.vlgmr.msra.gmra.mrb[102].mxu1 %vm565_vm1, %v8490_v39 }
 0x721   : > { %16779 = vmatpush3.bf16.msra.mxu1 %v16776_v22 }
 0x722   : > { %16785 = vmatprep.subr.bf16.mxu1 %v20158_v7 }
 0x725   : > { %v20161_v6 = vpop.f32.mrb[72].mxu1 }
 0x726   : > { %22191 = vst [vmem:[#allocation55_spill] sm:$0xff] %v20161_v6  ;;  %v20163_v2 = vpop.f32.mrb[73].mxu1 }
 0x727   : > { %22192 = vst [vmem:[#allocation53_spill] sm:$0xff] %v20163_v2 }
 0x72a   : > { %v20165_v12 = vpop.f32.mrb[62].mxu0 }
 0x72b   : > { %22193 = vst [vmem:[#allocation47_spill] sm:$0xff] %v20165_v12  ;;  %v20167_v20 = vpop.f32.mrb[63].mxu0 }
 0x72c   : > { %22194 = vst [vmem:[#allocation56_spill] sm:$0xff] %v20167_v20 }
 0x72e   : > { %v20169_v14 = vpop.f32.mrb[74].mxu1 }
 0x72f   : > { %22195 = vst [vmem:[#allocation45_spill] sm:$0xff] %v20169_v14  ;;  %v20171_v8 = vpop.f32.mrb[75].mxu1 }
 0x730   : > { %22196 = vst [vmem:[#allocation48_spill] sm:$0xff] %v20171_v8 }
 0x732   : > { %v20173_v0 = vpop.f32.mrb[64].mxu0 }
 0x733   : > { %22197 = vst [vmem:[#allocation58_spill] sm:$0xff] %v20173_v0  ;;  %v20175_v39 = vpop.f32.mrb[65].mxu0 }
 0x734   : > { %22198 = vst [vmem:[#allocation46_spill] sm:$0xff] %v20175_v39 }
 0x736   : > { %v20177_v58 = vpop.f32.mrb[76].mxu1 }
 0x737   : > { %22199 = vst [vmem:[#allocation52_spill] sm:$0xff] %v20177_v58  ;;  %v20179_v54 = vpop.f32.mrb[77].mxu1 }
 0x738   : > { %22200 = vst [vmem:[#allocation3_spill] sm:$0xff] %v20179_v54 }
 0x73a   : > { %v20181_v42 = vpop.f32.mrb[66].mxu0 }
 0x73b   : > { %22201 = vst [vmem:[#allocation8_spill] sm:$0xff] %v20181_v42  ;;  %v20183_v1 = vpop.f32.mrb[67].mxu0 }
 0x73c   : > { %22202 = vst [vmem:[#allocation12_spill] sm:$0xff] %v20183_v1 }
 0x73e   : > { %v20185_v38 = vpop.f32.mrb[78].mxu1 }
 0x73f   : > { %22203 = vst [vmem:[#allocation18_spill] sm:$0xff] %v20185_v38  ;;  %v20187_v4 = vpop.f32.mrb[79].mxu1 }
 0x740   : > { %22204 = vst [vmem:[#allocation57_spill] sm:$0xff] %v20187_v4 }
 0x742   : > { %v20189_v18 = vpop.f32.mrb[68].mxu0 }
 0x743   : > { %22205 = vst [vmem:[#allocation4_spill] sm:$0xff] %v20189_v18  ;;  %v20191_v22 = vpop.f32.mrb[69].mxu0 }
 0x744   : > { %22206 = vst [vmem:[#allocation7_spill] sm:$0xff] %v20191_v22 }
 0x746   : > { %v20193_v36 = vpop.f32.mrb[80].mxu1 }
 0x747   : > { %22207 = vst [vmem:[#allocation13_spill] sm:$0xff] %v20193_v36  ;;  %v20195_v56 = vpop.f32.mrb[81].mxu1 }
 0x748   : > { %22208 = vst [vmem:[#allocation17_spill] sm:$0xff] %v20195_v56 }
 0x74a   : > { %v20197_v34 = vpop.f32.mrb[70].mxu0 }
 0x74b   : > { %22209 = vst [vmem:[#allocation60_spill] sm:$0xff] %v20197_v34  ;;  %v20199_v0 = vpop.f32.mrb[71].mxu0 }
 0x74c   : > { %22210 = vst [vmem:[#allocation61_spill] sm:$0xff] %v20199_v0 }
 0x751   : > { %v20201_v12 = vpop.f32.mrb[82].mxu1 }
 0x752   : > { %22211 = vst [vmem:[#allocation59_spill] sm:$0xff] %v20201_v12  ;;  %v20203_v42 = vpop.f32.mrb[83].mxu1 }
 0x753   : > { %22212 = vst [vmem:[#allocation50_spill] sm:$0xff] %v20203_v42  ;;  %v20205_v58 = vpop.f32.mrb[72].mxu0 }
 0x754   : > { %v20207_v38 = vpop.f32.mrb[73].mxu0  ;;  %v8581_v18 = vsel %vm1984_vm3, %v20205_v58, -inf }
 0x755   : > { %8582 = vmax.xlane.f32.xlu1 %v8581_v18  ;;  %v8578_v36 = vsel %vm1984_vm3, %v20207_v38, -inf }
 0x756   : > { %8579 = vmax.xlane.f32.xlu0 %v8578_v36 }
 0x75b   : > { %v20213_v22 = vpop.f32.mrb[74].mxu0 }
 0x75c   : > { %v20215_v34 = vpop.f32.mrb[75].mxu0  ;;  %v8593_v12 = vsel %vm1984_vm3, %v20213_v22, -inf }
 0x75d   : > { %8594 = vmax.xlane.f32.xlu0 %v8593_v12  ;;  %v8590_v0 = vsel %vm1984_vm3, %v20215_v34, -inf  ;;  %v20233_v12 = vpop.permute.xlu1 %17466 }
 0x75e   : > { %22215 = vst [vmem:[#allocation63_spill] sm:$0xff] %v20233_v12 }
 0x761   : > { %8591 = vmax.xlane.f32.xlu0 %v8590_v0  ;;  %v20235_v14 = vpop.permute.xlu1 %17471 }
 0x765   : > { %v20237_v0 = vpop.permute.xlu1 %17476 }
 0x766   : > { %22216 = vst [vmem:[#allocation64_spill] sm:$0xff] %v20237_v0 }
 0x77e   : > { %v20221_v42 = vpop.f32.mrb[84].mxu1 }
 0x77f   : > { %22213 = vst [vmem:[#allocation62_spill] sm:$0xff] %v20221_v42  ;;  %v20223_v1 = vpop.f32.mrb[85].mxu1  ;;  %v20239_v42 = vpop.permute.xlu1 %17486 }
 0x780   : > { %22214 = vst [vmem:[#allocation49_spill] sm:$0xff] %v20223_v1  ;;  %v20225_v18 = vpop.f32.mrb[76].mxu0  ;;  %22217 = vst [vmem:[#allocation65_spill] sm:$0xff] %v20239_v42  ;;  %v20241_v1 = vpop.permute.xlu0 %17451 }
 0x781   : > { %v20227_v33 = vpop.f32.mrb[77].mxu0  ;;  %v8605_v36 = vsel %vm1984_vm3, %v20225_v18, -inf }
 0x782   : > { %8606 = vmax.xlane.f32.xlu0 %v8605_v36  ;;  %v8602_v56 = vsel %vm1984_vm3, %v20227_v33, -inf }
 0x783   : > { %v20243_v39 = vpop.permute.xlu1 %17491 }
 0x784   : > { %22218 = vst [vmem:[#allocation66_spill] sm:$0xff] %v20243_v39  ;;  %v20245_v46 = vpop.permute.xlu0 %17456 }
 0x786   : > { %8603 = vmax.xlane.f32.xlu0 %v8602_v56 }
 0x787   : > { %v20247_v4 = vpop.permute.xlu1 %17496 }
 0x788   : > { %22219 = vst [vmem:[#allocation67_spill] sm:$0xff] %v20247_v4  ;;  %v20249_v36 = vpop.permute.xlu0 %17461 }
 0x78b   : > { %v20251_v6 = vpop.permute.xlu1 %17501 }
 0x78c   : > { %22220 = vst [vmem:[#allocation68_spill] sm:$0xff] %v20251_v6  ;;  %v20257_v54 = vpop.permute.xlu0 %17481 }
 0x78f   : > { %v20261_v8 = vpop.permute.xlu1 %17506 }
 0x790   : > { %22222 = vst [vmem:[#allocation70_spill] sm:$0xff] %v20261_v8  ;;  %v20265_v2 = vpop.permute.xlu0 %17511 }
 0x791   : > { %22224 = vst [vmem:[#allocation72_spill] sm:$0xff] %v20265_v2 }
 0x793   : > { %v20267_v50 = vpop.permute.xlu1 %17516 }
 0x794   : > { %22225 = vst [vmem:[#allocation73_spill] sm:$0xff] %v20267_v50  ;;  %v20283_v25 = vpop.permute.xlu0 %17521 }
 0x795   : > { %22227 = vst [vmem:[#allocation75_spill] sm:$0xff] %v20283_v25 }
 0x798   : > { %v20299_v57 = vpop.permute.xlu0 %10485 }
 0x799   : > { %22229 = vst [vmem:[#allocation77_spill] sm:$0xff] %v20299_v57 }
 0x79c   : > { %v20315_v57 = vpop.permute.xlu0 %10574 }
 0x79d   : > { %22231 = vst [vmem:[#allocation79_spill] sm:$0xff] %v20315_v57 }
 0x7a0   : > { %v20329_v57 = vpop.permute.xlu0 %17531 }
 0x7a1   : > { %22233 = vst [vmem:[#allocation81_spill] sm:$0xff] %v20329_v57 }
 0x7ae   : > { %v20253_v56 = vpop.f32.mrb[78].mxu0 }
 0x7af   : > { %v20255_v20 = vpop.f32.mrb[79].mxu0  ;;  %v8617_v50 = vsel %vm1984_vm3, %v20253_v56, -inf }
 0x7b3   : > { %v20259_v60 = vpop.f32.mrb[86].mxu1 }
 0x7b4   : > { %22221 = vst [vmem:[#allocation69_spill] sm:$0xff] %v20259_v60  ;;  %v20263_v29 = vpop.f32.mrb[87].mxu1 }
 0x7b5   : > { %22223 = vst [vmem:[#allocation71_spill] sm:$0xff] %v20263_v29  ;;  %v20281_v29 = vpop.permute.xlu1 %10483 }
 0x7b6   : > { %22226 = vst [vmem:[#allocation74_spill] sm:$0xff] %v20281_v29 }
 0x7ba   : > { %v20269_v23 = vpop.f32.mrb[80].mxu0 }
 0x7bb   : > { %v20271_v49 = vpop.f32.mrb[88].mxu1  ;;  %v20273_v53 = vpop.f32.mrb[81].mxu0  ;;  %v8629_v61 = vsel %vm1984_vm3, %v20269_v23, -inf }
 0x7bc   : > { %v20275_v52 = vpop.f32.mrb[89].mxu1  ;;  %v8587_v21 = vsel %vm1984_vm3, %v20271_v49, -inf  ;;  %v8626_v24 = vsel %vm1984_vm3, %v20273_v53, -inf }
 0x7bd   : > { %8588 = vmax.xlane.f32.xlu1 %v8587_v21  ;;  %v8584_v60 = vsel %vm1984_vm3, %v20275_v52, -inf  ;;  %v8614_v21 = vsel %vm1984_vm3, %v20255_v20, -inf }
 0x7be   : > { %8585 = vmax.xlane.f32.xlu0 %v8584_v60  ;;  %v20295_v60 = vpop.permute.xlu1 %17526 }
 0x7bf   : > { %22228 = vst [vmem:[#allocation76_spill] sm:$0xff] %v20295_v60 }
 0x7c2   : > { %8618 = vmax.xlane.f32.xlu0 %v8617_v50  ;;  %v20309_v32 = vpop.permute.xlu1 %10576 }
 0x7c3   : > { %v20287_v41 = vpop.f32.mrb[90].mxu1  ;;  %22230 = vst [vmem:[#allocation78_spill] sm:$0xff] %v20309_v32 }
 0x7c4   : > { %v20289_v8 = vpop.f32.mrb[91].mxu1  ;;  %v8599_v9 = vsel %vm1984_vm3, %v20287_v41, -inf }
 0x7c5   : > { %8600 = vmax.xlane.f32.xlu1 %v8599_v9  ;;  %v8596_v50 = vsel %vm1984_vm3, %v20289_v8, -inf }
 0x7c6   : > { %8615 = vmax.xlane.f32.xlu0 %v8614_v21  ;;  %v20297_v29 = vpop.f32.mrb[82].mxu0  ;;  %v20327_v11 = vpop.permute.xlu1 %10665 }
 0x7c7   : > { %v20301_v25 = vpop.f32.mrb[83].mxu0  ;;  %v8641_v32 = vsel %vm1984_vm3, %v20297_v29, -inf  ;;  %22232 = vst [vmem:[#allocation80_spill] sm:$0xff] %v20327_v11 }
 0x7c8   : > { %v8638_v37 = vsel %vm1984_vm3, %v20301_v25, -inf }
 0x7c9   : > { %8597 = vmax.xlane.f32.xlu1 %v8596_v50 }
 0x7ca   : > { %8630 = vmax.xlane.f32.xlu0 %v8629_v61 }
 0x7cb   : > { %v20307_v9 = vpop.f32.mrb[92].mxu1 }
 0x7cc   : > { %v20311_v60 = vpop.f32.mrb[93].mxu1  ;;  %v8611_v21 = vsel %vm1984_vm3, %v20307_v9, -inf }
 0x7cd   : > { %8612 = vmax.xlane.f32.xlu1 %v8611_v21  ;;  %v8608_v61 = vsel %vm1984_vm3, %v20311_v60, -inf }
 0x7ce   : > { %8627 = vmax.xlane.f32.xlu0 %v8626_v24  ;;  %v20319_v50 = vpop.f32.mrb[84].mxu0 }
 0x7cf   : > { %v20321_v4 = vpop.f32.mrb[85].mxu0  ;;  %v8653_v57 = vsel %vm1984_vm3, %v20319_v50, -inf }
 0x7d1   : > { %8609 = vmax.xlane.f32.xlu1 %v8608_v61  ;;  %v20339_v61 = vpop.permute.xlu1 %17536 }
 0x7d2   : > { %8642 = vmax.xlane.f32.xlu0 %v8641_v32  ;;  %22234 = vst [vmem:[#allocation82_spill] sm:$0xff] %v20339_v61  ;;  %v20343_v32 = vpop.permute.xlu0 %10667 }
 0x7d3   : > { %v20331_v21 = vpop.f32.mrb[94].mxu1  ;;  %22235 = vst [vmem:[#allocation83_spill] sm:$0xff] %v20343_v32 }
 0x7d4   : > { %v20333_v51 = vpop.f32.mrb[95].mxu1  ;;  %v8623_v24 = vsel %vm1984_vm3, %v20331_v21, -inf }
 0x7d5   : > { %8624 = vmax.xlane.f32.xlu1 %v8623_v24  ;;  %v8620_v11 = vsel %vm1984_vm3, %v20333_v51, -inf  ;;  %v20357_v28 = vpop.permute.xlu1 %10758 }
 0x7d6   : > { %8639 = vmax.xlane.f32.xlu0 %v8638_v37  ;;  %v8650_v37 = vsel %vm1984_vm3, %v20321_v4, -inf  ;;  %22236 = vst [vmem:[#allocation84_spill] sm:$0xff] %v20357_v28  ;;  %v20361_v32 = vpop.permute.xlu0 %10756 }
 0x7d7   : > { %22237 = vst [vmem:[#allocation85_spill] sm:$0xff] %v20361_v32 }
 0x7d9   : > { %8621 = vmax.xlane.f32.xlu1 %v8620_v11 }
 0x7da   : > { %8654 = vmax.xlane.f32.xlu0 %v8653_v57 }
 0x7db   : > { %v20347_v2 = vpop.f32.mrb[96].mxu1 }
 0x7dc   : > { %v20349_v59 = vpop.f32.mrb[97].mxu1  ;;  %v8635_v24 = vsel %vm1984_vm3, %v20347_v2, -inf }
 0x7dd   : > { %8636 = vmax.xlane.f32.xlu1 %v8635_v24  ;;  %v20355_v61 = vpop.f32.mrb[86].mxu0  ;;  %v8632_v57 = vsel %vm1984_vm3, %v20349_v59, -inf }
 0x7de   : > { %8651 = vmax.xlane.f32.xlu0 %v8650_v37  ;;  %v20359_v11 = vpop.f32.mrb[87].mxu0  ;;  %v8665_v42 = vsel %vm1984_vm3, %v20355_v61, -inf }
 0x7df   : > { %v8662_v32 = vsel %vm1984_vm3, %v20359_v11, -inf }
 0x7e1   : > { %8633 = vmax.xlane.f32.xlu1 %v8632_v57 }
 0x7e2   : > { %v8583_v24 = vpop.xlane.xlu1 %8582  ;;  %8666 = vmax.xlane.f32.xlu0 %v8665_v42 }
 0x7e3   : > { %v8675_v27 = vsub.f32 %v20205_v58, %v8583_v24  ;;  %v8580_v6 = vpop.xlane.xlu0 %8579  ;;  %v20368_v45 = vpop.f32.mrb[98].mxu1 }
 0x7e4   : > { %v8674_v37 = vsub.f32 %v20207_v38, %v8580_v6  ;;  %v20371_v28 = vpop.f32.mrb[99].mxu1  ;;  %v8647_v0 = vsel %vm1984_vm3, %v20368_v45, -inf }
 0x7e5   : > { %8663 = vmax.xlane.f32.xlu1 %v8662_v32  ;;  %v8708_v16 = vmul.f32 1.442695, %v8675_v27  ;;  %v8644_v38 = vsel %vm1984_vm3, %v20371_v28, -inf }
 0x7e6   : > { %v8706_v57 = vmul.f32 1.442695, %v8674_v37 }
 0x7e7   : > { %17926 = vpow2.f32 %v8708_v16 }
 0x7e8   : > { %17928 = vpow2.f32 %v8706_v57 }
 0x7e9   : > { %8648 = vmax.xlane.f32.xlu1 %v8647_v0 }
 0x7ea   : > { %v8595_v42 = vpop.xlane.xlu0 %8594 }
 0x7eb   : > { %v8679_v58 = vsub.f32 %v20213_v22, %v8595_v42  ;;  %v20378_v24 = vpop.f32.mrb[100].mxu1 }
 0x7ec   : > { %v20380_v6 = vpop.f32.mrb[101].mxu1  ;;  %v8659_v27 = vsel %vm1984_vm3, %v20378_v24, -inf }
 0x7ed   : > { %v8716_v32 = vmul.f32 1.442695, %v8679_v58  ;;  %8645 = vmax.xlane.f32.xlu1 %v8644_v38  ;;  %8660 = vmax.xlane.f32.xlu0 %v8659_v27  ;;  %v8656_v22 = vsel %vm1984_vm3, %v20380_v6, -inf }
 0x7ee   : > { %v8592_v37 = vpop.xlane.xlu0 %8591 }
 0x7ef   : > { %17930 = vpow2.f32 %v8716_v32  ;;  %v8678_v16 = vsub.f32 %v20215_v34, %v8592_v37 }
 0x7f1   : > { %v8714_v0 = vmul.f32 1.442695, %v8678_v16  ;;  %8657 = vmax.xlane.f32.xlu1 %v8656_v22  ;;  %v20395_v58 = vpop.eup %17926 }
 0x7f2   : > { %v20399_v34 = vpop.eup %17928  ;;  %v8773_v27 = vsel %vm1984_vm3, %v20395_v58, 0.0 }
 0x7f3   : > { %17932 = vpow2.f32 %v8714_v0  ;;  %v20389_v57 = vpop.f32.mrb[102].mxu1  ;;  %v8770_v37 = vsel %vm1984_vm3, %v20399_v34, 0.0 }
 0x7f4   : > { %v20391_v42 = vpop.f32.mrb[103].mxu1  ;;  %v8671_v44 = vsel %vm1984_vm3, %v20389_v57, -inf }
 0x7f5   : > { %8672 = vmax.xlane.f32.xlu0 %v8671_v44  ;;  %v8668_v38 = vsel %vm1984_vm3, %v20391_v42, -inf }
 0x7f6   : > { %8669 = vmax.xlane.f32.xlu1 %v8668_v38 }
 0x7f9   : > { %v20403_v32 = vpop.eup %17930  ;;  %8774 = vadd.xlane.f32.xlu0 %v8773_v27 }
 0x7fa   : > { %8771 = vadd.xlane.f32.xlu1 %v8770_v37  ;;  %v8785_v16 = vsel %vm1984_vm3, %v20403_v32, 0.0 }
 0x7fd   : > { %v20409_v44 = vpop.eup %17932  ;;  %8786 = vadd.xlane.f32.xlu0 %v8785_v16 }
 0x7fe   : > { %v8782_v22 = vsel %vm1984_vm3, %v20409_v44, 0.0 }
 0x801   : > { %8783 = vadd.xlane.f32.xlu0 %v8782_v22 }
 0x80f   : > { %v8607_v0 = vpop.xlane.xlu0 %8606 }
 0x810   : > { %v8683_v38 = vsub.f32 %v20225_v18, %v8607_v0 }
 0x812   : > { %v8724_v26 = vmul.f32 1.442695, %v8683_v38 }
 0x813   : > { %v8604_v39 = vpop.xlane.xlu0 %8603 }
 0x814   : > { %17934 = vpow2.f32 %v8724_v26  ;;  %v8682_v27 = vsub.f32 %v20227_v33, %v8604_v39 }
 0x816   : > { %v8722_v35 = vmul.f32 1.442695, %v8682_v27 }
 0x818   : > { %17936 = vpow2.f32 %v8722_v35 }
 0x81e   : > { %v20415_v37 = vpop.eup %17934 }
 0x81f   : > { %v8797_v47 = vsel %vm1984_vm3, %v20415_v37, 0.0 }
 0x820   : > { %8798 = vadd.xlane.f32.xlu0 %v8797_v47 }
 0x822   : > { %v20419_v16 = vpop.eup %17936 }
 0x823   : > { %v8794_v22 = vsel %vm1984_vm3, %v20419_v16, 0.0 }
 0x824   : > { %8795 = vadd.xlane.f32.xlu0 %v8794_v22 }
 0x84a   : > { %v8589_v18 = vpop.xlane.xlu1 %8588 }
 0x84b   : > { %v8677_v0 = vsub.f32 %v20271_v49, %v8589_v18  ;;  %v8586_v26 = vpop.xlane.xlu0 %8585 }
 0x84c   : > { %v8676_v33 = vsub.f32 %v20275_v52, %v8586_v26 }
 0x84d   : > { %v8712_v39 = vmul.f32 1.442695, %v8677_v0 }
 0x84e   : > { %v8710_v35 = vmul.f32 1.442695, %v8676_v33 }
 0x84f   : > { %17938 = vpow2.f32 %v8712_v39  ;;  %v8619_v38 = vpop.xlane.xlu0 %8618 }
 0x850   : > { %v8687_v27 = vsub.f32 %v20253_v56, %v8619_v38  ;;  %17940 = vpow2.f32 %v8710_v35 }
 0x852   : > { %v8732_v47 = vmul.f32 1.442695, %v8687_v27  ;;  %v8601_v12 = vpop.xlane.xlu1 %8600 }
 0x853   : > { %v8681_v15 = vsub.f32 %v20287_v41, %v8601_v12  ;;  %v8616_v30 = vpop.xlane.xlu0 %8615 }
 0x854   : > { %17942 = vpow2.f32 %v8732_v47  ;;  %v8686_v22 = vsub.f32 %v20255_v20, %v8616_v30 }
 0x855   : > { %v8720_v7 = vmul.f32 1.442695, %v8681_v15 }
 0x856   : > { %v8730_v49 = vmul.f32 1.442695, %v8686_v22  ;;  %v8598_v18 = vpop.xlane.xlu1 %8597 }
 0x857   : > { %17944 = vpow2.f32 %v8720_v7  ;;  %v8680_v52 = vsub.f32 %v20289_v8, %v8598_v18  ;;  %v8631_v0 = vpop.xlane.xlu0 %8630 }
 0x858   : > { %17946 = vpow2.f32 %v8730_v49  ;;  %v8691_v26 = vsub.f32 %v20269_v23, %v8631_v0 }
 0x859   : > { %v20430_v56 = vpop.eup %17938  ;;  %v8718_v33 = vmul.f32 1.442695, %v8680_v52 }
 0x85a   : > { %v8740_v39 = vmul.f32 1.442695, %v8691_v26  ;;  %v8613_v35 = vpop.xlane.xlu1 %8612  ;;  %v8779_v41 = vsel %vm1984_vm3, %v20430_v56, 0.0  ;;  %v20434_v12 = vpop.eup %17940 }
 0x85b   : > { %17948 = vpow2.f32 %v8718_v33  ;;  %v8685_v30 = vsub.f32 %v20307_v9, %v8613_v35  ;;  %v8628_v15 = vpop.xlane.xlu0 %8627  ;;  %8780 = vadd.xlane.f32.xlu1 %v8779_v41  ;;  %v8776_v27 = vsel %vm1984_vm3, %v20434_v12, 0.0 }
 0x85c   : > { %17950 = vpow2.f32 %v8740_v39  ;;  %v8690_v7 = vsub.f32 %v20273_v53, %v8628_v15 }
 0x85d   : > { %v8728_v20 = vmul.f32 1.442695, %v8685_v30 }
 0x85e   : > { %v20438_v23 = vpop.eup %17942  ;;  %v8738_v8 = vmul.f32 1.442695, %v8690_v7  ;;  %v8610_v38 = vpop.xlane.xlu1 %8609 }
 0x85f   : > { %17952 = vpow2.f32 %v8728_v20  ;;  %v8684_v47 = vsub.f32 %v20311_v60, %v8610_v38  ;;  %v8643_v22 = vpop.xlane.xlu0 %8642  ;;  %8777 = vadd.xlane.f32.xlu1 %v8776_v27  ;;  %v8809_v9 = vsel %vm1984_vm3, %v20438_v23, 0.0 }
 0x860   : > { %17954 = vpow2.f32 %v8738_v8  ;;  %v8695_v49 = vsub.f32 %v20297_v29, %v8643_v22  ;;  %8810 = vadd.xlane.f32.xlu0 %v8809_v9 }
 0x861   : > { %v20446_v53 = vpop.eup %17944  ;;  %v8726_v18 = vmul.f32 1.442695, %v8684_v47 }
 0x862   : > { %v20448_v52 = vpop.eup %17946  ;;  %v8748_v0 = vmul.f32 1.442695, %v8695_v49  ;;  %v8625_v26 = vpop.xlane.xlu1 %8624  ;;  %v8791_v33 = vsel %vm1984_vm3, %v20446_v53, 0.0 }
 0x863   : > { %17956 = vpow2.f32 %v8726_v18  ;;  %v8689_v60 = vsub.f32 %v20331_v21, %v8625_v26  ;;  %v8640_v39 = vpop.xlane.xlu0 %8639  ;;  %8792 = vadd.xlane.f32.xlu1 %v8791_v33  ;;  %v8806_v35 = vsel %vm1984_vm3, %v20448_v52, 0.0 }
 0x864   : > { %17958 = vpow2.f32 %v8748_v0  ;;  %v8694_v29 = vsub.f32 %v20301_v25, %v8640_v39  ;;  %8807 = vadd.xlane.f32.xlu0 %v8806_v35 }
 0x865   : > { %v20456_v41 = vpop.eup %17948  ;;  %v8736_v30 = vmul.f32 1.442695, %v8689_v60 }
 0x866   : > { %v20458_v15 = vpop.eup %17950  ;;  %v8746_v7 = vmul.f32 1.442695, %v8694_v29  ;;  %v8622_v20 = vpop.xlane.xlu1 %8621  ;;  %v8788_v8 = vsel %vm1984_vm3, %v20456_v41, 0.0 }
 0x867   : > { %17960 = vpow2.f32 %v8736_v30  ;;  %v8688_v21 = vsub.f32 %v20333_v51, %v8622_v20  ;;  %v8655_v38 = vpop.xlane.xlu0 %8654  ;;  %8789 = vadd.xlane.f32.xlu1 %v8788_v8  ;;  %v8821_v27 = vsel %vm1984_vm3, %v20458_v15, 0.0 }
 0x868   : > { %17962 = vpow2.f32 %v8746_v7  ;;  %v8699_v25 = vsub.f32 %v20319_v50, %v8655_v38  ;;  %8822 = vadd.xlane.f32.xlu0 %v8821_v27 }
 0x869   : > { %v20466_v47 = vpop.eup %17952  ;;  %v8734_v22 = vmul.f32 1.442695, %v8688_v21 }
 0x86a   : > { %v20468_v9 = vpop.eup %17954  ;;  %v8756_v49 = vmul.f32 1.442695, %v8699_v25  ;;  %v8637_v18 = vpop.xlane.xlu1 %8636  ;;  %v8803_v0 = vsel %vm1984_vm3, %v20466_v47, 0.0 }
 0x86b   : > { %17964 = vpow2.f32 %v8734_v22  ;;  %v8693_v51 = vsub.f32 %v20347_v2, %v8637_v18  ;;  %v8652_v26 = vpop.xlane.xlu0 %8651  ;;  %8804 = vadd.xlane.f32.xlu1 %v8803_v0  ;;  %v8818_v33 = vsel %vm1984_vm3, %v20468_v9, 0.0 }
 0x86c   : > { %17966 = vpow2.f32 %v8756_v49  ;;  %v8698_v50 = vsub.f32 %v20321_v4, %v8652_v26  ;;  %8819 = vadd.xlane.f32.xlu0 %v8818_v33 }
 0x86d   : > { %v20476_v60 = vpop.eup %17956  ;;  %v8744_v39 = vmul.f32 1.442695, %v8693_v51 }
 0x86e   : > { %v20478_v35 = vpop.eup %17958  ;;  %v8754_v29 = vmul.f32 1.442695, %v8698_v50  ;;  %v8634_v30 = vpop.xlane.xlu1 %8633  ;;  %v8800_v7 = vsel %vm1984_vm3, %v20476_v60, 0.0 }
 0x86f   : > { %17968 = vpow2.f32 %v8744_v39  ;;  %v8692_v2 = vsub.f32 %v20349_v59, %v8634_v30  ;;  %v8667_v20 = vpop.xlane.xlu0 %8666  ;;  %8801 = vadd.xlane.f32.xlu1 %v8800_v7  ;;  %v8833_v8 = vsel %vm1984_vm3, %v20478_v35, 0.0 }
 0x870   : > { %17970 = vpow2.f32 %v8754_v29  ;;  %v8703_v4 = vsub.f32 %v20355_v61, %v8667_v20  ;;  %8834 = vadd.xlane.f32.xlu0 %v8833_v8 }
 0x871   : > { %v20486_v21 = vpop.eup %17960  ;;  %v8742_v38 = vmul.f32 1.442695, %v8692_v2 }
 0x872   : > { %v20488_v27 = vpop.eup %17962  ;;  %v8764_v25 = vmul.f32 1.442695, %v8703_v4  ;;  %v8664_v22 = vpop.xlane.xlu1 %8663  ;;  %v8815_v49 = vsel %vm1984_vm3, %v20486_v21, 0.0 }
 0x873   : > { %17972 = vpow2.f32 %v8742_v38  ;;  %v8702_v59 = vsub.f32 %v20359_v11, %v8664_v22  ;;  %8816 = vadd.xlane.f32.xlu1 %v8815_v49  ;;  %v8830_v18 = vsel %vm1984_vm3, %v20488_v27, 0.0 }
 0x874   : > { %17974 = vpow2.f32 %v8764_v25  ;;  %8831 = vadd.xlane.f32.xlu0 %v8830_v18 }
 0x875   : > { %v20495_v61 = vpop.eup %17964  ;;  %v8762_v0 = vmul.f32 1.442695, %v8702_v59 }
 0x876   : > { %v20497_v51 = vpop.eup %17966  ;;  %v8649_v26 = vpop.xlane.xlu1 %8648  ;;  %v8812_v33 = vsel %vm1984_vm3, %v20495_v61, 0.0 }
 0x877   : > { %17976 = vpow2.f32 %v8762_v0  ;;  %v8697_v50 = vsub.f32 %v20368_v45, %v8649_v26  ;;  %8813 = vadd.xlane.f32.xlu1 %v8812_v33  ;;  %v8845_v11 = vsel %vm1984_vm3, %v20497_v51, 0.0 }
 0x878   : > { %8846 = vadd.xlane.f32.xlu0 %v8845_v11 }
 0x879   : > { %v20504_v39 = vpop.eup %17968  ;;  %v8752_v29 = vmul.f32 1.442695, %v8697_v50 }
 0x87a   : > { %v20506_v30 = vpop.eup %17970  ;;  %v8646_v7 = vpop.xlane.xlu1 %8645  ;;  %v8827_v20 = vsel %vm1984_vm3, %v20504_v39, 0.0 }
 0x87b   : > { %v8661_v2 = vpop.xlane.xlu0 %8660  ;;  %17978 = vpow2.f32 %v8752_v29  ;;  %v8696_v8 = vsub.f32 %v20371_v28, %v8646_v7  ;;  %8828 = vadd.xlane.f32.xlu1 %v8827_v20  ;;  %v8842_v4 = vsel %vm1984_vm3, %v20506_v30, 0.0 }
 0x87c   : > { %v8701_v45 = vsub.f32 %v20378_v24, %v8661_v2  ;;  %8843 = vadd.xlane.f32.xlu0 %v8842_v4 }
 0x87d   : > { %v20514_v38 = vpop.eup %17972  ;;  %v8750_v25 = vmul.f32 1.442695, %v8696_v8 }
 0x87e   : > { %v8760_v22 = vmul.f32 1.442695, %v8701_v45  ;;  %v20516_v49 = vpop.eup %17974  ;;  %v8658_v59 = vpop.xlane.xlu1 %8657  ;;  %v8824_v18 = vsel %vm1984_vm3, %v20514_v38, 0.0 }
 0x87f   : > { %17980 = vpow2.f32 %v8750_v25  ;;  %8825 = vadd.xlane.f32.xlu1 %v8824_v18  ;;  %v8857_v28 = vsel %vm1984_vm3, %v20516_v49, 0.0 }
 0x880   : > { %8858 = vadd.xlane.f32.xlu0 %v8857_v28  ;;  %17982 = vpow2.f32 %v8760_v22  ;;  %v17454_v28 = vunpack.i.h.bf16 %v20241_v1 }
 0x881   : > { %v20522_v24 = vpop.eup %17976 }
 0x882   : > { %v8673_v0 = vpop.xlane.xlu0 %8672  ;;  %v8854_v26 = vsel %vm1984_vm3, %v20522_v24, 0.0 }
 0x883   : > { %8855 = vadd.xlane.f32.xlu1 %v8854_v26  ;;  %v20526_v33 = vpop.xlane.xlu1 %8669  ;;  %v17453_v26 = vunpack.i.l.bf16 %v20241_v1 }
 0x885   : > { %v20528_v50 = vpop.eup %17978 }
 0x886   : > { %v8775_v11 = vpop.xlane.xlu0 %8774  ;;  %v8839_v29 = vsel %vm1984_vm3, %v20528_v50, 0.0 }
 0x887   : > { %8840 = vadd.xlane.f32.xlu0 %v8839_v29  ;;  %v8772_v7 = vpop.xlane.xlu1 %8771  ;;  %17984 = vrcp.f32 %v8775_v11 }
 0x888   : > { %17986 = vrcp.f32 %v8772_v7 }
 0x889   : > { %v20532_v2 = vpop.eup %17980 }
 0x88a   : > { %v8787_v20 = vpop.xlane.xlu0 %8786  ;;  %v8836_v8 = vsel %vm1984_vm3, %v20532_v2, 0.0  ;;  %v20536_v45 = vpop.eup %17982 }
 0x88b   : > { %8837 = vadd.xlane.f32.xlu0 %v8836_v8  ;;  %17988 = vrcp.f32 %v8787_v20  ;;  %v8851_v25 = vsel %vm1984_vm3, %v20536_v45, 0.0  ;;  %v16788_v20 = vpack.c.bf16 %v17454_v28, %v17453_v26  ;;  %v17474_v26 = vunpack.i.h.bf16 %v20235_v14 }
 0x88e   : > { %v8784_v4 = vpop.xlane.xlu0 %8783 }
 0x88f   : > { %17990 = vrcp.f32 %v8784_v4  ;;  %8852 = vadd.xlane.f32.xlu0 %v8851_v25  ;;  %v17464_v4 = vunpack.i.h.bf16 %v20249_v36  ;;  %v17463_v25 = vunpack.i.l.bf16 %v20249_v36 }
 0x891   : > { %v17985_v22 = vpop.eup %17984 }
 0x892   : > { %v17987_v18 = vpop.eup %17986  ;;  %v8899_v29 = vmul.f32 %v17985_v22, %v20395_v58  ;;  %v16796_v58 = vpack.c.bf16 %v17464_v4, %v17463_v25  ;;  %v8705_v22 = vsub.f32 %v20389_v57, %v8673_v0 }
 0x893   : > { %v8898_v11 = vmul.f32 %v17987_v18, %v20399_v34  ;;  %v8700_v34 = vsub.f32 %v20380_v6, %v8658_v59 }
 0x894   : > { %10847 = vrot.lane.b32.xlu1 %v18401_v63, %s18199_s13 }
 0x895   : > { %15960 = vmatprep.mubr.msk.f32.mxu0 %vm1984_vm3, %v8898_v11  ;;  %v17989_v7 = vpop.eup %17988  ;;  %v8758_v36 = vmul.f32 1.442695, %v8700_v34  ;;  %v17473_v11 = vunpack.i.l.bf16 %v20235_v14  ;;  %v8704_v14 = vsub.f32 %v20391_v42, %v20526_v33 }
 0x896   : > { %15961 = vmatmul.mubr.msk.f32.vlgmr.msra.gmra.mrb[88].mxu0 %vm1984_vm3, %v8899_v29  ;;  %v8903_v1 = vmul.f32 %v17989_v7, %v20403_v32  ;;  %v8768_v32 = vmul.f32 1.442695, %v8705_v22 }
 0x897   : > { %16783 = vmatpush3.bf16.msra.mxu0 %v20150_v31  ;;  %17992 = vpow2.f32 %v8758_v36  ;;  %v20571_v7 = vpack.c.bf16 %v17474_v26, %v17473_v11  ;;  %v22239_v26 = vld [vmem:[#allocation14_spill] sm:$0xff] }
 0x898   : > { %16789 = vmatprep.subr.bf16.mxu0 %v16788_v20  ;;  %v22240_v11 = vld [vmem:[#allocation26_spill] sm:$0xff] }
 0x899   : > { %v17991_v8 = vpop.eup %17990 }
 0x89a   : > { %v8902_v63 = vmul.f32 %v17991_v8, %v20409_v44 }
 0x89c   : > { %15974 = vmatprep.mubr.msk.f32.mxu0 %vm1984_vm3, %v8902_v63 }
 0x89d   : > { %15975 = vmatmul.mubr.msk.f32.vlgmr.msra.gmra.mrb[90].mxu0 %vm1984_vm3, %v8903_v1  ;;  %v17459_v1 = vunpack.i.h.bf16 %v20245_v46 }
 0x89e   : > { %16791 = vmatpush3.bf16.msra.mxu0 %v16788_v20 }
 0x89f   : > { %16797 = vmatprep.subr.bf16.mxu0 %v16796_v58 }
 0x8a1   : > { %v20559_v18 = vpop.eup %17992 }
 0x8a2   : > { %v8848_v28 = vsel %vm1984_vm3, %v20559_v18, 0.0 }
 0x8a5   : > { %17541 = vrot.lane.b32.xlu0 %v18443_v13, %s18198_s12 }
 0x8ad   : > { %v8799_v31 = vpop.xlane.xlu0 %8798 }
 0x8ae   : > { %17994 = vrcp.f32 %v8799_v31 }
 0x8b1   : > { %v8796_v44 = vpop.xlane.xlu0 %8795 }
 0x8b2   : > { %17996 = vrcp.f32 %v8796_v44 }
 0x8b3   : > { %17998 = vpow2.f32 %v8768_v32  ;;  %v17483_v32 = vunpack.i.l.bf16 %v20257_v54 }
 0x8b8   : > { %8849 = vadd.xlane.f32.xlu1 %v8848_v28  ;;  %v17995_v6 = vpop.eup %17994 }
 0x8b9   : > { %v8907_v57 = vmul.f32 %v17995_v6, %v20415_v37  ;;  %v8766_v37 = vmul.f32 1.442695, %v8704_v14 }
 0x8bb   : > { %18000 = vpow2.f32 %v8766_v37 }
 0x8bc   : > { %v17997_v59 = vpop.eup %17996 }
 0x8bd   : > { %v8906_v29 = vmul.f32 %v17997_v59, %v20419_v16  ;;  %v20568_v0 = vpop.eup %17998 }
 0x8be   : > { %v8863_v20 = vsel %vm1984_vm3, %v20568_v0, 0.0 }
 0x8bf   : > { %15988 = vmatprep.mubr.msk.f32.mxu0 %vm1984_vm3, %v8906_v29 }
 0x8c0   : > { %15989 = vmatmul.mubr.msk.f32.vlgmr.msra.gmra.mrb[92].mxu0 %vm1984_vm3, %v8907_v57 }
 0x8c1   : > { %16799 = vmatpush3.bf16.msra.mxu0 %v16796_v58  ;;  %v17458_v58 = vunpack.i.l.bf16 %v20245_v46  ;;  %v17484_v46 = vunpack.i.h.bf16 %v20257_v54  ;;  %v22241_v54 = vld [vmem:[#allocation63_spill] sm:$0xff] }
 0x8c2   : > { %16805 = vmatprep.subr.bf16.mxu0 %v20571_v7  ;;  %v17468_v14 = vunpack.i.l.bf16 %v22241_v54 }
 0x8c4   : > { %8864 = vadd.xlane.f32.xlu0 %v8863_v20  ;;  %v17469_v20 = vunpack.i.h.bf16 %v22241_v54 }
 0x8c5   : > { %v20588_v8 = vpop.eup %18000 }
 0x8c9   : > { %17546 = vrot.lane.b32.xlu1 %v18461_v19, %s18198_s12 }
 0x8da   : > { %10849 = vrot.lane.b32.xlu0 %v18399_v62, %s18199_s13  ;;  %v8860_v62 = vsel %vm1984_vm3, %v20588_v8, 0.0 }
 0x8de   : > { %10938 = vrot.lane.b32.xlu0 %v18419_v5, %s18199_s13 }
 0x8e2   : > { %17551 = vrot.lane.b32.xlu0 %v18341_v43, %s18198_s12 }
 0x8e6   : > { %11031 = vrot.lane.b32.xlu0 %v18435_v10, %s18199_s13 }
 0x8e8   : > { %v8781_v16 = vpop.xlane.xlu1 %8780 }
 0x8e9   : > { %18002 = vrcp.f32 %v8781_v16 }
 0x8ea   : > { %11120 = vrot.lane.b32.xlu0 %v18455_v17, %s18199_s13 }
 0x8ec   : > { %v8778_v42 = vpop.xlane.xlu1 %8777 }
 0x8ed   : > { %18004 = vrcp.f32 %v8778_v42  ;;  %v8811_v5 = vpop.xlane.xlu0 %8810  ;;  %8861 = vadd.xlane.f32.xlu1 %v8860_v62 }
 0x8ee   : > { %17561 = vrot.lane.b32.xlu0 %v18377_v55, %s18198_s12  ;;  %18006 = vrcp.f32 %v8811_v5 }
 0x8f0   : > { %v8793_v33 = vpop.xlane.xlu1 %8792 }
 0x8f1   : > { %v8808_v10 = vpop.xlane.xlu0 %8807 }
 0x8f2   : > { %18008 = vrcp.f32 %v8808_v10  ;;  %11213 = vrot.lane.b32.xlu0 %v18327_v40, %s18199_s13 }
 0x8f3   : > { %18010 = vrcp.f32 %v8793_v33  ;;  %v18003_v25 = vpop.eup %18002  ;;  %v22243_v33 = vld [vmem:[#allocation31_spill] sm:$0xff] }
 0x8f4   : > { %v8790_v17 = vpop.xlane.xlu1 %8789  ;;  %v8901_v40 = vmul.f32 %v18003_v25, %v20430_v56 }
 0x8f5   : > { %18012 = vrcp.f32 %v8790_v17  ;;  %v8823_v4 = vpop.xlane.xlu0 %8822  ;;  %v22244_v17 = vld [vmem:[#allocation66_spill] sm:$0xff] }
 0x8f6   : > { %11302 = vrot.lane.b32.xlu0 %v18355_v48, %s18199_s13  ;;  %18014 = vrcp.f32 %v8823_v4  ;;  %v16792_v48 = vpack.c.bf16 %v17459_v1, %v17458_v58  ;;  %v17493_v4 = vunpack.i.l.bf16 %v22244_v17  ;;  %v22245_v58 = vld [vmem:[#allocation34_spill] sm:$0xff] }
 0x8f7   : > { %v18005_v63 = vpop.eup %18004 }
 0x8f8   : > { %v8805_v34 = vpop.xlane.xlu1 %8804  ;;  %v8900_v36 = vmul.f32 %v18005_v63, %v20434_v12  ;;  %v18007_v22 = vpop.eup %18006  ;;  %v22238_v12 = vld [vmem:[#allocation40_spill] sm:$0xff] }
 0x8f9   : > { %v8820_v31 = vpop.xlane.xlu0 %8819  ;;  %v8911_v29 = vmul.f32 %v18007_v22, %v20438_v23  ;;  %v22242_v23 = vld [vmem:[#allocation21_spill] sm:$0xff] }
 0x8fa   : > { %18016 = vrcp.f32 %v8820_v31  ;;  %17571 = vrot.lane.b32.xlu0 %v18413_v3, %s18198_s12  ;;  %15967 = vmatprep.mubr.msk.f32.mxu1 %vm1984_vm3, %v8900_v36  ;;  %v22246_v31 = vld [vmem:[#allocation11_spill] sm:$0xff] }
 0x8fb   : > { %15968 = vmatmul.mubr.msk.f32.vlgmr.msra.gmra.mrb[104].mxu1 %vm1984_vm3, %v8901_v40  ;;  %18018 = vrcp.f32 %v8805_v34  ;;  %v22247_v40 = vld [vmem:[#allocation64_spill] sm:$0xff] }
 0x8fc   : > { %v18009_v44 = vpop.eup %18008  ;;  %16787 = vmatpush3.bf16.msra.mxu1 %v22238_v12  ;;  %v8802_v28 = vpop.xlane.xlu1 %8801  ;;  %v17479_v22 = vunpack.i.h.bf16 %v22247_v40 }
 0x8fd   : > { %16793 = vmatprep.subr.bf16.mxu1 %v16792_v48  ;;  %18020 = vrcp.f32 %v8802_v28  ;;  %v8835_v56 = vpop.xlane.xlu0 %8834  ;;  %v8910_v6 = vmul.f32 %v18009_v44, %v20448_v52  ;;  %v18011_v59 = vpop.eup %18010  ;;  %v16812_v52 = vpack.c.bf16 %v17484_v46, %v17483_v32 }
 0x8fe   : > { %11395 = vrot.lane.b32.xlu0 %v22239_v26, %s18199_s13  ;;  %10940 = vrot.lane.b32.xlu1 %v22240_v11, %s18199_s13  ;;  %18022 = vrcp.f32 %v8835_v56  ;;  %v8905_v62 = vmul.f32 %v18011_v59, %v20446_v53  ;;  %v22249_v56 = vld [vmem:[#allocation35_spill] sm:$0xff]  ;;  %v22250_v59 = vld [vmem:[#allocation68_spill] sm:$0xff] }
 0x8ff   : > { %v18013_v57 = vpop.eup %18012  ;;  %16002 = vmatprep.mubr.msk.f32.mxu0 %vm1984_vm3, %v8910_v6  ;;  %v17504_v26 = vunpack.i.h.bf16 %v22250_v59 }
 0x900   : > { %16003 = vmatmul.mubr.msk.f32.vlgmr.msra.gmra.mrb[94].mxu0 %vm1984_vm3, %v8911_v29  ;;  %v8817_v37 = vpop.xlane.xlu1 %8816  ;;  %v8904_v16 = vmul.f32 %v18013_v57, %v20456_v41  ;;  %v18015_v5 = vpop.eup %18014  ;;  %v17494_v41 = vunpack.i.h.bf16 %v22244_v17  ;;  %v22255_v17 = vld [vmem:[#allocation72_spill] sm:$0xff] }
 0x901   : > { %16807 = vmatpush3.bf16.msra.mxu0 %v20571_v7  ;;  %v8832_v42 = vpop.xlane.xlu0 %8831  ;;  %v16800_v7 = vpack.c.bf16 %v17469_v20, %v17468_v14  ;;  %v8915_v34 = vmul.f32 %v18015_v5, %v20458_v15  ;;  %v22248_v15 = vld [vmem:[#allocation23_spill] sm:$0xff]  ;;  %v22251_v20 = vld [vmem:[#allocation29_spill] sm:$0xff] }
 0x902   : > { %18024 = vrcp.f32 %v8832_v42  ;;  %16813 = vmatprep.subr.bf16.mxu0 %v16812_v52  ;;  %11484 = vrot.lane.b32.xlu0 %v22242_v23, %s18199_s13  ;;  %v16820_v44 = vpack.c.bf16 %v17494_v41, %v17493_v4  ;;  %v22253_v42 = vld [vmem:[#allocation6_spill] sm:$0xff]  ;;  %v17514_v41 = vunpack.i.h.bf16 %v22255_v17  ;;  %v17513_v4 = vunpack.i.l.bf16 %v22255_v17 }
 0x903   : > { %11029 = vrot.lane.b32.xlu1 %v22243_v33, %s18199_s13  ;;  %15981 = vmatprep.mubr.msk.f32.mxu1 %vm1984_vm3, %v8904_v16  ;;  %18026 = vrcp.f32 %v8817_v37 }
 0x904   : > { %v18017_v10 = vpop.eup %18016  ;;  %15982 = vmatmul.mubr.msk.f32.vlgmr.msra.gmra.mrb[106].mxu1 %vm1984_vm3, %v8905_v62  ;;  %v8814_v25 = vpop.xlane.xlu1 %8813 }
 0x905   : > { %16795 = vmatpush3.bf16.msra.mxu1 %v16792_v48  ;;  %18028 = vrcp.f32 %v8814_v25  ;;  %v8847_v63 = vpop.xlane.xlu0 %8846  ;;  %v8914_v53 = vmul.f32 %v18017_v10, %v20468_v9  ;;  %v18019_v1 = vpop.eup %18018  ;;  %v17478_v48 = vunpack.i.l.bf16 %v22247_v40  ;;  %v16836_v40 = vpack.c.bf16 %v17514_v41, %v17513_v4  ;;  %v22274_v41 = vld [vmem:[#allocation27_spill] sm:$0xff] }
 0x906   : > { %16801 = vmatprep.subr.bf16.mxu1 %v16800_v7  ;;  %17581 = vrot.lane.b32.xlu0 %v22245_v58, %s18198_s12  ;;  %18030 = vrcp.f32 %v8847_v63  ;;  %v8909_v12 = vmul.f32 %v18019_v1, %v20466_v47 }
 0x907   : > { %v18021_v36 = vpop.eup %18020  ;;  %17556 = vrot.lane.b32.xlu1 %v22246_v31, %s18198_s12  ;;  %16016 = vmatprep.mubr.msk.f32.mxu0 %vm1984_vm3, %v8914_v53  ;;  %v16808_v11 = vpack.c.bf16 %v17479_v22, %v17478_v48  ;;  %v22258_v22 = vld [vmem:[#allocation9_spill] sm:$0xff]  ;;  %v22259_v48 = vld [vmem:[#allocation67_spill] sm:$0xff] }
 0x908   : > { %16017 = vmatmul.mubr.msk.f32.vlgmr.msra.gmra.mrb[96].mxu0 %vm1984_vm3, %v8915_v34  ;;  %v8829_v9 = vpop.xlane.xlu1 %8828  ;;  %v8908_v46 = vmul.f32 %v18021_v36, %v20476_v60  ;;  %v18023_v28 = vpop.eup %18022  ;;  %v17503_v60 = vunpack.i.l.bf16 %v22250_v59  ;;  %v22263_v59 = vld [vmem:[#allocation75_spill] sm:$0xff] }
 0x909   : > { %16815 = vmatpush3.bf16.msra.mxu0 %v16812_v52  ;;  %v8844_v32 = vpop.xlane.xlu0 %8843  ;;  %v8919_v14 = vmul.f32 %v18023_v28, %v20478_v35  ;;  %v22252_v52 = vld [vmem:[#allocation65_spill] sm:$0xff] }
 0x90a   : > { %18032 = vrcp.f32 %v8844_v32  ;;  %16821 = vmatprep.subr.bf16.mxu0 %v16820_v44  ;;  %11577 = vrot.lane.b32.xlu0 %v22248_v15, %s18199_s13  ;;  %v17489_v16 = vunpack.i.h.bf16 %v22252_v52  ;;  %v17488_v23 = vunpack.i.l.bf16 %v22252_v52  ;;  %v16828_v62 = vpack.c.bf16 %v17504_v26, %v17503_v60  ;;  %v22254_v35 = vld [vmem:[#allocation33_spill] sm:$0xff]  ;;  %v22261_v15 = vld [vmem:[#allocation10_spill] sm:$0xff] }
 0x90b   : > { %11122 = vrot.lane.b32.xlu1 %v22249_v56, %s18199_s13  ;;  %15995 = vmatprep.mubr.msk.f32.mxu1 %vm1984_vm3, %v8908_v46  ;;  %18034 = vrcp.f32 %v8829_v9  ;;  %v17499_v9 = vunpack.i.h.bf16 %v22259_v48  ;;  %v22262_v56 = vld [vmem:[#allocation16_spill] sm:$0xff]  ;;  %v17524_v26 = vunpack.i.h.bf16 %v22263_v59  ;;  %v17523_v60 = vunpack.i.l.bf16 %v22263_v59 }
 0x90c   : > { %v18025_v6 = vpop.eup %18024  ;;  %15996 = vmatmul.mubr.msk.f32.vlgmr.msra.gmra.mrb[108].mxu1 %vm1984_vm3, %v8909_v12  ;;  %v8826_v29 = vpop.xlane.xlu1 %8825  ;;  %v16816_v63 = vpack.c.bf16 %v17489_v16, %v17488_v23 }
 0x90d   : > { %16803 = vmatpush3.bf16.msra.mxu1 %v16800_v7  ;;  %18036 = vrcp.f32 %v8826_v29  ;;  %v8859_v57 = vpop.xlane.xlu0 %8858  ;;  %v8918_v47 = vmul.f32 %v18025_v6, %v20488_v27  ;;  %v18027_v54 = vpop.eup %18026  ;;  %v22256_v7 = vld [vmem:[#allocation22_spill] sm:$0xff] }
 0x90e   : > { %16809 = vmatprep.subr.bf16.mxu1 %v16808_v11  ;;  %11666 = vrot.lane.b32.xlu0 %v22251_v20, %s18199_s13  ;;  %18038 = vrcp.f32 %v8859_v57  ;;  %v8913_v33 = vmul.f32 %v18027_v54, %v20486_v21  ;;  %v22257_v21 = vld [vmem:[#allocation37_spill] sm:$0xff]  ;;  %v22265_v29 = vld [vmem:[#allocation30_spill] sm:$0xff]  ;;  %v16848_v57 = vpack.c.bf16 %v17524_v26, %v17523_v60 }
 0x90f   : > { %v18029_v37 = vpop.eup %18028  ;;  %11211 = vrot.lane.b32.xlu1 %v22253_v42, %s18199_s13  ;;  %16030 = vmatprep.mubr.msk.f32.mxu0 %vm1984_vm3, %v8918_v47  ;;  %v22269_v42 = vld [vmem:[#allocation81_spill] sm:$0xff] }
 0x910   : > { %16031 = vmatmul.mubr.msk.f32.vlgmr.msra.gmra.mrb[98].mxu0 %vm1984_vm3, %v8919_v14  ;;  %v8856_v27 = vpop.xlane.xlu1 %8855  ;;  %v8912_v5 = vmul.f32 %v18029_v37, %v20495_v61  ;;  %v18031_v10 = vpop.eup %18030  ;;  %v22268_v37 = vld [vmem:[#allocation19_spill] sm:$0xff]  ;;  %v17534_v23 = vunpack.i.h.bf16 %v22269_v42 }
 0x911   : > { %16823 = vmatpush3.bf16.msra.mxu0 %v16820_v44  ;;  %18040 = vrcp.f32 %v8856_v27  ;;  %v8923_v34 = vmul.f32 %v18031_v10, %v20497_v51  ;;  %v17498_v44 = vunpack.i.l.bf16 %v22259_v48  ;;  %v17533_v27 = vunpack.i.l.bf16 %v22269_v42 }
 0x912   : > { %16829 = vmatprep.subr.bf16.mxu0 %v16828_v62  ;;  %11757 = vrot.lane.b32.xlu0 %v22254_v35, %s18199_s13 }
 0x913   : > { %17566 = vrot.lane.b32.xlu1 %v22256_v7, %s18198_s12  ;;  %16009 = vmatprep.mubr.msk.f32.mxu1 %vm1984_vm3, %v8912_v5  ;;  %v16860_v35 = vpack.c.bf16 %v17534_v23, %v17533_v27 }
 0x914   : > { %v18033_v25 = vpop.eup %18032  ;;  %16010 = vmatmul.mubr.msk.f32.vlgmr.msra.gmra.mrb[110].mxu1 %vm1984_vm3, %v8913_v33  ;;  %v8841_v61 = vpop.xlane.xlu0 %8840 }
 0x915   : > { %16811 = vmatpush3.bf16.msra.mxu1 %v16808_v11  ;;  %v8922_v53 = vmul.f32 %v18033_v25, %v20506_v30  ;;  %v18035_v1 = vpop.eup %18034  ;;  %18042 = vrcp.f32 %v8841_v61  ;;  %v22264_v11 = vld [vmem:[#allocation24_spill] sm:$0xff]  ;;  %v10848_v4 = vpop.permute.xlu1 %10847  ;;  %v22275_v61 = vld [vmem:[#allocation83_spill] sm:$0xff] }
 0x916   : > { %16817 = vmatprep.subr.bf16.mxu1 %v16816_v63  ;;  %11848 = vrot.lane.b32.xlu0 %v22257_v21, %s18199_s13  ;;  %v8917_v12 = vmul.f32 %v18035_v1, %v20504_v39  ;;  %v22278_v1 = vld [vmem:[#allocation5_spill] sm:$0xff]  ;;  %v22279_v21 = vld [vmem:[#allocation15_spill] sm:$0xff] }
 0x917   : > { %v18037_v36 = vpop.eup %18036  ;;  %11304 = vrot.lane.b32.xlu1 %v22258_v22, %s18199_s13  ;;  %16044 = vmatprep.mubr.msk.f32.mxu0 %vm1984_vm3, %v8922_v53  ;;  %v22277_v53 = vld [vmem:[#allocation36_spill] sm:$0xff] }
 0x918   : > { %v8838_v30 = vpop.xlane.xlu0 %8837  ;;  %16045 = vmatmul.mubr.msk.f32.vlgmr.msra.gmra.mrb[100].mxu0 %vm1984_vm3, %v8923_v34  ;;  %v8916_v46 = vmul.f32 %v18037_v36, %v20514_v38  ;;  %v18039_v51 = vpop.eup %18038  ;;  %v16824_v38 = vpack.c.bf16 %v17499_v9, %v17498_v44  ;;  %v22280_v34 = vld [vmem:[#allocation20_spill] sm:$0xff]  ;;  %v22282_v9 = vld [vmem:[#allocation73_spill] sm:$0xff] }
 0x919   : > { %18044 = vrcp.f32 %v8838_v30  ;;  %16831 = vmatpush3.bf16.msra.mxu0 %v16828_v62  ;;  %v8927_v39 = vmul.f32 %v18039_v51, %v20516_v49  ;;  %v22267_v49 = vld [vmem:[#allocation70_spill] sm:$0xff]  ;;  %v22270_v62 = vld [vmem:[#allocation25_spill] sm:$0xff]  ;;  %v17519_v44 = vunpack.i.h.bf16 %v22282_v9  ;;  %v17518_v30 = vunpack.i.l.bf16 %v22282_v9 }
 0x91a   : > { %16838 = vmatprep.subr.msk.bf16.mxu0 %vm18547_vm2, %v16836_v40  ;;  %17596 = vrot.lane.b32.xlu0 %v22261_v15, %s18200_s14  ;;  %v17509_v20 = vunpack.i.h.bf16 %v22267_v49  ;;  %v17508_v14 = vunpack.i.l.bf16 %v22267_v49 }
 0x91b   : > { %v18041_v28 = vpop.eup %18040  ;;  %11393 = vrot.lane.b32.xlu1 %v22262_v56, %s18199_s13  ;;  %16023 = vmatprep.mubr.msk.f32.mxu1 %vm1984_vm3, %v8916_v46 }
 0x91c   : > { %16024 = vmatmul.mubr.msk.f32.vlgmr.msra.gmra.mrb[112].mxu1 %vm1984_vm3, %v8917_v12  ;;  %v8926_v6 = vmul.f32 %v18041_v28, %v20522_v24  ;;  %v22266_v24 = vld [vmem:[#allocation74_spill] sm:$0xff]  ;;  %v8853_v52 = vpop.xlane.xlu0 %8852  ;;  %v16832_v5 = vpack.c.bf16 %v17509_v20, %v17508_v14  ;;  %v16842_v12 = vpack.c.bf16 %v17519_v44, %v17518_v30 }
 0x91d   : > { %16819 = vmatpush3.bf16.msra.mxu1 %v16816_v63  ;;  %v22276_v63 = vld [vmem:[#allocation32_spill] sm:$0xff]  ;;  %18046 = vrcp.f32 %v8853_v52 }
 0x91e   : > { %16825 = vmatprep.subr.bf16.mxu1 %v16824_v38  ;;  %17611 = vrot.lane.b32.xlu0 %v22264_v11, %s18200_s14 }
 0x91f   : > { %17576 = vrot.lane.b32.xlu1 %v22265_v29, %s18198_s12  ;;  %16058 = vmatprep.mubr.msk.f32.mxu0 %vm1984_vm3, %v8926_v6  ;;  %v18043_v47 = vpop.eup %18042 }
 0x920   : > { %16059 = vmatmul.mubr.msk.f32.vlgmr.msra.gmra.mrb[102].mxu0 %vm1984_vm3, %v8927_v39  ;;  %v17542_v33 = vpop.permute.xlu0 %17541 }
 0x921   : > { %16072 = vmatprep.mubr.msk.f32.mxu0 %vm565_vm1, %v22266_v24  ;;  %v17544_v10 = vunpack.i.h.bf16 %v17542_v33  ;;  %v17543_v17 = vunpack.i.l.bf16 %v17542_v33 }
 0x922   : > { %16841 = vmatpush3.bf16.xpose.msk.msra.mxu0 %vm18547_vm2, %v16836_v40  ;;  %17621 = vrot.lane.b32.xlu0 %v18443_v13, %s18200_s14  ;;  %v8921_v13 = vmul.f32 %v18043_v47, %v20528_v50  ;;  %v22272_v50 = vld [vmem:[#allocation80_spill] sm:$0xff] }
 0x923   : > { %v18045_v54 = vpop.eup %18044  ;;  %11486 = vrot.lane.b32.xlu1 %v22268_v37, %s18199_s13  ;;  %16850 = vmatprep.subr.msk.bf16.mxu0 %vm18547_vm2, %v16848_v57  ;;  %v16872_v25 = vpack.c.bf16 %v17544_v10, %v17543_v17  ;;  %v22281_v40 = vld [vmem:[#allocation28_spill] sm:$0xff]  ;;  %v22288_v17 = vld [vmem:[#allocation79_spill] sm:$0xff] }
 0x924   : > { %v8920_v16 = vmul.f32 %v18045_v54, %v20532_v2  ;;  %v22271_v2 = vld [vmem:[#allocation77_spill] sm:$0xff] }
 0x926   : > { %17631 = vrot.lane.b32.xlu0 %v18341_v43, %s18200_s14  ;;  %16037 = vmatprep.mubr.msk.f32.mxu1 %vm1984_vm3, %v8920_v16  ;;  %v22273_v43 = vld [vmem:[#allocation38_spill] sm:$0xff] }
 0x927   : > { %11575 = vrot.lane.b32.xlu1 %v22270_v62, %s18199_s13  ;;  %16038 = vmatmul.mubr.msk.f32.vlgmr.msra.gmra.mrb[114].mxu1 %vm1984_vm3, %v8921_v13  ;;  %v18047_v22 = vpop.eup %18046  ;;  %v22287_v13 = vld [vmem:[#allocation76_spill] sm:$0xff] }
 0x928   : > { %16827 = vmatpush3.bf16.msra.mxu1 %v16824_v38  ;;  %v8925_v15 = vmul.f32 %v18047_v22, %v20536_v45  ;;  %v17529_v62 = vunpack.i.h.bf16 %v22287_v13 }
 0x929   : > { %16833 = vmatprep.subr.bf16.mxu1 %v16832_v5  ;;  %16073 = vmatmul.mubr.msk.f32.vlgmr.msra.gmra.mrb[104].mxu0 %vm565_vm1, %v22271_v2 }
 0x92a   : > { %16853 = vmatpush3.bf16.xpose.msk.msra.mxu0 %vm18547_vm2, %v16848_v57  ;;  %16086 = vmatprep.mubr.msk.f32.mxu0 %vm565_vm1, %v22272_v50 }
 0x92b   : > { %17586 = vrot.lane.b32.xlu1 %v22273_v43, %s18198_s12  ;;  %16862 = vmatprep.subr.msk.bf16.mxu0 %vm18547_vm2, %v16860_v35 }
 0x92f   : > { %11668 = vrot.lane.b32.xlu1 %v22274_v41, %s18199_s13 }
 0x931   : > { %16087 = vmatmul.mubr.msk.f32.vlgmr.msra.gmra.mrb[106].mxu0 %vm565_vm1, %v22275_v61 }
 0x932   : > { %16865 = vmatpush3.bf16.xpose.msk.msra.mxu0 %vm18547_vm2, %v16860_v35  ;;  %16100 = vmatprep.mubr.msk.f32.mxu0 %vm565_vm1, %v10848_v4  ;;  %v22289_v4 = vld [vmem:[#allocation82_spill] sm:$0xff] }
 0x933   : > { %11759 = vrot.lane.b32.xlu1 %v22276_v63, %s18199_s13  ;;  %16874 = vmatprep.subr.msk.bf16.mxu0 %vm18547_vm2, %v16872_v25 }
 0x937   : > { %11850 = vrot.lane.b32.xlu1 %v22277_v53, %s18199_s13 }
 0x93b   : > { %17591 = vrot.lane.b32.xlu1 %v22278_v1, %s18200_s14 }
 0x93f   : > { %17601 = vrot.lane.b32.xlu1 %v22279_v21, %s18200_s14 }
 0x943   : > { %17606 = vrot.lane.b32.xlu1 %v22280_v34, %s18200_s14  ;;  %v22290_v34 = vld [vmem:[#allocation78_spill] sm:$0xff] }
 0x945   : > { %v8850_v36 = vpop.xlane.xlu1 %8849 }
 0x946   : > { %18048 = vrcp.f32 %v8850_v36  ;;  %v22291_v36 = vld [vmem:[#allocation85_spill] sm:$0xff] }
 0x947   : > { %17616 = vrot.lane.b32.xlu1 %v22281_v40, %s18200_s14 }
 0x949   : > { %v17547_v24 = vpop.permute.xlu1 %17546 }
 0x94a   : > { %v17549_v9 = vunpack.i.h.bf16 %v17547_v24  ;;  %v17548_v44 = vunpack.i.l.bf16 %v17547_v24 }
 0x94b   : > { %17626 = vrot.lane.b32.xlu1 %v18461_v19, %s18200_s14 }
 0x950   : > { %v18049_v48 = vpop.eup %18048 }
 0x951   : > { %v8865_v46 = vpop.xlane.xlu0 %8864  ;;  %v8924_v51 = vmul.f32 %v18049_v48, %v20559_v18 }
 0x952   : > { %18050 = vrcp.f32 %v8865_v46 }
 0x953   : > { %16051 = vmatprep.mubr.msk.f32.mxu1 %vm1984_vm3, %v8924_v51 }
 0x954   : > { %16052 = vmatmul.mubr.msk.f32.vlgmr.msra.gmra.mrb[116].mxu1 %vm1984_vm3, %v8925_v15 }
 0x955   : > { %16835 = vmatpush3.bf16.msra.mxu1 %v16832_v5  ;;  %v10850_v28 = vpop.permute.xlu0 %10849  ;;  %v17528_v5 = vunpack.i.l.bf16 %v22287_v13 }
 0x956   : > { %16844 = vmatprep.subr.msk.bf16.mxu1 %vm18547_vm2, %v16842_v12  ;;  %16101 = vmatmul.mubr.msk.f32.vlgmr.msra.gmra.mrb[108].mxu0 %vm565_vm1, %v10850_v28  ;;  %v22294_v28 = vld [vmem:[#allocation84_spill] sm:$0xff] }
 0x957   : > { %16877 = vmatpush3.bf16.xpose.msk.msra.mxu0 %vm18547_vm2, %v16872_v25  ;;  %v16854_v50 = vpack.c.bf16 %v17529_v62, %v17528_v5 }
 0x959   : > { %v20768_v19 = vpop.permute.xlu0 %10938 }
 0x95c   : > { %v18051_v42 = vpop.eup %18050 }
 0x95d   : > { %v17552_v18 = vpop.permute.xlu0 %17551  ;;  %v8929_v33 = vmul.f32 %v18051_v42, %v20568_v0  ;;  %v17538_v0 = vunpack.i.l.bf16 %v22289_v4 }
 0x95e   : > { %v17554_v56 = vunpack.i.h.bf16 %v17552_v18  ;;  %v17553_v45 = vunpack.i.l.bf16 %v17552_v18 }
 0x960   : > { %v16884_v38 = vpack.c.bf16 %v17554_v56, %v17553_v45 }
 0x961   : > { %v11032_v6 = vpop.permute.xlu0 %11031 }
 0x962   : > { %16886 = vmatprep.subr.msk.bf16.mxu0 %vm18547_vm2, %v16884_v38 }
 0x965   : > { %v20772_v59 = vpop.permute.xlu0 %11120 }
 0x969   : > { %v20774_v26 = vpop.f32.mrb[88].mxu0  ;;  %v17562_v39 = vpop.permute.xlu0 %17561 }
 0x96a   : > { %22283 = vst [vmem:[#allocation40_spill] sm:$0xff] %v20774_v26  ;;  %v20776_v60 = vpop.f32.mrb[89].mxu0  ;;  %v17564_v14 = vunpack.i.h.bf16 %v17562_v39  ;;  %v17563_v37 = vunpack.i.l.bf16 %v17562_v39 }
 0x96b   : > { %22284 = vst [vmem:[#allocation14_spill] sm:$0xff] %v20776_v60 }
 0x96c   : > { %v16896_v23 = vpack.c.bf16 %v17564_v14, %v17563_v37 }
 0x96d   : > { %v11214_v47 = vpop.permute.xlu0 %11213 }
 0x970   : > { %v20778_v11 = vpop.f32.mrb[90].mxu0 }
 0x971   : > { %22285 = vst [vmem:[#allocation26_spill] sm:$0xff] %v20778_v11  ;;  %v20780_v57 = vpop.f32.mrb[91].mxu0  ;;  %v20782_v49 = vpop.permute.xlu0 %11302 }
 0x972   : > { %22286 = vst [vmem:[#allocation63_spill] sm:$0xff] %v20780_v57 }
 0x975   : > { %v17572_v16 = vpop.permute.xlu0 %17571 }
 0x976   : > { %v17574_v25 = vunpack.i.h.bf16 %v17572_v16  ;;  %v17573_v61 = vunpack.i.l.bf16 %v17572_v16 }
 0x978   : > { %v16908_v21 = vpack.c.bf16 %v17574_v25, %v17573_v61 }
 0x979   : > { %v11396_v10 = vpop.permute.xlu0 %11395 }
 0x97a   : > { %v8862_v54 = vpop.xlane.xlu1 %8861 }
 0x97b   : > { %18052 = vrcp.f32 %v8862_v54 }
 0x97d   : > { %v11485_v53 = vpop.permute.xlu0 %11484 }
 0x97e   : > { %v20784_v20 = vpop.permute.xlu1 %10940 }
 0x981   : > { %v17582_v30 = vpop.permute.xlu0 %17581 }
 0x982   : > { %v11030_v52 = vpop.permute.xlu1 %11029  ;;  %v17584_v51 = vunpack.i.h.bf16 %v17582_v30  ;;  %v17583_v15 = vunpack.i.l.bf16 %v17582_v30 }
 0x983   : > { %16114 = vmatprep.mubr.msk.f32.mxu0 %vm565_vm1, %v11030_v52 }
 0x984   : > { %16115 = vmatmul.mubr.msk.f32.vlgmr.msra.gmra.mrb[110].mxu0 %vm565_vm1, %v11032_v6  ;;  %v16920_v56 = vpack.c.bf16 %v17584_v51, %v17583_v15 }
 0x985   : > { %v18053_v27 = vpop.eup %18052  ;;  %16889 = vmatpush3.bf16.xpose.msk.msra.mxu0 %vm18547_vm2, %v16884_v38  ;;  %v11578_v6 = vpop.permute.xlu0 %11577 }
 0x986   : > { %16898 = vmatprep.subr.msk.bf16.mxu0 %vm18547_vm2, %v16896_v23  ;;  %v17557_v35 = vpop.permute.xlu1 %17556  ;;  %v8928_v2 = vmul.f32 %v18053_v27, %v20588_v8  ;;  %v17539_v8 = vunpack.i.h.bf16 %v22289_v4 }
 0x987   : > { %v17559_v45 = vunpack.i.h.bf16 %v17557_v35  ;;  %v17558_v38 = vunpack.i.l.bf16 %v17557_v35 }
 0x988   : > { %16065 = vmatprep.mubr.msk.f32.mxu1 %vm1984_vm3, %v8928_v2  ;;  %v16866_v1 = vpack.c.bf16 %v17539_v8, %v17538_v0 }
 0x989   : > { %16066 = vmatmul.mubr.msk.f32.vlgmr.msra.gmra.mrb[118].mxu1 %vm1984_vm3, %v8929_v33 }
 0x98a   : > { %16847 = vmatpush3.bf16.xpose.msk.msra.mxu1 %vm18547_vm2, %v16842_v12  ;;  %16079 = vmatprep.mubr.msk.f32.mxu1 %vm565_vm1, %v22288_v17  ;;  %v11123_v41 = vpop.permute.xlu1 %11122  ;;  %v16878_v12 = vpack.c.bf16 %v17549_v9, %v17548_v44 }
 0x98b   : > { %16856 = vmatprep.subr.msk.bf16.mxu1 %vm18547_vm2, %v16854_v50 }
 0x98e   : > { %v11212_v63 = vpop.permute.xlu1 %11211 }
 0x98f   : > { %16128 = vmatprep.mubr.msk.f32.mxu0 %vm565_vm1, %v11212_v63 }
 0x990   : > { %16129 = vmatmul.mubr.msk.f32.vlgmr.msra.gmra.mrb[112].mxu0 %vm565_vm1, %v11214_v47  ;;  %v11667_v47 = vpop.permute.xlu0 %11666 }
 0x991   : > { %16080 = vmatmul.mubr.msk.f32.vlgmr.msra.gmra.mrb[120].mxu1 %vm565_vm1, %v22290_v34  ;;  %16901 = vmatpush3.bf16.xpose.msk.msra.mxu0 %vm18547_vm2, %v16896_v23 }
 0x992   : > { %16859 = vmatpush3.bf16.xpose.msk.msra.mxu1 %vm18547_vm2, %v16854_v50  ;;  %16093 = vmatprep.mubr.msk.f32.mxu1 %vm565_vm1, %v22291_v36  ;;  %v17567_v40 = vpop.permute.xlu1 %17566 }
 0x993   : > { %16910 = vmatprep.subr.msk.bf16.mxu0 %vm18547_vm2, %v16908_v21  ;;  %16868 = vmatprep.subr.msk.bf16.mxu1 %vm18547_vm2, %v16866_v1  ;;  %v20820_v22 = vpop.f32.mrb[92].mxu0  ;;  %v17569_v54 = vunpack.i.h.bf16 %v17567_v40  ;;  %v17568_v14 = vunpack.i.l.bf16 %v17567_v40 }
 0x994   : > { %22292 = vst [vmem:[#allocation21_spill] sm:$0xff] %v20820_v22  ;;  %v20822_v48 = vpop.f32.mrb[93].mxu0 }
 0x995   : > { %22293 = vst [vmem:[#allocation31_spill] sm:$0xff] %v20822_v48  ;;  %v16902_v52 = vpack.c.bf16 %v17569_v54, %v17568_v14 }
 0x996   : > { %v11305_v46 = vpop.permute.xlu1 %11304 }
 0x999   : > { %16094 = vmatmul.mubr.msk.f32.vlgmr.msra.gmra.mrb[122].mxu1 %vm565_vm1, %v22294_v28 }
 0x99a   : > { %16871 = vmatpush3.bf16.xpose.msk.msra.mxu1 %vm18547_vm2, %v16866_v1  ;;  %16107 = vmatprep.mubr.msk.f32.mxu1 %vm565_vm1, %v20768_v19  ;;  %v11394_v18 = vpop.permute.xlu1 %11393  ;;  %v16890_v19 = vpack.c.bf16 %v17559_v45, %v17558_v38 }
 0x99b   : > { %16880 = vmatprep.subr.msk.bf16.mxu1 %vm18547_vm2, %v16878_v12  ;;  %16142 = vmatprep.mubr.msk.f32.mxu0 %vm565_vm1, %v11394_v18 }
 0x99c   : > { %16143 = vmatmul.mubr.msk.f32.vlgmr.msra.gmra.mrb[114].mxu0 %vm565_vm1, %v11396_v10 }
 0x99d   : > { %16913 = vmatpush3.bf16.xpose.msk.msra.mxu0 %vm18547_vm2, %v16908_v21 }
 0x99e   : > { %16922 = vmatprep.subr.msk.bf16.mxu0 %vm18547_vm2, %v16920_v56  ;;  %v17577_v39 = vpop.permute.xlu1 %17576 }
 0x99f   : > { %v17579_v16 = vunpack.i.h.bf16 %v17577_v39  ;;  %v17578_v42 = vunpack.i.l.bf16 %v17577_v39 }
 0x9a1   : > { %16108 = vmatmul.mubr.msk.f32.vlgmr.msra.gmra.mrb[124].mxu1 %vm565_vm1, %v20784_v20  ;;  %v11758_v20 = vpop.permute.xlu0 %11757  ;;  %v16914_v27 = vpack.c.bf16 %v17579_v16, %v17578_v42 }
 0x9a2   : > { %16883 = vmatpush3.bf16.xpose.msk.msra.mxu1 %vm18547_vm2, %v16878_v12  ;;  %16121 = vmatprep.mubr.msk.f32.mxu1 %vm565_vm1, %v20772_v59  ;;  %v11487_v24 = vpop.permute.xlu1 %11486 }
 0x9a3   : > { %16892 = vmatprep.subr.msk.bf16.mxu1 %vm18547_vm2, %v16890_v19 }
 0x9a6   : > { %v11576_v37 = vpop.permute.xlu1 %11575 }
 0x9a7   : > { %16156 = vmatprep.mubr.msk.f32.mxu0 %vm565_vm1, %v11576_v37 }
 0x9a8   : > { %16157 = vmatmul.mubr.msk.f32.vlgmr.msra.gmra.mrb[116].mxu0 %vm565_vm1, %v11578_v6 }
 0x9a9   : > { %16122 = vmatmul.mubr.msk.f32.vlgmr.msra.gmra.mrb[126].mxu1 %vm565_vm1, %v11123_v41  ;;  %16925 = vmatpush3.bf16.xpose.msk.msra.mxu0 %vm18547_vm2, %v16920_v56 }
 0x9aa   : > { %16895 = vmatpush3.bf16.xpose.msk.msra.mxu1 %vm18547_vm2, %v16890_v19  ;;  %16135 = vmatprep.mubr.msk.f32.mxu1 %vm565_vm1, %v20782_v49  ;;  %v17587_v59 = vpop.permute.xlu1 %17586  ;;  %v11849_v49 = vpop.permute.xlu0 %11848 }
 0x9ab   : > { %16170 = vmatprep.mubr.msk.f32.mxu0 %vm565_vm1, %v11758_v20  ;;  %16904 = vmatprep.subr.msk.bf16.mxu1 %vm18547_vm2, %v16902_v52  ;;  %v17589_v62 = vunpack.i.h.bf16 %v17587_v59  ;;  %v17588_v5 = vunpack.i.l.bf16 %v17587_v59 }
 0x9ad   : > { %v16926_v2 = vpack.c.bf16 %v17589_v62, %v17588_v5 }
 0x9ae   : > { %v11669_v23 = vpop.permute.xlu1 %11668  ;;  %v17597_v33 = vpop.permute.xlu0 %17596 }
 0x9af   : > { %v17599_v41 = vunpack.i.h.bf16 %v17597_v33  ;;  %v17598_v4 = vunpack.i.l.bf16 %v17597_v33 }
 0x9b1   : > { %16136 = vmatmul.mubr.msk.f32.vlgmr.msra.gmra.mrb[128].mxu1 %vm565_vm1, %v11305_v46  ;;  %v16936_v63 = vpack.c.bf16 %v17599_v41, %v17598_v4 }
 0x9b2   : > { %16907 = vmatpush3.bf16.xpose.msk.msra.mxu1 %vm18547_vm2, %v16902_v52  ;;  %16149 = vmatprep.mubr.msk.f32.mxu1 %vm565_vm1, %v11485_v53  ;;  %v11760_v13 = vpop.permute.xlu1 %11759 }
 0x9b3   : > { %16916 = vmatprep.subr.msk.bf16.mxu1 %vm18547_vm2, %v16914_v27  ;;  %16171 = vmatmul.mubr.msk.f32.vlgmr.msra.gmra.mrb[118].mxu0 %vm565_vm1, %v11760_v13 }
 0x9b6   : > { %v11851_v35 = vpop.permute.xlu1 %11850 }
 0x9b9   : > { %16150 = vmatmul.mubr.msk.f32.vlgmr.msra.gmra.mrb[130].mxu1 %vm565_vm1, %v11487_v24 }
 0x9ba   : > { %16919 = vmatpush3.bf16.xpose.msk.msra.mxu1 %vm18547_vm2, %v16914_v27  ;;  %16163 = vmatprep.mubr.msk.f32.mxu1 %vm565_vm1, %v11667_v47  ;;  %v17592_v50 = vpop.permute.xlu1 %17591 }
 0x9bb   : > { %v17594_v10 = vunpack.i.h.bf16 %v17592_v50  ;;  %v17593_v17 = vunpack.i.l.bf16 %v17592_v50  ;;  %16928 = vmatprep.subr.msk.bf16.mxu1 %vm18547_vm2, %v16926_v2 }
 0x9bd   : > { %v16932_v8 = vpack.c.bf16 %v17594_v10, %v17593_v17 }
 0x9be   : > { %v17602_v0 = vpop.permute.xlu1 %17601 }
 0x9bf   : > { %v17604_v25 = vunpack.i.h.bf16 %v17602_v0  ;;  %v17603_v61 = vunpack.i.l.bf16 %v17602_v0  ;;  %16933 = vmatprep.subr.bf16.mxu0 %v16932_v8 }
 0x9c0   : > { %16935 = vmatpush3.bf16.msra.mxu0 %v16932_v8 }
 0x9c1   : > { %16164 = vmatmul.mubr.msk.f32.vlgmr.msra.gmra.mrb[132].mxu1 %vm565_vm1, %v11669_v23  ;;  %v20872_v53 = vpack.c.bf16 %v17604_v25, %v17603_v61 }
 0x9c2   : > { %16931 = vmatpush3.bf16.xpose.msk.msra.mxu1 %vm18547_vm2, %v16926_v2  ;;  %16177 = vmatprep.mubr.msk.f32.mxu1 %vm565_vm1, %v11849_v49  ;;  %v17607_v1 = vpop.permute.xlu1 %17606 }
 0x9c3   : > { %16937 = vmatprep.subr.bf16.mxu1 %v16936_v63  ;;  %16941 = vmatprep.subr.bf16.mxu0 %v20872_v53  ;;  %v17609_v21 = vunpack.i.h.bf16 %v17607_v1  ;;  %v17608_v34 = vunpack.i.l.bf16 %v17607_v1 }
 0x9c5   : > { %v20879_v36 = vpack.c.bf16 %v17609_v21, %v17608_v34 }
 0x9c7   : > { %22295 = vst [vmem:[#allocation66_spill] sm:$0xff] %v20879_v36 }
 0x9c9   : > { %16178 = vmatmul.mubr.msk.f32.vlgmr.msra.gmra.mrb[134].mxu1 %vm565_vm1, %v11851_v35 }
 0x9ca   : > { %16939 = vmatpush3.bf16.msra.mxu1 %v16936_v63 }
 0x9cb   : > { %16945 = vmatprep.subr.bf16.mxu1 %v20879_v36 }
 0x9ce   : > { %v20882_v40 = vpop.f32.mrb[104].mxu1 }
 0x9cf   : > { %22296 = vst [vmem:[#allocation11_spill] sm:$0xff] %v20882_v40  ;;  %v20884_v9 = vpop.f32.mrb[105].mxu1 }
 0x9d0   : > { %22297 = vst [vmem:[#allocation64_spill] sm:$0xff] %v20884_v9 }
 0x9d3   : > { %v20886_v32 = vpop.f32.mrb[94].mxu0 }
 0x9d4   : > { %22298 = vst [vmem:[#allocation23_spill] sm:$0xff] %v20886_v32  ;;  %v20888_v44 = vpop.f32.mrb[95].mxu0 }
 0x9d5   : > { %22299 = vst [vmem:[#allocation35_spill] sm:$0xff] %v20888_v44 }
 0x9d7   : > { %v20890_v30 = vpop.f32.mrb[106].mxu1 }
 0x9d8   : > { %22300 = vst [vmem:[#allocation68_spill] sm:$0xff] %v20890_v30  ;;  %v20892_v46 = vpop.f32.mrb[107].mxu1 }
 0x9d9   : > { %22301 = vst [vmem:[#allocation29_spill] sm:$0xff] %v20892_v46 }
 0x9db   : > { %v20894_v51 = vpop.f32.mrb[96].mxu0 }
 0x9dc   : > { %22302 = vst [vmem:[#allocation65_spill] sm:$0xff] %v20894_v51  ;;  %v20896_v15 = vpop.f32.mrb[97].mxu0 }
 0x9dd   : > { %22303 = vst [vmem:[#allocation6_spill] sm:$0xff] %v20896_v15 }
 0x9df   : > { %v20898_v12 = vpop.f32.mrb[108].mxu1 }
 0x9e0   : > { %22304 = vst [vmem:[#allocation33_spill] sm:$0xff] %v20898_v12  ;;  %v20900_v28 = vpop.f32.mrb[109].mxu1 }
 0x9e1   : > { %22305 = vst [vmem:[#allocation72_spill] sm:$0xff] %v20900_v28 }
 0x9e3   : > { %v20902_v18 = vpop.f32.mrb[98].mxu0 }
 0x9e4   : > { %22306 = vst [vmem:[#allocation22_spill] sm:$0xff] %v20902_v18  ;;  %v20904_v56 = vpop.f32.mrb[99].mxu0 }
 0x9e5   : > { %22307 = vst [vmem:[#allocation37_spill] sm:$0xff] %v20904_v56 }
 0x9e7   : > { %v20906_v45 = vpop.f32.mrb[110].mxu1 }
 0x9e8   : > { %22308 = vst [vmem:[#allocation9_spill] sm:$0xff] %v20906_v45  ;;  %v20908_v38 = vpop.f32.mrb[111].mxu1 }
 0x9e9   : > { %22309 = vst [vmem:[#allocation67_spill] sm:$0xff] %v20908_v38 }
 0x9eb   : > { %v20910_v6 = vpop.f32.mrb[100].mxu0 }
 0x9ec   : > { %22310 = vst [vmem:[#allocation39_spill] sm:$0xff] %v20910_v6  ;;  %v20912_v39 = vpop.f32.mrb[101].mxu0 }
 0x9ed   : > { %22311 = vst [vmem:[#allocation10_spill] sm:$0xff] %v20912_v39 }
 0x9ef   : > { %v20914_v19 = vpop.f32.mrb[112].mxu1 }
 0x9f0   : > { %22312 = vst [vmem:[#allocation16_spill] sm:$0xff] %v20914_v19  ;;  %v20916_v24 = vpop.f32.mrb[113].mxu1 }
 0x9f1   : > { %22313 = vst [vmem:[#allocation75_spill] sm:$0xff] %v20916_v24 }
 0x9f3   : > { %v20918_v47 = vpop.f32.mrb[102].mxu0 }
 0x9f4   : > { %22314 = vst [vmem:[#allocation24_spill] sm:$0xff] %v20918_v47  ;;  %v20920_v54 = vpop.f32.mrb[103].mxu0 }
 0x9f5   : > { %22315 = vst [vmem:[#allocation30_spill] sm:$0xff] %v20920_v54 }
 0x9fa   : > { %v20922_v14 = vpop.f32.mrb[114].mxu1 }
 0x9fb   : > { %22316 = vst [vmem:[#allocation74_spill] sm:$0xff] %v20922_v14  ;;  %v20924_v37 = vpop.f32.mrb[115].mxu1 }
 0x9fc   : > { %22317 = vst [vmem:[#allocation70_spill] sm:$0xff] %v20924_v37  ;;  %v20926_v52 = vpop.f32.mrb[104].mxu0 }
 0x9fd   : > { %v20928_v20 = vpop.f32.mrb[105].mxu0  ;;  %v11942_v59 = vsel %vm1984_vm3, %v20926_v52, -inf }
 0x9fe   : > { %11943 = vmax.xlane.f32.xlu1 %v11942_v59  ;;  %v11939_v16 = vsel %vm1984_vm3, %v20928_v20, -inf }
 0x9ff   : > { %11940 = vmax.xlane.f32.xlu0 %v11939_v16 }
 0xa04   : > { %v20934_v42 = vpop.f32.mrb[106].mxu0 }
 0xa05   : > { %v20936_v23 = vpop.f32.mrb[107].mxu0  ;;  %v11954_v27 = vsel %vm1984_vm3, %v20934_v42, -inf }
 0xa06   : > { %11955 = vmax.xlane.f32.xlu0 %v11954_v27  ;;  %v11951_v13 = vsel %vm1984_vm3, %v20936_v23, -inf }
 0xa07   : > { %11952 = vmax.xlane.f32.xlu1 %v11951_v13 }
 0xa27   : > { %v20942_v49 = vpop.f32.mrb[116].mxu1 }
 0xa28   : > { %22318 = vst [vmem:[#allocation19_spill] sm:$0xff] %v20942_v49  ;;  %v20944_v62 = vpop.f32.mrb[117].mxu1  ;;  %v21018_v49 = vpop.permute.xlu1 %17616 }
 0xa29   : > { %22319 = vst [vmem:[#allocation81_spill] sm:$0xff] %v20944_v62  ;;  %v20946_v5 = vpop.f32.mrb[108].mxu0  ;;  %22322 = vst [vmem:[#allocation80_spill] sm:$0xff] %v21018_v49 }
 0xa2a   : > { %v20948_v35 = vpop.f32.mrb[109].mxu0  ;;  %v11966_v2 = vsel %vm1984_vm3, %v20946_v5, -inf }
 0xa2b   : > { %11967 = vmax.xlane.f32.xlu0 %v11966_v2  ;;  %v11963_v33 = vsel %vm1984_vm3, %v20948_v35, -inf }
 0xa2c   : > { %11964 = vmax.xlane.f32.xlu1 %v11963_v33  ;;  %v21036_v51 = vpop.permute.xlu1 %17626 }
 0xa2d   : > { %22323 = vst [vmem:[#allocation27_spill] sm:$0xff] %v21036_v51 }
 0xa57   : > { %v20954_v50 = vpop.f32.mrb[110].mxu0 }
 0xa58   : > { %v20956_v10 = vpop.f32.mrb[111].mxu0  ;;  %v11978_v59 = vsel %vm1984_vm3, %v20954_v50, -inf }
 0xa59   : > { %v11975_v17 = vsel %vm1984_vm3, %v20956_v10, -inf }
 0xa5a   : > { %11976 = vmax.xlane.f32.xlu1 %v11975_v17 }
 0xa5c   : > { %v20960_v41 = vpop.f32.mrb[118].mxu1 }
 0xa5d   : > { %22320 = vst [vmem:[#allocation25_spill] sm:$0xff] %v20960_v41  ;;  %v20962_v4 = vpop.f32.mrb[119].mxu1 }
 0xa5e   : > { %22321 = vst [vmem:[#allocation77_spill] sm:$0xff] %v20962_v4 }
 0xa63   : > { %v20964_v8 = vpop.f32.mrb[112].mxu0 }
 0xa64   : > { %v20966_v0 = vpop.f32.mrb[120].mxu1  ;;  %v20968_v25 = vpop.f32.mrb[113].mxu0 }
 0xa65   : > { %v20970_v61 = vpop.f32.mrb[121].mxu1  ;;  %v11948_v63 = vsel %vm1984_vm3, %v20966_v0, -inf  ;;  %v11987_v33 = vsel %vm1984_vm3, %v20968_v25, -inf }
 0xa66   : > { %11949 = vmax.xlane.f32.xlu0 %v11948_v63  ;;  %v11945_v1 = vsel %vm1984_vm3, %v20970_v61, -inf }
 0xa6a   : > { %11946 = vmax.xlane.f32.xlu0 %v11945_v1  ;;  %v11990_v1 = vsel %vm1984_vm3, %v20964_v8, -inf }
 0xa6c   : > { %v20976_v21 = vpop.f32.mrb[122].mxu1 }
 0xa6d   : > { %v20978_v34 = vpop.f32.mrb[123].mxu1  ;;  %v11960_v2 = vsel %vm1984_vm3, %v20976_v21, -inf }
 0xa6e   : > { %11979 = vmax.xlane.f32.xlu0 %v11978_v59  ;;  %v11957_v16 = vsel %vm1984_vm3, %v20978_v34, -inf }
 0xa6f   : > { %11958 = vmax.xlane.f32.xlu1 %v11957_v16  ;;  %v20984_v27 = vpop.f32.mrb[114].mxu0 }
 0xa70   : > { %v20986_v13 = vpop.f32.mrb[115].mxu0 }
 0xa72   : > { %11961 = vmax.xlane.f32.xlu0 %v11960_v2  ;;  %v11999_v2 = vsel %vm1984_vm3, %v20986_v13, -inf }
 0xa73   : > { %11988 = vmax.xlane.f32.xlu1 %v11987_v33  ;;  %v21004_v33 = vpop.permute.xlu0 %17611 }
 0xa74   : > { %v20992_v17 = vpop.f32.mrb[124].mxu1 }
 0xa75   : > { %v20994_v63 = vpop.f32.mrb[125].mxu1  ;;  %v11972_v16 = vsel %vm1984_vm3, %v20992_v17, -inf }
 0xa76   : > { %11991 = vmax.xlane.f32.xlu0 %v11990_v1  ;;  %v11969_v59 = vsel %vm1984_vm3, %v20994_v63, -inf }
 0xa77   : > { %11970 = vmax.xlane.f32.xlu1 %v11969_v59  ;;  %v12002_v59 = vsel %vm1984_vm3, %v20984_v27, -inf  ;;  %v21022_v6 = vpop.permute.xlu0 %17621 }
 0xa7a   : > { %11973 = vmax.xlane.f32.xlu0 %v11972_v16 }
 0xa7b   : > { %12000 = vmax.xlane.f32.xlu1 %v11999_v2  ;;  %v21006_v4 = vpop.f32.mrb[116].mxu0  ;;  %v21040_v62 = vpop.permute.xlu0 %17631 }
 0xa7c   : > { %v21008_v41 = vpop.f32.mrb[126].mxu1  ;;  %v21010_v47 = vpop.f32.mrb[117].mxu0 }
 0xa7d   : > { %v21012_v1 = vpop.f32.mrb[127].mxu1  ;;  %v11984_v2 = vsel %vm1984_vm3, %v21008_v41, -inf  ;;  %v12011_v14 = vsel %vm1984_vm3, %v21010_v47, -inf }
 0xa7e   : > { %12003 = vmax.xlane.f32.xlu0 %v12002_v59  ;;  %v11981_v16 = vsel %vm1984_vm3, %v21012_v1, -inf  ;;  %v12014_v59 = vsel %vm1984_vm3, %v21006_v4, -inf }
 0xa7f   : > { %11982 = vmax.xlane.f32.xlu1 %v11981_v16 }
 0xa82   : > { %11985 = vmax.xlane.f32.xlu0 %v11984_v2 }
 0xa83   : > { %12012 = vmax.xlane.f32.xlu1 %v12011_v14 }
 0xa84   : > { %v21026_v18 = vpop.f32.mrb[128].mxu1 }
 0xa85   : > { %v21028_v19 = vpop.f32.mrb[129].mxu1  ;;  %v11996_v45 = vsel %vm1984_vm3, %v21026_v18, -inf }
 0xa86   : > { %12015 = vmax.xlane.f32.xlu0 %v12014_v59  ;;  %v21032_v16 = vpop.f32.mrb[118].mxu0  ;;  %v11993_v54 = vsel %vm1984_vm3, %v21028_v19, -inf }
 0xa87   : > { %11994 = vmax.xlane.f32.xlu1 %v11993_v54  ;;  %v21038_v2 = vpop.f32.mrb[119].mxu0  ;;  %v12026_v12 = vsel %vm1984_vm3, %v21032_v16, -inf }
 0xa88   : > { %v12023_v14 = vsel %vm1984_vm3, %v21038_v2, -inf }
 0xa8a   : > { %11997 = vmax.xlane.f32.xlu0 %v11996_v45 }
 0xa8b   : > { %v11944_v59 = vpop.xlane.xlu1 %11943  ;;  %12024 = vmax.xlane.f32.xlu1 %v12023_v14 }
 0xa8c   : > { %v12036_v39 = vsub.f32 %v20926_v52, %v11944_v59  ;;  %v11941_v32 = vpop.xlane.xlu0 %11940  ;;  %v21047_v37 = vpop.f32.mrb[130].mxu1 }
 0xa8d   : > { %v12035_v54 = vsub.f32 %v20928_v20, %v11941_v32  ;;  %v21050_v51 = vpop.f32.mrb[131].mxu1  ;;  %v12008_v52 = vsel %vm1984_vm3, %v21047_v37, -inf }
 0xa8e   : > { %12027 = vmax.xlane.f32.xlu0 %v12026_v12  ;;  %v12005_v56 = vsel %vm1984_vm3, %v21050_v51, -inf  ;;  %v12069_v45 = vmul.f32 1.442695, %v12036_v39 }
 0xa8f   : > { %12006 = vmax.xlane.f32.xlu1 %v12005_v56  ;;  %v12067_v22 = vmul.f32 1.442695, %v12035_v54 }
 0xa90   : > { %18054 = vpow2.f32 %v12069_v45 }
 0xa91   : > { %18056 = vpow2.f32 %v12067_v22 }
 0xa92   : > { %12009 = vmax.xlane.f32.xlu0 %v12008_v52 }
 0xa93   : > { %v11956_v14 = vpop.xlane.xlu0 %11955 }
 0xa94   : > { %v12040_v32 = vsub.f32 %v20934_v42, %v11956_v14  ;;  %v11953_v20 = vpop.xlane.xlu1 %11952  ;;  %v21059_v59 = vpop.f32.mrb[132].mxu1 }
 0xa95   : > { %v12039_v12 = vsub.f32 %v20936_v23, %v11953_v20  ;;  %v21062_v24 = vpop.f32.mrb[133].mxu1  ;;  %v12020_v56 = vsel %vm1984_vm3, %v21059_v59, -inf }
 0xa96   : > { %v12077_v39 = vmul.f32 1.442695, %v12040_v32  ;;  %12021 = vmax.xlane.f32.xlu0 %v12020_v56  ;;  %v12017_v54 = vsel %vm1984_vm3, %v21062_v24, -inf }
 0xa97   : > { %v12075_v52 = vmul.f32 1.442695, %v12039_v12  ;;  %12018 = vmax.xlane.f32.xlu1 %v12017_v54 }
 0xa98   : > { %18058 = vpow2.f32 %v12077_v39 }
 0xa99   : > { %18060 = vpow2.f32 %v12075_v52 }
 0xa9a   : > { %v21074_v23 = vpop.eup %18054 }
 0xa9b   : > { %v21078_v32 = vpop.eup %18056  ;;  %v12134_v20 = vsel %vm1984_vm3, %v21074_v23, 0.0 }
 0xa9c   : > { %v21068_v42 = vpop.f32.mrb[134].mxu1  ;;  %v12131_v56 = vsel %vm1984_vm3, %v21078_v32, 0.0 }
 0xa9d   : > { %v21070_v45 = vpop.f32.mrb[135].mxu1  ;;  %v12032_v22 = vsel %vm1984_vm3, %v21068_v42, -inf }
 0xa9e   : > { %22324 = vst [vmem:[#allocation83_spill] sm:$0xff] %v21070_v45  ;;  %12033 = vmax.xlane.f32.xlu0 %v12032_v22  ;;  %v12029_v14 = vsel %vm1984_vm3, %v21070_v45, -inf }
 0xa9f   : > { %12030 = vmax.xlane.f32.xlu1 %v12029_v14 }
 0xaa2   : > { %v21082_v12 = vpop.eup %18058  ;;  %12135 = vadd.xlane.f32.xlu0 %v12134_v20 }
 0xaa3   : > { %v21086_v39 = vpop.eup %18060  ;;  %12132 = vadd.xlane.f32.xlu1 %v12131_v56  ;;  %v12146_v54 = vsel %vm1984_vm3, %v21082_v12, 0.0 }
 0xaa4   : > { %v12143_v52 = vsel %vm1984_vm3, %v21086_v39, 0.0 }
 0xaa6   : > { %12147 = vadd.xlane.f32.xlu0 %v12146_v54 }
 0xaa7   : > { %12144 = vadd.xlane.f32.xlu1 %v12143_v52 }
 0xab8   : > { %v11968_v22 = vpop.xlane.xlu0 %11967 }
 0xab9   : > { %v12044_v14 = vsub.f32 %v20946_v5, %v11968_v22  ;;  %v11965_v30 = vpop.xlane.xlu1 %11964 }
 0xaba   : > { %v12043_v20 = vsub.f32 %v20948_v35, %v11965_v30 }
 0xabb   : > { %v12085_v15 = vmul.f32 1.442695, %v12044_v14 }
 0xabc   : > { %v12083_v11 = vmul.f32 1.442695, %v12043_v20 }
 0xabd   : > { %18062 = vpow2.f32 %v12085_v15 }
 0xabe   : > { %18064 = vpow2.f32 %v12083_v11 }
 0xac7   : > { %v21094_v38 = vpop.eup %18062 }
 0xac8   : > { %22325 = vst [vmem:[#allocation32_spill] sm:$0xff] %v21094_v38  ;;  %v21096_v56 = vpop.eup %18064  ;;  %v12158_v54 = vsel %vm1984_vm3, %v21094_v38, 0.0 }
 0xac9   : > { %22326 = vst [vmem:[#allocation36_spill] sm:$0xff] %v21096_v56  ;;  %12159 = vadd.xlane.f32.xlu0 %v12158_v54  ;;  %v12155_v52 = vsel %vm1984_vm3, %v21096_v56, 0.0 }
 0xaca   : > { %12156 = vadd.xlane.f32.xlu1 %v12155_v52 }
 0xae7   : > { %v11977_v14 = vpop.xlane.xlu1 %11976 }
 0xaf3   : > { %v11950_v5 = vpop.xlane.xlu0 %11949 }
 0xaf4   : > { %v12038_v22 = vsub.f32 %v20966_v0, %v11950_v5 }
 0xaf6   : > { %v12073_v30 = vmul.f32 1.442695, %v12038_v22 }
 0xaf7   : > { %v11947_v35 = vpop.xlane.xlu0 %11946 }
 0xaf8   : > { %18066 = vpow2.f32 %v12073_v30  ;;  %v12037_v11 = vsub.f32 %v20970_v61, %v11947_v35 }
 0xafa   : > { %v12071_v15 = vmul.f32 1.442695, %v12037_v11 }
 0xafb   : > { %v11980_v20 = vpop.xlane.xlu0 %11979 }
 0xafc   : > { %18068 = vpow2.f32 %v12071_v15  ;;  %v11959_v40 = vpop.xlane.xlu1 %11958 }
 0xaff   : > { %v11962_v36 = vpop.xlane.xlu0 %11961 }
 0xb00   : > { %v21104_v44 = vpop.xlane.xlu1 %11988 }
 0xb02   : > { %v21106_v54 = vpop.eup %18066 }
 0xb03   : > { %22327 = vst [vmem:[#allocation5_spill] sm:$0xff] %v21106_v54  ;;  %v21108_v49 = vpop.xlane.xlu0 %11991  ;;  %v12140_v0 = vsel %vm1984_vm3, %v21106_v54, 0.0 }
 0xb04   : > { %v11971_v52 = vpop.xlane.xlu1 %11970  ;;  %12141 = vadd.xlane.f32.xlu0 %v12140_v0 }
 0xb05   : > { %v12045_v46 = vsub.f32 %v20994_v63, %v11971_v52 }
 0xb06   : > { %v21112_v5 = vpop.eup %18068 }
 0xb07   : > { %22328 = vst [vmem:[#allocation15_spill] sm:$0xff] %v21112_v5  ;;  %v21114_v22 = vpop.xlane.xlu0 %11973  ;;  %v12137_v61 = vsel %vm1984_vm3, %v21112_v5, 0.0  ;;  %v12087_v43 = vmul.f32 1.442695, %v12045_v46 }
 0xb08   : > { %v21118_v30 = vpop.xlane.xlu1 %12000  ;;  %12138 = vadd.xlane.f32.xlu1 %v12137_v61 }
 0xb0b   : > { %v12004_v35 = vpop.xlane.xlu0 %12003 }
 0xb0c   : > { %v11983_v11 = vpop.xlane.xlu1 %11982 }
 0xb0f   : > { %v21120_v15 = vpop.xlane.xlu0 %11985 }
 0xb10   : > { %v21122_v26 = vpop.xlane.xlu1 %12012 }
 0xb13   : > { %v12016_v60 = vpop.xlane.xlu0 %12015 }
 0xb14   : > { %v21126_v0 = vpop.xlane.xlu1 %11994 }
 0xb17   : > { %v21124_v54 = vpop.xlane.xlu0 %11997 }
 0xb18   : > { %v21134_v61 = vpop.xlane.xlu1 %12024 }
 0xb19   : > { %17636 = vrot.lane.b32.xlu1 %v22246_v31, %s18200_s14  ;;  %v12041_v31 = vsub.f32 %v20978_v34, %v11959_v40  ;;  %v12047_v40 = vsub.f32 %v20956_v10, %v11977_v14  ;;  %v12054_v14 = vsub.f32 %v21026_v18, %v21124_v54 }
 0xb1a   : > { %17641 = vrot.lane.b32.xlu0 %v18377_v55, %s18200_s14 }
 0xb1b   : > { %v21132_v5 = vpop.xlane.xlu0 %12027  ;;  %v12079_v57 = vmul.f32 1.442695, %v12041_v31  ;;  %v12049_v31 = vsub.f32 %v21012_v1, %v11983_v11  ;;  %v12091_v46 = vmul.f32 1.442695, %v12047_v40  ;;  %v12052_v1 = vsub.f32 %v20964_v8, %v21108_v49 }
 0xb1c   : > { %v21142_v48 = vpop.xlane.xlu1 %12006 }
 0xb1d   : > { %18070 = vpow2.f32 %v12079_v57  ;;  %v12042_v57 = vsub.f32 %v20976_v21, %v11962_v36 }
 0xb1e   : > { %17646 = vrot.lane.b32.xlu0 %v22256_v7, %s18200_s14  ;;  %18072 = vpow2.f32 %v12087_v43  ;;  %v12060_v43 = vsub.f32 %v21006_v4, %v12016_v60  ;;  %v17614_v60 = vunpack.i.h.bf16 %v21004_v33  ;;  %v17613_v4 = vunpack.i.l.bf16 %v21004_v33 }
 0xb1f   : > { %v21138_v28 = vpop.xlane.xlu0 %12009  ;;  %v12064_v33 = vsub.f32 %v21032_v16, %v21132_v5 }
 0xb22   : > { %17651 = vrot.lane.b32.xlu0 %v18413_v3, %s18200_s14  ;;  %v12048_v3 = vsub.f32 %v20954_v50, %v11980_v20  ;;  %v12095_v50 = vmul.f32 1.442695, %v12049_v31  ;;  %v12051_v20 = vsub.f32 %v20968_v25, %v21104_v44 }
 0xb23   : > { %v21147_v55 = vpop.xlane.xlu0 %12021 }
 0xb24   : > { %v21149_v58 = vpop.xlane.xlu1 %12018  ;;  %v12093_v34 = vmul.f32 1.442695, %v12048_v3  ;;  %v12105_v3 = vmul.f32 1.442695, %v12054_v14  ;;  %v12099_v16 = vmul.f32 1.442695, %v12051_v20  ;;  %v12062_v31 = vsub.f32 %v21059_v59, %v21147_v55 }
 0xb25   : > { %v12059_v14 = vsub.f32 %v21010_v47, %v21122_v26  ;;  %v12053_v26 = vsub.f32 %v21028_v19, %v21126_v0 }
 0xb26   : > { %17656 = vrot.lane.b32.xlu0 %v22265_v29, %s18200_s14  ;;  %v12056_v29 = vsub.f32 %v20984_v27, %v12004_v35  ;;  %v12081_v27 = vmul.f32 1.442695, %v12042_v57  ;;  %v12101_v35 = vmul.f32 1.442695, %v12052_v1 }
 0xb28   : > { %v12109_v52 = vmul.f32 1.442695, %v12056_v29  ;;  %v17623_v29 = vunpack.i.l.bf16 %v21022_v6 }
 0xb2b   : > { %v21152_v7 = vpop.xlane.xlu0 %12033 }
 0xb2c   : > { %v21154_v9 = vpop.xlane.xlu1 %12030  ;;  %v12066_v59 = vsub.f32 %v21068_v42, %v21152_v7 }
 0xb2f   : > { %v12136_v38 = vpop.xlane.xlu0 %12135 }
 0xb30   : > { %v12133_v56 = vpop.xlane.xlu1 %12132  ;;  %18074 = vrcp.f32 %v12136_v38  ;;  %v21162_v38 = vpop.eup %18070 }
 0xb31   : > { %18076 = vrcp.f32 %v12133_v56  ;;  %v21164_v10 = vpop.eup %18072  ;;  %v12149_v36 = vsel %vm1984_vm3, %v21162_v38, 0.0 }
 0xb32   : > { %v12161_v18 = vsel %vm1984_vm3, %v21164_v10, 0.0 }
 0xb33   : > { %v12148_v63 = vpop.xlane.xlu0 %12147 }
 0xb34   : > { %v12145_v45 = vpop.xlane.xlu1 %12144 }
 0xb35   : > { %18078 = vrcp.f32 %v12145_v45  ;;  %v12117_v45 = vmul.f32 1.442695, %v12060_v43 }
 0xb36   : > { %18080 = vrcp.f32 %v12148_v63 }
 0xb37   : > { %18082 = vpow2.f32 %v12093_v34  ;;  %v12058_v34 = vsub.f32 %v21047_v37, %v21138_v28  ;;  %v12055_v28 = vsub.f32 %v20986_v13, %v21118_v30  ;;  %v12050_v30 = vsub.f32 %v21008_v41, %v21120_v15 }
 0xb38   : > { %18084 = vpow2.f32 %v12109_v52  ;;  %v12129_v15 = vmul.f32 1.442695, %v12066_v59 }
 0xb39   : > { %18086 = vpow2.f32 %v12091_v46  ;;  %v12113_v37 = vmul.f32 1.442695, %v12058_v34  ;;  %v12107_v13 = vmul.f32 1.442695, %v12055_v28  ;;  %v12097_v41 = vmul.f32 1.442695, %v12050_v30 }
 0xb3a   : > { %v18075_v56 = vpop.eup %18074  ;;  %18088 = vpow2.f32 %v12095_v50  ;;  %v17634_v34 = vunpack.i.h.bf16 %v21040_v62 }
 0xb3b   : > { %v18077_v21 = vpop.eup %18076  ;;  %18090 = vpow2.f32 %v12081_v27  ;;  %v12260_v11 = vmul.f32 %v18075_v56, %v21074_v23  ;;  %v16948_v23 = vpack.c.bf16 %v17614_v60, %v17613_v4  ;;  %v12121_v27 = vmul.f32 1.442695, %v12062_v31  ;;  %v22331_v31 = vld [vmem:[#allocation32_spill] sm:$0xff] }
 0xb3c   : > { %v12259_v49 = vmul.f32 %v18077_v21, %v21078_v32  ;;  %18092 = vpow2.f32 %v12117_v45  ;;  %v17624_v32 = vunpack.i.h.bf16 %v21022_v6  ;;  %v12125_v6 = vmul.f32 1.442695, %v12064_v33 }
 0xb3d   : > { %12150 = vadd.xlane.f32.xlu1 %v12149_v36  ;;  %18094 = vpow2.f32 %v12101_v35  ;;  %v12115_v60 = vmul.f32 1.442695, %v12059_v14  ;;  %v12103_v35 = vmul.f32 1.442695, %v12053_v26  ;;  %v22336_v26 = vld [vmem:[#allocation63_spill] sm:$0xff] }
 0xb3e   : > { %16184 = vmatprep.mubr.msk.f32.mxu0 %vm1984_vm3, %v12259_v49  ;;  %18096 = vpow2.f32 %v12105_v3 }
 0xb3f   : > { %v18079_v8 = vpop.eup %18078  ;;  %16185 = vmatmul.mubr.msk.f32.vlgmr.msra.gmra.mrb[120].mxu0 %vm1984_vm3, %v12260_v11  ;;  %18098 = vpow2.f32 %v12099_v16  ;;  %v12063_v11 = vsub.f32 %v21038_v2, %v21134_v61  ;;  %v12057_v2 = vsub.f32 %v21050_v51, %v21142_v48  ;;  %v12061_v16 = vsub.f32 %v21062_v24, %v21149_v58  ;;  %v22329_v58 = vld [vmem:[#allocation83_spill] sm:$0xff] }
 0xb40   : > { %v18081_v54 = vpop.eup %18080  ;;  %v12263_v44 = vmul.f32 %v18079_v8, %v21086_v39  ;;  %16943 = vmatpush3.bf16.msra.mxu0 %v20872_v53  ;;  %v12046_v39 = vsub.f32 %v20992_v17, %v21114_v22  ;;  %v21203_v53 = vpack.c.bf16 %v17624_v32, %v17623_v29  ;;  %18100 = vpow2.f32 %v12125_v6 }
 0xb41   : > { %v21184_v25 = vpop.eup %18082  ;;  %12162 = vadd.xlane.f32.xlu1 %v12161_v18  ;;  %16949 = vmatprep.subr.bf16.mxu0 %v16948_v23  ;;  %v12264_v5 = vmul.f32 %v18081_v54, %v21082_v12  ;;  %v12123_v33 = vmul.f32 1.442695, %v12063_v11  ;;  %v12065_v24 = vsub.f32 %v22329_v58, %v21154_v9  ;;  %v22351_v58 = vld [vmem:[#allocation35_spill] sm:$0xff] }
 0xb42   : > { %v21189_v40 = vpop.eup %18084  ;;  %16198 = vmatprep.mubr.msk.f32.mxu0 %vm1984_vm3, %v12263_v44  ;;  %v12170_v63 = vsel %vm1984_vm3, %v21184_v25, 0.0  ;;  %v12089_v12 = vmul.f32 1.442695, %v12046_v39 }
 0xb43   : > { %v21200_v52 = vpop.eup %18086  ;;  %16199 = vmatmul.mubr.msk.f32.vlgmr.msra.gmra.mrb[122].mxu0 %vm1984_vm3, %v12264_v5  ;;  %v12194_v17 = vsel %vm1984_vm3, %v21189_v40, 0.0 }
 0xb44   : > { %v21207_v22 = vpop.eup %18088  ;;  %16951 = vmatpush3.bf16.msra.mxu0 %v16948_v23  ;;  %v12167_v46 = vsel %vm1984_vm3, %v21200_v52, 0.0  ;;  %18102 = vpow2.f32 %v12089_v12  ;;  %v12111_v23 = vmul.f32 1.442695, %v12057_v2  ;;  %v22330_v12 = vld [vmem:[#allocation36_spill] sm:$0xff]  ;;  %v22344_v2 = vld [vmem:[#allocation54_spill] sm:$0xff] }
 0xb45   : > { %12171 = vadd.xlane.f32.xlu0 %v12170_v63  ;;  %12195 = vadd.xlane.f32.xlu1 %v12194_v17  ;;  %v21216_v57 = vpop.eup %18090  ;;  %v12173_v50 = vsel %vm1984_vm3, %v21207_v22, 0.0  ;;  %18104 = vpow2.f32 %v12113_v37  ;;  %v17633_v63 = vunpack.i.l.bf16 %v21040_v62  ;;  %v12119_v17 = vmul.f32 1.442695, %v12061_v16  ;;  %v22347_v16 = vld [vmem:[#allocation56_spill] sm:$0xff] }
 0xb46   : > { %16957 = vmatprep.subr.bf16.mxu0 %v21203_v53  ;;  %v21220_v43 = vpop.eup %18092  ;;  %v12152_v55 = vsel %vm1984_vm3, %v21216_v57, 0.0  ;;  %18106 = vpow2.f32 %v12107_v13  ;;  %v12127_v13 = vmul.f32 1.442695, %v12065_v24  ;;  %v22352_v24 = vld [vmem:[#allocation55_spill] sm:$0xff] }
 0xb47   : > { %v21228_v1 = vpop.eup %18094  ;;  %v12206_v56 = vsel %vm1984_vm3, %v21220_v43, 0.0  ;;  %18108 = vpow2.f32 %v12121_v27  ;;  %v21294_v62 = vpack.c.bf16 %v17634_v34, %v17633_v63  ;;  %v22350_v63 = vld [vmem:[#allocation15_spill] sm:$0xff] }
 0xb48   : > { %v21232_v45 = vpop.eup %18096  ;;  %v12182_v42 = vsel %vm1984_vm3, %v21228_v1, 0.0  ;;  %18110 = vpow2.f32 %v12097_v41 }
 0xb49   : > { %12168 = vadd.xlane.f32.xlu0 %v12167_v46  ;;  %12174 = vadd.xlane.f32.xlu1 %v12173_v50  ;;  %v21238_v7 = vpop.eup %18098  ;;  %v12188_v36 = vsel %vm1984_vm3, %v21232_v45, 0.0  ;;  %18112 = vpow2.f32 %v12129_v15  ;;  %v22333_v15 = vld [vmem:[#allocation53_spill] sm:$0xff] }
 0xb4a   : > { %v21242_v21 = vpop.eup %18100  ;;  %v12179_v47 = vsel %vm1984_vm3, %v21238_v7, 0.0  ;;  %18114 = vpow2.f32 %v12115_v60  ;;  %v22335_v60 = vld [vmem:[#allocation44_spill] sm:$0xff] }
 0xb4b   : > { %v12218_v20 = vsel %vm1984_vm3, %v21242_v21, 0.0 }
 0xb4d   : > { %12153 = vadd.xlane.f32.xlu0 %v12152_v55  ;;  %12207 = vadd.xlane.f32.xlu1 %v12206_v56 }
 0xb4e   : > { %v21248_v4 = vpop.eup %18102 }
 0xb4f   : > { %v21252_v49 = vpop.eup %18104  ;;  %v12164_v0 = vsel %vm1984_vm3, %v21248_v4, 0.0 }
 0xb50   : > { %v21258_v18 = vpop.eup %18106  ;;  %v12200_v54 = vsel %vm1984_vm3, %v21252_v49, 0.0 }
 0xb51   : > { %12183 = vadd.xlane.f32.xlu0 %v12182_v42  ;;  %12189 = vadd.xlane.f32.xlu1 %v12188_v36  ;;  %v21262_v3 = vpop.eup %18108  ;;  %v12191_v61 = vsel %vm1984_vm3, %v21258_v18, 0.0  ;;  %v22334_v36 = vld [vmem:[#allocation64_spill] sm:$0xff] }
 0xb52   : > { %v21268_v44 = vpop.eup %18110  ;;  %v12212_v32 = vsel %vm1984_vm3, %v21262_v3, 0.0 }
 0xb53   : > { %v21272_v29 = vpop.eup %18112  ;;  %v12176_v48 = vsel %vm1984_vm3, %v21268_v44, 0.0 }
 0xb54   : > { %v21276_v39 = vpop.eup %18114  ;;  %v12224_v5 = vsel %vm1984_vm3, %v21272_v29, 0.0 }
 0xb55   : > { %12180 = vadd.xlane.f32.xlu0 %v12179_v47  ;;  %12219 = vadd.xlane.f32.xlu1 %v12218_v20  ;;  %v12203_v37 = vsel %vm1984_vm3, %v21276_v39, 0.0  ;;  %v22337_v47 = vld [vmem:[#allocation48_spill] sm:$0xff]  ;;  %v22338_v20 = vld [vmem:[#allocation29_spill] sm:$0xff] }
 0xb56   : > { %v12160_v8 = vpop.xlane.xlu0 %12159 }
 0xb57   : > { %18116 = vrcp.f32 %v12160_v8  ;;  %v12157_v19 = vpop.xlane.xlu1 %12156  ;;  %v22339_v8 = vld [vmem:[#allocation43_spill] sm:$0xff] }
 0xb58   : > { %18118 = vrcp.f32 %v12157_v19  ;;  %v22341_v19 = vld [vmem:[#allocation31_spill] sm:$0xff] }
 0xb59   : > { %12165 = vadd.xlane.f32.xlu0 %v12164_v0  ;;  %12201 = vadd.xlane.f32.xlu1 %v12200_v54  ;;  %18120 = vpow2.f32 %v12103_v35  ;;  %v22340_v35 = vld [vmem:[#allocation34_spill] sm:$0xff]  ;;  %v22342_v0 = vld [vmem:[#allocation51_spill] sm:$0xff] }
 0xb5a   : > { %18122 = vpow2.f32 %v12123_v33  ;;  %v22343_v33 = vld [vmem:[#allocation3_spill] sm:$0xff] }
 0xb5b   : > { %18124 = vpow2.f32 %v12111_v23 }
 0xb5c   : > { %18126 = vpow2.f32 %v12119_v17 }
 0xb5d   : > { %12192 = vadd.xlane.f32.xlu0 %v12191_v61  ;;  %12213 = vadd.xlane.f32.xlu1 %v12212_v32  ;;  %18128 = vpow2.f32 %v12127_v13  ;;  %v22345_v61 = vld [vmem:[#allocation72_spill] sm:$0xff]  ;;  %v22346_v32 = vld [vmem:[#allocation14_spill] sm:$0xff]  ;;  %v22356_v13 = vld [vmem:[#allocation11_spill] sm:$0xff] }
 0xb61   : > { %v18117_v51 = vpop.eup %18116  ;;  %12177 = vadd.xlane.f32.xlu0 %v12176_v48  ;;  %12225 = vadd.xlane.f32.xlu1 %v12224_v5  ;;  %v22348_v48 = vld [vmem:[#allocation40_spill] sm:$0xff] }
 0xb62   : > { %v18119_v6 = vpop.eup %18118  ;;  %v12268_v46 = vmul.f32 %v18117_v51, %v22331_v31  ;;  %v22349_v5 = vld [vmem:[#allocation80_spill] sm:$0xff]  ;;  %v22354_v31 = vld [vmem:[#allocation66_spill] sm:$0xff] }
 0xb63   : > { %v12267_v28 = vmul.f32 %v18119_v6, %v22330_v12  ;;  %v21290_v50 = vpop.eup %18120  ;;  %v17619_v6 = vunpack.i.h.bf16 %v22349_v5  ;;  %v17618_v34 = vunpack.i.l.bf16 %v22349_v5  ;;  %v22353_v12 = vld [vmem:[#allocation5_spill] sm:$0xff]  ;;  %v22376_v5 = vld [vmem:[#allocation23_spill] sm:$0xff] }
 0xb64   : > { %v12185_v9 = vsel %vm1984_vm3, %v21290_v50, 0.0  ;;  %v21300_v30 = vpop.eup %18122 }
 0xb65   : > { %12204 = vadd.xlane.f32.xlu0 %v12203_v37  ;;  %16212 = vmatprep.mubr.msk.f32.mxu0 %vm1984_vm3, %v12267_v28  ;;  %v12215_v27 = vsel %vm1984_vm3, %v21300_v30, 0.0  ;;  %v21304_v59 = vpop.eup %18124  ;;  %v21360_v37 = vpack.c.bf16 %v17619_v6, %v17618_v34  ;;  %v22377_v34 = vld [vmem:[#allocation10_spill] sm:$0xff] }
 0xb66   : > { %16213 = vmatmul.mubr.msk.f32.vlgmr.msra.gmra.mrb[124].mxu0 %vm1984_vm3, %v12268_v46  ;;  %v12197_v55 = vsel %vm1984_vm3, %v21304_v59, 0.0  ;;  %v21308_v56 = vpop.eup %18126  ;;  %v22355_v46 = vld [vmem:[#allocation57_spill] sm:$0xff] }
 0xb67   : > { %16959 = vmatpush3.bf16.msra.mxu0 %v21203_v53  ;;  %v22332_v53 = vld [vmem:[#allocation38_spill] sm:$0xff]  ;;  %v12209_v14 = vsel %vm1984_vm3, %v21308_v56, 0.0  ;;  %v21314_v41 = vpop.eup %18128 }
 0xb68   : > { %16965 = vmatprep.subr.bf16.mxu0 %v21294_v62  ;;  %v12221_v42 = vsel %vm1984_vm3, %v21314_v41, 0.0 }
 0xb69   : > { %12186 = vadd.xlane.f32.xlu0 %v12185_v9  ;;  %v22357_v9 = vld [vmem:[#allocation67_spill] sm:$0xff] }
 0xb6d   : > { %12216 = vadd.xlane.f32.xlu0 %v12215_v27  ;;  %v22358_v27 = vld [vmem:[#allocation41_spill] sm:$0xff] }
 0xb71   : > { %12198 = vadd.xlane.f32.xlu0 %v12197_v55  ;;  %v22359_v55 = vld [vmem:[#allocation46_spill] sm:$0xff] }
 0xb72   : > { %17666 = vrot.lane.b32.xlu1 %v22332_v53, %s18200_s14  ;;  %v22360_v53 = vld [vmem:[#allocation26_spill] sm:$0xff] }
 0xb75   : > { %12210 = vadd.xlane.f32.xlu0 %v12209_v14  ;;  %v22361_v14 = vld [vmem:[#allocation6_spill] sm:$0xff] }
 0xb76   : > { %6997 = vrot.lane.b32.xlu1 %v22333_v15, %s18201_s16  ;;  %v22362_v15 = vld [vmem:[#allocation45_spill] sm:$0xff] }
 0xb79   : > { %12222 = vadd.xlane.f32.xlu0 %v12221_v42  ;;  %v22363_v42 = vld [vmem:[#allocation17_spill] sm:$0xff] }
 0xb7a   : > { %10358 = vrot.lane.b32.xlu1 %v22334_v36, %s18202_s17  ;;  %v22364_v36 = vld [vmem:[#allocation68_spill] sm:$0xff] }
 0xb7e   : > { %7001 = vrot.lane.b32.xlu1 %v22335_v60, %s18201_s16  ;;  %v22365_v60 = vld [vmem:[#allocation75_spill] sm:$0xff] }
 0xb82   : > { %10362 = vrot.lane.b32.xlu1 %v22336_v26, %s18202_s17 }
 0xb86   : > { %7005 = vrot.lane.b32.xlu1 %v22337_v47, %s18201_s16  ;;  %v22366_v47 = vld [vmem:[#allocation42_spill] sm:$0xff] }
 0xb8a   : > { %10366 = vrot.lane.b32.xlu1 %v22338_v20, %s18202_s17  ;;  %v22367_v20 = vld [vmem:[#allocation12_spill] sm:$0xff] }
 0xb8e   : > { %7009 = vrot.lane.b32.xlu1 %v22339_v8, %s18201_s16  ;;  %v22368_v8 = vld [vmem:[#allocation21_spill] sm:$0xff] }
 0xb8f   : > { %17661 = vrot.lane.b32.xlu0 %v22340_v35, %s18200_s14 }
 0xb91   : > { %v12142_v11 = vpop.xlane.xlu0 %12141 }
 0xb92   : > { %10370 = vrot.lane.b32.xlu1 %v22341_v19, %s18202_s17  ;;  %18130 = vrcp.f32 %v12142_v11  ;;  %v22369_v11 = vld [vmem:[#allocation37_spill] sm:$0xff]  ;;  %v22370_v19 = vld [vmem:[#allocation52_spill] sm:$0xff] }
 0xb93   : > { %6993 = vrot.lane.b32.xlu0 %v22342_v0, %s18201_s16 }
 0xb95   : > { %v12139_v54 = vpop.xlane.xlu1 %12138  ;;  %v17642_v26 = vpop.permute.xlu0 %17641 }
 0xb96   : > { %18132 = vrcp.f32 %v12139_v54  ;;  %7013 = vrot.lane.b32.xlu1 %v22343_v33, %s18201_s16  ;;  %v22371_v54 = vld [vmem:[#allocation50_spill] sm:$0xff] }
 0xb97   : > { %6995 = vrot.lane.b32.xlu0 %v22344_v2, %s18201_s16  ;;  %v22372_v2 = vld [vmem:[#allocation33_spill] sm:$0xff] }
 0xb99   : > { %v21392_v35 = vpop.permute.xlu0 %17646  ;;  %v21398_v0 = vpop.permute.xlu1 %17636 }
 0xb9a   : > { %10374 = vrot.lane.b32.xlu1 %v22345_v61, %s18202_s17 }
 0xb9b   : > { %10354 = vrot.lane.b32.xlu0 %v22346_v32, %s18202_s17  ;;  %v22373_v32 = vld [vmem:[#allocation70_spill] sm:$0xff] }
 0xb9c   : > { %v18131_v23 = vpop.eup %18130 }
 0xb9d   : > { %v12262_v28 = vmul.f32 %v18131_v23, %v22353_v12  ;;  %v21402_v33 = vpop.permute.xlu0 %17651  ;;  %v22374_v23 = vld [vmem:[#allocation47_spill] sm:$0xff] }
 0xb9e   : > { %7017 = vrot.lane.b32.xlu1 %v22347_v16, %s18201_s16 }
 0xb9f   : > { %10356 = vrot.lane.b32.xlu0 %v22348_v48, %s18202_s17 }
 0xba0   : > { %v18133_v51 = vpop.eup %18132 }
 0xba1   : > { %v12261_v17 = vmul.f32 %v18133_v51, %v22350_v63  ;;  %v21410_v16 = vpop.permute.xlu0 %17656  ;;  %v22375_v51 = vld [vmem:[#allocation7_spill] sm:$0xff] }
 0xba2   : > { %10378 = vrot.lane.b32.xlu1 %v22351_v58, %s18202_s17 }
 0xba3   : > { %6999 = vrot.lane.b32.xlu0 %v22352_v24, %s18201_s16  ;;  %16191 = vmatprep.mubr.msk.f32.mxu1 %vm1984_vm3, %v12261_v17  ;;  %v22378_v17 = vld [vmem:[#allocation18_spill] sm:$0xff] }
 0xba4   : > { %16192 = vmatmul.mubr.msk.f32.vlgmr.msra.gmra.mrb[136].mxu1 %vm1984_vm3, %v12262_v28  ;;  %v22379_v28 = vld [vmem:[#allocation49_spill] sm:$0xff] }
 0xba5   : > { %16947 = vmatpush3.bf16.msra.mxu1 %v22354_v31 }
 0xba6   : > { %16953 = vmatprep.subr.bf16.mxu1 %v21360_v37  ;;  %7021 = vrot.lane.b32.xlu1 %v22355_v46, %s18201_s16  ;;  %v22380_v46 = vld [vmem:[#allocation9_spill] sm:$0xff] }
 0xba7   : > { %10360 = vrot.lane.b32.xlu0 %v22356_v13, %s18202_s17 }
 0xbaa   : > { %10382 = vrot.lane.b32.xlu1 %v22357_v9, %s18202_s17  ;;  %v22381_v9 = vld [vmem:[#allocation81_spill] sm:$0xff] }
 0xbab   : > { %7003 = vrot.lane.b32.xlu0 %v22358_v27, %s18201_s16 }
 0xbae   : > { %7025 = vrot.lane.b32.xlu1 %v22359_v55, %s18201_s16  ;;  %v22382_v55 = vld [vmem:[#allocation58_spill] sm:$0xff] }
 0xbaf   : > { %10364 = vrot.lane.b32.xlu0 %v22360_v53, %s18202_s17  ;;  %v22383_v53 = vld [vmem:[#allocation61_spill] sm:$0xff] }
 0xbb2   : > { %10386 = vrot.lane.b32.xlu1 %v22361_v14, %s18202_s17 }
 0xbb3   : > { %7007 = vrot.lane.b32.xlu0 %v22362_v15, %s18201_s16 }
 0xbb6   : > { %7029 = vrot.lane.b32.xlu1 %v22363_v42, %s18201_s16  ;;  %v22384_v42 = vld [vmem:[#allocation65_spill] sm:$0xff] }
 0xbb7   : > { %10368 = vrot.lane.b32.xlu0 %v22364_v36, %s18202_s17 }
 0xbba   : > { %10390 = vrot.lane.b32.xlu1 %v22365_v60, %s18202_s17  ;;  %v17644_v60 = vunpack.i.h.bf16 %v17642_v26 }
 0xbbb   : > { %7011 = vrot.lane.b32.xlu0 %v22366_v47, %s18201_s16  ;;  %v17643_v47 = vunpack.i.l.bf16 %v17642_v26 }
 0xbbe   : > { %7033 = vrot.lane.b32.xlu1 %v22367_v20, %s18201_s16 }
 0xbbf   : > { %10372 = vrot.lane.b32.xlu0 %v22368_v8, %s18202_s17 }
 0xbc2   : > { %10394 = vrot.lane.b32.xlu1 %v22369_v11, %s18202_s17  ;;  %v22385_v11 = vld [vmem:[#allocation30_spill] sm:$0xff] }
 0xbc3   : > { %7015 = vrot.lane.b32.xlu0 %v22370_v19, %s18201_s16 }
 0xbc6   : > { %7037 = vrot.lane.b32.xlu1 %v22371_v54, %s18201_s16 }
 0xbc7   : > { %10376 = vrot.lane.b32.xlu0 %v22372_v2, %s18202_s17 }
 0xbca   : > { %v12151_v61 = vpop.xlane.xlu1 %12150  ;;  %10398 = vrot.lane.b32.xlu1 %v22373_v32, %s18202_s17 }
 0xbcb   : > { %18134 = vrcp.f32 %v12151_v61  ;;  %7019 = vrot.lane.b32.xlu0 %v22374_v23, %s18201_s16  ;;  %v22386_v61 = vld [vmem:[#allocation27_spill] sm:$0xff] }
 0xbcc   : > { %v17629_v32 = vunpack.i.h.bf16 %v22386_v61  ;;  %v17628_v23 = vunpack.i.l.bf16 %v22386_v61 }
 0xbce   : > { %v12163_v48 = vpop.xlane.xlu1 %12162  ;;  %7041 = vrot.lane.b32.xlu1 %v22375_v51, %s18201_s16 }
 0xbcf   : > { %10380 = vrot.lane.b32.xlu0 %v22376_v5, %s18202_s17 }
 0xbd2   : > { %v12172_v6 = vpop.xlane.xlu0 %12171  ;;  %10402 = vrot.lane.b32.xlu1 %v22377_v34, %s18202_s17  ;;  %v12196_v63 = vpop.xlane.xlu1 %12195  ;;  %v22388_v34 = vld [vmem:[#allocation16_spill] sm:$0xff] }
 0xbd3   : > { %7023 = vrot.lane.b32.xlu0 %v22378_v17, %s18201_s16  ;;  %18136 = vrcp.f32 %v12172_v6  ;;  %v16960_v17 = vpack.c.bf16 %v17629_v32, %v17628_v23 }
 0xbd5   : > { %v18135_v58 = vpop.eup %18134 }
 0xbd6   : > { %v12169_v24 = vpop.xlane.xlu0 %12168  ;;  %v12265_v12 = vmul.f32 %v18135_v58, %v21162_v38  ;;  %7045 = vrot.lane.b32.xlu1 %v22379_v28, %s18201_s16  ;;  %v12175_v31 = vpop.xlane.xlu1 %12174  ;;  %v17653_v28 = vunpack.i.l.bf16 %v21402_v33 }
 0xbd7   : > { %18138 = vrcp.f32 %v12169_v24  ;;  %10384 = vrot.lane.b32.xlu0 %v22380_v46, %s18202_s17  ;;  %v22389_v24 = vld [vmem:[#allocation8_spill] sm:$0xff] }
 0xbd8   : > { %16205 = vmatprep.mubr.msk.f32.mxu1 %vm1984_vm3, %v12265_v12  ;;  %18140 = vrcp.f32 %v12163_v48  ;;  %v22387_v48 = vld [vmem:[#allocation13_spill] sm:$0xff]  ;;  %v17654_v12 = vunpack.i.h.bf16 %v21402_v33 }
 0xbda   : > { %v12154_v13 = vpop.xlane.xlu0 %12153  ;;  %10406 = vrot.lane.b32.xlu1 %v22381_v9, %s18202_s17  ;;  %v12208_v27 = vpop.xlane.xlu1 %12207  ;;  %v17639_v9 = vunpack.i.h.bf16 %v21398_v0  ;;  %v16980_v33 = vpack.c.bf16 %v17654_v12, %v17653_v28  ;;  %v22396_v12 = vld [vmem:[#allocation19_spill] sm:$0xff] }
 0xbdb   : > { %18142 = vrcp.f32 %v12154_v13  ;;  %7027 = vrot.lane.b32.xlu0 %v22382_v55, %s18201_s16  ;;  %v17638_v55 = vunpack.i.l.bf16 %v21398_v0 }
 0xbdd   : > { %v18137_v15 = vpop.eup %18136 }
 0xbde   : > { %v12184_v38 = vpop.xlane.xlu0 %12183  ;;  %7049 = vrot.lane.b32.xlu1 %v22383_v53, %s18201_s16  ;;  %v21432_v14 = vpop.xlane.xlu1 %12189  ;;  %v12272_v54 = vmul.f32 %v18137_v15, %v21184_v25 }
 0xbdf   : > { %10388 = vrot.lane.b32.xlu0 %v22384_v42, %s18202_s17  ;;  %18144 = vrcp.f32 %v12184_v38  ;;  %v22390_v38 = vld [vmem:[#allocation22_spill] sm:$0xff] }
 0xbe1   : > { %v18139_v36 = vpop.eup %18138 }
 0xbe2   : > { %v12181_v20 = vpop.xlane.xlu0 %12180  ;;  %v12271_v8 = vmul.f32 %v18139_v36, %v21200_v52  ;;  %10410 = vrot.lane.b32.xlu1 %v22385_v11, %s18202_s17  ;;  %v21439_v19 = vpop.xlane.xlu1 %12219  ;;  %v16972_v52 = vpack.c.bf16 %v17644_v60, %v17643_v47  ;;  %v22391_v36 = vld [vmem:[#allocation59_spill] sm:$0xff]  ;;  %v16968_v60 = vpack.c.bf16 %v17639_v9, %v17638_v55  ;;  %v17648_v11 = vunpack.i.l.bf16 %v21392_v35 }
 0xbe3   : > { %18146 = vrcp.f32 %v12181_v20  ;;  %v18141_v2 = vpop.eup %18140  ;;  %7031 = vrot.lane.b32.xlu0 %v22387_v48, %s18201_s16 }
 0xbe4   : > { %16226 = vmatprep.mubr.msk.f32.mxu0 %vm1984_vm3, %v12271_v8  ;;  %18148 = vrcp.f32 %v12175_v31  ;;  %v12269_v6 = vmul.f32 %v18141_v2, %v21164_v10  ;;  %v17649_v8 = vunpack.i.h.bf16 %v21392_v35  ;;  %v22393_v35 = vld [vmem:[#allocation4_spill] sm:$0xff] }
 0xbe5   : > { %v18143_v26 = vpop.eup %18142  ;;  %16227 = vmatmul.mubr.msk.f32.vlgmr.msra.gmra.mrb[126].mxu0 %vm1984_vm3, %v12272_v54  ;;  %v22392_v54 = vld [vmem:[#allocation74_spill] sm:$0xff] }
 0xbe6   : > { %16967 = vmatpush3.bf16.msra.mxu0 %v21294_v62  ;;  %v12166_v51 = vpop.xlane.xlu0 %12165  ;;  %v12266_v25 = vmul.f32 %v18143_v26, %v21216_v57  ;;  %v21450_v5 = vpop.xlane.xlu1 %12201  ;;  %v16976_v32 = vpack.c.bf16 %v17649_v8, %v17648_v11  ;;  %v13878_v11 = vld [vmem:[%s21830_s2 + $0x10] sm:$0xff] }
 0xbe7   : > { %18150 = vrcp.f32 %v12166_v51  ;;  %16973 = vmatprep.subr.bf16.mxu0 %v16972_v52  ;;  %10392 = vrot.lane.b32.xlu0 %v22388_v34, %s18202_s17  ;;  %v17659_v34 = vunpack.i.h.bf16 %v21410_v16 }
 0xbe8   : > { %16206 = vmatmul.mubr.msk.f32.vlgmr.msra.gmra.mrb[138].mxu1 %vm1984_vm3, %v12266_v25  ;;  %18152 = vrcp.f32 %v12196_v63  ;;  %v22394_v25 = vld [vmem:[#allocation39_spill] sm:$0xff] }
 0xbe9   : > { %16955 = vmatpush3.bf16.msra.mxu1 %v21360_v37  ;;  %16219 = vmatprep.mubr.msk.f32.mxu1 %vm1984_vm3, %v12269_v6  ;;  %v18145_v58 = vpop.eup %18144 }
 0xbea   : > { %16961 = vmatprep.subr.bf16.mxu1 %v16960_v17  ;;  %v12193_v62 = vpop.xlane.xlu0 %12192  ;;  %v21458_v57 = vpop.xlane.xlu1 %12213  ;;  %v12276_v63 = vmul.f32 %v18145_v58, %v21228_v1  ;;  %v22395_v58 = vld [vmem:[#allocation62_spill] sm:$0xff] }
 0xbeb   : > { %18154 = vrcp.f32 %v12193_v62  ;;  %7035 = vrot.lane.b32.xlu0 %v22389_v24, %s18201_s16 }
 0xbed   : > { %v18147_v10 = vpop.eup %18146 }
 0xbee   : > { %v12178_v31 = vpop.xlane.xlu0 %12177  ;;  %v12275_v37 = vmul.f32 %v18147_v10, %v21238_v7  ;;  %v21465_v46 = vpop.xlane.xlu1 %12225 }
 0xbef   : > { %18156 = vrcp.f32 %v12178_v31  ;;  %v18149_v13 = vpop.eup %18148  ;;  %10396 = vrot.lane.b32.xlu0 %v22390_v38, %s18202_s17  ;;  %v22397_v38 = vld [vmem:[#allocation60_spill] sm:$0xff] }
 0xbf0   : > { %16240 = vmatprep.mubr.msk.f32.mxu0 %vm1984_vm3, %v12275_v37  ;;  %18158 = vrcp.f32 %v12208_v27  ;;  %v12273_v0 = vmul.f32 %v18149_v13, %v21207_v22 }
 0xbf1   : > { %v18151_v53 = vpop.eup %18150  ;;  %16241 = vmatmul.mubr.msk.f32.vlgmr.msra.gmra.mrb[128].mxu0 %vm1984_vm3, %v12276_v63 }
 0xbf2   : > { %16975 = vmatpush3.bf16.msra.mxu0 %v16972_v52  ;;  %v12205_v7 = vpop.xlane.xlu0 %12204  ;;  %v12270_v15 = vmul.f32 %v18151_v53, %v21248_v4  ;;  %v21475_v1 = vpop.permute.xlu1 %17666 }
 0xbf3   : > { %18160 = vrcp.f32 %v12205_v7  ;;  %16981 = vmatprep.subr.bf16.mxu0 %v16980_v33  ;;  %v18153_v42 = vpop.eup %18152  ;;  %7039 = vrot.lane.b32.xlu0 %v22391_v36, %s18201_s16  ;;  %v17669_v28 = vunpack.i.h.bf16 %v21475_v1  ;;  %v17668_v31 = vunpack.i.l.bf16 %v21475_v1  ;;  %v13877_v36 = vld [vmem:[%s21830_s2 + $0x8] sm:$0xff] }
 0xbf4   : > { %16220 = vmatmul.mubr.msk.f32.vlgmr.msra.gmra.mrb[140].mxu1 %vm1984_vm3, %v12270_v15  ;;  %18162 = vrcp.f32 %v21432_v14  ;;  %v12280_v20 = vmul.f32 %v18153_v42, %v21189_v40  ;;  %v13876_v42 = vld [vmem:[%s21830_s2] sm:$0xff] }
 0xbf5   : > { %v18155_v47 = vpop.eup %18154  ;;  %16963 = vmatpush3.bf16.msra.mxu1 %v16960_v17  ;;  %16233 = vmatprep.mubr.msk.f32.mxu1 %vm1984_vm3, %v12273_v0 }
 0xbf6   : > { %16969 = vmatprep.subr.bf16.mxu1 %v16968_v60  ;;  %v12187_v4 = vpop.xlane.xlu0 %12186  ;;  %v12279_v27 = vmul.f32 %v18155_v47, %v21258_v18  ;;  %v6998_v22 = vpop.permute.xlu1 %6997 }
 0xbf7   : > { %18164 = vrcp.f32 %v12187_v4  ;;  %7092 = vst.msk [vmem:[#allocation2 + $0x10] sm:$0xff] %vm7089_vm4, %v6998_v22  ;;  %10400 = vrot.lane.b32.xlu0 %v22392_v54, %s18202_s17  ;;  %v13879_v54 = vld [vmem:[%s21830_s2 + $0x18] sm:$0xff] }
 0xbf8   : > { %16254 = vmatprep.mubr.msk.f32.mxu0 %vm1984_vm3, %v12279_v27 }
 0xbf9   : > { %v18157_v14 = vpop.eup %18156  ;;  %16255 = vmatmul.mubr.msk.f32.vlgmr.msra.gmra.mrb[130].mxu0 %vm1984_vm3, %v12280_v20 }
 0xbfa   : > { %16983 = vmatpush3.bf16.msra.mxu0 %v16980_v33  ;;  %v12217_v18 = vpop.xlane.xlu0 %12216  ;;  %v12274_v2 = vmul.f32 %v18157_v14, %v21268_v44  ;;  %v10359_v40 = vpop.permute.xlu1 %10358  ;;  %v16992_v33 = vpack.c.bf16 %v17669_v28, %v17668_v31 }
 0xbfb   : > { %18166 = vrcp.f32 %v12217_v18  ;;  %v18159_v61 = vpop.eup %18158  ;;  %10453 = vst.msk [vmem:[#allocation2 + $0x10] sm:$0xff] %vm10450_vm5, %v10359_v40  ;;  %7043 = vrot.lane.b32.xlu0 %v22393_v35, %s18201_s16 }
 0xbfc   : > { %16234 = vmatmul.mubr.msk.f32.vlgmr.msra.gmra.mrb[142].mxu1 %vm1984_vm3, %v12274_v2  ;;  %18168 = vrcp.f32 %v21450_v5  ;;  %v12284_v52 = vmul.f32 %v18159_v61, %v21220_v43  ;;  %v17658_v5 = vunpack.i.l.bf16 %v21410_v16 }
 0xbfd   : > { %v18161_v23 = vpop.eup %18160  ;;  %16971 = vmatpush3.bf16.msra.mxu1 %v16968_v60 }
 0xbfe   : > { %16977 = vmatprep.subr.bf16.mxu1 %v16976_v32  ;;  %v12199_v48 = vpop.xlane.xlu0 %12198  ;;  %v12283_v26 = vmul.f32 %v18161_v23, %v21276_v39  ;;  %v7002_v44 = vpop.permute.xlu1 %7001  ;;  %v16984_v16 = vpack.c.bf16 %v17659_v34, %v17658_v5 }
 0xbff   : > { %18170 = vrcp.f32 %v12199_v48  ;;  %v18163_v51 = vpop.eup %18162  ;;  %7094 = vst.msk [vmem:[#allocation2 + $0x20] sm:$0xff] %vm7089_vm4, %v7002_v44  ;;  %10404 = vrot.lane.b32.xlu0 %v22394_v25, %s18202_s17 }
 0xc00   : > { %16268 = vmatprep.mubr.msk.f32.mxu0 %vm1984_vm3, %v12283_v26  ;;  %18172 = vrcp.f32 %v21458_v57  ;;  %v12278_v62 = vmul.f32 %v18163_v51, %v21232_v45 }
 0xc01   : > { %v18165_v6 = vpop.eup %18164  ;;  %16269 = vmatmul.mubr.msk.f32.vlgmr.msra.gmra.mrb[132].mxu0 %vm1984_vm3, %v12284_v52 }
 0xc02   : > { %v12211_v39 = vpop.xlane.xlu0 %12210  ;;  %v12277_v43 = vmul.f32 %v18165_v6, %v21290_v50  ;;  %v10363_v17 = vpop.permute.xlu1 %10362 }
 0xc03   : > { %18174 = vrcp.f32 %v12211_v39  ;;  %10455 = vst.msk [vmem:[#allocation2 + $0x20] sm:$0xff] %vm10450_vm5, %v10363_v17  ;;  %7047 = vrot.lane.b32.xlu0 %v22395_v58, %s18201_s16 }
 0xc04   : > { %16247 = vmatprep.mubr.msk.f32.mxu1 %vm1984_vm3, %v12277_v43  ;;  %18176 = vrcp.f32 %v21439_v19 }
 0xc05   : > { %v18167_v24 = vpop.eup %18166  ;;  %16248 = vmatmul.mubr.msk.f32.vlgmr.msra.gmra.mrb[144].mxu1 %vm1984_vm3, %v12278_v62  ;;  %18178 = vrcp.f32 %v21465_v46 }
 0xc06   : > { %16979 = vmatpush3.bf16.msra.mxu1 %v16976_v32  ;;  %v12223_v50 = vpop.xlane.xlu0 %12222  ;;  %v12287_v57 = vmul.f32 %v18167_v24, %v21300_v30  ;;  %v7006_v45 = vpop.permute.xlu1 %7005 }
 0xc07   : > { %18180 = vrcp.f32 %v12223_v50  ;;  %16985 = vmatprep.subr.bf16.mxu1 %v16984_v16  ;;  %v18169_v10 = vpop.eup %18168  ;;  %7096 = vst.msk [vmem:[#allocation2 + $0x30] sm:$0xff] %vm7089_vm4, %v7006_v45  ;;  %10408 = vrot.lane.b32.xlu0 %v22396_v12, %s18202_s17 }
 0xc08   : > { %16282 = vmatprep.mubr.msk.f32.mxu0 %vm1984_vm3, %v12287_v57  ;;  %v12282_v9 = vmul.f32 %v18169_v10, %v21252_v49 }
 0xc09   : > { %v18171_v19 = vpop.eup %18170 }
 0xc0a   : > { %v17662_v37 = vpop.permute.xlu0 %17661  ;;  %v12281_v46 = vmul.f32 %v18171_v19, %v21304_v59  ;;  %v10367_v13 = vpop.permute.xlu1 %10366 }
 0xc0b   : > { %v17664_v30 = vunpack.i.h.bf16 %v17662_v37  ;;  %v17663_v63 = vunpack.i.l.bf16 %v17662_v37  ;;  %v18173_v55 = vpop.eup %18172  ;;  %10457 = vst.msk [vmem:[#allocation2 + $0x30] sm:$0xff] %vm10450_vm5, %v10367_v13  ;;  %7051 = vrot.lane.b32.xlu0 %v22397_v38, %s18201_s16 }
 0xc0c   : > { %16261 = vmatprep.mubr.msk.f32.mxu1 %vm1984_vm3, %v12281_v46  ;;  %v12286_v49 = vmul.f32 %v18173_v55, %v21262_v3  ;;  %v16996_v3 = vpack.c.bf16 %v13877_v36, %v13876_v42 }
 0xc0d   : > { %v18175_v53 = vpop.eup %18174  ;;  %16262 = vmatmul.mubr.msk.f32.vlgmr.msra.gmra.mrb[146].mxu1 %vm1984_vm3, %v12282_v9  ;;  %v16988_v7 = vpack.c.bf16 %v17664_v30, %v17663_v63 }
 0xc0e   : > { %16987 = vmatpush3.bf16.msra.mxu1 %v16984_v16  ;;  %v6994_v59 = vpop.permute.xlu0 %6993  ;;  %v12285_v15 = vmul.f32 %v18175_v53, %v21308_v56  ;;  %v18177_v1 = vpop.eup %18176  ;;  %v22398_v56 = vld [vmem:[#allocation24_spill] sm:$0xff] }
 0xc0f   : > { %7090 = vst.msk [vmem:[#allocation2] sm:$0xff] %vm7089_vm4, %v6994_v59  ;;  %v7010_v0 = vpop.permute.xlu1 %7009  ;;  %16993 = vmatprep.subr.bf16.mxu1 %v16992_v33  ;;  %16989 = vmatprep.subr.bf16.mxu0 %v16988_v7  ;;  %v18179_v60 = vpop.eup %18178  ;;  %v12288_v27 = vmul.f32 %v18177_v1, %v21242_v21  ;;  %v17000_v21 = vpack.c.bf16 %v13879_v54, %v13878_v11 }
 0xc10   : > { %7098 = vst.msk [vmem:[#allocation2 + $0x40] sm:$0xff] %vm7089_vm4, %v7010_v0  ;;  %10412 = vrot.lane.b32.xlu0 %v22398_v56, %s18202_s17  ;;  %16275 = vmatprep.mubr.msk.f32.mxu1 %vm1984_vm3, %v12285_v15  ;;  %v12290_v20 = vmul.f32 %v18179_v60, %v21272_v29 }
 0xc11   : > { %v18181_v47 = vpop.eup %18180  ;;  %16991 = vmatpush3.bf16.msra.mxu0 %v16988_v7  ;;  %16276 = vmatmul.mubr.msk.f32.vlgmr.msra.gmra.mrb[148].mxu1 %vm1984_vm3, %v12286_v49 }
 0xc12   : > { %16995 = vmatpush3.bf16.msra.mxu1 %v16992_v33  ;;  %v6996_v4 = vpop.permute.xlu0 %6995  ;;  %v12289_v22 = vmul.f32 %v18181_v47, %v21314_v41  ;;  %16997 = vmatprep.subr.bf16.mxu0 %v16996_v3  ;;  %v16186_v14 = vpop.f32.mrb[120].mxu0 }
 0xc13   : > { %7091 = vst.msk [vmem:[#allocation2 + $0x8] sm:$0xff] %vm7089_vm4, %v6996_v4  ;;  %v10371_v8 = vpop.permute.xlu1 %10370  ;;  %v12369_v29 = vpop.f32.mrb[121].mxu0 }
 0xc14   : > { %10459 = vst.msk [vmem:[#allocation2 + $0x40] sm:$0xff] %vm10450_vm5, %v10371_v8  ;;  %16283 = vmatmul.mubr.msk.f32.vlgmr.msra.gmra.mrb[134].mxu0 %vm1984_vm3, %v12288_v27  ;;  %16289 = vmatprep.mubr.msk.f32.mxu1 %vm1984_vm3, %v12289_v22 }
 0xc15   : > { %13717 = vrot.lane.b32.xlu0 %v16186_v14, %s18203_s28  ;;  %16290 = vmatmul.mubr.msk.f32.vlgmr.msra.gmra.mrb[150].mxu1 %vm1984_vm3, %v12290_v20 }
 0xc16   : > { %13715 = vrot.lane.b32.xlu1 %v12369_v29, %s18203_s28  ;;  %v10355_v41 = vpop.permute.xlu0 %10354  ;;  %16999 = vmatpush3.bf16.msra.mxu0 %v16996_v3  ;;  %v16200_v2 = vpop.f32.mrb[122].mxu0 }
 0xc17   : > { %10451 = vst.msk [vmem:[#allocation2] sm:$0xff] %vm10450_vm5, %v10355_v41  ;;  %v7014_v18 = vpop.permute.xlu1 %7013  ;;  %17001 = vmatprep.subr.bf16.mxu0 %v17000_v21  ;;  %v12543_v40 = vpop.f32.mrb[123].mxu0 }
 0xc18   : > { %7100 = vst.msk [vmem:[#allocation2 + $0x50] sm:$0xff] %vm7089_vm4, %v7014_v18 }
 0xc19   : > { %13725 = vrot.lane.b32.xlu0 %v16200_v2, %s18203_s28 }
 0xc1a   : > { %13723 = vrot.lane.b32.xlu1 %v12543_v40, %s18203_s28  ;;  %v10357_v61 = vpop.permute.xlu0 %10356  ;;  %17003 = vmatpush3.bf16.msra.mxu0 %v17000_v21 }
 0xc1b   : > { %10452 = vst.msk [vmem:[#allocation2 + $0x8] sm:$0xff] %vm10450_vm5, %v10357_v61  ;;  %v10375_v35 = vpop.permute.xlu1 %10374 }
 0xc1c   : > { %10461 = vst.msk [vmem:[#allocation2 + $0x50] sm:$0xff] %vm10450_vm5, %v10375_v35 }
 0xc1e   : > { %v7000_v32 = vpop.permute.xlu0 %6999 }
 0xc1f   : > { %7093 = vst.msk [vmem:[#allocation2 + $0x18] sm:$0xff] %vm7089_vm4, %v7000_v32  ;;  %v7018_v23 = vpop.permute.xlu1 %7017 }
 0xc20   : > { %7102 = vst.msk [vmem:[#allocation2 + $0x60] sm:$0xff] %vm7089_vm4, %v7018_v23 }
 0xc22   : > { %v10361_v48 = vpop.permute.xlu0 %10360 }
 0xc23   : > { %10454 = vst.msk [vmem:[#allocation2 + $0x18] sm:$0xff] %vm10450_vm5, %v10361_v48  ;;  %v10379_v26 = vpop.permute.xlu1 %10378 }
 0xc24   : > { %10463 = vst.msk [vmem:[#allocation2 + $0x60] sm:$0xff] %vm10450_vm5, %v10379_v26 }
 0xc26   : > { %v7004_v44 = vpop.permute.xlu0 %7003 }
 0xc27   : > { %7095 = vst.msk [vmem:[#allocation2 + $0x28] sm:$0xff] %vm7089_vm4, %v7004_v44  ;;  %v7022_v52 = vpop.permute.xlu1 %7021 }
 0xc28   : > { %7104 = vst.msk [vmem:[#allocation2 + $0x70] sm:$0xff] %vm7089_vm4, %v7022_v52 }
 0xc2a   : > { %v10365_v51 = vpop.permute.xlu0 %10364 }
 0xc2b   : > { %10456 = vst.msk [vmem:[#allocation2 + $0x28] sm:$0xff] %vm10450_vm5, %v10365_v51  ;;  %v10383_v25 = vpop.permute.xlu1 %10382 }
 0xc2c   : > { %10465 = vst.msk [vmem:[#allocation2 + $0x70] sm:$0xff] %vm10450_vm5, %v10383_v25 }
 0xc2e   : > { %v7008_v6 = vpop.permute.xlu0 %7007 }
 0xc2f   : > { %7097 = vst.msk [vmem:[#allocation2 + $0x38] sm:$0xff] %vm7089_vm4, %v7008_v6  ;;  %v7026_v34 = vpop.permute.xlu1 %7025 }
 0xc30   : > { %7106 = vst.msk [vmem:[#allocation2 + $0x80] sm:$0xff] %vm7089_vm4, %v7026_v34 }
 0xc32   : > { %v10369_v5 = vpop.permute.xlu0 %10368 }
 0xc33   : > { %10458 = vst.msk [vmem:[#allocation2 + $0x38] sm:$0xff] %vm10450_vm5, %v10369_v5  ;;  %v10387_v39 = vpop.permute.xlu1 %10386 }
 0xc34   : > { %10467 = vst.msk [vmem:[#allocation2 + $0x80] sm:$0xff] %vm10450_vm5, %v10387_v39 }
 0xc36   : > { %v7012_v43 = vpop.permute.xlu0 %7011 }
 0xc37   : > { %7099 = vst.msk [vmem:[#allocation2 + $0x48] sm:$0xff] %vm7089_vm4, %v7012_v43  ;;  %v7030_v17 = vpop.permute.xlu1 %7029 }
 0xc38   : > { %7108 = vst.msk [vmem:[#allocation2 + $0x90] sm:$0xff] %vm7089_vm4, %v7030_v17 }
 0xc39   : > { %v16214_v62 = vpop.f32.mrb[124].mxu0 }
 0xc3a   : > { %v10373_v58 = vpop.permute.xlu0 %10372  ;;  %13733 = vrot.lane.b32.xlu0 %v16214_v62, %s18203_s28  ;;  %v12717_v24 = vpop.f32.mrb[125].mxu0 }
 0xc3b   : > { %10460 = vst.msk [vmem:[#allocation2 + $0x48] sm:$0xff] %vm10450_vm5, %v10373_v58  ;;  %v10391_v16 = vpop.permute.xlu1 %10390  ;;  %13731 = vrot.lane.b32.xlu1 %v12717_v24, %s18203_s28 }
 0xc3c   : > { %10469 = vst.msk [vmem:[#allocation2 + $0x90] sm:$0xff] %vm10450_vm5, %v10391_v16 }
 0xc3e   : > { %v7016_v50 = vpop.permute.xlu0 %7015 }
 0xc3f   : > { %7101 = vst.msk [vmem:[#allocation2 + $0x58] sm:$0xff] %vm7089_vm4, %v7016_v50  ;;  %v7034_v57 = vpop.permute.xlu1 %7033 }
 0xc40   : > { %7110 = vst.msk [vmem:[#allocation2 + $0xa0] sm:$0xff] %vm7089_vm4, %v7034_v57 }
 0xc42   : > { %v10377_v45 = vpop.permute.xlu0 %10376 }
 0xc43   : > { %10462 = vst.msk [vmem:[#allocation2 + $0x58] sm:$0xff] %vm10450_vm5, %v10377_v45  ;;  %v10395_v10 = vpop.permute.xlu1 %10394  ;;  %v22399_v45 = vld [vmem:[#allocation69_spill] sm:$0xff] }
 0xc44   : > { %10471 = vst.msk [vmem:[#allocation2 + $0xa0] sm:$0xff] %vm10450_vm5, %v10395_v10  ;;  %v22400_v10 = vld [vmem:[#allocation71_spill] sm:$0xff] }
 0xc46   : > { %v7020_v12 = vpop.permute.xlu0 %7019 }
 0xc47   : > { %7103 = vst.msk [vmem:[#allocation2 + $0x68] sm:$0xff] %vm7089_vm4, %v7020_v12  ;;  %v7038_v19 = vpop.permute.xlu1 %7037 }
 0xc48   : > { %7112 = vst.msk [vmem:[#allocation2 + $0xb0] sm:$0xff] %vm7089_vm4, %v7038_v19 }
 0xc4a   : > { %v10381_v28 = vpop.permute.xlu0 %10380 }
 0xc4b   : > { %10464 = vst.msk [vmem:[#allocation2 + $0x68] sm:$0xff] %vm10450_vm5, %v10381_v28  ;;  %v10399_v31 = vpop.permute.xlu1 %10398 }
 0xc4c   : > { %10473 = vst.msk [vmem:[#allocation2 + $0xb0] sm:$0xff] %vm10450_vm5, %v10399_v31  ;;  %v22401_v31 = vld [vmem:[#allocation25_spill] sm:$0xff] }
 0xc4e   : > { %v7024_v37 = vpop.permute.xlu0 %7023 }
 0xc4f   : > { %7105 = vst.msk [vmem:[#allocation2 + $0x78] sm:$0xff] %vm7089_vm4, %v7024_v37  ;;  %v7042_v46 = vpop.permute.xlu1 %7041  ;;  %v22402_v37 = vld [vmem:[#allocation77_spill] sm:$0xff] }
 0xc50   : > { %7114 = vst.msk [vmem:[#allocation2 + $0xc0] sm:$0xff] %vm7089_vm4, %v7042_v46 }
 0xc52   : > { %v10385_v30 = vpop.permute.xlu0 %10384 }
 0xc53   : > { %10466 = vst.msk [vmem:[#allocation2 + $0x78] sm:$0xff] %vm10450_vm5, %v10385_v30  ;;  %v10403_v63 = vpop.permute.xlu1 %10402 }
 0xc54   : > { %10475 = vst.msk [vmem:[#allocation2 + $0xc0] sm:$0xff] %vm10450_vm5, %v10403_v63 }
 0xc56   : > { %v7028_v13 = vpop.permute.xlu0 %7027 }
 0xc57   : > { %7107 = vst.msk [vmem:[#allocation2 + $0x88] sm:$0xff] %vm7089_vm4, %v7028_v13  ;;  %v7046_v9 = vpop.permute.xlu1 %7045 }
 0xc58   : > { %7116 = vst.msk [vmem:[#allocation2 + $0xd0] sm:$0xff] %vm7089_vm4, %v7046_v9 }
 0xc5a   : > { %v10389_v55 = vpop.permute.xlu0 %10388 }
 0xc5b   : > { %10468 = vst.msk [vmem:[#allocation2 + $0x88] sm:$0xff] %vm10450_vm5, %v10389_v55  ;;  %v10407_v38 = vpop.permute.xlu1 %10406 }
 0xc5c   : > { %10477 = vst.msk [vmem:[#allocation2 + $0xd0] sm:$0xff] %vm10450_vm5, %v10407_v38 }
 0xc5e   : > { %v7032_v53 = vpop.permute.xlu0 %7031 }
 0xc5f   : > { %7109 = vst.msk [vmem:[#allocation2 + $0x98] sm:$0xff] %vm7089_vm4, %v7032_v53  ;;  %v7050_v33 = vpop.permute.xlu1 %7049 }
 0xc60   : > { %7118 = vst.msk [vmem:[#allocation2 + $0xe0] sm:$0xff] %vm7089_vm4, %v7050_v33 }
 0xc62   : > { %v10393_v7 = vpop.permute.xlu0 %10392 }
 0xc63   : > { %10470 = vst.msk [vmem:[#allocation2 + $0x98] sm:$0xff] %vm10450_vm5, %v10393_v7  ;;  %v10411_v59 = vpop.permute.xlu1 %10410 }
 0xc64   : > { %10479 = vst.msk [vmem:[#allocation2 + $0xe0] sm:$0xff] %vm10450_vm5, %v10411_v59 }
 0xc66   : > { %v7036_v15 = vpop.permute.xlu0 %7035 }
 0xc67   : > { %7111 = vst.msk [vmem:[#allocation2 + $0xa8] sm:$0xff] %vm7089_vm4, %v7036_v15 }
 0xc6a   : > { %v10397_v1 = vpop.permute.xlu0 %10396 }
 0xc6b   : > { %10472 = vst.msk [vmem:[#allocation2 + $0xa8] sm:$0xff] %vm10450_vm5, %v10397_v1 }
 0xc6e   : > { %v7040_v49 = vpop.permute.xlu0 %7039 }
 0xc6f   : > { %7113 = vst.msk [vmem:[#allocation2 + $0xb8] sm:$0xff] %vm7089_vm4, %v7040_v49 }
 0xc72   : > { %v10401_v0 = vpop.permute.xlu0 %10400 }
 0xc73   : > { %10474 = vst.msk [vmem:[#allocation2 + $0xb8] sm:$0xff] %vm10450_vm5, %v10401_v0 }
 0xc76   : > { %v7044_v42 = vpop.permute.xlu0 %7043 }
 0xc77   : > { %7115 = vst.msk [vmem:[#allocation2 + $0xc8] sm:$0xff] %vm7089_vm4, %v7044_v42  ;;  %v16193_v36 = vpop.f32.mrb[136].mxu1 }
 0xc78   : > { %13721 = vrot.lane.b32.xlu0 %v16193_v36, %s18203_s28  ;;  %v12456_v60 = vpop.f32.mrb[137].mxu1 }
 0xc79   : > { %13719 = vrot.lane.b32.xlu1 %v12456_v60, %s18203_s28 }
 0xc7a   : > { %v10405_v56 = vpop.permute.xlu0 %10404 }
 0xc7b   : > { %10476 = vst.msk [vmem:[#allocation2 + $0xc8] sm:$0xff] %vm10450_vm5, %v10405_v56 }
 0xc7e   : > { %v7048_v3 = vpop.permute.xlu0 %7047 }
 0xc7f   : > { %7117 = vst.msk [vmem:[#allocation2 + $0xd8] sm:$0xff] %vm7089_vm4, %v7048_v3 }
 0xc82   : > { %v10409_v47 = vpop.permute.xlu0 %10408 }
 0xc83   : > { %10478 = vst.msk [vmem:[#allocation2 + $0xd8] sm:$0xff] %vm10450_vm5, %v10409_v47 }
 0xc86   : > { %v7052_v4 = vpop.permute.xlu0 %7051 }
 0xc87   : > { %7119 = vst.msk [vmem:[#allocation2 + $0xe8] sm:$0xff] %vm7089_vm4, %v7052_v4 }
 0xc88   : > { %v13716_v27 = vpop.permute.xlu1 %13715 }
 0xc89   : > { %13812 = vst.msk [vmem:[#allocation2] sm:$0xff] %vm13811_vm6, %v13716_v27 }
 0xc8a   : > { %v10413_v22 = vpop.permute.xlu0 %10412 }
 0xc8b   : > { %10480 = vst.msk [vmem:[#allocation2 + $0xe8] sm:$0xff] %vm10450_vm5, %v10413_v22 }
 0xc8c   : > { %v13724_v20 = vpop.permute.xlu1 %13723 }
 0xc8d   : > { %13816 = vst.msk [vmem:[#allocation2 + $0x20] sm:$0xff] %vm13811_vm6, %v13724_v20 }
 0xc8e   : > { %v13718_v8 = vpop.permute.xlu0 %13717 }
 0xc8f   : > { %13813 = vst.msk [vmem:[#allocation2 + $0x8] sm:$0xff] %vm13811_vm6, %v13718_v8 }
 0xc90   : > { %v13844_v11 = vld [vmem:[#allocation2] sm:$0xff] }
 0xc91   : > { %16300 = vmatprep.mubr.msk.f32.mxu0 %vm237_vm0, %v13844_v11 }
 0xc92   : > { %v13726_v54 = vpop.permute.xlu0 %13725 }
 0xc93   : > { %13817 = vst.msk [vmem:[#allocation2 + $0x28] sm:$0xff] %vm13811_vm6, %v13726_v54 }
 0xc94   : > { %v13848_v28 = vld [vmem:[#allocation2 + $0x20] sm:$0xff] }
 0xc96   : > { %v13845_v14 = vld [vmem:[#allocation2 + $0x8] sm:$0xff] }
 0xc97   : > { %16301 = vmatmul.mubr.msk.f32.vlgmr.msra.gmra.mrb[136].mxu0 %vm237_vm0, %v13845_v14 }
 0xc9a   : > { %v13849_v46 = vld [vmem:[#allocation2 + $0x28] sm:$0xff] }
 0xcac   : > { %v13734_v21 = vpop.permute.xlu0 %13733 }
 0xcad   : > { %13821 = vst.msk [vmem:[#allocation2 + $0x48] sm:$0xff] %vm13811_vm6, %v13734_v21  ;;  %v13732_v29 = vpop.permute.xlu1 %13731 }
 0xcae   : > { %13820 = vst.msk [vmem:[#allocation2 + $0x40] sm:$0xff] %vm13811_vm6, %v13732_v29 }
 0xcb4   : > { %v13853_v1 = vld [vmem:[#allocation2 + $0x48] sm:$0xff] }
 0xcb5   : > { %v13852_v7 = vld [vmem:[#allocation2 + $0x40] sm:$0xff] }
 0xcb8   : > { %v16228_v41 = vpop.f32.mrb[126].mxu0 }
 0xcb9   : > { %v12891_v18 = vpop.f32.mrb[127].mxu0  ;;  %13741 = vrot.lane.b32.xlu0 %v16228_v41, %s18203_s28 }
 0xcba   : > { %13739 = vrot.lane.b32.xlu1 %v12891_v18, %s18203_s28 }
 0xcbb   : > { %v16207_v2 = vpop.f32.mrb[138].mxu1 }
 0xcbc   : > { %v12630_v40 = vpop.f32.mrb[139].mxu1 }
 0xcbd   : > { %13729 = vrot.lane.b32.xlu0 %v16207_v2, %s18203_s28 }
 0xcbe   : > { %13727 = vrot.lane.b32.xlu1 %v12630_v40, %s18203_s28 }
 0xcc4   : > { %v16242_v61 = vpop.f32.mrb[128].mxu0 }
 0xcc5   : > { %v13065_v35 = vpop.f32.mrb[129].mxu0  ;;  %13749 = vrot.lane.b32.xlu0 %v16242_v61, %s18203_s28 }
 0xcc6   : > { %13747 = vrot.lane.b32.xlu1 %v13065_v35, %s18203_s28 }
 0xcc7   : > { %v16221_v32 = vpop.f32.mrb[140].mxu1 }
 0xcc8   : > { %v12804_v23 = vpop.f32.mrb[141].mxu1 }
 0xcc9   : > { %13737 = vrot.lane.b32.xlu0 %v16221_v32, %s18203_s28 }
 0xcca   : > { %13735 = vrot.lane.b32.xlu1 %v12804_v23, %s18203_s28 }
 0xccc   : > { %v16256_v48 = vpop.f32.mrb[130].mxu0 }
 0xccd   : > { %13757 = vrot.lane.b32.xlu0 %v16256_v48, %s18203_s28  ;;  %v13239_v26 = vpop.f32.mrb[131].mxu0 }
 0xcce   : > { %13755 = vrot.lane.b32.xlu1 %v13239_v26, %s18203_s28 }
 0xccf   : > { %v16235_v44 = vpop.f32.mrb[142].mxu1 }
 0xcd0   : > { %v12978_v52 = vpop.f32.mrb[143].mxu1 }
 0xcd1   : > { %13745 = vrot.lane.b32.xlu0 %v16235_v44, %s18203_s28 }
 0xcd2   : > { %13743 = vrot.lane.b32.xlu1 %v12978_v52, %s18203_s28 }
 0xcd4   : > { %v16270_v51 = vpop.f32.mrb[132].mxu0 }
 0xcd5   : > { %13765 = vrot.lane.b32.xlu0 %v16270_v51, %s18203_s28  ;;  %v13413_v25 = vpop.f32.mrb[133].mxu0  ;;  %v21707_v51 = vld [vmem:[%s21831_s3] ss:$0 sm:$0xff] }
 0xcd6   : > { %13763 = vrot.lane.b32.xlu1 %v13413_v25, %s18203_s28 }
 0xcd8   : > { %v16249_v6 = vpop.f32.mrb[144].mxu1 }
 0xcd9   : > { %13753 = vrot.lane.b32.xlu0 %v16249_v6, %s18203_s28  ;;  %v13152_v34 = vpop.f32.mrb[145].mxu1 }
 0xcda   : > { %13751 = vrot.lane.b32.xlu1 %v13152_v34, %s18203_s28 }
 0xce0   : > { %v16263_v5 = vpop.f32.mrb[146].mxu1 }
 0xce1   : > { %v13326_v39 = vpop.f32.mrb[147].mxu1 }
 0xce4   : > { %v16277_v43 = vpop.f32.mrb[148].mxu1 }
 0xce5   : > { %v13500_v17 = vpop.f32.mrb[149].mxu1 }
 0xce7   : > { %v16284_v62 = vpop.f32.mrb[134].mxu0 }
 0xce8   : > { %v13587_v58 = vpop.f32.mrb[135].mxu0  ;;  %13773 = vrot.lane.b32.xlu0 %v16284_v62, %s18203_s28  ;;  %v16291_v24 = vpop.f32.mrb[150].mxu1 }
 0xce9   : > { %13771 = vrot.lane.b32.xlu1 %v13587_v58, %s18203_s28  ;;  %v13674_v16 = vpop.f32.mrb[151].mxu1 }
 0xcea   : > { %v13722_v50 = vpop.permute.xlu0 %13721 }
 0xceb   : > { %13815 = vst.msk [vmem:[#allocation2 + $0x18] sm:$0xff] %vm13811_vm6, %v13722_v50  ;;  %v13720_v57 = vpop.permute.xlu1 %13719 }
 0xcec   : > { %13761 = vrot.lane.b32.xlu0 %v16263_v5, %s18203_s28  ;;  %13814 = vst.msk [vmem:[#allocation2 + $0x10] sm:$0xff] %vm13811_vm6, %v13720_v57 }
 0xced   : > { %13759 = vrot.lane.b32.xlu1 %v13326_v39, %s18203_s28 }
 0xcf0   : > { %7055 = vrot.lane.b32.xlu0 %v22399_v45, %s18201_s16 }
 0xcf1   : > { %7053 = vrot.lane.b32.xlu1 %v22400_v10, %s18201_s16 }
 0xcf2   : > { %v13847_v19 = vld [vmem:[#allocation2 + $0x18] sm:$0xff] }
 0xcf3   : > { %v13846_v12 = vld [vmem:[#allocation2 + $0x10] sm:$0xff] }
 0xcf4   : > { %13769 = vrot.lane.b32.xlu0 %v16277_v43, %s18203_s28  ;;  %16303 = vmatprep.mubr.msk.f32.mxu0 %vm237_vm0, %v13846_v12 }
 0xcf5   : > { %13767 = vrot.lane.b32.xlu1 %v13500_v17, %s18203_s28  ;;  %16304 = vmatmul.mubr.msk.f32.gmra.mrb[138].mxu0 %vm237_vm0, %v13847_v19 }
 0xcf6   : > { %16306 = vmatprep.mubr.msk.f32.mxu0 %vm237_vm0, %v13848_v28 }
 0xcf8   : > { %10416 = vrot.lane.b32.xlu0 %v22401_v31, %s18202_s17 }
 0xcf9   : > { %10414 = vrot.lane.b32.xlu1 %v22402_v37, %s18202_s17  ;;  %16307 = vmatmul.mubr.msk.f32.gmra.mrb[140].mxu0 %vm237_vm0, %v13849_v46 }
 0xcfc   : > { %13777 = vrot.lane.b32.xlu0 %v16291_v24, %s18203_s28 }
 0xcfd   : > { %13775 = vrot.lane.b32.xlu1 %v13674_v16, %s18203_s28 }
 0xd2b   : > { %v13742_v30 = vpop.permute.xlu0 %13741 }
 0xd2c   : > { %13825 = vst.msk [vmem:[#allocation2 + $0x68] sm:$0xff] %vm13811_vm6, %v13742_v30  ;;  %v13740_v63 = vpop.permute.xlu1 %13739 }
 0xd2d   : > { %13824 = vst.msk [vmem:[#allocation2 + $0x60] sm:$0xff] %vm13811_vm6, %v13740_v63 }
 0xd2f   : > { %v13730_v13 = vpop.permute.xlu0 %13729 }
 0xd30   : > { %13819 = vst.msk [vmem:[#allocation2 + $0x38] sm:$0xff] %vm13811_vm6, %v13730_v13  ;;  %v13728_v9 = vpop.permute.xlu1 %13727 }
 0xd31   : > { %13818 = vst.msk [vmem:[#allocation2 + $0x30] sm:$0xff] %vm13811_vm6, %v13728_v9 }
 0xd33   : > { %v13857_v27 = vld [vmem:[#allocation2 + $0x68] sm:$0xff] }
 0xd34   : > { %v13856_v3 = vld [vmem:[#allocation2 + $0x60] sm:$0xff] }
 0xd37   : > { %v13750_v55 = vpop.permute.xlu0 %13749  ;;  %v13851_v33 = vld [vmem:[#allocation2 + $0x38] sm:$0xff] }
 0xd38   : > { %13829 = vst.msk [vmem:[#allocation2 + $0x88] sm:$0xff] %vm13811_vm6, %v13750_v55  ;;  %v13748_v38 = vpop.permute.xlu1 %13747  ;;  %v13850_v53 = vld [vmem:[#allocation2 + $0x30] sm:$0xff] }
 0xd39   : > { %13828 = vst.msk [vmem:[#allocation2 + $0x80] sm:$0xff] %vm13811_vm6, %v13748_v38  ;;  %16309 = vmatprep.mubr.msk.f32.mxu0 %vm237_vm0, %v13850_v53 }
 0xd3a   : > { %16310 = vmatmul.mubr.msk.f32.gmra.mrb[142].mxu0 %vm237_vm0, %v13851_v33 }
 0xd3b   : > { %v13738_v59 = vpop.permute.xlu0 %13737  ;;  %16312 = vmatprep.mubr.msk.f32.mxu0 %vm237_vm0, %v13852_v7 }
 0xd3c   : > { %13823 = vst.msk [vmem:[#allocation2 + $0x58] sm:$0xff] %vm13811_vm6, %v13738_v59  ;;  %v13736_v15 = vpop.permute.xlu1 %13735 }
 0xd3d   : > { %13822 = vst.msk [vmem:[#allocation2 + $0x50] sm:$0xff] %vm13811_vm6, %v13736_v15 }
 0xd3e   : > { %16313 = vmatmul.mubr.msk.f32.gmra.mrb[144].mxu0 %vm237_vm0, %v13853_v1 }
 0xd3f   : > { %v13758_v49 = vpop.permute.xlu0 %13757  ;;  %v13861_v14 = vld [vmem:[#allocation2 + $0x88] sm:$0xff] }
 0xd40   : > { %13833 = vst.msk [vmem:[#allocation2 + $0xa8] sm:$0xff] %vm13811_vm6, %v13758_v49  ;;  %v13756_v0 = vpop.permute.xlu1 %13755  ;;  %v13860_v54 = vld [vmem:[#allocation2 + $0x80] sm:$0xff] }
 0xd41   : > { %13832 = vst.msk [vmem:[#allocation2 + $0xa0] sm:$0xff] %vm13811_vm6, %v13756_v0 }
 0xd43   : > { %v13746_v42 = vpop.permute.xlu0 %13745  ;;  %v13855_v56 = vld [vmem:[#allocation2 + $0x58] sm:$0xff] }
 0xd44   : > { %13827 = vst.msk [vmem:[#allocation2 + $0x78] sm:$0xff] %vm13811_vm6, %v13746_v42  ;;  %v13744_v36 = vpop.permute.xlu1 %13743  ;;  %v13854_v60 = vld [vmem:[#allocation2 + $0x50] sm:$0xff] }
 0xd45   : > { %13826 = vst.msk [vmem:[#allocation2 + $0x70] sm:$0xff] %vm13811_vm6, %v13744_v36  ;;  %16315 = vmatprep.mubr.msk.f32.mxu0 %vm237_vm0, %v13854_v60 }
 0xd46   : > { %16316 = vmatmul.mubr.msk.f32.gmra.mrb[146].mxu0 %vm237_vm0, %v13855_v56 }
 0xd47   : > { %v13766_v47 = vpop.permute.xlu0 %13765  ;;  %16318 = vmatprep.mubr.msk.f32.mxu0 %vm237_vm0, %v13856_v3  ;;  %v13865_v18 = vld [vmem:[#allocation2 + $0xa8] sm:$0xff] }
 0xd48   : > { %13837 = vst.msk [vmem:[#allocation2 + $0xc8] sm:$0xff] %vm13811_vm6, %v13766_v47  ;;  %v13764_v4 = vpop.permute.xlu1 %13763  ;;  %v13864_v41 = vld [vmem:[#allocation2 + $0xa0] sm:$0xff] }
 0xd49   : > { %13836 = vst.msk [vmem:[#allocation2 + $0xc0] sm:$0xff] %vm13811_vm6, %v13764_v4 }
 0xd4a   : > { %16319 = vmatmul.mubr.msk.f32.gmra.mrb[148].mxu0 %vm237_vm0, %v13857_v27 }
 0xd4b   : > { %v13754_v22 = vpop.permute.xlu0 %13753  ;;  %v13859_v11 = vld [vmem:[#allocation2 + $0x78] sm:$0xff] }
 0xd4c   : > { %13831 = vst.msk [vmem:[#allocation2 + $0x98] sm:$0xff] %vm13811_vm6, %v13754_v22  ;;  %v13752_v20 = vpop.permute.xlu1 %13751  ;;  %v13858_v8 = vld [vmem:[#allocation2 + $0x70] sm:$0xff] }
 0xd4d   : > { %13830 = vst.msk [vmem:[#allocation2 + $0x90] sm:$0xff] %vm13811_vm6, %v13752_v20  ;;  %16321 = vmatprep.mubr.msk.f32.mxu0 %vm237_vm0, %v13858_v8 }
 0xd4e   : > { %16322 = vmatmul.mubr.msk.f32.gmra.mrb[150].mxu0 %vm237_vm0, %v13859_v11 }
 0xd4f   : > { %16324 = vmatprep.mubr.msk.f32.mxu0 %vm237_vm0, %v13860_v54  ;;  %v13869_v62 = vld [vmem:[#allocation2 + $0xc8] sm:$0xff] }
 0xd50   : > { %v13868_v25 = vld [vmem:[#allocation2 + $0xc0] sm:$0xff] }
 0xd52   : > { %16325 = vmatmul.mubr.msk.f32.gmra.mrb[152].mxu0 %vm237_vm0, %v13861_v14 }
 0xd53   : > { %v13863_v29 = vld [vmem:[#allocation2 + $0x98] sm:$0xff] }
 0xd54   : > { %v13862_v21 = vld [vmem:[#allocation2 + $0x90] sm:$0xff] }
 0xd55   : > { %16327 = vmatprep.mubr.msk.f32.mxu0 %vm237_vm0, %v13862_v21 }
 0xd56   : > { %16328 = vmatmul.mubr.msk.f32.gmra.mrb[154].mxu0 %vm237_vm0, %v13863_v29 }
 0xd57   : > { %16330 = vmatprep.mubr.msk.f32.mxu0 %vm237_vm0, %v13864_v41 }
 0xd5a   : > { %v13774_v2 = vpop.permute.xlu0 %13773  ;;  %16331 = vmatmul.mubr.msk.f32.gmra.mrb[156].mxu0 %vm237_vm0, %v13865_v18 }
 0xd5b   : > { %13841 = vst.msk [vmem:[#allocation2 + $0xe8] sm:$0xff] %vm13811_vm6, %v13774_v2  ;;  %v13772_v40 = vpop.permute.xlu1 %13771 }
 0xd5c   : > { %13840 = vst.msk [vmem:[#allocation2 + $0xe0] sm:$0xff] %vm13811_vm6, %v13772_v40 }
 0xd5e   : > { %v13762_v61 = vpop.permute.xlu0 %13761 }
 0xd5f   : > { %13835 = vst.msk [vmem:[#allocation2 + $0xb8] sm:$0xff] %vm13811_vm6, %v13762_v61  ;;  %v13760_v35 = vpop.permute.xlu1 %13759 }
 0xd60   : > { %13834 = vst.msk [vmem:[#allocation2 + $0xb0] sm:$0xff] %vm13811_vm6, %v13760_v35 }
 0xd62   : > { %v7056_v32 = vpop.permute.xlu0 %7055  ;;  %v13873_v45 = vld [vmem:[#allocation2 + $0xe8] sm:$0xff] }
 0xd63   : > { %7121 = vst.msk [vmem:[#allocation2 + $0xf8] sm:$0xff] %vm7089_vm4, %v7056_v32  ;;  %v7054_v23 = vpop.permute.xlu1 %7053  ;;  %v13872_v57 = vld [vmem:[#allocation2 + $0xe0] sm:$0xff] }
 0xd64   : > { %7120 = vst.msk [vmem:[#allocation2 + $0xf0] sm:$0xff] %vm7089_vm4, %v7054_v23 }
 0xd66   : > { %v13770_v48 = vpop.permute.xlu0 %13769  ;;  %v13867_v52 = vld [vmem:[#allocation2 + $0xb8] sm:$0xff] }
 0xd67   : > { %13839 = vst.msk [vmem:[#allocation2 + $0xd8] sm:$0xff] %vm13811_vm6, %v13770_v48  ;;  %v13768_v26 = vpop.permute.xlu1 %13767  ;;  %v13866_v44 = vld [vmem:[#allocation2 + $0xb0] sm:$0xff] }
 0xd68   : > { %13838 = vst.msk [vmem:[#allocation2 + $0xd0] sm:$0xff] %vm13811_vm6, %v13768_v26  ;;  %16333 = vmatprep.mubr.msk.f32.mxu0 %vm237_vm0, %v13866_v44 }
 0xd69   : > { %16334 = vmatmul.mubr.msk.f32.gmra.mrb[158].mxu0 %vm237_vm0, %v13867_v52 }
 0xd6a   : > { %16336 = vmatprep.mubr.msk.f32.mxu0 %vm237_vm0, %v13868_v25  ;;  %v10417_v6 = vpop.permute.xlu0 %10416  ;;  %v16302_v34 = vpop.f32.mrb[136].mxu0 }
 0xd6b   : > { %10482 = vst.msk [vmem:[#allocation2 + $0xf8] sm:$0xff] %vm10450_vm5, %v10417_v6  ;;  %v14055_v5 = vadd.f32 %v16302_v34, %v21707_v51  ;;  %v10415_v39 = vpop.permute.xlu1 %10414  ;;  %v14049_v43 = vpop.f32.mrb[137].mxu0 }
 0xd6c   : > { %10481 = vst.msk [vmem:[#allocation2 + $0xf0] sm:$0xff] %vm10450_vm5, %v10415_v39  ;;  %v14050_v17 = vadd.f32 %v21707_v51, %v14049_v43 }
 0xd6d   : > { %14209 = vst.msk [vmem:[%s21715_s7 + $0x8] sm:$0xff] %vm237_vm0, %v14055_v5  ;;  %16337 = vmatmul.mubr.msk.f32.gmra.mrb[160].mxu0 %vm237_vm0, %v13869_v62 }
 0xd6e   : > { %14208 = vst.msk [vmem:[%s21715_s7] sm:$0xff] %vm237_vm0, %v14050_v17  ;;  %v13778_v58 = vpop.permute.xlu0 %13777  ;;  %v13871_v50 = vld [vmem:[#allocation2 + $0xd8] sm:$0xff] }
 0xd6f   : > { %13843 = vst.msk [vmem:[#allocation2 + $0xf8] sm:$0xff] %vm13811_vm6, %v13778_v58  ;;  %v13776_v24 = vpop.permute.xlu1 %13775  ;;  %v13870_v16 = vld [vmem:[#allocation2 + $0xd0] sm:$0xff] }
 0xd70   : > { %13842 = vst.msk [vmem:[#allocation2 + $0xf0] sm:$0xff] %vm13811_vm6, %v13776_v24  ;;  %16339 = vmatprep.mubr.msk.f32.mxu0 %vm237_vm0, %v13870_v16 }
 0xd71   : > { %16340 = vmatmul.mubr.msk.f32.gmra.mrb[162].mxu0 %vm237_vm0, %v13871_v50 }
 0xd72   : > { %16342 = vmatprep.mubr.msk.f32.mxu0 %vm237_vm0, %v13872_v57 }
 0xd75   : > { %16343 = vmatmul.mubr.msk.f32.gmra.mrb[164].mxu0 %vm237_vm0, %v13873_v45 }
 0xd76   : > { %v13875_v12 = vld [vmem:[#allocation2 + $0xf8] sm:$0xff] }
 0xd77   : > { %v13874_v10 = vld [vmem:[#allocation2 + $0xf0] sm:$0xff] }
 0xd78   : > { %16345 = vmatprep.mubr.msk.f32.mxu0 %vm237_vm0, %v13874_v10 }
 0xd79   : > { %16346 = vmatmul.mubr.msk.f32.gmra.mrb[166].mxu0 %vm237_vm0, %v13875_v12 }
 0xdc8   : > { %v16305_v19 = vpop.f32.mrb[138].mxu0 }
 0xdc9   : > { %v14065_v28 = vadd.f32 %v16305_v19, %v21707_v51  ;;  %v14059_v31 = vpop.f32.mrb[139].mxu0 }
 0xdca   : > { %v14060_v37 = vadd.f32 %v21707_v51, %v14059_v31 }
 0xdcb   : > { %14211 = vst.msk [vmem:[%s21715_s7 + $0x18] sm:$0xff] %vm237_vm0, %v14065_v28 }
 0xdcc   : > { %14210 = vst.msk [vmem:[%s21715_s7 + $0x10] sm:$0xff] %vm237_vm0, %v14060_v37  ;;  %v16308_v46 = vpop.f32.mrb[140].mxu0 }
 0xdcd   : > { %v14075_v30 = vadd.f32 %v16308_v46, %v21707_v51  ;;  %v14069_v63 = vpop.f32.mrb[141].mxu0 }
 0xdce   : > { %v14070_v13 = vadd.f32 %v21707_v51, %v14069_v63 }
 0xdcf   : > { %14213 = vst.msk [vmem:[%s21715_s7 + $0x28] sm:$0xff] %vm237_vm0, %v14075_v30 }
 0xdd0   : > { %14212 = vst.msk [vmem:[%s21715_s7 + $0x20] sm:$0xff] %vm237_vm0, %v14070_v13 }
 0xe0d   : > { %v16311_v9 = vpop.f32.mrb[142].mxu0 }
 0xe0e   : > { %v14085_v55 = vadd.f32 %v16311_v9, %v21707_v51  ;;  %v14079_v38 = vpop.f32.mrb[143].mxu0 }
 0xe0f   : > { %v14080_v53 = vadd.f32 %v21707_v51, %v14079_v38 }
 0xe10   : > { %14215 = vst.msk [vmem:[%s21715_s7 + $0x38] sm:$0xff] %vm237_vm0, %v14085_v55 }
 0xe11   : > { %14214 = vst.msk [vmem:[%s21715_s7 + $0x30] sm:$0xff] %vm237_vm0, %v14080_v53  ;;  %v16314_v33 = vpop.f32.mrb[144].mxu0 }
 0xe12   : > { %v14095_v7 = vadd.f32 %v16314_v33, %v21707_v51  ;;  %v14089_v59 = vpop.f32.mrb[145].mxu0 }
 0xe13   : > { %v14090_v15 = vadd.f32 %v21707_v51, %v14089_v59 }
 0xe14   : > { %14217 = vst.msk [vmem:[%s21715_s7 + $0x48] sm:$0xff] %vm237_vm0, %v14095_v7 }
 0xe15   : > { %14216 = vst.msk [vmem:[%s21715_s7 + $0x40] sm:$0xff] %vm237_vm0, %v14090_v15 }
 0xe19   : > { %v16317_v1 = vpop.f32.mrb[146].mxu0 }
 0xe1a   : > { %v14105_v49 = vadd.f32 %v16317_v1, %v21707_v51  ;;  %v14099_v0 = vpop.f32.mrb[147].mxu0 }
 0xe1b   : > { %v14100_v42 = vadd.f32 %v21707_v51, %v14099_v0 }
 0xe1c   : > { %14219 = vst.msk [vmem:[%s21715_s7 + $0x58] sm:$0xff] %vm237_vm0, %v14105_v49 }
 0xe1d   : > { %14218 = vst.msk [vmem:[%s21715_s7 + $0x50] sm:$0xff] %vm237_vm0, %v14100_v42  ;;  %v16320_v36 = vpop.f32.mrb[148].mxu0 }
 0xe1e   : > { %v14115_v60 = vadd.f32 %v16320_v36, %v21707_v51  ;;  %v14109_v56 = vpop.f32.mrb[149].mxu0 }
 0xe1f   : > { %v14110_v3 = vadd.f32 %v21707_v51, %v14109_v56 }
 0xe20   : > { %14221 = vst.msk [vmem:[%s21715_s7 + $0x68] sm:$0xff] %vm237_vm0, %v14115_v60 }
 0xe21   : > { %14220 = vst.msk [vmem:[%s21715_s7 + $0x60] sm:$0xff] %vm237_vm0, %v14110_v3  ;;  %v16323_v47 = vpop.f32.mrb[150].mxu0 }
 0xe22   : > { %v14125_v4 = vadd.f32 %v16323_v47, %v21707_v51  ;;  %v14119_v27 = vpop.f32.mrb[151].mxu0 }
 0xe23   : > { %v14120_v22 = vadd.f32 %v21707_v51, %v14119_v27 }
 0xe24   : > { %14223 = vst.msk [vmem:[%s21715_s7 + $0x78] sm:$0xff] %vm237_vm0, %v14125_v4 }
 0xe25   : > { %14222 = vst.msk [vmem:[%s21715_s7 + $0x70] sm:$0xff] %vm237_vm0, %v14120_v22  ;;  %v16326_v20 = vpop.f32.mrb[152].mxu0 }
 0xe26   : > { %v14135_v8 = vadd.f32 %v16326_v20, %v21707_v51  ;;  %v14129_v11 = vpop.f32.mrb[153].mxu0 }
 0xe27   : > { %v14130_v54 = vadd.f32 %v21707_v51, %v14129_v11 }
 0xe28   : > { %14225 = vst.msk [vmem:[%s21715_s7 + $0x88] sm:$0xff] %vm237_vm0, %v14135_v8 }
 0xe29   : > { %14224 = vst.msk [vmem:[%s21715_s7 + $0x80] sm:$0xff] %vm237_vm0, %v14130_v54  ;;  %v16329_v14 = vpop.f32.mrb[154].mxu0 }
 0xe2a   : > { %v14145_v21 = vadd.f32 %v16329_v14, %v21707_v51  ;;  %v14139_v29 = vpop.f32.mrb[155].mxu0 }
 0xe2b   : > { %v14140_v41 = vadd.f32 %v21707_v51, %v14139_v29 }
 0xe2c   : > { %14227 = vst.msk [vmem:[%s21715_s7 + $0x98] sm:$0xff] %vm237_vm0, %v14145_v21 }
 0xe2d   : > { %14226 = vst.msk [vmem:[%s21715_s7 + $0x90] sm:$0xff] %vm237_vm0, %v14140_v41  ;;  %v16332_v18 = vpop.f32.mrb[156].mxu0 }
 0xe2e   : > { %v14155_v2 = vadd.f32 %v16332_v18, %v21707_v51  ;;  %v14149_v40 = vpop.f32.mrb[157].mxu0 }
 0xe2f   : > { %v14150_v61 = vadd.f32 %v21707_v51, %v14149_v40 }
 0xe30   : > { %14229 = vst.msk [vmem:[%s21715_s7 + $0xa8] sm:$0xff] %vm237_vm0, %v14155_v2 }
 0xe31   : > { %14228 = vst.msk [vmem:[%s21715_s7 + $0xa0] sm:$0xff] %vm237_vm0, %v14150_v61 }
 0xe3c   : > { %v16335_v35 = vpop.f32.mrb[158].mxu0 }
 0xe3d   : > { %v14165_v32 = vadd.f32 %v16335_v35, %v21707_v51  ;;  %v14159_v23 = vpop.f32.mrb[159].mxu0 }
 0xe3e   : > { %v14160_v48 = vadd.f32 %v21707_v51, %v14159_v23 }
 0xe3f   : > { %14231 = vst.msk [vmem:[%s21715_s7 + $0xb8] sm:$0xff] %vm237_vm0, %v14165_v32 }
 0xe40   : > { %14230 = vst.msk [vmem:[%s21715_s7 + $0xb0] sm:$0xff] %vm237_vm0, %v14160_v48  ;;  %v16338_v26 = vpop.f32.mrb[160].mxu0 }
 0xe41   : > { %v14175_v44 = vadd.f32 %v16338_v26, %v21707_v51  ;;  %v14169_v52 = vpop.f32.mrb[161].mxu0 }
 0xe42   : > { %v14170_v25 = vadd.f32 %v21707_v51, %v14169_v52 }
 0xe43   : > { %14233 = vst.msk [vmem:[%s21715_s7 + $0xc8] sm:$0xff] %vm237_vm0, %v14175_v44 }
 0xe44   : > { %14232 = vst.msk [vmem:[%s21715_s7 + $0xc0] sm:$0xff] %vm237_vm0, %v14170_v25  ;;  %v16341_v6 = vpop.f32.mrb[162].mxu0 }
 0xe45   : > { %v14185_v34 = vadd.f32 %v16341_v6, %v21707_v51  ;;  %v14179_v5 = vpop.f32.mrb[163].mxu0 }
 0xe46   : > { %v14180_v39 = vadd.f32 %v21707_v51, %v14179_v5 }
 0xe47   : > { %14235 = vst.msk [vmem:[%s21715_s7 + $0xd8] sm:$0xff] %vm237_vm0, %v14185_v34 }
 0xe48   : > { %14234 = vst.msk [vmem:[%s21715_s7 + $0xd0] sm:$0xff] %vm237_vm0, %v14180_v39  ;;  %v16344_v43 = vpop.f32.mrb[164].mxu0 }
 0xe49   : > { %v14195_v17 = vadd.f32 %v16344_v43, %v21707_v51  ;;  %v14189_v62 = vpop.f32.mrb[165].mxu0 }
 0xe4a   : > { %v14190_v58 = vadd.f32 %v21707_v51, %v14189_v62 }
 0xe4b   : > { %14237 = vst.msk [vmem:[%s21715_s7 + $0xe8] sm:$0xff] %vm237_vm0, %v14195_v17 }
 0xe4c   : > { %14236 = vst.msk [vmem:[%s21715_s7 + $0xe0] sm:$0xff] %vm237_vm0, %v14190_v58  ;;  %v16347_v24 = vpop.f32.mrb[166].mxu0 }
 0xe4d   : > { %v14205_v16 = vadd.f32 %v16347_v24, %v21707_v51  ;;  %v14199_v50 = vpop.f32.mrb[167].mxu0 }
 0xe4e   : > { %v14200_v57 = vadd.f32 %v21707_v51, %v14199_v50 }
 0xe4f   : > { %14239 = vst.msk [vmem:[%s21715_s7 + $0xf8] sm:$0xff] %vm237_vm0, %v14205_v16 }
 0xe50   : > { %14238 = vst.msk [vmem:[%s21715_s7 + $0xf0] sm:$0xff] %vm237_vm0, %v14200_v57 }
 0xe51 PF: > { %s14_s15 = sadd.s32 1, %s18188_s15  }
 0xe52   : > { %p11_p4 = scmp.ge.s32.totalorder %s14_s15, 6  }
 0xe54   :  { %13 = sbr.rel (!%p11_p4) target bundleno = 1 (0x1), region = 66 }

</bundles_post_ra>
